<compile_context>
chip_gen: v6e
topology: v6e:2x2x1
jax: 0.10.0
libtpu: 0.0.40
codegen_flags: <defaults>
</compile_context>

<pallas_src>
import functools
import math

import jax
import jax.numpy as jnp
import numpy as np
from jax import lax
from jax.experimental import pallas as pl
from jax.experimental.pallas import tpu as pltpu

_RES_SCALE = math.sqrt(0.5)  # FloWaveNet residual scaling


# ----------------------------------------------------------------------------
# Kernel
# ----------------------------------------------------------------------------
def _wavenet_kernel(x_ref, c_ref,
                    wfr_ref, bfr_ref,
                    wfg_ref, bfg_ref,
                    wrs_ref, brs_ref,
                    wo1_ref, bo1_ref, wo2t_ref, bo2_ref,
                    out_ref,
                    hpad_ref, slab_ref,
                    *, dilations, ksize, ksize_front, pmax, seg):
    f32, bf16 = jnp.float32, jnp.bfloat16
    NB, Cin, T = x_ref.shape
    Ccond = c_ref.shape[1]
    R = wfr_ref.shape[0]
    KR = ksize * R
    G = wfg_ref.shape[1] // 2
    S = wo1_ref.shape[0]
    Cout = out_ref.shape[1]
    W = NB * T

    # ---- zero the padded-activation scratch ONCE: only the halo strips need
    # ---- to be zero, and the interior is fully overwritten every layer.
    hpad_ref[...] = jnp.zeros_like(hpad_ref)

    # ---- conditioning rows of the fused slab are layer-invariant: write once.
    for b in range(NB):
        slab_ref[KR:KR + Ccond, b * T:(b + 1) * T] = c_ref[b]

    # ---- front conv (k=3, pad=1) + ReLU ------------------------------------
    # in_channels is tiny (raw waveform) -> VPU broadcast-FMAs, not a 3-wide
    # MXU contraction.
    pf = (ksize_front - 1) // 2
    for b in range(NB):
        base = b * seg + pmax
        hpad_ref[0:Cin, base:base + T] = x_ref[b].astype(bf16)
    bias0 = jnp.broadcast_to(bfr_ref[...], (R, T))            # hoisted broadcast
    h_parts = []
    for b in range(NB):
        base = b * seg + pmax
        acc = bias0
        for k in range(ksize_front):
            for ci in range(Cin):
                col = k * Cin + ci
                st = base - pf + k
                acc = acc + wfr_ref[:, col:col + 1] * hpad_ref[ci:ci + 1, st:st + T].astype(f32)
        h_parts.append(jnp.maximum(acc, 0.0))
    h = jnp.concatenate(h_parts, axis=1) if NB > 1 else h_parts[0]   # (R, W) f32

    skip = jnp.zeros((S, W), f32)

    # ---- gated residual blocks (fully fused, h / skip stay in VMEM) --------
    for l, d in enumerate(dilations):
        p = d * (ksize - 1) // 2
        hb = h.astype(bf16)                                   # cast once per layer
        for b in range(NB):
            base = b * seg + pmax                             # lane-aligned write
            hpad_ref[:, base:base + T] = hb[:, b * T:(b + 1) * T]
        # Fold the K taps (+ cond rows already present) into one matmul slab:
        # rows [k*R:(k+1)*R] = h shifted by (k*d - p), bf16->bf16 copies.
        for b in range(NB):
            base = b * seg + pmax
            for k in range(ksize):
                st = base - p + k * d
                slab_ref[k * R:(k + 1) * R, b * T:(b + 1) * T] = hpad_ref[:, st:st + T]

        # Single (2G, KS*R+Ccond) x (KS*R+Ccond, NB*T) MXU matmul per layer.
        pre = jnp.dot(wfg_ref[l], slab_ref[...], preferred_element_type=f32)
        pre = pre + bfg_ref[l]                                # (2G, W) f32
        # tanh -> EUP; sigmoid as exp (EUP) + approx reciprocal (EUP), no VPU divide.
        gate = jnp.tanh(pre[:G, :]) * pl.reciprocal(1.0 + jnp.exp(-pre[G:, :]),
                                                    approx=True)

        rs = jnp.dot(wrs_ref[l], gate.astype(bf16),
                     preferred_element_type=f32) + brs_ref[l]  # (R+S, W) f32
        h = (h + rs[:R, :]) * _RES_SCALE
        skip = skip + rs[R:, :]

    # ---- final_conv: ReLU -> 1x1 -> ReLU -> 1x1 -----------------------------
    y = jnp.maximum(skip, 0.0)
    y = jnp.dot(wo1_ref[...], y.astype(bf16), preferred_element_type=f32) + bo1_ref[...]
    y = jnp.maximum(y, 0.0)
    # Cout is tiny (vocoder output): a 1-row MXU matmul wastes a full pass, so
    # use an f32 VPU multiply + cross-sublane reduce per output channel.
    rows = []
    for co in range(Cout):
        w_col = wo2t_ref[:, co:co + 1]                        # (S, 1) f32
        rows.append(jnp.sum(w_col * y, axis=0, keepdims=True) + bo2_ref[co:co + 1, :])
    y2 = jnp.concatenate(rows, axis=0) if Cout > 1 else rows[0]   # (Cout, W) f32
    for b in range(NB):
        out_ref[b] = y2[:, b * T:(b + 1) * T].astype(out_ref.dtype)


# ----------------------------------------------------------------------------
# Wrapper
# ----------------------------------------------------------------------------
def _whole_spec(a):
    nd = a.ndim
    return pl.BlockSpec(a.shape, lambda b, _nd=nd: (0,) * _nd)


def _fold_k(w):
    """(O, I, K) PyTorch Conv1d weight -> (O, K*I), tap-major contraction axis."""
    o, i, k = w.shape
    return jnp.transpose(w, (0, 2, 1)).reshape(o, k * i)


def wavenet_forward(x, c, params, *, dilation_rate=2, batch_block=None):
    """WaveNet forward.  x: (B, in_ch, T) f32 waveform, c: (B, cin_ch, T) f32."""
    f32, bf16 = jnp.float32, jnp.bfloat16
    B, Cin, T = x.shape
    Ccond = c.shape[1]
    layers = params["layers"]
    L = len(layers)
    R = params["front_w"].shape[0]
    KSF = params["front_w"].shape[-1]
    KS = layers[0]["wf"].shape[-1]
    G = layers[0]["wf"].shape[0]
    S = layers[0]["wskip"].shape[0]
    Cout = params["o2_w"].shape[0]

    assert T % 128 == 0, "time axis must be lane-dense (multiple of 128)"
    assert Cin <= R, "front-conv scratch reuse assumes in_channels <= residual_channels"

    # Batch rows per grid step: enlarge matmul N while keeping >= 2 parallel
    # grid steps when possible (v7x has two TensorCores).
    if batch_block is None:
        batch_block = 2 if (B % 2 == 0 and B >= 4) else 1
    NB = batch_block
    assert B % NB == 0, "batch must divide evenly into batch_block"

    dilations = tuple(int(dilation_rate) ** n for n in range(L))
    pad_needed = max([d * (KS - 1) // 2 for d in dilations] + [(KSF - 1) // 2])
    pmax = ((pad_needed + 127) // 128) * 128                  # lane-aligned halo
    seg = T + 2 * pmax                                        # per-batch segment width

    # ---- layout plumbing in plain JAX: fold taps, concatenate filter/gate and
    # ---- cond convs into one weight slab, concatenate res/skip convs, cast
    # ---- MXU operands to bf16 (done once, outside the kernel).
    wfr = _fold_k(params["front_w"]).astype(f32)              # VPU path stays f32
    bfr = params["front_b"].reshape(R, 1).astype(f32)
    wfg = jnp.stack([
        jnp.concatenate([
            jnp.concatenate([_fold_k(p["wf"]), _fold_k(p["wg"])], axis=0),   # (2G, KS*R)
            jnp.concatenate([p["wfc"][:, :, 0], p["wgc"][:, :, 0]], axis=0),  # (2G, Ccond)
        ], axis=1)
        for p in layers]).astype(bf16)                        # (L, 2G, KS*R+Ccond)
    bfg = jnp.stack([jnp.concatenate([p["bf"] + p["bfc"], p["bg"] + p["bgc"]])
                     for p in layers]).reshape(L, 2 * G, 1).astype(f32)
    wrs = jnp.stack([jnp.concatenate([p["wres"][:, :, 0], p["wskip"][:, :, 0]], axis=0)
                     for p in layers]).astype(bf16)           # (L, R+S, G)
    brs = jnp.stack([jnp.concatenate([p["bres"], p["bskip"]])
                     for p in layers]).reshape(L, R + S, 1).astype(f32)
    wo1 = params["o1_w"][:, :, 0].astype(bf16)
    bo1 = params["o1_b"].reshape(S, 1).astype(f32)
    wo2t = params["o2_w"][:, :, 0].T.astype(f32)              # (S, Cout), VPU path f32
    bo2 = params["o2_b"].reshape(Cout, 1).astype(f32)
    cb = c.astype(bf16)                                       # halve conditioning DMA

    operands = (x, cb, wfr, bfr, wfg, bfg, wrs, brs, wo1, bo1, wo2t, bo2)

    in_specs = [
        pl.BlockSpec((NB, Cin, T), lambda g: (g, 0, 0)),      # x: NB batch rows / step
        pl.BlockSpec((NB, Ccond, T), lambda g: (g, 0, 0)),    # c: NB batch rows / step
    ] + [_whole_spec(a) for a in operands[2:]]                # weights: resident

    flops = 2 * B * T * (KSF * Cin * R
                         + L * ((KS * R + Ccond) * 2 * G + G * (R + S))
                         + S * S + S * Cout)
    transcendentals = 2 * B * T * G * L
    bytes_accessed = int(sum(int(np.prod(a.shape)) * a.dtype.itemsize for a in operands)
                         + B * Cout * T * 4)

    kernel = functools.partial(_wavenet_kernel, dilations=dilations, ksize=KS,
                               ksize_front=KSF, pmax=pmax, seg=seg)

    return pl.pallas_call(
        kernel,
        out_shape=jax.ShapeDtypeStruct((B, Cout, T), jnp.float32),
        grid=(B // NB,),
        in_specs=in_specs,
        out_specs=pl.BlockSpec((NB, Cout, T), lambda g: (g, 0, 0)),
        scratch_shapes=[pltpu.VMEM((R, NB * seg), jnp.bfloat16),         # padded h (bf16)
                        pltpu.VMEM((KS * R + Ccond, NB * T), jnp.bfloat16)],  # fused slab
        compiler_params=pltpu.CompilerParams(
            dimension_semantics=("parallel",),
            vmem_limit_bytes=32 * 1024 * 1024,   # fits v7x's 64 MiB physical VMEM
        ),
        cost_estimate=pl.CostEstimate(flops=int(flops),
                                      transcendentals=int(transcendentals),
                                      bytes_accessed=bytes_accessed),
    )(*operands)


# ----------------------------------------------------------------------------
# Pure-JAX reference (fp32) for the correctness check
# ----------------------------------------------------------------------------
def wavenet_reference(x, c, params, *, dilation_rate=2):
    dn = ("NCH", "OIH", "NCH")

    def conv(h, w, b, dil=1, pad=0):
        y = lax.conv_general_dilated(h, w, window_strides=(1,),
                                     padding=[(pad, pad)], rhs_dilation=(dil,),
                                     dimension_numbers=dn)
        return y + b[None, :, None]

    ksf = params["front_w"].shape[-1]
    h = jax.nn.relu(conv(x, params["front_w"], params["front_b"], 1, (ksf - 1) // 2))
    skip = 0.0
    for n, p in enumerate(params["layers"]):
        d = int(dilation_rate) ** n
        ks = p["wf"].shape[-1]
        pad = d * (ks - 1) // 2
        hf = conv(h, p["wf"], p["bf"], d, pad) + conv(c, p["wfc"], p["bfc"])
        hg = conv(h, p["wg"], p["bg"], d, pad) + conv(c, p["wgc"], p["bgc"])
        o = jnp.tanh(hf) * jax.nn.sigmoid(hg)
        h = (h + conv(o, p["wres"], p["bres"])) * _RES_SCALE
        skip = skip + conv(o, p["wskip"], p["bskip"])
    y = jax.nn.relu(skip)
    y = jax.nn.relu(conv(y, params["o1_w"], params["o1_b"]))
    return conv(y, params["o2_w"], params["o2_b"])


# ----------------------------------------------------------------------------
# Random effective (post weight-norm) parameters, PyTorch Conv1d layouts
# ----------------------------------------------------------------------------
def init_params(key, *, in_channels=1, out_channels=1, num_layers=4,
                residual_channels=64, gate_channels=64, skip_channels=64,
                cin_channels=16, kernel_size=3):
    def draw(k, shape):
        return 0.1 * jax.random.normal(k, shape, jnp.float32)

    keys = iter(jax.random.split(key, 6 + num_layers * 12))
    p = {
        "front_w": draw(next(keys), (residual_channels, in_channels, 3)),
        "front_b": draw(next(keys), (residual_channels,)),
        "o1_w": draw(next(keys), (skip_channels, skip_channels, 1)),
        "o1_b": draw(next(keys), (skip_channels,)),
        "o2_w": draw(next(keys), (out_channels, skip_channels, 1)),
        "o2_b": draw(next(keys), (out_channels,)),
        "layers": [],
    }
    for _ in range(num_layers):
        p["layers"].append({
            "wf": draw(next(keys), (gate_channels, residual_channels, kernel_size)),
            "bf": draw(next(keys), (gate_channels,)),
            "wg": draw(next(keys), (gate_channels, residual_channels, kernel_size)),
            "bg": draw(next(keys), (gate_channels,)),
            "wfc": draw(next(keys), (gate_channels, cin_channels, 1)),
            "bfc": draw(next(keys), (gate_channels,)),
            "wgc": draw(next(keys), (gate_channels, cin_channels, 1)),
            "bgc": draw(next(keys), (gate_channels,)),
            "wres": draw(next(keys), (residual_channels, gate_channels, 1)),
            "bres": draw(next(keys), (residual_channels,)),
            "wskip": draw(next(keys), (skip_channels, gate_channels, 1)),
            "bskip": draw(next(keys), (skip_channels,)),
        })
    return p


if __name__ == "__main__":
    B, T = 4, 256                        # B=4 -> 2 parallel grid steps of 2 batch rows
    in_ch, out_ch = 1, 1
    num_layers = 4                       # dilations 1, 2, 4, 8
    R = G = S = 64                       # residual / gate / skip channels
    cin = 16                             # local-conditioning channels

    key = jax.random.PRNGKey(0)
    kx, kc, kp = jax.random.split(key, 3)
    x = jax.random.normal(kx, (B, in_ch, T), jnp.float32)
    c = jax.random.normal(kc, (B, cin, T), jnp.float32)
    params = init_params(kp, in_channels=in_ch, out_channels=out_ch,
                         num_layers=num_layers, residual_channels=R,
                         gate_channels=G, skip_channels=S, cin_channels=cin,
                         kernel_size=3)

    out = jax.block_until_ready(wavenet_forward(x, c, params, dilation_rate=2))
    assert out.shape == (B, out_ch, T), out.shape

    ref = jax.block_until_ready(wavenet_reference(x, c, params, dilation_rate=2))
    # bf16 MXU operands + approx-reciprocal sigmoid vs fp32 XLA reference.
    np.testing.assert_allclose(np.asarray(out), np.asarray(ref), rtol=5e-2, atol=3e-2)

    print("KERNEL_OK")
</pallas_src>

<mosaic_0001>
module attributes {stable_mosaic.version = 11 : i64} {
  func.func @_wavenet_kernel(%arg0: i32, %arg1: memref<2x1x256xf32, #tpu.memory_space<vmem>>, %arg2: memref<2x16x256xbf16, #tpu.memory_space<vmem>>, %arg3: memref<64x3xf32, #tpu.memory_space<vmem>>, %arg4: memref<64x1xf32, #tpu.memory_space<vmem>>, %arg5: memref<4x128x208xbf16, #tpu.memory_space<vmem>>, %arg6: memref<4x128x1xf32, #tpu.memory_space<vmem>>, %arg7: memref<4x128x64xbf16, #tpu.memory_space<vmem>>, %arg8: memref<4x128x1xf32, #tpu.memory_space<vmem>>, %arg9: memref<64x64xbf16, #tpu.memory_space<vmem>>, %arg10: memref<64x1xf32, #tpu.memory_space<vmem>>, %arg11: memref<64x1xf32, #tpu.memory_space<vmem>>, %arg12: memref<1x1xf32, #tpu.memory_space<vmem>>, %arg13: memref<2x1x256xf32, #tpu.memory_space<vmem>>, %arg14: memref<64x1024xbf16, #tpu.memory_space<vmem>>, %arg15: memref<208x512xbf16, #tpu.memory_space<vmem>>) attributes {dimension_semantics = [#tpu.dimension_semantics<parallel>], iteration_bounds = array<i64: 2>, scalar_prefetch = 0 : i64, scratch_operands = 2 : i64, tpu.core_type = #tpu.core_type<tc>, window_params = [{transform_indices = @transform_0, window_bounds = array<i64: 2, 1, 256>}, {transform_indices = @transform_1, window_bounds = array<i64: 2, 16, 256>}, {pipeline_mode = #tpu.pipeline_mode<synchronous>, transform_indices = @transform_2, window_bounds = array<i64: 64, 3>}, {pipeline_mode = #tpu.pipeline_mode<synchronous>, transform_indices = @transform_3, window_bounds = array<i64: 64, 1>}, {pipeline_mode = #tpu.pipeline_mode<synchronous>, transform_indices = @transform_4, window_bounds = array<i64: 4, 128, 208>}, {pipeline_mode = #tpu.pipeline_mode<synchronous>, transform_indices = @transform_5, window_bounds = array<i64: 4, 128, 1>}, {pipeline_mode = #tpu.pipeline_mode<synchronous>, transform_indices = @transform_6, window_bounds = array<i64: 4, 128, 64>}, {pipeline_mode = #tpu.pipeline_mode<synchronous>, transform_indices = @transform_7, window_bounds = array<i64: 4, 128, 1>}, {pipeline_mode = #tpu.pipeline_mode<synchronous>, transform_indices = @transform_8, window_bounds = array<i64: 64, 64>}, {pipeline_mode = #tpu.pipeline_mode<synchronous>, transform_indices = @transform_9, window_bounds = array<i64: 64, 1>}, {pipeline_mode = #tpu.pipeline_mode<synchronous>, transform_indices = @transform_10, window_bounds = array<i64: 64, 1>}, {pipeline_mode = #tpu.pipeline_mode<synchronous>, transform_indices = @transform_11, window_bounds = array<i64: 1, 1>}, {transform_indices = @transform_12, window_bounds = array<i64: 2, 1, 256>}]} {
    %cst = arith.constant 0.000000e+00 : bf16
    %0 = vector.broadcast %cst : bf16 to vector<64x1024xbf16>
    %c0 = arith.constant 0 : index
    %c0_0 = arith.constant 0 : index
    %1 = vector.load %arg14[%c0, %c0_0] : memref<64x1024xbf16, #tpu.memory_space<vmem>>, vector<64x1024xbf16>
    tpu.vector_store %arg14[%c0, %c0_0], %0 {strides = array<i32>} : memref<64x1024xbf16, #tpu.memory_space<vmem>>, vector<64x1024xbf16>,
    %c0_1 = arith.constant 0 : index
    %c0_2 = arith.constant 0 : index
    %c0_3 = arith.constant 0 : index
    %2 = vector.load %arg2[%c0_1, %c0_2, %c0_3] : memref<2x16x256xbf16, #tpu.memory_space<vmem>>, vector<1x16x256xbf16>
    %3 = vector.shape_cast %2 : vector<1x16x256xbf16> to vector<16x256xbf16>
    %c192 = arith.constant 192 : index
    %c0_4 = arith.constant 0 : index
    %4 = vector.load %arg15[%c192, %c0_4] : memref<208x512xbf16, #tpu.memory_space<vmem>>, vector<16x256xbf16>
    tpu.vector_store %arg15[%c192, %c0_4], %3 {strides = array<i32>} : memref<208x512xbf16, #tpu.memory_space<vmem>>, vector<16x256xbf16>,
    %c1 = arith.constant 1 : index
    %c0_5 = arith.constant 0 : index
    %c0_6 = arith.constant 0 : index
    %5 = vector.load %arg2[%c1, %c0_5, %c0_6] : memref<2x16x256xbf16, #tpu.memory_space<vmem>>, vector<1x16x256xbf16>
    %6 = vector.shape_cast %5 : vector<1x16x256xbf16> to vector<16x256xbf16>
    %c192_7 = arith.constant 192 : index
    %c256 = arith.constant 256 : index
    %7 = vector.load %arg15[%c192_7, %c256] : memref<208x512xbf16, #tpu.memory_space<vmem>>, vector<16x256xbf16>
    tpu.vector_store %arg15[%c192_7, %c256], %6 {strides = array<i32>} : memref<208x512xbf16, #tpu.memory_space<vmem>>, vector<16x256xbf16>,
    %c0_8 = arith.constant 0 : index
    %c0_9 = arith.constant 0 : index
    %c0_10 = arith.constant 0 : index
    %8 = vector.load %arg1[%c0_8, %c0_9, %c0_10] : memref<2x1x256xf32, #tpu.memory_space<vmem>>, vector<1x1x256xf32>
    %9 = vector.shape_cast %8 : vector<1x1x256xf32> to vector<1x256xf32>
    %10 = arith.truncf %9 : vector<1x256xf32> to vector<1x256xbf16>
    %c0_11 = arith.constant 0 : index
    %c128 = arith.constant 128 : index
    %11 = vector.load %arg14[%c0_11, %c128] : memref<64x1024xbf16, #tpu.memory_space<vmem>>, vector<1x256xbf16>
    tpu.vector_store %arg14[%c0_11, %c128], %10 {strides = array<i32>} : memref<64x1024xbf16, #tpu.memory_space<vmem>>, vector<1x256xbf16>,
    %c1_12 = arith.constant 1 : index
    %c0_13 = arith.constant 0 : index
    %c0_14 = arith.constant 0 : index
    %12 = vector.load %arg1[%c1_12, %c0_13, %c0_14] : memref<2x1x256xf32, #tpu.memory_space<vmem>>, vector<1x1x256xf32>
    %13 = vector.shape_cast %12 : vector<1x1x256xf32> to vector<1x256xf32>
    %14 = arith.truncf %13 : vector<1x256xf32> to vector<1x256xbf16>
    %c0_15 = arith.constant 0 : index
    %c640 = arith.constant 640 : index
    %15 = vector.load %arg14[%c0_15, %c640] : memref<64x1024xbf16, #tpu.memory_space<vmem>>, vector<1x256xbf16>
    tpu.vector_store %arg14[%c0_15, %c640], %14 {strides = array<i32>} : memref<64x1024xbf16, #tpu.memory_space<vmem>>, vector<1x256xbf16>,
    %c0_16 = arith.constant 0 : index
    %c0_17 = arith.constant 0 : index
    %16 = vector.load %arg4[%c0_16, %c0_17] : memref<64x1xf32, #tpu.memory_space<vmem>>, vector<64x1xf32>
    %17 = vector.shape_cast %16 : vector<64x1xf32> to vector<64x1xf32>
    %18 = vector.broadcast %17 : vector<64x1xf32> to vector<64x256xf32>
    %c0_18 = arith.constant 0 : index
    %c0_19 = arith.constant 0 : index
    %19 = vector.load %arg3[%c0_18, %c0_19] : memref<64x3xf32, #tpu.memory_space<vmem>>, vector<64x1xf32>
    %c0_20 = arith.constant 0 : index
    %c127 = arith.constant 127 : index
    %20 = vector.load %arg14[%c0_20, %c127] : memref<64x1024xbf16, #tpu.memory_space<vmem>>, vector<1x256xbf16>
    %21 = arith.extf %20 : vector<1x256xbf16> to vector<1x256xf32>
    %22 = vector.broadcast %19 : vector<64x1xf32> to vector<64x256xf32>
    %23 = vector.broadcast %21 : vector<1x256xf32> to vector<64x256xf32>
    %24 = arith.mulf %22, %23 : vector<64x256xf32>
    %25 = arith.addf %18, %24 : vector<64x256xf32>
    %c0_21 = arith.constant 0 : index
    %c1_22 = arith.constant 1 : index
    %26 = vector.load %arg3[%c0_21, %c1_22] : memref<64x3xf32, #tpu.memory_space<vmem>>, vector<64x1xf32>
    %c0_23 = arith.constant 0 : index
    %c128_24 = arith.constant 128 : index
    %27 = vector.load %arg14[%c0_23, %c128_24] : memref<64x1024xbf16, #tpu.memory_space<vmem>>, vector<1x256xbf16>
    %28 = arith.extf %27 : vector<1x256xbf16> to vector<1x256xf32>
    %29 = vector.broadcast %26 : vector<64x1xf32> to vector<64x256xf32>
    %30 = vector.broadcast %28 : vector<1x256xf32> to vector<64x256xf32>
    %31 = arith.mulf %29, %30 : vector<64x256xf32>
    %32 = arith.addf %25, %31 : vector<64x256xf32>
    %c0_25 = arith.constant 0 : index
    %c2 = arith.constant 2 : index
    %33 = vector.load %arg3[%c0_25, %c2] : memref<64x3xf32, #tpu.memory_space<vmem>>, vector<64x1xf32>
    %c0_26 = arith.constant 0 : index
    %c129 = arith.constant 129 : index
    %34 = vector.load %arg14[%c0_26, %c129] : memref<64x1024xbf16, #tpu.memory_space<vmem>>, vector<1x256xbf16>
    %35 = arith.extf %34 : vector<1x256xbf16> to vector<1x256xf32>
    %36 = vector.broadcast %33 : vector<64x1xf32> to vector<64x256xf32>
    %37 = vector.broadcast %35 : vector<1x256xf32> to vector<64x256xf32>
    %38 = arith.mulf %36, %37 : vector<64x256xf32>
    %39 = arith.addf %32, %38 : vector<64x256xf32>
    %cst_27 = arith.constant 0.000000e+00 : f32
    %40 = vector.broadcast %cst_27 : f32 to vector<64x256xf32>
    %41 = arith.maximumf %39, %40 : vector<64x256xf32>
    %c0_28 = arith.constant 0 : index
    %c0_29 = arith.constant 0 : index
    %42 = vector.load %arg3[%c0_28, %c0_29] : memref<64x3xf32, #tpu.memory_space<vmem>>, vector<64x1xf32>
    %c0_30 = arith.constant 0 : index
    %c639 = arith.constant 639 : index
    %43 = vector.load %arg14[%c0_30, %c639] : memref<64x1024xbf16, #tpu.memory_space<vmem>>, vector<1x256xbf16>
    %44 = arith.extf %43 : vector<1x256xbf16> to vector<1x256xf32>
    %45 = vector.broadcast %42 : vector<64x1xf32> to vector<64x256xf32>
    %46 = vector.broadcast %44 : vector<1x256xf32> to vector<64x256xf32>
    %47 = arith.mulf %45, %46 : vector<64x256xf32>
    %48 = arith.addf %18, %47 : vector<64x256xf32>
    %c0_31 = arith.constant 0 : index
    %c1_32 = arith.constant 1 : index
    %49 = vector.load %arg3[%c0_31, %c1_32] : memref<64x3xf32, #tpu.memory_space<vmem>>, vector<64x1xf32>
    %c0_33 = arith.constant 0 : index
    %c640_34 = arith.constant 640 : index
    %50 = vector.load %arg14[%c0_33, %c640_34] : memref<64x1024xbf16, #tpu.memory_space<vmem>>, vector<1x256xbf16>
    %51 = arith.extf %50 : vector<1x256xbf16> to vector<1x256xf32>
    %52 = vector.broadcast %49 : vector<64x1xf32> to vector<64x256xf32>
    %53 = vector.broadcast %51 : vector<1x256xf32> to vector<64x256xf32>
    %54 = arith.mulf %52, %53 : vector<64x256xf32>
    %55 = arith.addf %48, %54 : vector<64x256xf32>
    %c0_35 = arith.constant 0 : index
    %c2_36 = arith.constant 2 : index
    %56 = vector.load %arg3[%c0_35, %c2_36] : memref<64x3xf32, #tpu.memory_space<vmem>>, vector<64x1xf32>
    %c0_37 = arith.constant 0 : index
    %c641 = arith.constant 641 : index
    %57 = vector.load %arg14[%c0_37, %c641] : memref<64x1024xbf16, #tpu.memory_space<vmem>>, vector<1x256xbf16>
    %58 = arith.extf %57 : vector<1x256xbf16> to vector<1x256xf32>
    %59 = vector.broadcast %56 : vector<64x1xf32> to vector<64x256xf32>
    %60 = vector.broadcast %58 : vector<1x256xf32> to vector<64x256xf32>
    %61 = arith.mulf %59, %60 : vector<64x256xf32>
    %62 = arith.addf %55, %61 : vector<64x256xf32>
    %cst_38 = arith.constant 0.000000e+00 : f32
    %63 = vector.broadcast %cst_38 : f32 to vector<64x256xf32>
    %64 = arith.maximumf %62, %63 : vector<64x256xf32>
    %65 = tpu.concatenate %41, %64 in 1 : vector<64x256xf32>, vector<64x256xf32> -> vector<64x512xf32>
    %cst_39 = arith.constant 0.000000e+00 : f32
    %66 = vector.broadcast %cst_39 : f32 to vector<64x512xf32>
    %67 = arith.truncf %65 : vector<64x512xf32> to vector<64x512xbf16>
    %68 = vector.extract_strided_slice %67 {offsets = [0, 0], sizes = [64, 256], strides = [1, 1]} : vector<64x512xbf16> to vector<64x256xbf16>
    %c0_40 = arith.constant 0 : index
    %c128_41 = arith.constant 128 : index
    %69 = vector.load %arg14[%c0_40, %c128_41] : memref<64x1024xbf16, #tpu.memory_space<vmem>>, vector<64x256xbf16>
    tpu.vector_store %arg14[%c0_40, %c128_41], %68 {strides = array<i32>} : memref<64x1024xbf16, #tpu.memory_space<vmem>>, vector<64x256xbf16>,
    %70 = vector.extract_strided_slice %67 {offsets = [0, 256], sizes = [64, 256], strides = [1, 1]} : vector<64x512xbf16> to vector<64x256xbf16>
    %c0_42 = arith.constant 0 : index
    %c640_43 = arith.constant 640 : index
    %71 = vector.load %arg14[%c0_42, %c640_43] : memref<64x1024xbf16, #tpu.memory_space<vmem>>, vector<64x256xbf16>
    tpu.vector_store %arg14[%c0_42, %c640_43], %70 {strides = array<i32>} : memref<64x1024xbf16, #tpu.memory_space<vmem>>, vector<64x256xbf16>,
    %c0_44 = arith.constant 0 : index
    %c127_45 = arith.constant 127 : index
    %72 = vector.load %arg14[%c0_44, %c127_45] : memref<64x1024xbf16, #tpu.memory_space<vmem>>, vector<64x256xbf16>
    %c0_46 = arith.constant 0 : index
    %c0_47 = arith.constant 0 : index
    %73 = vector.load %arg15[%c0_46, %c0_47] : memref<208x512xbf16, #tpu.memory_space<vmem>>, vector<64x256xbf16>
    tpu.vector_store %arg15[%c0_46, %c0_47], %72 {strides = array<i32>} : memref<208x512xbf16, #tpu.memory_space<vmem>>, vector<64x256xbf16>,
    %c0_48 = arith.constant 0 : index
    %c128_49 = arith.constant 128 : index
    %74 = vector.load %arg14[%c0_48, %c128_49] : memref<64x1024xbf16, #tpu.memory_space<vmem>>, vector<64x256xbf16>
    %c64 = arith.constant 64 : index
    %c0_50 = arith.constant 0 : index
    %75 = vector.load %arg15[%c64, %c0_50] : memref<208x512xbf16, #tpu.memory_space<vmem>>, vector<64x256xbf16>
    tpu.vector_store %arg15[%c64, %c0_50], %74 {strides = array<i32>} : memref<208x512xbf16, #tpu.memory_space<vmem>>, vector<64x256xbf16>,
    %c0_51 = arith.constant 0 : index
    %c129_52 = arith.constant 129 : index
    %76 = vector.load %arg14[%c0_51, %c129_52] : memref<64x1024xbf16, #tpu.memory_space<vmem>>, vector<64x256xbf16>
    %c128_53 = arith.constant 128 : index
    %c0_54 = arith.constant 0 : index
    %77 = vector.load %arg15[%c128_53, %c0_54] : memref<208x512xbf16, #tpu.memory_space<vmem>>, vector<64x256xbf16>
    tpu.vector_store %arg15[%c128_53, %c0_54], %76 {strides = array<i32>} : memref<208x512xbf16, #tpu.memory_space<vmem>>, vector<64x256xbf16>,
    %c0_55 = arith.constant 0 : index
    %c639_56 = arith.constant 639 : index
    %78 = vector.load %arg14[%c0_55, %c639_56] : memref<64x1024xbf16, #tpu.memory_space<vmem>>, vector<64x256xbf16>
    %c0_57 = arith.constant 0 : index
    %c256_58 = arith.constant 256 : index
    %79 = vector.load %arg15[%c0_57, %c256_58] : memref<208x512xbf16, #tpu.memory_space<vmem>>, vector<64x256xbf16>
    tpu.vector_store %arg15[%c0_57, %c256_58], %78 {strides = array<i32>} : memref<208x512xbf16, #tpu.memory_space<vmem>>, vector<64x256xbf16>,
    %c0_59 = arith.constant 0 : index
    %c640_60 = arith.constant 640 : index
    %80 = vector.load %arg14[%c0_59, %c640_60] : memref<64x1024xbf16, #tpu.memory_space<vmem>>, vector<64x256xbf16>
    %c64_61 = arith.constant 64 : index
    %c256_62 = arith.constant 256 : index
    %81 = vector.load %arg15[%c64_61, %c256_62] : memref<208x512xbf16, #tpu.memory_space<vmem>>, vector<64x256xbf16>
    tpu.vector_store %arg15[%c64_61, %c256_62], %80 {strides = array<i32>} : memref<208x512xbf16, #tpu.memory_space<vmem>>, vector<64x256xbf16>,
    %c0_63 = arith.constant 0 : index
    %c641_64 = arith.constant 641 : index
    %82 = vector.load %arg14[%c0_63, %c641_64] : memref<64x1024xbf16, #tpu.memory_space<vmem>>, vector<64x256xbf16>
    %c128_65 = arith.constant 128 : index
    %c256_66 = arith.constant 256 : index
    %83 = vector.load %arg15[%c128_65, %c256_66] : memref<208x512xbf16, #tpu.memory_space<vmem>>, vector<64x256xbf16>
    tpu.vector_store %arg15[%c128_65, %c256_66], %82 {strides = array<i32>} : memref<208x512xbf16, #tpu.memory_space<vmem>>, vector<64x256xbf16>,
    %c0_67 = arith.constant 0 : index
    %c0_68 = arith.constant 0 : index
    %c0_69 = arith.constant 0 : index
    %84 = vector.load %arg5[%c0_67, %c0_68, %c0_69] : memref<4x128x208xbf16, #tpu.memory_space<vmem>>, vector<1x128x208xbf16>
    %85 = vector.shape_cast %84 : vector<1x128x208xbf16> to vector<128x208xbf16>
    %c0_70 = arith.constant 0 : index
    %c0_71 = arith.constant 0 : index
    %86 = vector.load %arg15[%c0_70, %c0_71] : memref<208x512xbf16, #tpu.memory_space<vmem>>, vector<208x512xbf16>
    %cst_72 = arith.constant dense<0.000000e+00> : vector<128x512xf32>
    %87 = tpu.matmul %85, %86, %cst_72 {dimension_numbers = #tpu.dot_dimension_numbers<[1], [0], [0], [1], [0, 0, 1, 1], [], []>} : vector<128x208xbf16>, vector<208x512xbf16>, vector<128x512xf32> -> vector<128x512xf32>
    %c0_73 = arith.constant 0 : index
    %c0_74 = arith.constant 0 : index
    %c0_75 = arith.constant 0 : index
    %88 = vector.load %arg6[%c0_73, %c0_74, %c0_75] : memref<4x128x1xf32, #tpu.memory_space<vmem>>, vector<1x128x1xf32>
    %89 = vector.shape_cast %88 : vector<1x128x1xf32> to vector<128x1xf32>
    %90 = vector.broadcast %89 : vector<128x1xf32> to vector<128x512xf32>
    %91 = arith.addf %87, %90 : vector<128x512xf32>
    %92 = vector.extract_strided_slice %91 {offsets = [0, 0], sizes = [64, 512], strides = [1, 1]} : vector<128x512xf32> to vector<64x512xf32>
    %93 = math.tanh %92 : vector<64x512xf32>
    %94 = vector.extract_strided_slice %91 {offsets = [64, 0], sizes = [64, 512], strides = [1, 1]} : vector<128x512xf32> to vector<64x512xf32>
    %cst_76 = arith.constant 0.000000e+00 : f32
    %95 = vector.broadcast %cst_76 : f32 to vector<64x512xf32>
    %96 = arith.subf %95, %94 : vector<64x512xf32>
    %97 = math.exp %96 : vector<64x512xf32>
    %cst_77 = arith.constant 1.000000e+00 : f32
    %98 = vector.broadcast %cst_77 : f32 to vector<64x512xf32>
    %99 = arith.addf %98, %97 : vector<64x512xf32>
    %100 = tpu.reciprocal %99 {approx = true} : vector<64x512xf32> -> vector<64x512xf32>
    %101 = arith.mulf %93, %100 : vector<64x512xf32>
    %c0_78 = arith.constant 0 : index
    %c0_79 = arith.constant 0 : index
    %c0_80 = arith.constant 0 : index
    %102 = vector.load %arg7[%c0_78, %c0_79, %c0_80] : memref<4x128x64xbf16, #tpu.memory_space<vmem>>, vector<1x128x64xbf16>
    %103 = vector.shape_cast %102 : vector<1x128x64xbf16> to vector<128x64xbf16>
    %104 = arith.truncf %101 : vector<64x512xf32> to vector<64x512xbf16>
    %cst_81 = arith.constant dense<0.000000e+00> : vector<128x512xf32>
    %105 = tpu.matmul %103, %104, %cst_81 {dimension_numbers = #tpu.dot_dimension_numbers<[1], [0], [0], [1], [0, 0, 1, 1], [], []>} : vector<128x64xbf16>, vector<64x512xbf16>, vector<128x512xf32> -> vector<128x512xf32>
    %c0_82 = arith.constant 0 : index
    %c0_83 = arith.constant 0 : index
    %c0_84 = arith.constant 0 : index
    %106 = vector.load %arg8[%c0_82, %c0_83, %c0_84] : memref<4x128x1xf32, #tpu.memory_space<vmem>>, vector<1x128x1xf32>
    %107 = vector.shape_cast %106 : vector<1x128x1xf32> to vector<128x1xf32>
    %108 = vector.broadcast %107 : vector<128x1xf32> to vector<128x512xf32>
    %109 = arith.addf %105, %108 : vector<128x512xf32>
    %110 = vector.extract_strided_slice %109 {offsets = [0, 0], sizes = [64, 512], strides = [1, 1]} : vector<128x512xf32> to vector<64x512xf32>
    %111 = arith.addf %65, %110 : vector<64x512xf32>
    %cst_85 = arith.constant 0.707106769 : f32
    %112 = vector.broadcast %cst_85 : f32 to vector<64x512xf32>
    %113 = arith.mulf %111, %112 : vector<64x512xf32>
    %114 = vector.extract_strided_slice %109 {offsets = [64, 0], sizes = [64, 512], strides = [1, 1]} : vector<128x512xf32> to vector<64x512xf32>
    %115 = arith.addf %66, %114 : vector<64x512xf32>
    %116 = arith.truncf %113 : vector<64x512xf32> to vector<64x512xbf16>
    %117 = vector.extract_strided_slice %116 {offsets = [0, 0], sizes = [64, 256], strides = [1, 1]} : vector<64x512xbf16> to vector<64x256xbf16>
    %c0_86 = arith.constant 0 : index
    %c128_87 = arith.constant 128 : index
    %118 = vector.load %arg14[%c0_86, %c128_87] : memref<64x1024xbf16, #tpu.memory_space<vmem>>, vector<64x256xbf16>
    tpu.vector_store %arg14[%c0_86, %c128_87], %117 {strides = array<i32>} : memref<64x1024xbf16, #tpu.memory_space<vmem>>, vector<64x256xbf16>,
    %119 = vector.extract_strided_slice %116 {offsets = [0, 256], sizes = [64, 256], strides = [1, 1]} : vector<64x512xbf16> to vector<64x256xbf16>
    %c0_88 = arith.constant 0 : index
    %c640_89 = arith.constant 640 : index
    %120 = vector.load %arg14[%c0_88, %c640_89] : memref<64x1024xbf16, #tpu.memory_space<vmem>>, vector<64x256xbf16>
    tpu.vector_store %arg14[%c0_88, %c640_89], %119 {strides = array<i32>} : memref<64x1024xbf16, #tpu.memory_space<vmem>>, vector<64x256xbf16>,
    %c0_90 = arith.constant 0 : index
    %c126 = arith.constant 126 : index
    %121 = vector.load %arg14[%c0_90, %c126] : memref<64x1024xbf16, #tpu.memory_space<vmem>>, vector<64x256xbf16>
    %c0_91 = arith.constant 0 : index
    %c0_92 = arith.constant 0 : index
    %122 = vector.load %arg15[%c0_91, %c0_92] : memref<208x512xbf16, #tpu.memory_space<vmem>>, vector<64x256xbf16>
    tpu.vector_store %arg15[%c0_91, %c0_92], %121 {strides = array<i32>} : memref<208x512xbf16, #tpu.memory_space<vmem>>, vector<64x256xbf16>,
    %c0_93 = arith.constant 0 : index
    %c128_94 = arith.constant 128 : index
    %123 = vector.load %arg14[%c0_93, %c128_94] : memref<64x1024xbf16, #tpu.memory_space<vmem>>, vector<64x256xbf16>
    %c64_95 = arith.constant 64 : index
    %c0_96 = arith.constant 0 : index
    %124 = vector.load %arg15[%c64_95, %c0_96] : memref<208x512xbf16, #tpu.memory_space<vmem>>, vector<64x256xbf16>
    tpu.vector_store %arg15[%c64_95, %c0_96], %123 {strides = array<i32>} : memref<208x512xbf16, #tpu.memory_space<vmem>>, vector<64x256xbf16>,
    %c0_97 = arith.constant 0 : index
    %c130 = arith.constant 130 : index
    %125 = vector.load %arg14[%c0_97, %c130] : memref<64x1024xbf16, #tpu.memory_space<vmem>>, vector<64x256xbf16>
    %c128_98 = arith.constant 128 : index
    %c0_99 = arith.constant 0 : index
    %126 = vector.load %arg15[%c128_98, %c0_99] : memref<208x512xbf16, #tpu.memory_space<vmem>>, vector<64x256xbf16>
    tpu.vector_store %arg15[%c128_98, %c0_99], %125 {strides = array<i32>} : memref<208x512xbf16, #tpu.memory_space<vmem>>, vector<64x256xbf16>,
    %c0_100 = arith.constant 0 : index
    %c638 = arith.constant 638 : index
    %127 = vector.load %arg14[%c0_100, %c638] : memref<64x1024xbf16, #tpu.memory_space<vmem>>, vector<64x256xbf16>
    %c0_101 = arith.constant 0 : index
    %c256_102 = arith.constant 256 : index
    %128 = vector.load %arg15[%c0_101, %c256_102] : memref<208x512xbf16, #tpu.memory_space<vmem>>, vector<64x256xbf16>
    tpu.vector_store %arg15[%c0_101, %c256_102], %127 {strides = array<i32>} : memref<208x512xbf16, #tpu.memory_space<vmem>>, vector<64x256xbf16>,
    %c0_103 = arith.constant 0 : index
    %c640_104 = arith.constant 640 : index
    %129 = vector.load %arg14[%c0_103, %c640_104] : memref<64x1024xbf16, #tpu.memory_space<vmem>>, vector<64x256xbf16>
    %c64_105 = arith.constant 64 : index
    %c256_106 = arith.constant 256 : index
    %130 = vector.load %arg15[%c64_105, %c256_106] : memref<208x512xbf16, #tpu.memory_space<vmem>>, vector<64x256xbf16>
    tpu.vector_store %arg15[%c64_105, %c256_106], %129 {strides = array<i32>} : memref<208x512xbf16, #tpu.memory_space<vmem>>, vector<64x256xbf16>,
    %c0_107 = arith.constant 0 : index
    %c642 = arith.constant 642 : index
    %131 = vector.load %arg14[%c0_107, %c642] : memref<64x1024xbf16, #tpu.memory_space<vmem>>, vector<64x256xbf16>
    %c128_108 = arith.constant 128 : index
    %c256_109 = arith.constant 256 : index
    %132 = vector.load %arg15[%c128_108, %c256_109] : memref<208x512xbf16, #tpu.memory_space<vmem>>, vector<64x256xbf16>
    tpu.vector_store %arg15[%c128_108, %c256_109], %131 {strides = array<i32>} : memref<208x512xbf16, #tpu.memory_space<vmem>>, vector<64x256xbf16>,
    %c1_110 = arith.constant 1 : index
    %c0_111 = arith.constant 0 : index
    %c0_112 = arith.constant 0 : index
    %133 = vector.load %arg5[%c1_110, %c0_111, %c0_112] : memref<4x128x208xbf16, #tpu.memory_space<vmem>>, vector<1x128x208xbf16>
    %134 = vector.shape_cast %133 : vector<1x128x208xbf16> to vector<128x208xbf16>
    %c0_113 = arith.constant 0 : index
    %c0_114 = arith.constant 0 : index
    %135 = vector.load %arg15[%c0_113, %c0_114] : memref<208x512xbf16, #tpu.memory_space<vmem>>, vector<208x512xbf16>
    %cst_115 = arith.constant dense<0.000000e+00> : vector<128x512xf32>
    %136 = tpu.matmul %134, %135, %cst_115 {dimension_numbers = #tpu.dot_dimension_numbers<[1], [0], [0], [1], [0, 0, 1, 1], [], []>} : vector<128x208xbf16>, vector<208x512xbf16>, vector<128x512xf32> -> vector<128x512xf32>
    %c1_116 = arith.constant 1 : index
    %c0_117 = arith.constant 0 : index
    %c0_118 = arith.constant 0 : index
    %137 = vector.load %arg6[%c1_116, %c0_117, %c0_118] : memref<4x128x1xf32, #tpu.memory_space<vmem>>, vector<1x128x1xf32>
    %138 = vector.shape_cast %137 : vector<1x128x1xf32> to vector<128x1xf32>
    %139 = vector.broadcast %138 : vector<128x1xf32> to vector<128x512xf32>
    %140 = arith.addf %136, %139 : vector<128x512xf32>
    %141 = vector.extract_strided_slice %140 {offsets = [0, 0], sizes = [64, 512], strides = [1, 1]} : vector<128x512xf32> to vector<64x512xf32>
    %142 = math.tanh %141 : vector<64x512xf32>
    %143 = vector.extract_strided_slice %140 {offsets = [64, 0], sizes = [64, 512], strides = [1, 1]} : vector<128x512xf32> to vector<64x512xf32>
    %cst_119 = arith.constant 0.000000e+00 : f32
    %144 = vector.broadcast %cst_119 : f32 to vector<64x512xf32>
    %145 = arith.subf %144, %143 : vector<64x512xf32>
    %146 = math.exp %145 : vector<64x512xf32>
    %cst_120 = arith.constant 1.000000e+00 : f32
    %147 = vector.broadcast %cst_120 : f32 to vector<64x512xf32>
    %148 = arith.addf %147, %146 : vector<64x512xf32>
    %149 = tpu.reciprocal %148 {approx = true} : vector<64x512xf32> -> vector<64x512xf32>
    %150 = arith.mulf %142, %149 : vector<64x512xf32>
    %c1_121 = arith.constant 1 : index
    %c0_122 = arith.constant 0 : index
    %c0_123 = arith.constant 0 : index
    %151 = vector.load %arg7[%c1_121, %c0_122, %c0_123] : memref<4x128x64xbf16, #tpu.memory_space<vmem>>, vector<1x128x64xbf16>
    %152 = vector.shape_cast %151 : vector<1x128x64xbf16> to vector<128x64xbf16>
    %153 = arith.truncf %150 : vector<64x512xf32> to vector<64x512xbf16>
    %cst_124 = arith.constant dense<0.000000e+00> : vector<128x512xf32>
    %154 = tpu.matmul %152, %153, %cst_124 {dimension_numbers = #tpu.dot_dimension_numbers<[1], [0], [0], [1], [0, 0, 1, 1], [], []>} : vector<128x64xbf16>, vector<64x512xbf16>, vector<128x512xf32> -> vector<128x512xf32>
    %c1_125 = arith.constant 1 : index
    %c0_126 = arith.constant 0 : index
    %c0_127 = arith.constant 0 : index
    %155 = vector.load %arg8[%c1_125, %c0_126, %c0_127] : memref<4x128x1xf32, #tpu.memory_space<vmem>>, vector<1x128x1xf32>
    %156 = vector.shape_cast %155 : vector<1x128x1xf32> to vector<128x1xf32>
    %157 = vector.broadcast %156 : vector<128x1xf32> to vector<128x512xf32>
    %158 = arith.addf %154, %157 : vector<128x512xf32>
    %159 = vector.extract_strided_slice %158 {offsets = [0, 0], sizes = [64, 512], strides = [1, 1]} : vector<128x512xf32> to vector<64x512xf32>
    %160 = arith.addf %113, %159 : vector<64x512xf32>
    %cst_128 = arith.constant 0.707106769 : f32
    %161 = vector.broadcast %cst_128 : f32 to vector<64x512xf32>
    %162 = arith.mulf %160, %161 : vector<64x512xf32>
    %163 = vector.extract_strided_slice %158 {offsets = [64, 0], sizes = [64, 512], strides = [1, 1]} : vector<128x512xf32> to vector<64x512xf32>
    %164 = arith.addf %115, %163 : vector<64x512xf32>
    %165 = arith.truncf %162 : vector<64x512xf32> to vector<64x512xbf16>
    %166 = vector.extract_strided_slice %165 {offsets = [0, 0], sizes = [64, 256], strides = [1, 1]} : vector<64x512xbf16> to vector<64x256xbf16>
    %c0_129 = arith.constant 0 : index
    %c128_130 = arith.constant 128 : index
    %167 = vector.load %arg14[%c0_129, %c128_130] : memref<64x1024xbf16, #tpu.memory_space<vmem>>, vector<64x256xbf16>
    tpu.vector_store %arg14[%c0_129, %c128_130], %166 {strides = array<i32>} : memref<64x1024xbf16, #tpu.memory_space<vmem>>, vector<64x256xbf16>,
    %168 = vector.extract_strided_slice %165 {offsets = [0, 256], sizes = [64, 256], strides = [1, 1]} : vector<64x512xbf16> to vector<64x256xbf16>
    %c0_131 = arith.constant 0 : index
    %c640_132 = arith.constant 640 : index
    %169 = vector.load %arg14[%c0_131, %c640_132] : memref<64x1024xbf16, #tpu.memory_space<vmem>>, vector<64x256xbf16>
    tpu.vector_store %arg14[%c0_131, %c640_132], %168 {strides = array<i32>} : memref<64x1024xbf16, #tpu.memory_space<vmem>>, vector<64x256xbf16>,
    %c0_133 = arith.constant 0 : index
    %c124 = arith.constant 124 : index
    %170 = vector.load %arg14[%c0_133, %c124] : memref<64x1024xbf16, #tpu.memory_space<vmem>>, vector<64x256xbf16>
    %c0_134 = arith.constant 0 : index
    %c0_135 = arith.constant 0 : index
    %171 = vector.load %arg15[%c0_134, %c0_135] : memref<208x512xbf16, #tpu.memory_space<vmem>>, vector<64x256xbf16>
    tpu.vector_store %arg15[%c0_134, %c0_135], %170 {strides = array<i32>} : memref<208x512xbf16, #tpu.memory_space<vmem>>, vector<64x256xbf16>,
    %c0_136 = arith.constant 0 : index
    %c128_137 = arith.constant 128 : index
    %172 = vector.load %arg14[%c0_136, %c128_137] : memref<64x1024xbf16, #tpu.memory_space<vmem>>, vector<64x256xbf16>
    %c64_138 = arith.constant 64 : index
    %c0_139 = arith.constant 0 : index
    %173 = vector.load %arg15[%c64_138, %c0_139] : memref<208x512xbf16, #tpu.memory_space<vmem>>, vector<64x256xbf16>
    tpu.vector_store %arg15[%c64_138, %c0_139], %172 {strides = array<i32>} : memref<208x512xbf16, #tpu.memory_space<vmem>>, vector<64x256xbf16>,
    %c0_140 = arith.constant 0 : index
    %c132 = arith.constant 132 : index
    %174 = vector.load %arg14[%c0_140, %c132] : memref<64x1024xbf16, #tpu.memory_space<vmem>>, vector<64x256xbf16>
    %c128_141 = arith.constant 128 : index
    %c0_142 = arith.constant 0 : index
    %175 = vector.load %arg15[%c128_141, %c0_142] : memref<208x512xbf16, #tpu.memory_space<vmem>>, vector<64x256xbf16>
    tpu.vector_store %arg15[%c128_141, %c0_142], %174 {strides = array<i32>} : memref<208x512xbf16, #tpu.memory_space<vmem>>, vector<64x256xbf16>,
    %c0_143 = arith.constant 0 : index
    %c636 = arith.constant 636 : index
    %176 = vector.load %arg14[%c0_143, %c636] : memref<64x1024xbf16, #tpu.memory_space<vmem>>, vector<64x256xbf16>
    %c0_144 = arith.constant 0 : index
    %c256_145 = arith.constant 256 : index
    %177 = vector.load %arg15[%c0_144, %c256_145] : memref<208x512xbf16, #tpu.memory_space<vmem>>, vector<64x256xbf16>
    tpu.vector_store %arg15[%c0_144, %c256_145], %176 {strides = array<i32>} : memref<208x512xbf16, #tpu.memory_space<vmem>>, vector<64x256xbf16>,
    %c0_146 = arith.constant 0 : index
    %c640_147 = arith.constant 640 : index
    %178 = vector.load %arg14[%c0_146, %c640_147] : memref<64x1024xbf16, #tpu.memory_space<vmem>>, vector<64x256xbf16>
    %c64_148 = arith.constant 64 : index
    %c256_149 = arith.constant 256 : index
    %179 = vector.load %arg15[%c64_148, %c256_149] : memref<208x512xbf16, #tpu.memory_space<vmem>>, vector<64x256xbf16>
    tpu.vector_store %arg15[%c64_148, %c256_149], %178 {strides = array<i32>} : memref<208x512xbf16, #tpu.memory_space<vmem>>, vector<64x256xbf16>,
    %c0_150 = arith.constant 0 : index
    %c644 = arith.constant 644 : index
    %180 = vector.load %arg14[%c0_150, %c644] : memref<64x1024xbf16, #tpu.memory_space<vmem>>, vector<64x256xbf16>
    %c128_151 = arith.constant 128 : index
    %c256_152 = arith.constant 256 : index
    %181 = vector.load %arg15[%c128_151, %c256_152] : memref<208x512xbf16, #tpu.memory_space<vmem>>, vector<64x256xbf16>
    tpu.vector_store %arg15[%c128_151, %c256_152], %180 {strides = array<i32>} : memref<208x512xbf16, #tpu.memory_space<vmem>>, vector<64x256xbf16>,
    %c2_153 = arith.constant 2 : index
    %c0_154 = arith.constant 0 : index
    %c0_155 = arith.constant 0 : index
    %182 = vector.load %arg5[%c2_153, %c0_154, %c0_155] : memref<4x128x208xbf16, #tpu.memory_space<vmem>>, vector<1x128x208xbf16>
    %183 = vector.shape_cast %182 : vector<1x128x208xbf16> to vector<128x208xbf16>
    %c0_156 = arith.constant 0 : index
    %c0_157 = arith.constant 0 : index
    %184 = vector.load %arg15[%c0_156, %c0_157] : memref<208x512xbf16, #tpu.memory_space<vmem>>, vector<208x512xbf16>
    %cst_158 = arith.constant dense<0.000000e+00> : vector<128x512xf32>
    %185 = tpu.matmul %183, %184, %cst_158 {dimension_numbers = #tpu.dot_dimension_numbers<[1], [0], [0], [1], [0, 0, 1, 1], [], []>} : vector<128x208xbf16>, vector<208x512xbf16>, vector<128x512xf32> -> vector<128x512xf32>
    %c2_159 = arith.constant 2 : index
    %c0_160 = arith.constant 0 : index
    %c0_161 = arith.constant 0 : index
    %186 = vector.load %arg6[%c2_159, %c0_160, %c0_161] : memref<4x128x1xf32, #tpu.memory_space<vmem>>, vector<1x128x1xf32>
    %187 = vector.shape_cast %186 : vector<1x128x1xf32> to vector<128x1xf32>
    %188 = vector.broadcast %187 : vector<128x1xf32> to vector<128x512xf32>
    %189 = arith.addf %185, %188 : vector<128x512xf32>
    %190 = vector.extract_strided_slice %189 {offsets = [0, 0], sizes = [64, 512], strides = [1, 1]} : vector<128x512xf32> to vector<64x512xf32>
    %191 = math.tanh %190 : vector<64x512xf32>
    %192 = vector.extract_strided_slice %189 {offsets = [64, 0], sizes = [64, 512], strides = [1, 1]} : vector<128x512xf32> to vector<64x512xf32>
    %cst_162 = arith.constant 0.000000e+00 : f32
    %193 = vector.broadcast %cst_162 : f32 to vector<64x512xf32>
    %194 = arith.subf %193, %192 : vector<64x512xf32>
    %195 = math.exp %194 : vector<64x512xf32>
    %cst_163 = arith.constant 1.000000e+00 : f32
    %196 = vector.broadcast %cst_163 : f32 to vector<64x512xf32>
    %197 = arith.addf %196, %195 : vector<64x512xf32>
    %198 = tpu.reciprocal %197 {approx = true} : vector<64x512xf32> -> vector<64x512xf32>
    %199 = arith.mulf %191, %198 : vector<64x512xf32>
    %c2_164 = arith.constant 2 : index
    %c0_165 = arith.constant 0 : index
    %c0_166 = arith.constant 0 : index
    %200 = vector.load %arg7[%c2_164, %c0_165, %c0_166] : memref<4x128x64xbf16, #tpu.memory_space<vmem>>, vector<1x128x64xbf16>
    %201 = vector.shape_cast %200 : vector<1x128x64xbf16> to vector<128x64xbf16>
    %202 = arith.truncf %199 : vector<64x512xf32> to vector<64x512xbf16>
    %cst_167 = arith.constant dense<0.000000e+00> : vector<128x512xf32>
    %203 = tpu.matmul %201, %202, %cst_167 {dimension_numbers = #tpu.dot_dimension_numbers<[1], [0], [0], [1], [0, 0, 1, 1], [], []>} : vector<128x64xbf16>, vector<64x512xbf16>, vector<128x512xf32> -> vector<128x512xf32>
    %c2_168 = arith.constant 2 : index
    %c0_169 = arith.constant 0 : index
    %c0_170 = arith.constant 0 : index
    %204 = vector.load %arg8[%c2_168, %c0_169, %c0_170] : memref<4x128x1xf32, #tpu.memory_space<vmem>>, vector<1x128x1xf32>
    %205 = vector.shape_cast %204 : vector<1x128x1xf32> to vector<128x1xf32>
    %206 = vector.broadcast %205 : vector<128x1xf32> to vector<128x512xf32>
    %207 = arith.addf %203, %206 : vector<128x512xf32>
    %208 = vector.extract_strided_slice %207 {offsets = [0, 0], sizes = [64, 512], strides = [1, 1]} : vector<128x512xf32> to vector<64x512xf32>
    %209 = arith.addf %162, %208 : vector<64x512xf32>
    %cst_171 = arith.constant 0.707106769 : f32
    %210 = vector.broadcast %cst_171 : f32 to vector<64x512xf32>
    %211 = arith.mulf %209, %210 : vector<64x512xf32>
    %212 = vector.extract_strided_slice %207 {offsets = [64, 0], sizes = [64, 512], strides = [1, 1]} : vector<128x512xf32> to vector<64x512xf32>
    %213 = arith.addf %164, %212 : vector<64x512xf32>
    %214 = arith.truncf %211 : vector<64x512xf32> to vector<64x512xbf16>
    %215 = vector.extract_strided_slice %214 {offsets = [0, 0], sizes = [64, 256], strides = [1, 1]} : vector<64x512xbf16> to vector<64x256xbf16>
    %c0_172 = arith.constant 0 : index
    %c128_173 = arith.constant 128 : index
    %216 = vector.load %arg14[%c0_172, %c128_173] : memref<64x1024xbf16, #tpu.memory_space<vmem>>, vector<64x256xbf16>
    tpu.vector_store %arg14[%c0_172, %c128_173], %215 {strides = array<i32>} : memref<64x1024xbf16, #tpu.memory_space<vmem>>, vector<64x256xbf16>,
    %217 = vector.extract_strided_slice %214 {offsets = [0, 256], sizes = [64, 256], strides = [1, 1]} : vector<64x512xbf16> to vector<64x256xbf16>
    %c0_174 = arith.constant 0 : index
    %c640_175 = arith.constant 640 : index
    %218 = vector.load %arg14[%c0_174, %c640_175] : memref<64x1024xbf16, #tpu.memory_space<vmem>>, vector<64x256xbf16>
    tpu.vector_store %arg14[%c0_174, %c640_175], %217 {strides = array<i32>} : memref<64x1024xbf16, #tpu.memory_space<vmem>>, vector<64x256xbf16>,
    %c0_176 = arith.constant 0 : index
    %c120 = arith.constant 120 : index
    %219 = vector.load %arg14[%c0_176, %c120] : memref<64x1024xbf16, #tpu.memory_space<vmem>>, vector<64x256xbf16>
    %c0_177 = arith.constant 0 : index
    %c0_178 = arith.constant 0 : index
    %220 = vector.load %arg15[%c0_177, %c0_178] : memref<208x512xbf16, #tpu.memory_space<vmem>>, vector<64x256xbf16>
    tpu.vector_store %arg15[%c0_177, %c0_178], %219 {strides = array<i32>} : memref<208x512xbf16, #tpu.memory_space<vmem>>, vector<64x256xbf16>,
    %c0_179 = arith.constant 0 : index
    %c128_180 = arith.constant 128 : index
    %221 = vector.load %arg14[%c0_179, %c128_180] : memref<64x1024xbf16, #tpu.memory_space<vmem>>, vector<64x256xbf16>
    %c64_181 = arith.constant 64 : index
    %c0_182 = arith.constant 0 : index
    %222 = vector.load %arg15[%c64_181, %c0_182] : memref<208x512xbf16, #tpu.memory_space<vmem>>, vector<64x256xbf16>
    tpu.vector_store %arg15[%c64_181, %c0_182], %221 {strides = array<i32>} : memref<208x512xbf16, #tpu.memory_space<vmem>>, vector<64x256xbf16>,
    %c0_183 = arith.constant 0 : index
    %c136 = arith.constant 136 : index
    %223 = vector.load %arg14[%c0_183, %c136] : memref<64x1024xbf16, #tpu.memory_space<vmem>>, vector<64x256xbf16>
    %c128_184 = arith.constant 128 : index
    %c0_185 = arith.constant 0 : index
    %224 = vector.load %arg15[%c128_184, %c0_185] : memref<208x512xbf16, #tpu.memory_space<vmem>>, vector<64x256xbf16>
    tpu.vector_store %arg15[%c128_184, %c0_185], %223 {strides = array<i32>} : memref<208x512xbf16, #tpu.memory_space<vmem>>, vector<64x256xbf16>,
    %c0_186 = arith.constant 0 : index
    %c632 = arith.constant 632 : index
    %225 = vector.load %arg14[%c0_186, %c632] : memref<64x1024xbf16, #tpu.memory_space<vmem>>, vector<64x256xbf16>
    %c0_187 = arith.constant 0 : index
    %c256_188 = arith.constant 256 : index
    %226 = vector.load %arg15[%c0_187, %c256_188] : memref<208x512xbf16, #tpu.memory_space<vmem>>, vector<64x256xbf16>
    tpu.vector_store %arg15[%c0_187, %c256_188], %225 {strides = array<i32>} : memref<208x512xbf16, #tpu.memory_space<vmem>>, vector<64x256xbf16>,
    %c0_189 = arith.constant 0 : index
    %c640_190 = arith.constant 640 : index
    %227 = vector.load %arg14[%c0_189, %c640_190] : memref<64x1024xbf16, #tpu.memory_space<vmem>>, vector<64x256xbf16>
    %c64_191 = arith.constant 64 : index
    %c256_192 = arith.constant 256 : index
    %228 = vector.load %arg15[%c64_191, %c256_192] : memref<208x512xbf16, #tpu.memory_space<vmem>>, vector<64x256xbf16>
    tpu.vector_store %arg15[%c64_191, %c256_192], %227 {strides = array<i32>} : memref<208x512xbf16, #tpu.memory_space<vmem>>, vector<64x256xbf16>,
    %c0_193 = arith.constant 0 : index
    %c648 = arith.constant 648 : index
    %229 = vector.load %arg14[%c0_193, %c648] : memref<64x1024xbf16, #tpu.memory_space<vmem>>, vector<64x256xbf16>
    %c128_194 = arith.constant 128 : index
    %c256_195 = arith.constant 256 : index
    %230 = vector.load %arg15[%c128_194, %c256_195] : memref<208x512xbf16, #tpu.memory_space<vmem>>, vector<64x256xbf16>
    tpu.vector_store %arg15[%c128_194, %c256_195], %229 {strides = array<i32>} : memref<208x512xbf16, #tpu.memory_space<vmem>>, vector<64x256xbf16>,
    %c3 = arith.constant 3 : index
    %c0_196 = arith.constant 0 : index
    %c0_197 = arith.constant 0 : index
    %231 = vector.load %arg5[%c3, %c0_196, %c0_197] : memref<4x128x208xbf16, #tpu.memory_space<vmem>>, vector<1x128x208xbf16>
    %232 = vector.shape_cast %231 : vector<1x128x208xbf16> to vector<128x208xbf16>
    %c0_198 = arith.constant 0 : index
    %c0_199 = arith.constant 0 : index
    %233 = vector.load %arg15[%c0_198, %c0_199] : memref<208x512xbf16, #tpu.memory_space<vmem>>, vector<208x512xbf16>
    %cst_200 = arith.constant dense<0.000000e+00> : vector<128x512xf32>
    %234 = tpu.matmul %232, %233, %cst_200 {dimension_numbers = #tpu.dot_dimension_numbers<[1], [0], [0], [1], [0, 0, 1, 1], [], []>} : vector<128x208xbf16>, vector<208x512xbf16>, vector<128x512xf32> -> vector<128x512xf32>
    %c3_201 = arith.constant 3 : index
    %c0_202 = arith.constant 0 : index
    %c0_203 = arith.constant 0 : index
    %235 = vector.load %arg6[%c3_201, %c0_202, %c0_203] : memref<4x128x1xf32, #tpu.memory_space<vmem>>, vector<1x128x1xf32>
    %236 = vector.shape_cast %235 : vector<1x128x1xf32> to vector<128x1xf32>
    %237 = vector.broadcast %236 : vector<128x1xf32> to vector<128x512xf32>
    %238 = arith.addf %234, %237 : vector<128x512xf32>
    %239 = vector.extract_strided_slice %238 {offsets = [0, 0], sizes = [64, 512], strides = [1, 1]} : vector<128x512xf32> to vector<64x512xf32>
    %240 = math.tanh %239 : vector<64x512xf32>
    %241 = vector.extract_strided_slice %238 {offsets = [64, 0], sizes = [64, 512], strides = [1, 1]} : vector<128x512xf32> to vector<64x512xf32>
    %cst_204 = arith.constant 0.000000e+00 : f32
    %242 = vector.broadcast %cst_204 : f32 to vector<64x512xf32>
    %243 = arith.subf %242, %241 : vector<64x512xf32>
    %244 = math.exp %243 : vector<64x512xf32>
    %cst_205 = arith.constant 1.000000e+00 : f32
    %245 = vector.broadcast %cst_205 : f32 to vector<64x512xf32>
    %246 = arith.addf %245, %244 : vector<64x512xf32>
    %247 = tpu.reciprocal %246 {approx = true} : vector<64x512xf32> -> vector<64x512xf32>
    %248 = arith.mulf %240, %247 : vector<64x512xf32>
    %c3_206 = arith.constant 3 : index
    %c0_207 = arith.constant 0 : index
    %c0_208 = arith.constant 0 : index
    %249 = vector.load %arg7[%c3_206, %c0_207, %c0_208] : memref<4x128x64xbf16, #tpu.memory_space<vmem>>, vector<1x128x64xbf16>
    %250 = vector.shape_cast %249 : vector<1x128x64xbf16> to vector<128x64xbf16>
    %251 = arith.truncf %248 : vector<64x512xf32> to vector<64x512xbf16>
    %cst_209 = arith.constant dense<0.000000e+00> : vector<128x512xf32>
    %252 = tpu.matmul %250, %251, %cst_209 {dimension_numbers = #tpu.dot_dimension_numbers<[1], [0], [0], [1], [0, 0, 1, 1], [], []>} : vector<128x64xbf16>, vector<64x512xbf16>, vector<128x512xf32> -> vector<128x512xf32>
    %c3_210 = arith.constant 3 : index
    %c0_211 = arith.constant 0 : index
    %c0_212 = arith.constant 0 : index
    %253 = vector.load %arg8[%c3_210, %c0_211, %c0_212] : memref<4x128x1xf32, #tpu.memory_space<vmem>>, vector<1x128x1xf32>
    %254 = vector.shape_cast %253 : vector<1x128x1xf32> to vector<128x1xf32>
    %255 = vector.broadcast %254 : vector<128x1xf32> to vector<128x512xf32>
    %256 = arith.addf %252, %255 : vector<128x512xf32>
    %257 = vector.extract_strided_slice %256 {offsets = [64, 0], sizes = [64, 512], strides = [1, 1]} : vector<128x512xf32> to vector<64x512xf32>
    %258 = arith.addf %213, %257 : vector<64x512xf32>
    %cst_213 = arith.constant 0.000000e+00 : f32
    %259 = vector.broadcast %cst_213 : f32 to vector<64x512xf32>
    %260 = arith.maximumf %258, %259 : vector<64x512xf32>
    %c0_214 = arith.constant 0 : index
    %c0_215 = arith.constant 0 : index
    %261 = vector.load %arg9[%c0_214, %c0_215] : memref<64x64xbf16, #tpu.memory_space<vmem>>, vector<64x64xbf16>
    %262 = arith.truncf %260 : vector<64x512xf32> to vector<64x512xbf16>
    %cst_216 = arith.constant dense<0.000000e+00> : vector<64x512xf32>
    %263 = tpu.matmul %261, %262, %cst_216 {dimension_numbers = #tpu.dot_dimension_numbers<[1], [0], [0], [1], [0, 0, 1, 1], [], []>} : vector<64x64xbf16>, vector<64x512xbf16>, vector<64x512xf32> -> vector<64x512xf32>
    %c0_217 = arith.constant 0 : index
    %c0_218 = arith.constant 0 : index
    %264 = vector.load %arg10[%c0_217, %c0_218] : memref<64x1xf32, #tpu.memory_space<vmem>>, vector<64x1xf32>
    %265 = vector.broadcast %264 : vector<64x1xf32> to vector<64x512xf32>
    %266 = arith.addf %263, %265 : vector<64x512xf32>
    %cst_219 = arith.constant 0.000000e+00 : f32
    %267 = vector.broadcast %cst_219 : f32 to vector<64x512xf32>
    %268 = arith.maximumf %266, %267 : vector<64x512xf32>
    %c0_220 = arith.constant 0 : index
    %c0_221 = arith.constant 0 : index
    %269 = vector.load %arg11[%c0_220, %c0_221] : memref<64x1xf32, #tpu.memory_space<vmem>>, vector<64x1xf32>
    %270 = vector.broadcast %269 : vector<64x1xf32> to vector<64x512xf32>
    %271 = arith.mulf %270, %268 : vector<64x512xf32>
    %cst_222 = arith.constant dense<0.000000e+00> : vector<512xf32>
    %272 = vector.multi_reduction <add>, %271, %cst_222 [0] : vector<64x512xf32> to vector<512xf32>
    %273 = vector.shape_cast %272 : vector<512xf32> to vector<1x512xf32>
    %c0_223 = arith.constant 0 : index
    %c0_224 = arith.constant 0 : index
    %274 = vector.load %arg12[%c0_223, %c0_224] : memref<1x1xf32, #tpu.memory_space<vmem>>, vector<1x1xf32>
    %275 = vector.broadcast %274 : vector<1x1xf32> to vector<1x512xf32>
    %276 = arith.addf %273, %275 : vector<1x512xf32>
    %277 = vector.extract_strided_slice %276 {offsets = [0, 0], sizes = [1, 256], strides = [1, 1]} : vector<1x512xf32> to vector<1x256xf32>
    %c0_225 = arith.constant 0 : index
    %c0_226 = arith.constant 0 : index
    %c0_227 = arith.constant 0 : index
    %278 = vector.load %arg13[%c0_225, %c0_226, %c0_227] : memref<2x1x256xf32, #tpu.memory_space<vmem>>, vector<1x1x256xf32>
    %279 = vector.shape_cast %278 : vector<1x1x256xf32> to vector<1x256xf32>
    %280 = vector.shape_cast %277 : vector<1x256xf32> to vector<1x1x256xf32>
    tpu.vector_store %arg13[%c0_225, %c0_226, %c0_227], %280 {strides = array<i32>} : memref<2x1x256xf32, #tpu.memory_space<vmem>>, vector<1x1x256xf32>,
    %281 = vector.extract_strided_slice %276 {offsets = [0, 256], sizes = [1, 256], strides = [1, 1]} : vector<1x512xf32> to vector<1x256xf32>
    %c1_228 = arith.constant 1 : index
    %c0_229 = arith.constant 0 : index
    %c0_230 = arith.constant 0 : index
    %282 = vector.load %arg13[%c1_228, %c0_229, %c0_230] : memref<2x1x256xf32, #tpu.memory_space<vmem>>, vector<1x1x256xf32>
    %283 = vector.shape_cast %282 : vector<1x1x256xf32> to vector<1x256xf32>
    %284 = vector.shape_cast %281 : vector<1x256xf32> to vector<1x1x256xf32>
    tpu.vector_store %arg13[%c1_228, %c0_229, %c0_230], %284 {strides = array<i32>} : memref<2x1x256xf32, #tpu.memory_space<vmem>>, vector<1x1x256xf32>,
    return
  }
  func.func @transform_0(%arg0: i32) -> (i32, i32, i32) {
    %c0_i32 = arith.constant 0 : i32
    %c0_i32_0 = arith.constant 0 : i32
    %c0_i32_1 = arith.constant 0 : i32
    return %arg0, %c0_i32, %c0_i32_0 : i32, i32, i32
  }
  func.func @transform_1(%arg0: i32) -> (i32, i32, i32) {
    %c0_i32 = arith.constant 0 : i32
    %c0_i32_0 = arith.constant 0 : i32
    %c0_i32_1 = arith.constant 0 : i32
    return %arg0, %c0_i32, %c0_i32_0 : i32, i32, i32
  }
  func.func @transform_2(%arg0: i32) -> (i32, i32) {
    %c0_i32 = arith.constant 0 : i32
    %c0_i32_0 = arith.constant 0 : i32
    %c0_i32_1 = arith.constant 0 : i32
    return %c0_i32, %c0_i32_0 : i32, i32
  }
  func.func @transform_3(%arg0: i32) -> (i32, i32) {
    %c0_i32 = arith.constant 0 : i32
    %c0_i32_0 = arith.constant 0 : i32
    %c0_i32_1 = arith.constant 0 : i32
    return %c0_i32, %c0_i32_0 : i32, i32
  }
  func.func @transform_4(%arg0: i32) -> (i32, i32, i32) {
    %c0_i32 = arith.constant 0 : i32
    %c0_i32_0 = arith.constant 0 : i32
    %c0_i32_1 = arith.constant 0 : i32
    %c0_i32_2 = arith.constant 0 : i32
    return %c0_i32, %c0_i32_0, %c0_i32_1 : i32, i32, i32
  }
  func.func @transform_5(%arg0: i32) -> (i32, i32, i32) {
    %c0_i32 = arith.constant 0 : i32
    %c0_i32_0 = arith.constant 0 : i32
    %c0_i32_1 = arith.constant 0 : i32
    %c0_i32_2 = arith.constant 0 : i32
    return %c0_i32, %c0_i32_0, %c0_i32_1 : i32, i32, i32
  }
  func.func @transform_6(%arg0: i32) -> (i32, i32, i32) {
    %c0_i32 = arith.constant 0 : i32
    %c0_i32_0 = arith.constant 0 : i32
    %c0_i32_1 = arith.constant 0 : i32
    %c0_i32_2 = arith.constant 0 : i32
    return %c0_i32, %c0_i32_0, %c0_i32_1 : i32, i32, i32
  }
  func.func @transform_7(%arg0: i32) -> (i32, i32, i32) {
    %c0_i32 = arith.constant 0 : i32
    %c0_i32_0 = arith.constant 0 : i32
    %c0_i32_1 = arith.constant 0 : i32
    %c0_i32_2 = arith.constant 0 : i32
    return %c0_i32, %c0_i32_0, %c0_i32_1 : i32, i32, i32
  }
  func.func @transform_8(%arg0: i32) -> (i32, i32) {
    %c0_i32 = arith.constant 0 : i32
    %c0_i32_0 = arith.constant 0 : i32
    %c0_i32_1 = arith.constant 0 : i32
    return %c0_i32, %c0_i32_0 : i32, i32
  }
  func.func @transform_9(%arg0: i32) -> (i32, i32) {
    %c0_i32 = arith.constant 0 : i32
    %c0_i32_0 = arith.constant 0 : i32
    %c0_i32_1 = arith.constant 0 : i32
    return %c0_i32, %c0_i32_0 : i32, i32
  }
  func.func @transform_10(%arg0: i32) -> (i32, i32) {
    %c0_i32 = arith.constant 0 : i32
    %c0_i32_0 = arith.constant 0 : i32
    %c0_i32_1 = arith.constant 0 : i32
    return %c0_i32, %c0_i32_0 : i32, i32
  }
  func.func @transform_11(%arg0: i32) -> (i32, i32) {
    %c0_i32 = arith.constant 0 : i32
    %c0_i32_0 = arith.constant 0 : i32
    %c0_i32_1 = arith.constant 0 : i32
    return %c0_i32, %c0_i32_0 : i32, i32
  }
  func.func @transform_12(%arg0: i32) -> (i32, i32, i32) {
    %c0_i32 = arith.constant 0 : i32
    %c0_i32_0 = arith.constant 0 : i32
    %c0_i32_1 = arith.constant 0 : i32
    return %arg0, %c0_i32, %c0_i32_0 : i32, i32, i32
  }
}

</mosaic_0001>

<bundles_post_ra>
// kernel: tpu_custom_call.1
= control target key start
LH: loop header
LB: loop body
LE: loop exit
PB: predicated region body
PF: predicated region fallthrough
CT: control target
= control target key end

     0   :  { %s18110_s0 = inlined_call_operand.vmem [shape: f32[4,1,256], index: 0, kind: input, shape index: {}]   ;;  %s18111_s1 = inlined_call_operand.vmem [shape: bf16[4,16,256], index: 1, kind: input, shape index: {}]   ;;  %s18112_s2 = inlined_call_operand.vmem [shape: f32[64,3], index: 2, kind: input, shape index: {}]   ;;  %s18113_s3 = inlined_call_operand.vmem [shape: f32[64,1], index: 3, kind: input, shape index: {}]   ;;  %s18114_s4 = inlined_call_operand.vmem [shape: bf16[4,128,208], index: 4, kind: input, shape index: {}]   ;;  %s18115_s5 = inlined_call_operand.vmem [shape: f32[4,128,1], index: 5, kind: input, shape index: {}]   ;;  %s18116_s6 = inlined_call_operand.vmem [shape: bf16[4,128,64], index: 6, kind: input, shape index: {}]   ;;  %s18117_s7 = inlined_call_operand.vmem [shape: f32[4,128,1], index: 7, kind: input, shape index: {}]   ;;  %s18118_s8 = inlined_call_operand.vmem [shape: bf16[64,64], index: 8, kind: input, shape index: {}]   ;;  %s18119_s9 = inlined_call_operand.vmem [shape: f32[64,1], index: 9, kind: input, shape index: {}]   ;;  %s18120_s10 = inlined_call_operand.vmem [shape: f32[64,1], index: 10, kind: input, shape index: {}]   ;;  %s18121_s11 = inlined_call_operand.<no memory space> [shape: f32[1,1], index: 11, kind: input, shape index: {}]   ;;  %s18122_s12 = inlined_call_operand.hbm [shape: f32[4,1,256], index: 12, kind: output, shape index: {}]  }
   0x1   :  { %v17_v0 = vstv %s18121_s11 }
   0x2   :  { %18 = vst [vmem:[#allocation4] sm:$0x1] %v17_v0 }
   0x3   :  { %19 = vsyncpa [#allocation6], 0 }
   0x4   :  { %21 = vsyncpa [#allocation6 + $0x1], 0  ;;  %s12647_s23 = smov 0   ;;  %s12649_s24 = smov 0  }
   0x5   :  { %s12651_s25 = smov 0   ;;  %s12653_s26 = smov 0  }
   0x6 LB: > { %s12668_s11 = sadd.s32 4294967295, %s12563_s26   ;;  %s10507_s27 = sadd.s32 4294967294, %s12563_s26   ;;  %s12563_s26 = sphi %s12653_s26, %s18736_s26   ;;  %s12559_s25 = sphi %s12651_s25, %s18735_s25   ;;  %s12555_s24 = sphi %s12649_s24, %s18734_s24   ;;  %s12551_s23 = sphi %s12647_s23, %s18733_s23  }
   0x7   : > { %s12672_s28 = sadd.s32 1, %s12563_s26   ;;  %s296_s29 = sadd.s32 1, %s12559_s25 }
   0x8   : > { %s293_s30 = ssub.s32 %s12563_s26, %s12672_s28  ;;  %p306_p0 = scmp.ne.s32.totalorder %s12559_s25, %s12555_s24 }
   0x9   : > { %p294_p1 = scmp.eq.s32.totalorder %s293_s30, 0  ;;  %p307_p2 = scmp.eq.s32.totalorder %s12668_s11, 1 }
   0xa   : > { %p312_p3 = scmp.ne.s32.totalorder %s12555_s24, %s12551_s23  ;;  %p313_p4 = scmp.eq.s32.totalorder %s10507_s27, 1 }
   0xb   : > { %s12683_s13 = scalar_select %p294_p1, %s12559_s25, %s296_s29  }
   0xc   : > { %p12685_p5 = por %p307_p2, %p306_p0  ;;  %p12689_p6 = por %p313_p4, %p312_p3 }
   0xd   : > { %18233 = sst [smem:[#allocation8_spill]] %s12683_s13  ;;  %p10510_p7 = scmp.ge.s32.totalorder %s12563_s26, 1 }
   0xe   : > { %p380_p8 = scmp.lt.s32.totalorder %s12563_s26, 3 }
  0x10   : > { %p381_p9 = pnand %p10510_p7, %p380_p8 }
  0x12   : > { %384 = sbr.rel (%p381_p9) target bundleno = 3905 (0xf41), region = 68 }
  0x17   : > { %v12698_v1 = vld [vmem:[%s18112_s2 + $0x30] sm:$0xff]  ;;  %v18123_v2 = vlaneseq  ;;  %v12565_v3 = vmov 1   ;;  %v12566_v4 = vmov 2   ;;  %v18124_v5 = vmov 0   ;;  %s10512_s18 = sshll.u32 %s12668_s11, 1  ;;  %v593_v7 = vld [vmem:[%s18112_s2 + $0x38] sm:$0xff] }
  0x18   : > { %11350 = vset.pattern.permute.xlu0 %v12565_v3  ;;  %11351 = vset.pattern.permute.xlu1 %v12566_v4  ;;  %443 = vst [vmem:[#allocation2] sm:$0xff] %v18124_v5  ;;  %444 = vst [vmem:[#allocation2 + $0x8] sm:$0xff] %v18124_v5  ;;  %p429_p10 = scmp.lt.s32.totalorder %s10512_s18, 3  ;;  %vm504_vm0 = vcmask 1040384   ;;  %vm505_vm1 = vsmask.f32 256 }
  0x19   : > { %445 = vst [vmem:[#allocation2 + $0x10] sm:$0xff] %v18124_v5  ;;  %446 = vst [vmem:[#allocation2 + $0x18] sm:$0xff] %v18124_v5  ;;  %727 = vperm.xlu0 %11350, %v12698_v1   ;;  %893 = vperm.xlu1 %11351, %v12698_v1   ;;  %v12738_v6 = vshrl.u32 %v18123_v2, 7  ;;  %vm507_vm2 = vcmask 1044484   ;;  %vm508_vm4 = vsmask.f32 4352 }
  0x1a   : > { %447 = vst [vmem:[#allocation2 + $0x20] sm:$0xff] %v18124_v5  ;;  %448 = vst [vmem:[#allocation2 + $0x28] sm:$0xff] %v18124_v5  ;;  %s18738_s18 = smov (!%p429_p10, %s10512_s18), 3  ;;  %v590_v12 = vld [vmem:[%s18112_s2 + $0x20] sm:$0xff]  ;;  %v591_v13 = vld [vmem:[%s18112_s2 + $0x28] sm:$0xff]  ;;  %s12568_s22 = smov 127  }
  0x1b   : > { %449 = vst [vmem:[#allocation2 + $0x30] sm:$0xff] %v18124_v5  ;;  %450 = vst [vmem:[#allocation2 + $0x38] sm:$0xff] %v18124_v5  ;;  %v12746_v8 = vsub.s32 0, %v12738_v6  ;;  %v492_v9 = vsub.s32 1, %v12738_v6  ;;  %s10513_s21 = sshll.u32 %s18738_s18, 1  ;;  %v589_v16 = vld [vmem:[%s18112_s2 + $0x18] sm:$0xff] }
  0x1c   : > { %451 = vst [vmem:[#allocation2 + $0x40] sm:$0xff] %v18124_v5  ;;  %452 = vst [vmem:[#allocation2 + $0x48] sm:$0xff] %v18124_v5  ;;  %s432_s16 = scalar_lea.vmem %s18110_s0, %s10513_s21  ;;  %v586_v25 = vld [vmem:[%s18112_s2] sm:$0xff]  ;;  %v588_v28 = vld [vmem:[%s18112_s2 + $0x10] sm:$0xff]  ;;  %s18127_s27 = smov 126   ;;  %vm1008_vm7 = vcmask 1031168  }
  0x1d   : > { %453 = vst [vmem:[#allocation2 + $0x50] sm:$0xff] %v18124_v5  ;;  %454 = vst [vmem:[#allocation2 + $0x58] sm:$0xff] %v18124_v5  ;;  %731 = vperm.xlu0 %11350, %v593_v7   ;;  %897 = vperm.xlu1 %11351, %v593_v7   ;;  %v484_v14 = vld [vmem:[%s432_s16] sm:$0x3]  ;;  %v10520_v15 = vld [vmem:[%s432_s16 + $0x2] sm:$0x3] }
  0x1e   : > { %455 = vst [vmem:[#allocation2 + $0x60] sm:$0xff] %v18124_v5  ;;  %456 = vst [vmem:[#allocation2 + $0x68] sm:$0xff] %v18124_v5  ;;  %v489_v17 = vrot.slane %v484_v14, %v12746_v8  ;;  %v493_v18 = vrot.slane %v484_v14, %v492_v9  ;;  %v520_v20 = vrot.slane %v10520_v15, %v12746_v8  ;;  %v587_v29 = vld [vmem:[%s18112_s2 + $0x8] sm:$0xff]  ;;  %v542_v30 = vld [vmem:[%s18113_s3 + $0x20] sm:$0xff]  ;;  %vm806_vm8 = vcmask 1039360   ;;  %s12570_s29 = smov 1  }
  0x1f   : > { %457 = vst [vmem:[#allocation2 + $0x70] sm:$0xff] %v18124_v5  ;;  %458 = vst [vmem:[#allocation2 + $0x78] sm:$0xff] %v18124_v5  ;;  %v511_v19 = vld [vmem:[#allocation2 + $0x4] sm:$0x11]  ;;  %v524_v21 = vrot.slane %v10520_v15, %v492_v9  ;;  %v540_v31 = vld [vmem:[%s18113_s3 + $0x10] sm:$0xff]  ;;  %vm1555_vm9 = vcmask 7168  }
  0x20   : > { %459 = vst [vmem:[#allocation2 + $0x80] sm:$0xff] %v18124_v5  ;;  %460 = vst [vmem:[#allocation2 + $0x88] sm:$0xff] %v18124_v5  ;;  %v535_v22 = vld [vmem:[#allocation2 + $0x14] sm:$0x11]  ;;  %v11230_v23 = vpack.c.bf16 %v493_v18, %v489_v17  ;;  %v538_v34 = vld [vmem:[%s18113_s3] sm:$0xff]  ;;  %s11229_s30 = sshll.u32 %s18738_s18, 4 }
  0x21   : > { %461 = vst [vmem:[#allocation2 + $0x90] sm:$0xff] %v18124_v5  ;;  %462 = vst [vmem:[#allocation2 + $0x98] sm:$0xff] %v18124_v5  ;;  %719 = vperm.xlu0 %11350, %v590_v12   ;;  %11352 = vset.pattern.permute.xlu1 %v12565_v3  ;;  %v11231_v24 = vpack.c.bf16 %v524_v21, %v520_v20  ;;  %v544_v32 = vld [vmem:[%s18113_s3 + $0x30] sm:$0xff]  ;;  %v545_v33 = vld [vmem:[%s18113_s3 + $0x38] sm:$0xff]  ;;  %s13720_s19 = scalar_lea.vmem %s18111_s1, %s11229_s30  ;;  %vm1884_vm10 = vcmask 1043456   ;;  %vm2783_vm11 = vcmask 654336  }
  0x22   : > { %463 = vst [vmem:[#allocation2 + $0xa0] sm:$0xff] %v18124_v5  ;;  %464 = vst [vmem:[#allocation2 + $0xa8] sm:$0xff] %v18124_v5  ;;  %723 = vperm.xlu1 %11352, %v591_v13   ;;  %v543_v35 = vld [vmem:[%s18113_s3 + $0x28] sm:$0xff]  ;;  %v541_v36 = vld [vmem:[%s18113_s3 + $0x18] sm:$0xff]  ;;  %vm3426_vm12 = vcmask 523264   ;;  %s18290_s13 = smov 126  }
  0x23   : > { %465 = vst [vmem:[#allocation2 + $0xb0] sm:$0xff] %v18124_v5  ;;  %466 = vst [vmem:[#allocation2 + $0xb8] sm:$0xff] %v18124_v5  ;;  %v539_v37 = vld [vmem:[%s18113_s3 + $0x8] sm:$0xff]  ;;  %s18232_s21 = smov 2   ;;  %vm3966_vm13 = vcmask 15360   ;;  %vm6048_vm14 = vcmask 31744  }
  0x24   : > { %467 = vst [vmem:[#allocation2 + $0xc0] sm:$0xff] %v18124_v5  ;;  %468 = vst [vmem:[#allocation2 + $0xc8] sm:$0xff] %v18124_v5  ;;  %v864_v59 = vld [vmem:[#allocation2 + $0xc] sm:$0x1]  ;;  %vm6177_vm15 = vcmask 1014784   ;;  %s425_s18 = sand.u32 1, %s12555_s24  }
  0x25   : > { %469 = vst [vmem:[#allocation2 + $0xd0] sm:$0xff] %v18124_v5  ;;  %470 = vst [vmem:[#allocation2 + $0xd8] sm:$0xff] %v18124_v5  ;;  %715 = vperm.xlu0 %11350, %v589_v16   ;;  %s10511_s20 = sshll.u32 %s425_s18, 2  ;;  %s12577_s17 = smov [#allocation5]  }
  0x26   : > { %471 = vst [vmem:[#allocation2 + $0xe0] sm:$0xff] %v18124_v5  ;;  %472 = vst [vmem:[#allocation2 + $0xe8] sm:$0xff] %v18124_v5  ;;  %11353 = vset.pattern.permute.xlu1 %v12566_v4  ;;  %s427_s30 = scalar_lea.vmem [#allocation5], %s10511_s20  ;;  %s12507_s20 = sshll.u32 %s12577_s17, 4  ;;  %s12508_s20 = int_to_ptr.vmem [resolvable:$false] %s12507_s20 }
  0x27   : > { %473 = vst [vmem:[#allocation2 + $0xf0] sm:$0xff] %v18124_v5  ;;  %474 = vst [vmem:[#allocation2 + $0xf8] sm:$0xff] %v18124_v5  ;;  %889 = vperm.xlu1 %11353, %v591_v13  }
  0x28   : > { %18236 = vst [vmem:[#allocation9_spill] sm:$0xff] %v12738_v6  ;;  %18237 = vst [vmem:[#allocation10_spill] sm:$0xff] %v12746_v8 }
  0x29   : > { %vm12749_vm3 = vmand %vm504_vm0, %vm505_vm1  ;;  %703 = vperm.xlu0 %11350, %v586_v25   ;;  %vm8130_vm0 = vcmask 64512   ;;  %vm8259_vm1 = vcmask 982016  }
  0x2a   : > { %vm12754_vm5 = vmand %vm507_vm2, %vm508_vm4 }
  0x2b   : > { %vm510_vm6 = vmor %vm12754_vm5, %vm12749_vm3  ;;  %11354 = vset.pattern.permute.xlu1 %v12565_v3 }
  0x2c   : > { %v512_v26 = vsel %vm510_vm6, %v11230_v23, %v511_v19  ;;  %v536_v27 = vsel %vm510_vm6, %v11231_v24, %v535_v22  ;;  %711 = vperm.xlu1 %11354, %v588_v28  }
  0x2d   : > { %513 = vst [vmem:[#allocation2 + $0x4] sm:$0x11] %v512_v26  ;;  %537 = vst [vmem:[#allocation2 + $0x14] sm:$0x11] %v536_v27  ;;  %11356 = vset.pattern.permute.xlu0 %v12566_v4 }
  0x2e   : > { %885 = vperm.xlu0 %11356, %v590_v12  }
  0x30   : > { %11355 = vset.pattern.permute.xlu1 %v12566_v4 }
  0x31   : > { %877 = vperm.xlu1 %11355, %v588_v28  }
  0x32   : > { %869 = vperm.xlu0 %11356, %v586_v25  }
  0x34   : > { %v699_v38 = vld [vmem:[#allocation2 + $0x4] sm:$0x11]  ;;  %v1162_v43 = vld [vmem:[#allocation2 + $0x14] sm:$0x11] }
  0x35   : > { %881 = vperm.xlu1 %11355, %v589_v16   ;;  %v701_v39 = vunpack.c.h.bf16 %v699_v38  ;;  %v700_v40 = vunpack.c.l.bf16 %v699_v38  ;;  %v1163_v46 = vunpack.c.l.bf16 %v1162_v43  ;;  %v1164_v47 = vunpack.c.h.bf16 %v1162_v43  ;;  %v863_v50 = vld [vmem:[#allocation2 + $0x4] sm:$0x11] }
  0x36   : > { %11360 = vset.pattern.permute.xlu0 %v18124_v5  ;;  %v866_v55 = vunpack.c.h.bf16 %v863_v50  ;;  %v865_v56 = vunpack.c.l.bf16 %v863_v50 }
  0x37   : > { %636 = vperm.xlu0 %11360, %v593_v7   ;;  %v12820_v41 = vrot.slane %v701_v39, %v12746_v8  ;;  %v12823_v42 = vrot.slane %v700_v40, %v12746_v8  ;;  %v12832_v53 = vrot.slane %v1164_v47, %v12746_v8  ;;  %v12835_v54 = vrot.slane %v1163_v46, %v12746_v8 }
  0x38   : > { %v12844_v61 = vrot.slane %v866_v55, %v12746_v8  ;;  %v12847_v62 = vrot.slane %v865_v56, %v12746_v8 }
  0x39   : > { %11357 = vset.pattern.permute.xlu1 %v12565_v3 }
  0x3a   : > { %707 = vperm.xlu1 %11357, %v587_v29  }
  0x3b   : > { %621 = vperm.xlu0 %11360, %v590_v12   ;;  %v1293_v12 = vld [vmem:[#allocation2 + $0x1c] sm:$0x1] }
  0x3e   : > { %11358 = vset.pattern.permute.xlu1 %v12566_v4 }
  0x3f   : > { %873 = vperm.xlu1 %11358, %v587_v29   ;;  %568 = vperm.xlu0 %11360, %v542_v30  }
  0x43   : > { %11359 = vset.pattern.permute.xlu1 %v18124_v5  ;;  %611 = vperm.xlu0 %11360, %v588_v28  }
  0x44   : > { %631 = vperm.xlu1 %11359, %v12698_v1   ;;  %v867_v1 = vunpack.c.l.bf16 %v864_v59 }
  0x46   : > { %v12856_v9 = vrot.slane %v867_v1, %v12746_v8 }
  0x47   : > { %558 = vperm.xlu0 %11360, %v540_v31  }
  0x48   : > { %578 = vperm.xlu1 %11359, %v544_v32  }
  0x4b   : > { %601 = vperm.xlu0 %11360, %v586_v25  }
  0x4c   : > { %583 = vperm.xlu1 %11359, %v545_v33  }
  0x4f   : > { %548 = vperm.xlu0 %11360, %v538_v34  }
  0x50   : > { %626 = vperm.xlu1 %11359, %v591_v13  }
  0x54   : > { %573 = vperm.xlu1 %11359, %v543_v35  }
  0x58   : > { %616 = vperm.xlu1 %11359, %v589_v16   ;;  %v1294_v16 = vunpack.c.l.bf16 %v1293_v12 }
  0x5a   : > { %v12873_v20 = vrot.slane %v1294_v16, %v12746_v8 }
  0x5c   : > { %563 = vperm.xlu1 %11359, %v541_v36  }
  0x60   : > { %606 = vperm.xlu1 %11359, %v587_v29  }
  0x64   : > { %553 = vperm.xlu1 %11359, %v539_v37  }
  0x94   : > { %v728_v44 = vpop.permute.xlu0 %727  ;;  %v894_v60 = vpop.permute.xlu1 %893 }
  0x95   : > { %v755_v45 = vmul.f32 %v12820_v41, %v728_v44  ;;  %v754_v48 = vmul.f32 %v12823_v42, %v728_v44  ;;  %v1186_v57 = vmul.f32 %v12832_v53, %v728_v44  ;;  %v1185_v58 = vmul.f32 %v12835_v54, %v728_v44 }
  0x96   : > { %v931_v3 = vmul.f32 %v12844_v61, %v894_v60  ;;  %v930_v4 = vmul.f32 %v12847_v62, %v894_v60  ;;  %v932_v11 = vmul.f32 %v12856_v9, %v894_v60  ;;  %v1318_v18 = vmul.f32 %v12832_v53, %v894_v60 }
  0x97   : > { %800 = vrot.lane.b32.xlu1 %v755_v45, %s12568_s22  ;;  %798 = vrot.lane.b32.xlu0 %v754_v48, %s12568_s22  ;;  %v1317_v19 = vmul.f32 %v12835_v54, %v894_v60  ;;  %v1319_v22 = vmul.f32 %v12873_v20, %v894_v60 }
  0x98   : > { %v732_v49 = vpop.permute.xlu0 %731  ;;  %v898_v7 = vpop.permute.xlu1 %897 }
  0x99   : > { %v757_v51 = vmul.f32 %v12820_v41, %v732_v49  ;;  %v756_v52 = vmul.f32 %v12823_v42, %v732_v49  ;;  %v1188_v63 = vmul.f32 %v12832_v53, %v732_v49  ;;  %v1187_v0 = vmul.f32 %v12835_v54, %v732_v49 }
  0x9a   : > { %v933_v10 = vmul.f32 %v12847_v62, %v898_v7  ;;  %v935_v14 = vmul.f32 %v12856_v9, %v898_v7  ;;  %v934_v15 = vmul.f32 %v12844_v61, %v898_v7  ;;  %v1320_v21 = vmul.f32 %v12835_v54, %v898_v7 }
  0x9b   : > { %804 = vrot.lane.b32.xlu1 %v757_v51, %s12568_s22  ;;  %802 = vrot.lane.b32.xlu0 %v756_v52, %s12568_s22  ;;  %v1322_v24 = vmul.f32 %v12873_v20, %v898_v7  ;;  %v1321_v25 = vmul.f32 %v12832_v53, %v898_v7 }
  0x9c   : > { %v720_v26 = vpop.permute.xlu0 %719 }
  0x9d   : > { %v724_v13 = vpop.permute.xlu1 %723  ;;  %v751_v28 = vmul.f32 %v12820_v41, %v720_v26  ;;  %v750_v29 = vmul.f32 %v12823_v42, %v720_v26  ;;  %v1182_v34 = vmul.f32 %v12832_v53, %v720_v26  ;;  %v1181_v35 = vmul.f32 %v12835_v54, %v720_v26 }
  0x9e   : > { %v753_v30 = vmul.f32 %v12820_v41, %v724_v13  ;;  %v752_v31 = vmul.f32 %v12823_v42, %v724_v13  ;;  %v1184_v38 = vmul.f32 %v12832_v53, %v724_v13  ;;  %v1183_v39 = vmul.f32 %v12835_v54, %v724_v13 }
  0x9f   : > { %1231 = vrot.lane.b32.xlu1 %v1186_v57, %s12568_s22  ;;  %1229 = vrot.lane.b32.xlu0 %v1185_v58, %s12568_s22 }
  0xa0   : > { %v716_v32 = vpop.permute.xlu0 %715 }
  0xa1   : > { %v1180_v16 = vmul.f32 %v12832_v53, %v716_v32 }
  0xa2   : > { %v12868_v17 = vpop.permute.xlu1 %889 }
  0xa3   : > { %1235 = vrot.lane.b32.xlu1 %v1188_v63, %s12568_s22  ;;  %1233 = vrot.lane.b32.xlu0 %v1187_v0, %s12568_s22  ;;  %v927_v46 = vmul.f32 %v12847_v62, %v12868_v17  ;;  %v929_v49 = vmul.f32 %v12856_v9, %v12868_v17  ;;  %v928_v50 = vmul.f32 %v12844_v61, %v12868_v17 }
  0xa4   : > { %v12901_v36 = vpop.permute.xlu0 %703  ;;  %v1314_v57 = vmul.f32 %v12835_v54, %v12868_v17  ;;  %v1316_v63 = vmul.f32 %v12873_v20, %v12868_v17  ;;  %v1315_v0 = vmul.f32 %v12832_v53, %v12868_v17  ;;  %v1179_v17 = vmul.f32 %v12835_v54, %v716_v32 }
  0xa7   : > { %998 = vrot.lane.b32.xlu1 %v931_v3, %s18127_s27  ;;  %996 = vrot.lane.b32.xlu0 %v930_v4, %s18127_s27  ;;  %v12879_v23 = vpop.permute.xlu1 %711 }
  0xa8   : > { %v747_v1 = vmul.f32 %v12820_v41, %v12879_v23  ;;  %v746_v3 = vmul.f32 %v12823_v42, %v12879_v23 }
  0xa9   : > { %v886_v40 = vpop.permute.xlu0 %885 }
  0xaa   : > { %v925_v43 = vmul.f32 %v12844_v61, %v886_v40  ;;  %v924_v44 = vmul.f32 %v12847_v62, %v886_v40  ;;  %v926_v47 = vmul.f32 %v12856_v9, %v886_v40  ;;  %v1312_v51 = vmul.f32 %v12832_v53, %v886_v40 }
  0xab   : > { %1002 = vrot.lane.b32.xlu1 %v933_v10, %s18127_s27  ;;  %1000 = vrot.lane.b32.xlu0 %v932_v11, %s18127_s27  ;;  %v1311_v52 = vmul.f32 %v12835_v54, %v886_v40  ;;  %v1313_v58 = vmul.f32 %v12873_v20, %v886_v40  ;;  %v749_v10 = vmul.f32 %v12820_v41, %v716_v32 }
  0xac   : > { %v12887_v27 = vpop.permute.xlu1 %877  ;;  %v748_v11 = vmul.f32 %v12823_v42, %v716_v32 }
  0xad   : > { %v12936_v56 = vpop.permute.xlu0 %869  ;;  %v920_v26 = vmul.f32 %v12856_v9, %v12887_v27  ;;  %v1306_v32 = vmul.f32 %v12832_v53, %v12887_v27  ;;  %v1307_v40 = vmul.f32 %v12873_v20, %v12887_v27 }
  0xaf   : > { %1006 = vrot.lane.b32.xlu1 %v935_v14, %s18127_s27  ;;  %1004 = vrot.lane.b32.xlu0 %v934_v15, %s18127_s27  ;;  %v1178_v14 = vmul.f32 %v12832_v53, %v12879_v23  ;;  %v1177_v15 = vmul.f32 %v12835_v54, %v12879_v23 }
  0xb0   : > { %v12895_v33 = vpop.permute.xlu1 %881 }
  0xb2   : > { %v12945_v60 = vpop.permute.xlu0 %636 }
  0xb3   : > { %1385 = vrot.lane.b32.xlu1 %v1318_v18, %s18127_s27  ;;  %1383 = vrot.lane.b32.xlu0 %v1317_v19, %s18127_s27 }
  0xb5   : > { %v12905_v37 = vpop.permute.xlu1 %707 }
  0xb6   : > { %v12959_v7 = vpop.permute.xlu0 %621 }
  0xb7   : > { %1389 = vrot.lane.b32.xlu1 %v1320_v21, %s18127_s27  ;;  %1387 = vrot.lane.b32.xlu0 %v1319_v22, %s18127_s27  ;;  %v919_v21 = vmul.f32 %v12844_v61, %v12887_v27  ;;  %v918_v22 = vmul.f32 %v12847_v62, %v12887_v27 }
  0xba   : > { %v12913_v45 = vpop.permute.xlu1 %873  ;;  %v12969_v13 = vpop.permute.xlu0 %568 }
  0xbb   : > { %1393 = vrot.lane.b32.xlu1 %v1322_v24, %s18127_s27  ;;  %1391 = vrot.lane.b32.xlu0 %v1321_v25, %s18127_s27  ;;  %v921_v25 = vmul.f32 %v12847_v62, %v12895_v33 }
  0xbe   : > { %v12981_v19 = vpop.permute.xlu0 %611 }
  0xbf   : > { %792 = vrot.lane.b32.xlu1 %v751_v28, %s12568_s22  ;;  %790 = vrot.lane.b32.xlu0 %v750_v29, %s12568_s22  ;;  %v12922_v48 = vpop.permute.xlu1 %631  ;;  %v923_v28 = vmul.f32 %v12856_v9, %v12895_v33  ;;  %v922_v29 = vmul.f32 %v12844_v61, %v12895_v33 }
  0xc2   : > { %v12993_v24 = vpop.permute.xlu0 %558 }
  0xc3   : > { %796 = vrot.lane.b32.xlu1 %v753_v30, %s12568_s22  ;;  %794 = vrot.lane.b32.xlu0 %v752_v31, %s12568_s22  ;;  %v12932_v55 = vpop.permute.xlu1 %578 }
  0xc6   : > { %v13007_v31 = vpop.permute.xlu0 %601 }
  0xc7   : > { %1223 = vrot.lane.b32.xlu1 %v1182_v34, %s12568_s22  ;;  %1221 = vrot.lane.b32.xlu0 %v1181_v35, %s12568_s22  ;;  %v12943_v59 = vpop.permute.xlu1 %583  ;;  %v1305_v34 = vmul.f32 %v12835_v54, %v12887_v27 }
  0xcb   : > { %1227 = vrot.lane.b32.xlu1 %v1184_v38, %s12568_s22  ;;  %1225 = vrot.lane.b32.xlu0 %v1183_v39, %s12568_s22  ;;  %v12957_v4 = vpop.permute.xlu1 %626  ;;  %v13019_v38 = vpop.permute.xlu0 %548  ;;  %v1308_v39 = vmul.f32 %v12835_v54, %v12895_v33 }
  0xcf   : > { %986 = vrot.lane.b32.xlu1 %v925_v43, %s18127_s27  ;;  %984 = vrot.lane.b32.xlu0 %v924_v44, %s18127_s27  ;;  %v12967_v12 = vpop.permute.xlu1 %573 }
  0xd3   : > { %990 = vrot.lane.b32.xlu1 %v927_v46, %s18127_s27  ;;  %988 = vrot.lane.b32.xlu0 %v926_v47, %s18127_s27  ;;  %v12979_v18 = vpop.permute.xlu1 %616  ;;  %v1310_v46 = vmul.f32 %v12873_v20, %v12895_v33  ;;  %v1309_v47 = vmul.f32 %v12832_v53, %v12895_v33 }
  0xd7   : > { %994 = vrot.lane.b32.xlu1 %v929_v49, %s18127_s27  ;;  %992 = vrot.lane.b32.xlu0 %v928_v50, %s18127_s27  ;;  %v12991_v23 = vpop.permute.xlu1 %563  ;;  %v743_v50 = vmul.f32 %v12820_v41, %v12901_v36 }
  0xdb   : > { %1373 = vrot.lane.b32.xlu1 %v1312_v51, %s18127_s27  ;;  %1371 = vrot.lane.b32.xlu0 %v1311_v52, %s18127_s27  ;;  %v13005_v30 = vpop.permute.xlu1 %606  ;;  %v742_v51 = vmul.f32 %v12823_v42, %v12901_v36 }
  0xdf   : > { %1377 = vrot.lane.b32.xlu1 %v1314_v57, %s18127_s27  ;;  %1375 = vrot.lane.b32.xlu0 %v1313_v58, %s18127_s27  ;;  %v13017_v35 = vpop.permute.xlu1 %553  ;;  %v745_v57 = vmul.f32 %v12820_v41, %v12905_v37  ;;  %v744_v58 = vmul.f32 %v12823_v42, %v12905_v37 }
  0xe3   : > { %1381 = vrot.lane.b32.xlu1 %v1316_v63, %s18127_s27  ;;  %1379 = vrot.lane.b32.xlu0 %v1315_v0, %s18127_s27 }
  0xe7   : > { %784 = vrot.lane.b32.xlu1 %v747_v1, %s12568_s22  ;;  %782 = vrot.lane.b32.xlu0 %v746_v3, %s12568_s22  ;;  %v1174_v1 = vmul.f32 %v12832_v53, %v12901_v36  ;;  %v1173_v3 = vmul.f32 %v12835_v54, %v12901_v36 }
  0xeb   : > { %788 = vrot.lane.b32.xlu1 %v749_v10, %s12568_s22  ;;  %786 = vrot.lane.b32.xlu0 %v748_v11, %s12568_s22  ;;  %v1176_v10 = vmul.f32 %v12832_v53, %v12905_v37  ;;  %v1175_v11 = vmul.f32 %v12835_v54, %v12905_v37  ;;  %v595_v37 = vld [vmem:[#allocation2 + $0x8] sm:$0x1] }
  0xef   : > { %1215 = vrot.lane.b32.xlu1 %v1178_v14, %s12568_s22  ;;  %1213 = vrot.lane.b32.xlu0 %v1177_v15, %s12568_s22  ;;  %v913_v15 = vmul.f32 %v12844_v61, %v12936_v56 }
  0xf3   : > { %1219 = vrot.lane.b32.xlu1 %v1180_v16, %s12568_s22  ;;  %1217 = vrot.lane.b32.xlu0 %v1179_v17, %s12568_s22  ;;  %v912_v16 = vmul.f32 %v12847_v62, %v12936_v56  ;;  %v594_v17 = vld [vmem:[#allocation2] sm:$0x11] }
  0xf7   : > { %974 = vrot.lane.b32.xlu1 %v919_v21, %s18127_s27  ;;  %972 = vrot.lane.b32.xlu0 %v918_v22, %s18127_s27  ;;  %v596_v21 = vunpack.c.l.bf16 %v594_v17 }
  0xfb   : > { %978 = vrot.lane.b32.xlu1 %v921_v25, %s18127_s27  ;;  %976 = vrot.lane.b32.xlu0 %v920_v26, %s18127_s27  ;;  %v915_v26 = vmul.f32 %v12847_v62, %v12913_v45  ;;  %v916_v62 = vmul.f32 %v12844_v61, %v12913_v45  ;;  %v1300_v61 = vmul.f32 %v12832_v53, %v12936_v56 }
  0xff   : > { %982 = vrot.lane.b32.xlu1 %v923_v28, %s18127_s27  ;;  %980 = vrot.lane.b32.xlu0 %v922_v29, %s18127_s27  ;;  %v914_v28 = vmul.f32 %v12856_v9, %v12936_v56  ;;  %v598_v29 = vunpack.c.l.bf16 %v595_v37  ;;  %v1301_v37 = vmul.f32 %v12873_v20, %v12936_v56 }
 0x103   : > { %1361 = vrot.lane.b32.xlu1 %v1306_v32, %s18127_s27  ;;  %1359 = vrot.lane.b32.xlu0 %v1305_v34, %s18127_s27  ;;  %v13096_v32 = vrot.slane %v596_v21, %v12746_v8  ;;  %v1097_v34 = vld [vmem:[#allocation2 + $0x10] sm:$0x11] }
 0x107   : > { %1365 = vrot.lane.b32.xlu1 %v1308_v39, %s18127_s27  ;;  %1363 = vrot.lane.b32.xlu0 %v1307_v40, %s18127_s27 }
 0x109   : > { %v13027_v43 = vpop.permute.xlu1 %800  ;;  %v13029_v44 = vpop.permute.xlu0 %798 }
 0x10b   : > { %1369 = vrot.lane.b32.xlu1 %v1310_v46, %s18127_s27  ;;  %1367 = vrot.lane.b32.xlu0 %v1309_v47, %s18127_s27  ;;  %v917_v46 = vmul.f32 %v12856_v9, %v12913_v45  ;;  %v13109_v47 = vrot.slane %v598_v29, %v12746_v8 }
 0x10d   : > { %v13037_v49 = vpop.permute.xlu1 %804  ;;  %v13039_v27 = vpop.permute.xlu0 %802  ;;  %v671_v21 = vmul.f32 %v13109_v47, %v12922_v48 }
 0x10f   : > { %776 = vrot.lane.b32.xlu1 %v743_v50, %s12568_s22  ;;  %774 = vrot.lane.b32.xlu0 %v742_v51, %s12568_s22  ;;  %v1098_v50 = vld [vmem:[#allocation2 + $0x18] sm:$0x1]  ;;  %v1099_v51 = vunpack.c.l.bf16 %v1097_v34 }
 0x111   : > { %v13047_v52 = vpop.permute.xlu1 %1231  ;;  %v13049_v33 = vpop.permute.xlu0 %1229 }
 0x113   : > { %780 = vrot.lane.b32.xlu1 %v745_v57, %s12568_s22  ;;  %778 = vrot.lane.b32.xlu0 %v744_v58, %s12568_s22  ;;  %v669_v57 = vmul.f32 %v13096_v32, %v12922_v48  ;;  %v672_v58 = vmul.f32 %v13096_v32, %v12945_v60 }
 0x115   : > { %v13057_v63 = vpop.permute.xlu1 %1235  ;;  %v13059_v0 = vpop.permute.xlu0 %1233 }
 0x117   : > { %1207 = vrot.lane.b32.xlu1 %v1174_v1, %s12568_s22  ;;  %1205 = vrot.lane.b32.xlu0 %v1173_v3, %s12568_s22  ;;  %v1299_v3 = vmul.f32 %v12835_v54, %v12936_v56 }
 0x119   : > { %v13067_v41 = vpop.permute.xlu1 %998  ;;  %v13069_v42 = vpop.permute.xlu0 %996 }
 0x11b   : > { %1211 = vrot.lane.b32.xlu1 %v1176_v10, %s12568_s22  ;;  %1209 = vrot.lane.b32.xlu0 %v1175_v11, %s12568_s22  ;;  %v597_v10 = vunpack.c.h.bf16 %v594_v17  ;;  %v1101_v11 = vunpack.c.l.bf16 %v1098_v50  ;;  %v696_v17 = vadd.f32 %v672_v58, %v12943_v59  ;;  %v1100_v50 = vunpack.c.h.bf16 %v1097_v34 }
 0x11c   : > { %v1304_v34 = vmul.f32 %v12873_v20, %v12913_v45  ;;  %v1303_v58 = vmul.f32 %v12832_v53, %v12913_v45 }
 0x11d   : > { %v13077_v14 = vpop.permute.xlu1 %1002  ;;  %v13079_v36 = vpop.permute.xlu0 %1000 }
 0x11f   : > { %962 = vrot.lane.b32.xlu1 %v913_v15, %s18127_s27  ;;  %960 = vrot.lane.b32.xlu0 %v912_v16, %s18127_s27  ;;  %v674_v15 = vmul.f32 %v13109_v47, %v12945_v60  ;;  %v13128_v16 = vrot.slane %v1099_v51, %v12746_v8  ;;  %v860_v51 = vadd.f32 %v13039_v27, %v696_v17 }
 0x121   : > { %v1007_v22 = vpop.permute.xlu1 %1006  ;;  %v13087_v25 = vpop.permute.xlu0 %1004 }
 0x122   : > { %v1024_v20 = vsel %vm1008_vm7, %v13087_v25, %v1007_v22 }
 0x123   : > { %966 = vrot.lane.b32.xlu1 %v915_v26, %s18127_s27  ;;  %964 = vrot.lane.b32.xlu0 %v914_v28, %s18127_s27  ;;  %v693_v26 = vadd.f32 %v669_v57, %v12932_v55  ;;  %v1132_v57 = vmul.f32 %v13128_v16, %v12922_v48 }
 0x125   : > { %v13098_v39 = vpop.permute.xlu1 %1385  ;;  %v13100_v40 = vpop.permute.xlu0 %1383  ;;  %v857_v56 = vadd.f32 %v13029_v44, %v693_v26  ;;  %v1156_v22 = vadd.f32 %v1132_v57, %v12932_v55 }
 0x127   : > { %970 = vrot.lane.b32.xlu1 %v917_v46, %s18127_s27  ;;  %968 = vrot.lane.b32.xlu0 %v916_v62, %s18127_s27  ;;  %v1302_v46 = vmul.f32 %v12835_v54, %v12913_v45  ;;  %v13143_v62 = vrot.slane %v597_v10, %v12746_v8  ;;  %v1135_v54 = vmul.f32 %v13128_v16, %v12945_v60 }
 0x128   : > { %v698_v10 = vadd.f32 %v674_v15, %v12943_v59  ;;  %v13176_v15 = vrot.slane %v1100_v50, %v12746_v8 }
 0x129   : > { %v13115_v1 = vpop.permute.xlu1 %1389  ;;  %v13117_v9 = vpop.permute.xlu0 %1387 }
 0x12a   : > { %v862_v45 = vadd.f32 %v13037_v49, %v698_v10 }
 0x12b   : > { %1349 = vrot.lane.b32.xlu1 %v1300_v61, %s18127_s27  ;;  %1347 = vrot.lane.b32.xlu0 %v1299_v3, %s18127_s27  ;;  %v13148_v61 = vrot.slane %v1101_v11, %v12746_v8  ;;  %v695_v3 = vadd.f32 %v671_v21, %v12932_v55  ;;  %v1067_v11 = vadd.f32 %v13069_v42, %v857_v56 }
 0x12c   : > { %v670_v21 = vmul.f32 %v13143_v62, %v12922_v48  ;;  %v1159_v56 = vadd.f32 %v1135_v54, %v12943_v59  ;;  %v1072_v2 = vadd.f32 %v1024_v20, %v862_v45  ;;  %v813_v54 = vsel %vm806_vm8, %v13029_v44, %v13027_v43 }
 0x12d   : > { %v13136_v28 = vpop.permute.xlu1 %1393  ;;  %v13138_v29 = vpop.permute.xlu0 %1391  ;;  %v859_v53 = vadd.f32 %v13027_v43, %v695_v3  ;;  %v1021_v43 = vsel %vm1008_vm7, %v13069_v42, %v13067_v41 }
 0x12e   : > { %v1290_v6 = vadd.f32 %v13059_v0, %v1159_v56  ;;  %v694_v57 = vadd.f32 %v670_v21, %v12932_v55  ;;  %v1096_v20 = vmax.f32 %v1072_v2, 0.0  ;;  %v1137_v21 = vmul.f32 %v13148_v61, %v12945_v60 }
 0x12f   : > { %1353 = vrot.lane.b32.xlu1 %v1302_v46, %s18127_s27  ;;  %1351 = vrot.lane.b32.xlu0 %v1301_v37, %s18127_s27  ;;  %v1070_v37 = vadd.f32 %v13077_v14, %v860_v51  ;;  %v1022_v46 = vsel %vm1008_vm7, %v13067_v41, %v13079_v36  ;;  %v1134_v36 = vmul.f32 %v13148_v61, %v12922_v48  ;;  %v1091_v51 = vmax.f32 %v1067_v11, 0.0 }
 0x130   : > { %v1069_v10 = vadd.f32 %v1022_v46, %v859_v53  ;;  %v1456_v45 = vadd.f32 %v13115_v1, %v1290_v6  ;;  %v858_v2 = vadd.f32 %v813_v54, %v694_v57  ;;  %v1136_v6 = vmul.f32 %v13176_v15, %v12945_v60 }
 0x131   : > { %v13164_v26 = vpop.permute.xlu1 %792  ;;  %v13166_v17 = vpop.permute.xlu0 %790  ;;  %v1094_v3 = vmax.f32 %v1070_v37, 0.0  ;;  %v1158_v11 = vadd.f32 %v1134_v36, %v12932_v55  ;;  %v1133_v37 = vmul.f32 %v13176_v15, %v12922_v48  ;;  %v1408_v48 = vsel %vm1008_vm7, %v13098_v39, %v13117_v9 }
 0x132   : > { %v1093_v46 = vmax.f32 %v1069_v10, 0.0  ;;  %v814_v41 = vsel %vm806_vm8, %v13039_v27, %v13037_v49  ;;  %v1243_v9 = vsel %vm806_vm8, %v13049_v33, %v13047_v52  ;;  %v1480_v10 = vmax.f32 %v1456_v45, 0.0 }
 0x133   : > { %1357 = vrot.lane.b32.xlu1 %v1304_v34, %s18127_s27  ;;  %1355 = vrot.lane.b32.xlu0 %v1303_v58, %s18127_s27  ;;  %v673_v34 = vmul.f32 %v13143_v62, %v12945_v60  ;;  %v1287_v58 = vadd.f32 %v13049_v33, %v1156_v22  ;;  %v1289_v44 = vadd.f32 %v13047_v52, %v1158_v11  ;;  %s12573_s27 = smov 4  }
 0x134   : > { %v1157_v42 = vadd.f32 %v1133_v37, %v12932_v55  ;;  %v1407_v55 = vsel %vm1008_vm7, %v13100_v40, %v13098_v39  ;;  %v663_v52 = vmul.f32 %v13096_v32, %v12959_v7  ;;  %v1161_v33 = vadd.f32 %v1137_v21, %v12943_v59 }
 0x135   : > { %v13186_v50 = vpop.permute.xlu1 %796  ;;  %v13188_v5 = vpop.permute.xlu0 %794  ;;  %v1453_v53 = vadd.f32 %v13100_v40, %v1287_v58  ;;  %v697_v36 = vadd.f32 %v673_v34, %v12943_v59  ;;  %v1455_v60 = vadd.f32 %v1408_v48, %v1289_v44  ;;  %v1023_v34 = vsel %vm1008_vm7, %v13077_v14, %v13087_v25 }
 0x136   : > { %v1288_v27 = vadd.f32 %v1243_v9, %v1157_v42  ;;  %v1160_v54 = vadd.f32 %v1136_v6, %v12943_v59  ;;  %v1244_v14 = vsel %vm806_vm8, %v13059_v0, %v13057_v63  ;;  %v664_v25 = vmul.f32 %v13143_v62, %v12959_v7 }
 0x137   : > { %1549 = vrot.lane.b32.xlu1 %v1094_v3, %s12570_s29  ;;  %1543 = vrot.lane.b32.xlu0 %v1091_v51, %s12570_s29  ;;  %v1068_v51 = vadd.f32 %v1021_v43, %v858_v2  ;;  %v1477_v3 = vmax.f32 %v1453_v53, 0.0  ;;  %v861_v49 = vadd.f32 %v814_v41, %v697_v36  ;;  %v1479_v37 = vmax.f32 %v1455_v60, 0.0 }
 0x138   : > { %v1454_v11 = vadd.f32 %v1407_v55, %v1288_v27  ;;  %v1409_v53 = vsel %vm1008_vm7, %v13115_v1, %v13138_v29  ;;  %v1410_v59 = vsel %vm1008_vm7, %v13138_v29, %v13136_v28  ;;  %v1292_v45 = vadd.f32 %v13057_v63, %v1161_v33 }
 0x139   : > { %v13205_v22 = vpop.permute.xlu1 %1223  ;;  %v13207_v56 = vpop.permute.xlu0 %1221  ;;  %v1092_v39 = vmax.f32 %v1068_v51, 0.0  ;;  %v1071_v40 = vadd.f32 %v1023_v34, %v861_v49  ;;  %v1291_v0 = vadd.f32 %v1244_v14, %v1160_v54  ;;  %v665_v21 = vmul.f32 %v13109_v47, %v12959_v7 }
 0x13a   : > { %v687_v43 = vadd.f32 %v663_v52, %v12969_v13  ;;  %v688_v48 = vadd.f32 %v664_v25, %v12969_v13  ;;  %v811_v1 = vsel %vm806_vm8, %v13166_v17, %v13164_v26  ;;  %v666_v28 = vmul.f32 %v13096_v32, %v12957_v4 }
 0x13b   : > { %1553 = vrot.lane.b32.xlu1 %v1096_v20, %s12570_s29  ;;  %1547 = vrot.lane.b32.xlu0 %v1093_v46, %s12570_s29  ;;  %v1095_v63 = vmax.f32 %v1071_v40, 0.0  ;;  %v1478_v29 = vmax.f32 %v1454_v11, 0.0  ;;  %v1457_v2 = vadd.f32 %v1409_v53, %v1291_v0  ;;  %v1458_v44 = vadd.f32 %v1410_v59, %v1292_v45 }
 0x13c   : > { %v851_v42 = vadd.f32 %v13166_v17, %v687_v43  ;;  %v852_v9 = vadd.f32 %v811_v1, %v688_v48  ;;  %v689_v51 = vadd.f32 %v665_v21, %v12969_v13  ;;  %v690_v60 = vadd.f32 %v666_v28, %v12967_v12 }
 0x13d   : > { %v13230_v58 = vpop.permute.xlu1 %1227  ;;  %v13232_v57 = vpop.permute.xlu0 %1225  ;;  %v1481_v34 = vmax.f32 %v1457_v2, 0.0  ;;  %v1482_v55 = vmax.f32 %v1458_v44, 0.0  ;;  %v1126_v25 = vmul.f32 %v13128_v16, %v12959_v7  ;;  %v812_v11 = vsel %vm806_vm8, %v13188_v5, %v13186_v50 }
 0x13e   : > { %v853_v54 = vadd.f32 %v13164_v26, %v689_v51  ;;  %v854_v14 = vadd.f32 %v13188_v5, %v690_v60  ;;  %v1127_v26 = vmul.f32 %v13176_v15, %v12959_v7  ;;  %v1128_v1 = vmul.f32 %v13148_v61, %v12959_v7 }
 0x13f   : > { %1654 = vrot.lane.b32.xlu1 %v1480_v10, %s12570_s29  ;;  %1648 = vrot.lane.b32.xlu0 %v1477_v3, %s12570_s29  ;;  %v668_v3 = vmul.f32 %v13109_v47, %v12957_v4  ;;  %v667_v10 = vmul.f32 %v13143_v62, %v12957_v4  ;;  %v1150_v5 = vadd.f32 %v1126_v25, %v12969_v13 }
 0x140   : > { %v1151_v28 = vadd.f32 %v1127_v26, %v12969_v13  ;;  %v1152_v51 = vadd.f32 %v1128_v1, %v12969_v13 }
 0x141   : > { %v987_v46 = vpop.permute.xlu1 %986  ;;  %v985_v20 = vpop.permute.xlu0 %984  ;;  %v691_v40 = vadd.f32 %v667_v10, %v12967_v12  ;;  %v1130_v10 = vmul.f32 %v13176_v15, %v12957_v4 }
 0x142   : > { %v1017_v41 = vsel %vm1008_vm7, %v985_v20, %v987_v46  ;;  %v1061_v49 = vadd.f32 %v985_v20, %v851_v42  ;;  %v1281_v42 = vadd.f32 %v13207_v56, %v1150_v5  ;;  %v657_v5 = vmul.f32 %v13096_v32, %v12981_v19 }
 0x143   : > { %1545 = vrot.lane.b32.xlu1 %v1092_v39, %s12570_s29  ;;  %1652 = vrot.lane.b32.xlu0 %v1479_v37, %s12570_s29  ;;  %v1062_v27 = vadd.f32 %v1017_v41, %v852_v9  ;;  %v692_v39 = vadd.f32 %v668_v3, %v12967_v12  ;;  %v855_v48 = vadd.f32 %v812_v11, %v691_v40 }
 0x144   : > { %v1085_v37 = vmax.f32 %v1061_v49, 0.0  ;;  %v1131_v3 = vmul.f32 %v13148_v61, %v12957_v4 }
 0x145   : > { %v991_v6 = vpop.permute.xlu1 %990  ;;  %v989_v36 = vpop.permute.xlu0 %988  ;;  %v856_v43 = vadd.f32 %v13186_v50, %v692_v39 }
 0x146   : > { %v1018_v33 = vsel %vm1008_vm7, %v987_v46, %v989_v36  ;;  %v1086_v46 = vmax.f32 %v1062_v27, 0.0  ;;  %v1064_v20 = vadd.f32 %v991_v6, %v854_v14  ;;  %v1242_v14 = vsel %vm806_vm8, %v13232_v57, %v13230_v58 }
 0x147   : > { %1650 = vrot.lane.b32.xlu1 %v1478_v29, %s12570_s29  ;;  %1551 = vrot.lane.b32.xlu0 %v1095_v63, %s12570_s29  ;;  %v1063_v53 = vadd.f32 %v1018_v33, %v853_v54  ;;  %v1241_v63 = vsel %vm806_vm8, %v13207_v56, %v13205_v22  ;;  %v1129_v29 = vmul.f32 %v13128_v16, %v12957_v4 }
 0x148   : > { %v1088_v50 = vmax.f32 %v1064_v20, 0.0  ;;  %v1282_v9 = vadd.f32 %v1241_v63, %v1151_v28  ;;  %v1283_v33 = vadd.f32 %v13205_v22, %v1152_v51  ;;  %v1155_v4 = vadd.f32 %v1131_v3, %v12967_v12 }
 0x149   : > { %v995_v17 = vpop.permute.xlu1 %994  ;;  %v993_v52 = vpop.permute.xlu0 %992  ;;  %v1087_v2 = vmax.f32 %v1063_v53, 0.0  ;;  %v1153_v60 = vadd.f32 %v1129_v29, %v12967_v12  ;;  %v1154_v54 = vadd.f32 %v1130_v10, %v12967_v12  ;;  %v658_v28 = vmul.f32 %v13143_v62, %v12981_v19 }
 0x14a   : > { %v1019_v0 = vsel %vm1008_vm7, %v991_v6, %v993_v52  ;;  %v1020_v21 = vsel %vm1008_vm7, %v993_v52, %v995_v17  ;;  %v1286_v20 = vadd.f32 %v13230_v58, %v1155_v4 }
 0x14b   : > { %1658 = vrot.lane.b32.xlu1 %v1482_v55, %s12570_s29  ;;  %1656 = vrot.lane.b32.xlu0 %v1481_v34, %s12570_s29  ;;  %v1065_v44 = vadd.f32 %v1019_v0, %v855_v48  ;;  %v1066_v6 = vadd.f32 %v1020_v21, %v856_v43  ;;  %v1284_v13 = vadd.f32 %v13232_v57, %v1153_v60 }
 0x14c   : > { %v1285_v53 = vadd.f32 %v1242_v14, %v1154_v54 }
 0x14d   : > { %v1374_v59 = vpop.permute.xlu1 %1373  ;;  %v1372_v45 = vpop.permute.xlu0 %1371  ;;  %v1089_v34 = vmax.f32 %v1065_v44, 0.0  ;;  %v1090_v55 = vmax.f32 %v1066_v6, 0.0  ;;  %v660_v44 = vmul.f32 %v13096_v32, %v12979_v18  ;;  %v659_v6 = vmul.f32 %v13109_v47, %v12981_v19 }
 0x14e   : > { %v1403_v41 = vsel %vm1008_vm7, %v1372_v45, %v1374_v59  ;;  %v1447_v49 = vadd.f32 %v1372_v45, %v1281_v42 }
 0x14f   : > { %1533 = vrot.lane.b32.xlu1 %v1086_v46, %s12570_s29  ;;  %1531 = vrot.lane.b32.xlu0 %v1085_v37, %s12570_s29  ;;  %v1448_v27 = vadd.f32 %v1403_v41, %v1282_v9  ;;  %v684_v51 = vadd.f32 %v660_v44, %v12991_v23  ;;  %v683_v60 = vadd.f32 %v659_v6, %v12993_v24 }
 0x150   : > { %v1471_v25 = vmax.f32 %v1447_v49, 0.0 }
 0x151   : > { %v1378_v7 = vpop.permute.xlu1 %1377  ;;  %v1376_v36 = vpop.permute.xlu0 %1375  ;;  %v1472_v39 = vmax.f32 %v1448_v27, 0.0 }
 0x152   : > { %v1404_v52 = vsel %vm1008_vm7, %v1374_v59, %v1376_v36  ;;  %v1450_v40 = vadd.f32 %v1378_v7, %v1284_v13 }
 0x153   : > { %1537 = vrot.lane.b32.xlu1 %v1088_v50, %s12570_s29  ;;  %1535 = vrot.lane.b32.xlu0 %v1087_v2, %s12570_s29  ;;  %v1449_v11 = vadd.f32 %v1404_v52, %v1283_v33  ;;  %v681_v50 = vadd.f32 %v657_v5, %v12993_v24  ;;  %v1120_v52 = vmul.f32 %v13128_v16, %v12981_v19 }
 0x154   : > { %v1474_v12 = vmax.f32 %v1450_v40, 0.0 }
 0x155   : > { %v1382_v56 = vpop.permute.xlu1 %1381  ;;  %v1380_v17 = vpop.permute.xlu0 %1379  ;;  %v1473_v59 = vmax.f32 %v1449_v11, 0.0  ;;  %v1121_v11 = vmul.f32 %v13176_v15, %v12981_v19 }
 0x156   : > { %v1405_v37 = vsel %vm1008_vm7, %v1378_v7, %v1380_v17  ;;  %v1406_v46 = vsel %vm1008_vm7, %v1380_v17, %v1382_v56  ;;  %v682_v7 = vadd.f32 %v658_v28, %v12993_v24 }
 0x157   : > { %1541 = vrot.lane.b32.xlu1 %v1090_v55, %s12570_s29  ;;  %1539 = vrot.lane.b32.xlu0 %v1089_v34, %s12570_s29  ;;  %v1451_v57 = vadd.f32 %v1405_v37, %v1285_v53  ;;  %v1452_v45 = vadd.f32 %v1406_v46, %v1286_v20  ;;  %v662_v34 = vmul.f32 %v13109_v47, %v12979_v18 }
 0x158   : > { %v661_v55 = vmul.f32 %v13143_v62, %v12979_v18  ;;  %v1144_v53 = vadd.f32 %v1120_v52, %v12993_v24 }
 0x159   : > { %v785_v26 = vpop.permute.xlu1 %784  ;;  %v783_v22 = vpop.permute.xlu0 %782  ;;  %v1475_v43 = vmax.f32 %v1451_v57, 0.0  ;;  %v1476_v48 = vmax.f32 %v1452_v45, 0.0 }
 0x15a   : > { %v809_v2 = vsel %vm806_vm8, %v783_v22, %v785_v26  ;;  %v845_v36 = vadd.f32 %v783_v22, %v681_v50  ;;  %v847_v17 = vadd.f32 %v785_v26, %v683_v60  ;;  %v685_v40 = vadd.f32 %v661_v55, %v12991_v23 }
 0x15b   : > { %1638 = vrot.lane.b32.xlu1 %v1472_v39, %s12570_s29  ;;  %1636 = vrot.lane.b32.xlu0 %v1471_v25, %s12570_s29  ;;  %v846_v41 = vadd.f32 %v809_v2, %v682_v7  ;;  %v686_v39 = vadd.f32 %v662_v34, %v12991_v23  ;;  %v1122_v22 = vmul.f32 %v13148_v61, %v12981_v19 }
 0x15c   : > { %v1145_v19 = vadd.f32 %v1121_v11, %v12993_v24 }
 0x15d   : > { %v789_v0 = vpop.permute.xlu1 %788  ;;  %v787_v21 = vpop.permute.xlu0 %786 }
 0x15e   : > { %v848_v27 = vadd.f32 %v787_v21, %v684_v51  ;;  %v810_v54 = vsel %vm806_vm8, %v787_v21, %v789_v0  ;;  %v850_v46 = vadd.f32 %v789_v0, %v686_v39  ;;  %v1123_v21 = vmul.f32 %v13128_v16, %v12979_v18 }
 0x15f   : > { %1642 = vrot.lane.b32.xlu1 %v1474_v12, %s12570_s29  ;;  %1640 = vrot.lane.b32.xlu0 %v1473_v59, %s12570_s29  ;;  %v849_v20 = vadd.f32 %v810_v54, %v685_v40  ;;  %v1125_v51 = vmul.f32 %v13148_v61, %v12979_v18 }
 0x161   : > { %v13334_v1 = vpop.permute.xlu1 %1215  ;;  %v1214_v58 = vpop.permute.xlu0 %1213 }
 0x162   : > { %v1239_v45 = vsel %vm806_vm8, %v1214_v58, %v13334_v1  ;;  %v1275_v28 = vadd.f32 %v1214_v58, %v1144_v53 }
 0x163   : > { %1646 = vrot.lane.b32.xlu1 %v1476_v48, %s12570_s29  ;;  %1644 = vrot.lane.b32.xlu0 %v1475_v43, %s12570_s29  ;;  %v1276_v50 = vadd.f32 %v1239_v45, %v1145_v19  ;;  %v653_v19 = vmul.f32 %v13109_v47, %v13007_v31 }
 0x165   : > { %v13342_v63 = vpop.permute.xlu1 %1219  ;;  %v13344_v29 = vpop.permute.xlu0 %1217 }
 0x169   : > { %v975_v42 = vpop.permute.xlu1 %974  ;;  %v973_v9 = vpop.permute.xlu0 %972 }
 0x16a   : > { %v1013_v3 = vsel %vm1008_vm7, %v973_v9, %v975_v42  ;;  %v1055_v10 = vadd.f32 %v973_v9, %v845_v36  ;;  %v1146_v36 = vadd.f32 %v1122_v22, %v12993_v24 }
 0x16b   : > { %v1056_v49 = vadd.f32 %v1013_v3, %v846_v41  ;;  %v1147_v41 = vadd.f32 %v1123_v21, %v12991_v23  ;;  %v1124_v3 = vmul.f32 %v13176_v15, %v12979_v18 }
 0x16c   : > { %v1079_v56 = vmax.f32 %v1055_v10, 0.0  ;;  %v1277_v24 = vadd.f32 %v13334_v1, %v1146_v36  ;;  %v677_v36 = vadd.f32 %v653_v19, %v13019_v38 }
 0x16d   : > { %v1080_v33 = vmax.f32 %v1056_v49, 0.0  ;;  %v979_v13 = vpop.permute.xlu1 %978  ;;  %v977_v4 = vpop.permute.xlu0 %976  ;;  %v1278_v58 = vadd.f32 %v13344_v29, %v1147_v41  ;;  %v1148_v52 = vadd.f32 %v1124_v3, %v12991_v23  ;;  %v656_v41 = vmul.f32 %v13109_v47, %v13005_v30 }
 0x16e   : > { %v1058_v14 = vadd.f32 %v979_v13, %v848_v27  ;;  %v1014_v25 = vsel %vm1008_vm7, %v975_v42, %v977_v4  ;;  %1519 = vrot.lane.b32.xlu0 %v1079_v56, %s12570_s29  ;;  %v1240_v27 = vsel %vm806_vm8, %v13344_v29, %v13342_v63 }
 0x16f   : > { %v1057_v26 = vadd.f32 %v1014_v25, %v847_v17  ;;  %1521 = vrot.lane.b32.xlu1 %v1080_v33, %s12570_s29  ;;  %v1149_v17 = vadd.f32 %v1125_v51, %v12991_v23  ;;  %v1279_v4 = vadd.f32 %v1240_v27, %v1148_v52  ;;  %v680_v47 = vadd.f32 %v656_v41, %v13017_v35 }
 0x170   : > { %v1082_v37 = vmax.f32 %v1058_v14, 0.0  ;;  %v1115_v27 = vmul.f32 %v13176_v15, %v13007_v31 }
 0x171   : > { %v1081_v12 = vmax.f32 %v1057_v26, 0.0  ;;  %v983_v59 = vpop.permute.xlu1 %982  ;;  %v981_v57 = vpop.permute.xlu0 %980 }
 0x172   : > { %v1015_v43 = vsel %vm1008_vm7, %v979_v13, %v981_v57  ;;  %v1016_v48 = vsel %vm1008_vm7, %v981_v57, %v983_v59  ;;  %v1280_v13 = vadd.f32 %v13342_v63, %v1149_v17  ;;  %v652_v59 = vmul.f32 %v13143_v62, %v13007_v31 }
 0x173   : > { %v1059_v5 = vadd.f32 %v1015_v43, %v849_v20  ;;  %v1060_v0 = vadd.f32 %v1016_v48, %v850_v46  ;;  %1525 = vrot.lane.b32.xlu1 %v1082_v37, %s12570_s29  ;;  %1523 = vrot.lane.b32.xlu0 %v1081_v12, %s12570_s29  ;;  %v651_v12 = vmul.f32 %v13096_v32, %v13007_v31 }
 0x174   : > { %v654_v48 = vmul.f32 %v13096_v32, %v13005_v30  ;;  %v655_v32 = vmul.f32 %v13143_v62, %v13005_v30 }
 0x175   : > { %v1083_v2 = vmax.f32 %v1059_v5, 0.0  ;;  %v1084_v44 = vmax.f32 %v1060_v0, 0.0  ;;  %v1362_v6 = vpop.permute.xlu1 %1361  ;;  %v1360_v7 = vpop.permute.xlu0 %1359  ;;  %v675_v21 = vadd.f32 %v651_v12, %v13019_v38  ;;  %v676_v5 = vadd.f32 %v652_v59, %v13019_v38 }
 0x176   : > { %v1399_v42 = vsel %vm1008_vm7, %v1360_v7, %v1362_v6  ;;  %v1441_v9 = vadd.f32 %v1360_v7, %v1275_v28  ;;  %v679_v62 = vadd.f32 %v655_v32, %v13017_v35 }
 0x177   : > { %v1442_v10 = vadd.f32 %v1399_v42, %v1276_v50  ;;  %1529 = vrot.lane.b32.xlu1 %v1084_v44, %s12570_s29  ;;  %1527 = vrot.lane.b32.xlu0 %v1083_v2, %s12570_s29  ;;  %v678_v44 = vadd.f32 %v654_v48, %v13017_v35  ;;  %v1118_v48 = vmul.f32 %v13176_v15, %v13005_v30 }
 0x178   : > { %v1465_v60 = vmax.f32 %v1441_v9, 0.0 }
 0x179   : > { %v1466_v34 = vmax.f32 %v1442_v10, 0.0  ;;  %v1366_v55 = vpop.permute.xlu1 %1365  ;;  %v1364_v49 = vpop.permute.xlu0 %1363  ;;  %v1114_v10 = vmul.f32 %v13128_v16, %v13007_v31 }
 0x17a   : > { %v1444_v56 = vadd.f32 %v1366_v55, %v1278_v58  ;;  %v1400_v18 = vsel %vm1008_vm7, %v1362_v6, %v1364_v49 }
 0x17b   : > { %v1443_v33 = vadd.f32 %v1400_v18, %v1277_v24  ;;  %1626 = vrot.lane.b32.xlu1 %v1466_v34, %s12570_s29  ;;  %1624 = vrot.lane.b32.xlu0 %v1465_v60, %s12570_s29  ;;  %v1116_v18 = vmul.f32 %v13148_v61, %v13007_v31  ;;  %v1139_v31 = vadd.f32 %v1115_v27, %v13019_v38 }
 0x17c   : > { %v1468_v1 = vmax.f32 %v1444_v56, 0.0 }
 0x17d   : > { %v1467_v54 = vmax.f32 %v1443_v33, 0.0  ;;  %v1370_v14 = vpop.permute.xlu1 %1369  ;;  %v1368_v25 = vpop.permute.xlu0 %1367 }
 0x17e   : > { %v1401_v29 = vsel %vm1008_vm7, %v1366_v55, %v1368_v25  ;;  %v1402_v39 = vsel %vm1008_vm7, %v1368_v25, %v1370_v14  ;;  %v1117_v25 = vmul.f32 %v13128_v16, %v13005_v30  ;;  %v1140_v16 = vadd.f32 %v1116_v18, %v13019_v38 }
 0x17f   : > { %v1445_v40 = vadd.f32 %v1401_v29, %v1279_v4  ;;  %v1446_v11 = vadd.f32 %v1402_v39, %v1280_v13  ;;  %1630 = vrot.lane.b32.xlu1 %v1468_v1, %s12570_s29  ;;  %1628 = vrot.lane.b32.xlu0 %v1467_v54, %s12570_s29  ;;  %v1138_v1 = vadd.f32 %v1114_v10, %v13019_v38 }
 0x180   : > { %v1141_v12 = vadd.f32 %v1117_v25, %v13017_v35 }
 0x181   : > { %v1469_v23 = vmax.f32 %v1445_v40, 0.0  ;;  %v1470_v26 = vmax.f32 %v1446_v11, 0.0  ;;  %v777_v22 = vpop.permute.xlu1 %776  ;;  %v775_v37 = vpop.permute.xlu0 %774 }
 0x182   : > { %v807_v43 = vsel %vm806_vm8, %v775_v37, %v777_v22  ;;  %v839_v0 = vadd.f32 %v775_v37, %v675_v21  ;;  %v841_v3 = vadd.f32 %v777_v22, %v677_v36 }
 0x183   : > { %1634 = vrot.lane.b32.xlu1 %v1470_v26, %s12570_s29  ;;  %1632 = vrot.lane.b32.xlu0 %v1469_v23, %s12570_s29  ;;  %v840_v28 = vadd.f32 %v807_v43, %v676_v5  ;;  %v1119_v43 = vmul.f32 %v13148_v61, %v13005_v30 }
 0x185   : > { %v781_v63 = vpop.permute.xlu1 %780  ;;  %v779_v46 = vpop.permute.xlu0 %778  ;;  %v1143_v15 = vadd.f32 %v1119_v43, %v13017_v35 }
 0x186   : > { %v842_v9 = vadd.f32 %v779_v46, %v678_v44  ;;  %v808_v34 = vsel %vm806_vm8, %v779_v46, %v781_v63  ;;  %v844_v52 = vadd.f32 %v781_v63, %v680_v47  ;;  %v1142_v44 = vadd.f32 %v1118_v48, %v13017_v35 }
 0x187   : > { %v843_v33 = vadd.f32 %v808_v34, %v679_v62 }
 0x189   : > { %v13408_v20 = vpop.permute.xlu1 %1207  ;;  %v1206_v53 = vpop.permute.xlu0 %1205 }
 0x18a   : > { %v1237_v14 = vsel %vm806_vm8, %v1206_v53, %v13408_v20  ;;  %v1269_v23 = vadd.f32 %v1206_v53, %v1138_v1  ;;  %v1271_v38 = vadd.f32 %v13408_v20, %v1140_v16 }
 0x18b   : > { %v1270_v26 = vadd.f32 %v1237_v14, %v1139_v31 }
 0x18d   : > { %v13414_v57 = vpop.permute.xlu1 %1211  ;;  %v13416_v45 = vpop.permute.xlu0 %1209 }
 0x18e   : > { %v1272_v53 = vadd.f32 %v13416_v45, %v1141_v12  ;;  %v1238_v61 = vsel %vm806_vm8, %v13416_v45, %v13414_v57 }
 0x18f   : > { %v1273_v36 = vadd.f32 %v1238_v61, %v1142_v44 }
 0x191   : > { %v963_v50 = vpop.permute.xlu1 %962  ;;  %v961_v2 = vpop.permute.xlu0 %960 }
 0x192   : > { %v1009_v6 = vsel %vm1008_vm7, %v961_v2, %v963_v50  ;;  %v1049_v7 = vadd.f32 %v961_v2, %v839_v0 }
 0x193   : > { %v1050_v42 = vadd.f32 %v1009_v6, %v840_v28 }
 0x194   : > { %v1073_v51 = vmax.f32 %v1049_v7, 0.0  ;;  %v1274_v7 = vadd.f32 %v13414_v57, %v1143_v15 }
 0x195   : > { %v1074_v58 = vmax.f32 %v1050_v42, 0.0  ;;  %v967_v60 = vpop.permute.xlu1 %966  ;;  %v965_v24 = vpop.permute.xlu0 %964 }
 0x196   : > { %v1052_v55 = vadd.f32 %v967_v60, %v842_v9  ;;  %v1010_v49 = vsel %vm1008_vm7, %v963_v50, %v965_v24  ;;  %1507 = vrot.lane.b32.xlu0 %v1073_v51, %s12570_s29 }
 0x197   : > { %v1051_v56 = vadd.f32 %v1010_v49, %v841_v3  ;;  %1509 = vrot.lane.b32.xlu1 %v1074_v58, %s12570_s29 }
 0x198   : > { %v1076_v17 = vmax.f32 %v1052_v55, 0.0 }
 0x199   : > { %v1075_v13 = vmax.f32 %v1051_v56, 0.0  ;;  %v971_v4 = vpop.permute.xlu1 %970  ;;  %v969_v54 = vpop.permute.xlu0 %968 }
 0x19a   : > { %v1011_v29 = vsel %vm1008_vm7, %v967_v60, %v969_v54  ;;  %v1012_v39 = vsel %vm1008_vm7, %v969_v54, %v971_v4 }
 0x19b   : > { %v1053_v40 = vadd.f32 %v1011_v29, %v843_v33  ;;  %v1054_v11 = vadd.f32 %v1012_v39, %v844_v52  ;;  %1513 = vrot.lane.b32.xlu1 %v1076_v17, %s12570_s29  ;;  %1511 = vrot.lane.b32.xlu0 %v1075_v13, %s12570_s29 }
 0x19d   : > { %v1077_v22 = vmax.f32 %v1053_v40, 0.0  ;;  %v1078_v37 = vmax.f32 %v1054_v11, 0.0  ;;  %v1350_v63 = vpop.permute.xlu1 %1349  ;;  %v1348_v46 = vpop.permute.xlu0 %1347 }
 0x19e   : > { %v1395_v59 = vsel %vm1008_vm7, %v1348_v46, %v1350_v63  ;;  %v1435_v21 = vadd.f32 %v1348_v46, %v1269_v23 }
 0x19f   : > { %v1436_v19 = vadd.f32 %v1395_v59, %v1270_v26  ;;  %1517 = vrot.lane.b32.xlu1 %v1078_v37, %s12570_s29  ;;  %1515 = vrot.lane.b32.xlu0 %v1077_v22, %s12570_s29 }
 0x1a0   : > { %v1459_v5 = vmax.f32 %v1435_v21, 0.0 }
 0x1a1   : > { %v1460_v0 = vmax.f32 %v1436_v19, 0.0  ;;  %v1354_v28 = vpop.permute.xlu1 %1353  ;;  %v1352_v50 = vpop.permute.xlu0 %1351 }
 0x1a2   : > { %v1438_v2 = vadd.f32 %v1354_v28, %v1272_v53  ;;  %v1396_v30 = vsel %vm1008_vm7, %v1350_v63, %v1352_v50 }
 0x1a3   : > { %v1437_v6 = vadd.f32 %v1396_v30, %v1271_v38  ;;  %1614 = vrot.lane.b32.xlu1 %v1460_v0, %s12570_s29  ;;  %1612 = vrot.lane.b32.xlu0 %v1459_v5, %s12570_s29 }
 0x1a4   : > { %v1462_v20 = vmax.f32 %v1438_v2, 0.0 }
 0x1a5   : > { %v1461_v41 = vmax.f32 %v1437_v6, 0.0  ;;  %v1358_v32 = vpop.permute.xlu1 %1357  ;;  %v1356_v42 = vpop.permute.xlu0 %1355 }
 0x1a6   : > { %v1397_v45 = vsel %vm1008_vm7, %v1354_v28, %v1356_v42  ;;  %v1398_v9 = vsel %vm1008_vm7, %v1356_v42, %v1358_v32 }
 0x1a7   : > { %v1439_v51 = vadd.f32 %v1397_v45, %v1273_v36  ;;  %v1440_v3 = vadd.f32 %v1398_v9, %v1274_v7  ;;  %1618 = vrot.lane.b32.xlu1 %v1462_v20, %s12570_s29  ;;  %1616 = vrot.lane.b32.xlu0 %v1461_v41, %s12570_s29 }
 0x1a9   : > { %v1463_v35 = vmax.f32 %v1439_v51, 0.0  ;;  %v1464_v10 = vmax.f32 %v1440_v3, 0.0  ;;  %v1550_v58 = vpop.permute.xlu1 %1549  ;;  %v1544_v60 = vpop.permute.xlu0 %1543 }
 0x1ab   : > { %1622 = vrot.lane.b32.xlu1 %v1464_v10, %s12570_s29  ;;  %1620 = vrot.lane.b32.xlu0 %v1463_v35, %s12570_s29 }
 0x1ad   : > { %v1554_v57 = vpop.permute.xlu1 %1553  ;;  %v1548_v24 = vpop.permute.xlu0 %1547 }
 0x1b1   : > { %v1655_v34 = vpop.permute.xlu1 %1654  ;;  %v1649_v55 = vpop.permute.xlu0 %1648 }
 0x1b5   : > { %v1546_v49 = vpop.permute.xlu1 %1545  ;;  %v1653_v47 = vpop.permute.xlu0 %1652 }
 0x1b6   : > { %v13481_v62 = vsel %vm1555_vm9, %v1544_v60, %v1546_v49  ;;  %v13484_v27 = vsel %vm1555_vm9, %v1546_v49, %v1548_v24 }
 0x1b7   : > { %18242 = vst [vmem:[#allocation11_spill] sm:$0xff] %v13481_v62  ;;  %18243 = vst [vmem:[#allocation12_spill] sm:$0xff] %v13484_v27  ;;  %v13488_v56 = vpack.c.bf16 %v13484_v27, %v13481_v62 }
 0x1b9   : > { %1754 = vst [vmem:[#allocation2 + $0xc4] sm:$0xff] %v13488_v56  ;;  %v1651_v18 = vpop.permute.xlu1 %1650  ;;  %v1552_v17 = vpop.permute.xlu0 %1551 }
 0x1ba   : > { %v13492_v52 = vsel %vm1555_vm9, %v1649_v55, %v1651_v18  ;;  %v13495_v33 = vsel %vm1555_vm9, %v1651_v18, %v1653_v47  ;;  %v13498_v1 = vsel %vm1555_vm9, %v1550_v58, %v1552_v17  ;;  %v13501_v13 = vsel %vm1555_vm9, %v1552_v17, %v1554_v57 }
 0x1bb   : > { %18244 = vst [vmem:[#allocation13_spill] sm:$0xff] %v13492_v52  ;;  %18245 = vst [vmem:[#allocation14_spill] sm:$0xff] %v13495_v33  ;;  %v13505_v4 = vpack.c.bf16 %v13495_v33, %v13492_v52  ;;  %v13509_v54 = vpack.c.bf16 %v13501_v13, %v13498_v1  ;;  %v12439_v29 = vpack.c.bf16 %v13501_v13, %v13484_v27 }
 0x1bc   : > { %18246 = vst [vmem:[#allocation15_spill] sm:$0xff] %v13498_v1  ;;  %18247 = vst [vmem:[#allocation16_spill] sm:$0xff] %v13501_v13  ;;  %v12440_v39 = vpack.c.bf16 %v13498_v1, %v13481_v62 }
 0x1bd   : > { %1802 = vst [vmem:[#allocation2 + $0xd4] sm:$0xff] %v13505_v4  ;;  %1755 = vst [vmem:[#allocation2 + $0xe4] sm:$0xff] %v13509_v54  ;;  %v1659_v14 = vpop.permute.xlu1 %1658  ;;  %v1657_v25 = vpop.permute.xlu0 %1656  ;;  %2808 = vmatprep.subr.bf16.mxu0 %v12439_v29 }
 0x1be   : > { %v13518_v31 = vsel %vm1555_vm9, %v1655_v34, %v1657_v25  ;;  %v13521_v40 = vsel %vm1555_vm9, %v1657_v25, %v1659_v14  ;;  %2809 = vmatpush1.bf16.msra.mxu0 %v12440_v39 }
 0x1bf   : > { %18248 = vst [vmem:[#allocation17_spill] sm:$0xff] %v13518_v31  ;;  %18249 = vst [vmem:[#allocation18_spill] sm:$0xff] %v13521_v40  ;;  %v13525_v11 = vpack.c.bf16 %v13521_v40, %v13518_v31  ;;  %v12441_v63 = vpack.c.bf16 %v13521_v40, %v13495_v33  ;;  %v12442_v46 = vpack.c.bf16 %v13518_v31, %v13492_v52 }
 0x1c0   : > { %v1817_v23 = vld [vmem:[#allocation2 + $0xc8] sm:$0xf]  ;;  %v1816_v26 = vld [vmem:[#allocation2 + $0xc0] sm:$0xff] }
 0x1c1   : > { %1803 = vst [vmem:[#allocation2 + $0xf4] sm:$0xff] %v13525_v11  ;;  %v1534_v22 = vpop.permute.xlu1 %1533  ;;  %v1532_v37 = vpop.permute.xlu0 %1531  ;;  %1862 = vrot.lane.b32.xlu1 %v1817_v23, %s12570_s29  ;;  %1860 = vrot.lane.b32.xlu0 %v1816_v26, %s12570_s29 }
 0x1c2   : > { %2921 = vmatprep.subr.bf16.mxu1 %v12441_v63  ;;  %v13537_v43 = vsel %vm1555_vm9, %v1532_v37, %v1534_v22 }
 0x1c3   : > { %2922 = vmatpush1.bf16.msra.mxu1 %v12442_v46  ;;  %18250 = vst [vmem:[#allocation19_spill] sm:$0xff] %v13537_v43 }
 0x1c4   : > { %v1819_v16 = vld [vmem:[#allocation2 + $0xe8] sm:$0xf]  ;;  %v1818_v12 = vld [vmem:[#allocation2 + $0xe0] sm:$0xff]  ;;  %v2060_v53 = vld [vmem:[#allocation2 + $0xd8] sm:$0xf] }
 0x1c5   : > { %v1538_v59 = vpop.permute.xlu1 %1537  ;;  %v1536_v21 = vpop.permute.xlu0 %1535  ;;  %1866 = vrot.lane.b32.xlu1 %v1819_v16, %s12570_s29  ;;  %1864 = vrot.lane.b32.xlu0 %v1818_v12, %s12570_s29  ;;  %v2059_v5 = vld [vmem:[#allocation2 + $0xd0] sm:$0xff] }
 0x1c6   : > { %v13540_v48 = vsel %vm1555_vm9, %v1534_v22, %v1536_v21 }
 0x1c7   : > { %18251 = vst [vmem:[#allocation20_spill] sm:$0xff] %v13540_v48  ;;  %v13544_v19 = vpack.c.bf16 %v13540_v48, %v13537_v43 }
 0x1c8   : > { %v2062_v2 = vld [vmem:[#allocation2 + $0xf8] sm:$0xf]  ;;  %v2061_v30 = vld [vmem:[#allocation2 + $0xf0] sm:$0xff] }
 0x1c9   : > { %1752 = vst [vmem:[#allocation2 + $0x84] sm:$0xff] %v13544_v19  ;;  %v1542_v38 = vpop.permute.xlu1 %1541  ;;  %v1540_v0 = vpop.permute.xlu0 %1539  ;;  %2105 = vrot.lane.b32.xlu1 %v2060_v53, %s12570_s29  ;;  %2103 = vrot.lane.b32.xlu0 %v2059_v5, %s12570_s29 }
 0x1ca   : > { %v13550_v28 = vsel %vm1555_vm9, %v1538_v59, %v1540_v0  ;;  %v13553_v50 = vsel %vm1555_vm9, %v1540_v0, %v1542_v38 }
 0x1cb   : > { %18252 = vst [vmem:[#allocation21_spill] sm:$0xff] %v13550_v28  ;;  %18253 = vst [vmem:[#allocation22_spill] sm:$0xff] %v13553_v50  ;;  %v13557_v61 = vpack.c.bf16 %v13553_v50, %v13550_v28  ;;  %v12443_v6 = vpack.c.bf16 %v13553_v50, %v13540_v48  ;;  %v12444_v20 = vpack.c.bf16 %v13550_v28, %v13537_v43 }
 0x1cd   : > { %1753 = vst [vmem:[#allocation2 + $0xa4] sm:$0xff] %v13557_v61  ;;  %v1639_v15 = vpop.permute.xlu1 %1638  ;;  %v1637_v44 = vpop.permute.xlu0 %1636  ;;  %2109 = vrot.lane.b32.xlu1 %v2062_v2, %s12570_s29  ;;  %2107 = vrot.lane.b32.xlu0 %v2061_v30, %s12570_s29 }
 0x1ce   : > { %2810 = vmatprep.subr.bf16.mxu0 %v12443_v6  ;;  %v13569_v42 = vsel %vm1555_vm9, %v1637_v44, %v1639_v15 }
 0x1cf   : > { %2811 = vmatpush1.bf16.msra.mxu0 %v12444_v20  ;;  %18254 = vst [vmem:[#allocation23_spill] sm:$0xff] %v13569_v42 }
 0x1d0   : > { %v1813_v7 = vld [vmem:[#allocation2 + $0x88] sm:$0xf]  ;;  %v1812_v36 = vld [vmem:[#allocation2 + $0x80] sm:$0xff] }
 0x1d1   : > { %v1643_v41 = vpop.permute.xlu1 %1642  ;;  %v1641_v32 = vpop.permute.xlu0 %1640  ;;  %1854 = vrot.lane.b32.xlu1 %v1813_v7, %s12570_s29  ;;  %1852 = vrot.lane.b32.xlu0 %v1812_v36, %s12570_s29 }
 0x1d2   : > { %v13572_v45 = vsel %vm1555_vm9, %v1639_v15, %v1641_v32 }
 0x1d3   : > { %18255 = vst [vmem:[#allocation24_spill] sm:$0xff] %v13572_v45  ;;  %v13576_v9 = vpack.c.bf16 %v13572_v45, %v13569_v42 }
 0x1d4   : > { %v1815_v51 = vld [vmem:[#allocation2 + $0xa8] sm:$0xf]  ;;  %v1814_v3 = vld [vmem:[#allocation2 + $0xa0] sm:$0xff] }
 0x1d5   : > { %1800 = vst [vmem:[#allocation2 + $0x94] sm:$0xff] %v13576_v9  ;;  %v1647_v35 = vpop.permute.xlu1 %1646  ;;  %v1645_v10 = vpop.permute.xlu0 %1644  ;;  %1858 = vrot.lane.b32.xlu1 %v1815_v51, %s12570_s29  ;;  %1856 = vrot.lane.b32.xlu0 %v1814_v3, %s12570_s29 }
 0x1d6   : > { %v13582_v58 = vsel %vm1555_vm9, %v1643_v41, %v1645_v10  ;;  %v13585_v60 = vsel %vm1555_vm9, %v1645_v10, %v1647_v35 }
 0x1d7   : > { %18256 = vst [vmem:[#allocation25_spill] sm:$0xff] %v13582_v58  ;;  %18257 = vst [vmem:[#allocation26_spill] sm:$0xff] %v13585_v60  ;;  %v13589_v57 = vpack.c.bf16 %v13585_v60, %v13582_v58  ;;  %v12445_v24 = vpack.c.bf16 %v13585_v60, %v13572_v45  ;;  %v12446_v34 = vpack.c.bf16 %v13582_v58, %v13569_v42 }
 0x1d9   : > { %1801 = vst [vmem:[#allocation2 + $0xb4] sm:$0xff] %v13589_v57  ;;  %2923 = vmatprep.subr.bf16.mxu1 %v12445_v24 }
 0x1da   : > { %2924 = vmatpush1.bf16.msra.mxu1 %v12446_v34 }
 0x1dc   : > { %v2056_v55 = vld [vmem:[#allocation2 + $0x98] sm:$0xf]  ;;  %v2055_v49 = vld [vmem:[#allocation2 + $0x90] sm:$0xff] }
 0x1dd   : > { %2097 = vrot.lane.b32.xlu1 %v2056_v55, %s12570_s29  ;;  %2095 = vrot.lane.b32.xlu0 %v2055_v49, %s12570_s29 }
 0x1e0   : > { %v1520_v47 = vpop.permute.xlu0 %1519  ;;  %v2058_v18 = vld [vmem:[#allocation2 + $0xb8] sm:$0xf]  ;;  %v2057_v17 = vld [vmem:[#allocation2 + $0xb0] sm:$0xff] }
 0x1e1   : > { %v1522_v14 = vpop.permute.xlu1 %1521  ;;  %2101 = vrot.lane.b32.xlu1 %v2058_v18, %s12570_s29  ;;  %2099 = vrot.lane.b32.xlu0 %v2057_v17, %s12570_s29 }
 0x1e2   : > { %v13601_v39 = vsel %vm1555_vm9, %v1520_v47, %v1522_v14 }
 0x1e3   : > { %18258 = vst [vmem:[#allocation27_spill] sm:$0xff] %v13601_v39 }
 0x1e5   : > { %v1526_v25 = vpop.permute.xlu1 %1525  ;;  %v1524_v29 = vpop.permute.xlu0 %1523 }
 0x1e6   : > { %v13604_v23 = vsel %vm1555_vm9, %v1522_v14, %v1524_v29 }
 0x1e7   : > { %18259 = vst [vmem:[#allocation28_spill] sm:$0xff] %v13604_v23  ;;  %v13608_v26 = vpack.c.bf16 %v13604_v23, %v13601_v39 }
 0x1e9   : > { %1750 = vst [vmem:[#allocation2 + $0x44] sm:$0xff] %v13608_v26  ;;  %v1530_v22 = vpop.permute.xlu1 %1529  ;;  %v1528_v37 = vpop.permute.xlu0 %1527 }
 0x1ea   : > { %v13612_v63 = vsel %vm1555_vm9, %v1526_v25, %v1528_v37  ;;  %v13615_v46 = vsel %vm1555_vm9, %v1528_v37, %v1530_v22 }
 0x1eb   : > { %18260 = vst [vmem:[#allocation29_spill] sm:$0xff] %v13612_v63  ;;  %18261 = vst [vmem:[#allocation30_spill] sm:$0xff] %v13615_v46  ;;  %v13619_v16 = vpack.c.bf16 %v13615_v46, %v13612_v63  ;;  %v12447_v21 = vpack.c.bf16 %v13615_v46, %v13604_v23  ;;  %v12448_v53 = vpack.c.bf16 %v13612_v63, %v13601_v39 }
 0x1ed   : > { %1751 = vst [vmem:[#allocation2 + $0x64] sm:$0xff] %v13619_v16  ;;  %v1627_v12 = vpop.permute.xlu1 %1626  ;;  %v1625_v59 = vpop.permute.xlu0 %1624  ;;  %2812 = vmatprep.subr.bf16.mxu0 %v12447_v21 }
 0x1ee   : > { %2813 = vmatpush1.bf16.msra.mxu0 %v12448_v53  ;;  %v13629_v30 = vsel %vm1555_vm9, %v1625_v59, %v1627_v12 }
 0x1ef   : > { %18262 = vst [vmem:[#allocation31_spill] sm:$0xff] %v13629_v30 }
 0x1f0   : > { %v1809_v5 = vld [vmem:[#allocation2 + $0x48] sm:$0xf]  ;;  %v1808_v38 = vld [vmem:[#allocation2 + $0x40] sm:$0xff] }
 0x1f1   : > { %v1631_v0 = vpop.permute.xlu1 %1630  ;;  %v1629_v2 = vpop.permute.xlu0 %1628  ;;  %1846 = vrot.lane.b32.xlu1 %v1809_v5, %s12570_s29  ;;  %1844 = vrot.lane.b32.xlu0 %v1808_v38, %s12570_s29 }
 0x1f2   : > { %v13632_v15 = vsel %vm1555_vm9, %v1627_v12, %v1629_v2 }
 0x1f3   : > { %18263 = vst [vmem:[#allocation32_spill] sm:$0xff] %v13632_v15  ;;  %v13636_v44 = vpack.c.bf16 %v13632_v15, %v13629_v30 }
 0x1f4   : > { %v1811_v6 = vld [vmem:[#allocation2 + $0x68] sm:$0xf]  ;;  %v1810_v20 = vld [vmem:[#allocation2 + $0x60] sm:$0xff] }
 0x1f5   : > { %1798 = vst [vmem:[#allocation2 + $0x54] sm:$0xff] %v13636_v44  ;;  %v1635_v7 = vpop.permute.xlu1 %1634  ;;  %v1633_v36 = vpop.permute.xlu0 %1632  ;;  %1850 = vrot.lane.b32.xlu1 %v1811_v6, %s12570_s29  ;;  %1848 = vrot.lane.b32.xlu0 %v1810_v20, %s12570_s29 }
 0x1f6   : > { %v13642_v41 = vsel %vm1555_vm9, %v1631_v0, %v1633_v36  ;;  %v13645_v32 = vsel %vm1555_vm9, %v1633_v36, %v1635_v7 }
 0x1f7   : > { %18264 = vst [vmem:[#allocation33_spill] sm:$0xff] %v13642_v41  ;;  %18265 = vst [vmem:[#allocation34_spill] sm:$0xff] %v13645_v32  ;;  %v13649_v51 = vpack.c.bf16 %v13645_v32, %v13642_v41  ;;  %v12449_v3 = vpack.c.bf16 %v13645_v32, %v13632_v15  ;;  %v12450_v35 = vpack.c.bf16 %v13642_v41, %v13629_v30 }
 0x1f9   : > { %1799 = vst [vmem:[#allocation2 + $0x74] sm:$0xff] %v13649_v51  ;;  %2925 = vmatprep.subr.bf16.mxu1 %v12449_v3 }
 0x1fa   : > { %2926 = vmatpush1.bf16.msra.mxu1 %v12450_v35 }
 0x1fc   : > { %v2052_v10 = vld [vmem:[#allocation2 + $0x58] sm:$0xf]  ;;  %v2051_v24 = vld [vmem:[#allocation2 + $0x50] sm:$0xff] }
 0x1fd   : > { %2089 = vrot.lane.b32.xlu1 %v2052_v10, %s12570_s29  ;;  %2087 = vrot.lane.b32.xlu0 %v2051_v24, %s12570_s29 }
 0x200   : > { %v2054_v34 = vld [vmem:[#allocation2 + $0x78] sm:$0xf]  ;;  %v2053_v55 = vld [vmem:[#allocation2 + $0x70] sm:$0xff] }
 0x201   : > { %2093 = vrot.lane.b32.xlu1 %v2054_v34, %s12570_s29  ;;  %2091 = vrot.lane.b32.xlu0 %v2053_v55, %s12570_s29 }
 0x208   : > { %v1508_v49 = vpop.permute.xlu0 %1507 }
 0x209   : > { %v1510_v47 = vpop.permute.xlu1 %1509 }
 0x20a   : > { %v13661_v14 = vsel %vm1555_vm9, %v1508_v49, %v1510_v47 }
 0x20b   : > { %18266 = vst [vmem:[#allocation35_spill] sm:$0xff] %v13661_v14 }
 0x20d   : > { %v1514_v18 = vpop.permute.xlu1 %1513  ;;  %v1512_v17 = vpop.permute.xlu0 %1511 }
 0x20e   : > { %v13664_v25 = vsel %vm1555_vm9, %v1510_v47, %v1512_v17 }
 0x20f   : > { %18267 = vst [vmem:[#allocation36_spill] sm:$0xff] %v13664_v25  ;;  %v13668_v29 = vpack.c.bf16 %v13664_v25, %v13661_v14 }
 0x211   : > { %1748 = vst [vmem:[#allocation2 + $0x4] sm:$0xff] %v13668_v29  ;;  %v1518_v22 = vpop.permute.xlu1 %1517  ;;  %v1516_v37 = vpop.permute.xlu0 %1515 }
 0x212   : > { %v13672_v12 = vsel %vm1555_vm9, %v1514_v18, %v1516_v37  ;;  %v13675_v59 = vsel %vm1555_vm9, %v1516_v37, %v1518_v22 }
 0x213   : > { %18268 = vst [vmem:[#allocation37_spill] sm:$0xff] %v13672_v12  ;;  %18269 = vst [vmem:[#allocation38_spill] sm:$0xff] %v13675_v59  ;;  %v13679_v21 = vpack.c.bf16 %v13675_v59, %v13672_v12  ;;  %v12451_v38 = vpack.c.bf16 %v13675_v59, %v13664_v25  ;;  %v12452_v0 = vpack.c.bf16 %v13672_v12, %v13661_v14 }
 0x215   : > { %1749 = vst [vmem:[#allocation2 + $0x24] sm:$0xff] %v13679_v21  ;;  %v1615_v53 = vpop.permute.xlu1 %1614  ;;  %v1613_v5 = vpop.permute.xlu0 %1612  ;;  %2814 = vmatprep.subr.bf16.mxu0 %v12451_v38  ;;  %v1949_v38 = vld [vmem:[#allocation2 + $0xec] sm:$0xf] }
 0x216   : > { %2815 = vmatpush1.bf16.msra.mxu0 %v12452_v0  ;;  %v13689_v36 = vsel %vm1555_vm9, %v1613_v5, %v1615_v53  ;;  %v1947_v5 = vld [vmem:[#allocation2 + $0xcc] sm:$0xf] }
 0x217   : > { %18270 = vst [vmem:[#allocation39_spill] sm:$0xff] %v13689_v36 }
 0x218   : > { %v1805_v2 = vld [vmem:[#allocation2 + $0x8] sm:$0xf]  ;;  %v1804_v6 = vld [vmem:[#allocation2] sm:$0xff] }
 0x219   : > { %v1619_v20 = vpop.permute.xlu1 %1618  ;;  %1838 = vrot.lane.b32.xlu1 %v1805_v2, %s12570_s29  ;;  %1836 = vrot.lane.b32.xlu0 %v1804_v6, %s12570_s29  ;;  %v1617_v7 = vpop.permute.xlu0 %1616  ;;  %v11361_v6 = vpack.i.bf16 %v1949_v38, %v1947_v5 }
 0x21a   : > { %v13692_v3 = vsel %vm1555_vm9, %v1615_v53, %v1617_v7  ;;  %v2190_v7 = vld [vmem:[#allocation2 + $0xfc] sm:$0xf] }
 0x21b   : > { %18271 = vst [vmem:[#allocation40_spill] sm:$0xff] %v13692_v3  ;;  %v13696_v35 = vpack.c.bf16 %v13692_v3, %v13689_v36 }
 0x21c   : > { %v1807_v10 = vld [vmem:[#allocation2 + $0x28] sm:$0xf]  ;;  %v1806_v24 = vld [vmem:[#allocation2 + $0x20] sm:$0xff] }
 0x21d   : > { %1796 = vst [vmem:[#allocation2 + $0x14] sm:$0xff] %v13696_v35  ;;  %v1623_v34 = vpop.permute.xlu1 %1622  ;;  %1842 = vrot.lane.b32.xlu1 %v1807_v10, %s12570_s29  ;;  %1840 = vrot.lane.b32.xlu0 %v1806_v24, %s12570_s29  ;;  %v1621_v55 = vpop.permute.xlu0 %1620  ;;  %v1943_v24 = vld [vmem:[#allocation2 + $0x8c] sm:$0xf] }
 0x21e   : > { %v13702_v49 = vsel %vm1555_vm9, %v1619_v20, %v1621_v55  ;;  %v13705_v47 = vsel %vm1555_vm9, %v1621_v55, %v1623_v34  ;;  %v2188_v20 = vld [vmem:[#allocation2 + $0xdc] sm:$0xf]  ;;  %v1945_v34 = vld [vmem:[#allocation2 + $0xac] sm:$0xf] }
 0x21f   : > { %18272 = vst [vmem:[#allocation41_spill] sm:$0xff] %v13702_v49  ;;  %18273 = vst [vmem:[#allocation42_spill] sm:$0xff] %v13705_v47  ;;  %v13709_v18 = vpack.c.bf16 %v13705_v47, %v13702_v49  ;;  %v12453_v17 = vpack.c.bf16 %v13705_v47, %v13692_v3  ;;  %v12454_v22 = vpack.c.bf16 %v13702_v49, %v13689_v36 }
 0x220   : > { %v11366_v10 = vpack.i.bf16 %v2190_v7, %v2188_v20 }
 0x221   : > { %1797 = vst [vmem:[#allocation2 + $0x34] sm:$0xff] %v13709_v18  ;;  %2927 = vmatprep.subr.bf16.mxu1 %v12453_v17 }
 0x222   : > { %2928 = vmatpush1.bf16.msra.mxu1 %v12454_v22 }
 0x224   : > { %v2048_v37 = vld [vmem:[#allocation2 + $0x18] sm:$0xf]  ;;  %v2047_v53 = vld [vmem:[#allocation2 + $0x10] sm:$0xff] }
 0x225   : > { %2081 = vrot.lane.b32.xlu1 %v2048_v37, %s12570_s29  ;;  %2079 = vrot.lane.b32.xlu0 %v2047_v53, %s12570_s29 }
 0x228   : > { %v2050_v0 = vld [vmem:[#allocation2 + $0x38] sm:$0xf]  ;;  %v2049_v2 = vld [vmem:[#allocation2 + $0x30] sm:$0xff] }
 0x229   : > { %2085 = vrot.lane.b32.xlu1 %v2050_v0, %s12570_s29  ;;  %2083 = vrot.lane.b32.xlu0 %v2049_v2, %s12570_s29  ;;  %v2184_v2 = vld [vmem:[#allocation2 + $0x9c] sm:$0xf]  ;;  %s12575_s29 = smov 8  }
 0x22d   : > { %11362 = vrot.lane.b32.xlu1 %v11361_v6, %s12568_s22  ;;  %1990 = vrot.lane.b32.xlu0 %v13488_v56, %s12568_s22  ;;  %v11371_v56 = vpack.i.bf16 %v1945_v34, %v1943_v24  ;;  %v2186_v6 = vld [vmem:[#allocation2 + $0xbc] sm:$0xf] }
 0x231   : > { %2231 = vrot.lane.b32.xlu1 %v13505_v4, %s12568_s22  ;;  %1994 = vrot.lane.b32.xlu0 %v13509_v54, %s12568_s22 }
 0x233   : > { %v1863_v55 = vpop.permute.xlu1 %1862  ;;  %v1861_v17 = vpop.permute.xlu0 %1860 }
 0x234   : > { %v1881_v22 = vrot.slane %v1863_v55, 4  ;;  %v1880_v37 = vrot.slane %v1861_v17, 4 }
 0x235   : > { %2235 = vrot.lane.b32.xlu1 %v13525_v11, %s12568_s22  ;;  %11367 = vrot.lane.b32.xlu0 %v11366_v10, %s12568_s22 }
 0x236   : > { %v1898_v4 = vsel %vm1884_vm10, %v1880_v37, %v1881_v22  ;;  %v1939_v37 = vld [vmem:[#allocation2 + $0x4c] sm:$0xf] }
 0x237   : > { %v1867_v53 = vpop.permute.xlu1 %1866  ;;  %v1865_v5 = vpop.permute.xlu0 %1864  ;;  %v1899_v11 = vsel %vm1555_vm9, %v1861_v17, %v1898_v4 }
 0x238   : > { %v1883_v38 = vrot.slane %v1867_v53, 4  ;;  %v1882_v54 = vrot.slane %v1865_v5, 4 }
 0x239   : > { %11372 = vrot.lane.b32.xlu1 %v11371_v56, %s12568_s22  ;;  %1982 = vrot.lane.b32.xlu0 %v13544_v19, %s12568_s22  ;;  %v11376_v19 = vpack.i.bf16 %v2186_v6, %v2184_v2  ;;  %v1941_v56 = vld [vmem:[#allocation2 + $0x6c] sm:$0xf] }
 0x23a   : > { %v1900_v0 = vsel %vm1884_vm10, %v1882_v54, %v1883_v38 }
 0x23b   : > { %v1901_v20 = vsel %vm1555_vm9, %v1865_v5, %v1900_v0  ;;  %v2106_v7 = vpop.permute.xlu1 %2105  ;;  %v2104_v10 = vpop.permute.xlu0 %2103 }
 0x23c   : > { %v2124_v24 = vrot.slane %v2106_v7, 4  ;;  %v2123_v34 = vrot.slane %v2104_v10, 4  ;;  %v10567_v55 = vcombine.high %v1899_v11, %v1901_v20  ;;  %v10566_v22 = vcombine.low %v1899_v11, %v1901_v20 }
 0x23d   : > { %2223 = vrot.lane.b32.xlu1 %v13576_v9, %s12568_s22  ;;  %1986 = vrot.lane.b32.xlu0 %v13557_v61, %s12568_s22  ;;  %v11381_v9 = vpack.i.bf16 %v1941_v56, %v1939_v37 }
 0x23e   : > { %2816 = vmatprep.subr.bf16.mxu0 %v10567_v55  ;;  %v2139_v5 = vsel %vm1884_vm10, %v2123_v34, %v2124_v24  ;;  %v2182_v34 = vld [vmem:[#allocation2 + $0x7c] sm:$0xf] }
 0x23f   : > { %v2110_v53 = vpop.permute.xlu1 %2109  ;;  %2817 = vmatpush1.bf16.msra.mxu0 %v10566_v22  ;;  %v2108_v17 = vpop.permute.xlu0 %2107  ;;  %v2140_v61 = vsel %vm1555_vm9, %v2104_v10, %v2139_v5 }
 0x240   : > { %v2126_v4 = vrot.slane %v2110_v53, 4  ;;  %v2125_v38 = vrot.slane %v2108_v17, 4 }
 0x241   : > { %2227 = vrot.lane.b32.xlu1 %v13589_v57, %s12568_s22  ;;  %11377 = vrot.lane.b32.xlu0 %v11376_v19, %s12568_s22  ;;  %v2180_v57 = vld [vmem:[#allocation2 + $0x5c] sm:$0xf] }
 0x242   : > { %v2141_v54 = vsel %vm1884_vm10, %v2125_v38, %v2126_v4  ;;  %v11386_v56 = vpack.i.bf16 %v2182_v34, %v2180_v57 }
 0x243   : > { %v2142_v0 = vsel %vm1555_vm9, %v2108_v17, %v2141_v54  ;;  %v1855_v2 = vpop.permute.xlu1 %1854  ;;  %v1853_v6 = vpop.permute.xlu0 %1852  ;;  %v1937_v17 = vld [vmem:[#allocation2 + $0x2c] sm:$0xf] }
 0x244   : > { %v1877_v11 = vrot.slane %v1855_v2, 4  ;;  %v1876_v20 = vrot.slane %v1853_v6, 4  ;;  %v10569_v7 = vcombine.high %v2140_v61, %v2142_v0  ;;  %v10568_v24 = vcombine.low %v2140_v61, %v2142_v0  ;;  %v11529_v61 = vld [vmem:[%s18114_s4 + $0x4] ss:$8 sps:$4 sm:$0xff]  }
 0x245   : > { %11382 = vrot.lane.b32.xlu1 %v11381_v9, %s12568_s22  ;;  %1974 = vrot.lane.b32.xlu0 %v13608_v26, %s12568_s22  ;;  %v1935_v26 = vld [vmem:[#allocation2 + $0xc] sm:$0xf] }
 0x246   : > { %2929 = vmatprep.subr.bf16.mxu1 %v10569_v7  ;;  %v1894_v10 = vsel %vm1884_vm10, %v1876_v20, %v1877_v11  ;;  %10606 = vmatprep.mubr.msk.bf16.mxu0 %vm2783_vm11, %v11529_v61 }
 0x247   : > { %v1859_v55 = vpop.permute.xlu1 %1858  ;;  %2930 = vmatpush1.bf16.msra.mxu1 %v10568_v24  ;;  %v1857_v22 = vpop.permute.xlu0 %1856  ;;  %v1895_v5 = vsel %vm1555_vm9, %v1853_v6, %v1894_v10  ;;  %v2178_v6 = vld [vmem:[#allocation2 + $0x3c] sm:$0xf]  ;;  %10614 = vmatprep.mubr.msk.bf16.mxu1 %vm2783_vm11, %v11529_v61 }
 0x248   : > { %v1879_v19 = vrot.slane %v1859_v55, 4  ;;  %v1878_v37 = vrot.slane %v1857_v22, 4 }
 0x249   : > { %2215 = vrot.lane.b32.xlu1 %v13636_v44, %s12568_s22  ;;  %1978 = vrot.lane.b32.xlu0 %v13619_v16, %s12568_s22  ;;  %v11391_v44 = vpack.i.bf16 %v1937_v17, %v1935_v26 }
 0x24a   : > { %v1896_v53 = vsel %vm1884_vm10, %v1878_v37, %v1879_v19  ;;  %v2368_v37 = vld [vmem:[%s18115_s5 + $0x68] sm:$0xff] }
 0x24b   : > { %v1897_v4 = vsel %vm1555_vm9, %v1857_v22, %v1896_v53  ;;  %v2365_v53 = vld [vmem:[%s18115_s5 + $0x50] sm:$0xff] }
 0x24c   : > { %v10563_v38 = vcombine.high %v1895_v5, %v1897_v4  ;;  %v10562_v9 = vcombine.low %v1895_v5, %v1897_v4 }
 0x24d   : > { %2219 = vrot.lane.b32.xlu1 %v13649_v51, %s12568_s22  ;;  %11387 = vrot.lane.b32.xlu0 %v11386_v56, %s12568_s22  ;;  %v2176_v51 = vld [vmem:[#allocation2 + $0x1c] sm:$0xf] }
 0x24e   : > { %2818 = vmatprep.subr.bf16.mxu0 %v10563_v38  ;;  %v11396_v34 = vpack.i.bf16 %v2178_v6, %v2176_v51  ;;  %v2366_v56 = vld [vmem:[%s18115_s5 + $0x58] sm:$0xff]  ;;  %v2364_v38 = vld [vmem:[%s18115_s5 + $0x48] sm:$0xff]  ;;  %v2361_v6 = vld [vmem:[%s18115_s5 + $0x30] sm:$0xff] }
 0x24f   : > { %v2098_v54 = vpop.permute.xlu1 %2097  ;;  %2819 = vmatpush1.bf16.msra.mxu0 %v10562_v9  ;;  %v2096_v16 = vpop.permute.xlu0 %2095  ;;  %v2363_v9 = vld [vmem:[%s18115_s5 + $0x40] sm:$0xff]  ;;  %v2362_v51 = vld [vmem:[%s18115_s5 + $0x38] sm:$0xff] }
 0x250   : > { %v2120_v0 = vrot.slane %v2098_v54, 4  ;;  %v2119_v2 = vrot.slane %v2096_v16, 4 }
 0x251   : > { %11392 = vrot.lane.b32.xlu1 %v11391_v44, %s12568_s22  ;;  %1966 = vrot.lane.b32.xlu0 %v13668_v29, %s12568_s22 }
 0x252   : > { %v2135_v7 = vsel %vm1884_vm10, %v2119_v2, %v2120_v0 }
 0x253   : > { %v2102_v11 = vpop.permute.xlu1 %2101  ;;  %v2100_v20 = vpop.permute.xlu0 %2099  ;;  %v2136_v55 = vsel %vm1555_vm9, %v2096_v16, %v2135_v7 }
 0x254   : > { %v2122_v24 = vrot.slane %v2102_v11, 4  ;;  %v2121_v57 = vrot.slane %v2100_v20, 4 }
 0x255   : > { %2207 = vrot.lane.b32.xlu1 %v13696_v35, %s12568_s22  ;;  %1970 = vrot.lane.b32.xlu0 %v13679_v21, %s12568_s22  ;;  %v2370_v35 = vld [vmem:[%s18115_s5 + $0x78] sm:$0xff]  ;;  %v2369_v21 = vld [vmem:[%s18115_s5 + $0x70] sm:$0xff] }
 0x256   : > { %v2137_v29 = vsel %vm1884_vm10, %v2121_v57, %v2122_v24  ;;  %v2360_v57 = vld [vmem:[%s18115_s5 + $0x28] sm:$0xff] }
 0x257   : > { %v2138_v22 = vsel %vm1555_vm9, %v2100_v20, %v2137_v29 }
 0x258   : > { %v10565_v10 = vcombine.high %v2136_v55, %v2138_v22  ;;  %v10564_v19 = vcombine.low %v2136_v55, %v2138_v22 }
 0x259   : > { %2211 = vrot.lane.b32.xlu1 %v13709_v18, %s12568_s22  ;;  %11397 = vrot.lane.b32.xlu0 %v11396_v34, %s12568_s22  ;;  %v2367_v18 = vld [vmem:[%s18115_s5 + $0x60] sm:$0xff]  ;;  %s12572_s22 = smov 124  }
 0x25a   : > { %2931 = vmatprep.subr.bf16.mxu1 %v10565_v10  ;;  %v2359_v34 = vld [vmem:[%s18115_s5 + $0x20] sm:$0xff] }
 0x25b   : > { %2932 = vmatpush1.bf16.msra.mxu1 %v10564_v19  ;;  %v2358_v19 = vld [vmem:[%s18115_s5 + $0x18] sm:$0xff] }
 0x25d   : > { %2448 = vperm.xlu1 %11359, %v2370_v35   ;;  %2443 = vperm.xlu0 %11360, %v2369_v21   ;;  %v2357_v35 = vld [vmem:[%s18115_s5 + $0x10] sm:$0xff] }
 0x261   : > { %2438 = vperm.xlu1 %11359, %v2368_v37   ;;  %2433 = vperm.xlu0 %11360, %v2367_v18  }
 0x263   : > { %v1847_v26 = vpop.permute.xlu1 %1846  ;;  %v1845_v17 = vpop.permute.xlu0 %1844 }
 0x264   : > { %v1873_v5 = vrot.slane %v1847_v26, 4  ;;  %v1872_v4 = vrot.slane %v1845_v17, 4 }
 0x265   : > { %2428 = vperm.xlu1 %11359, %v2366_v56   ;;  %2423 = vperm.xlu0 %11360, %v2365_v53  }
 0x266   : > { %v1890_v16 = vsel %vm1884_vm10, %v1872_v4, %v1873_v5  ;;  %v2355_v5 = vld [vmem:[%s18115_s5] sm:$0xff] }
 0x267   : > { %v1851_v44 = vpop.permute.xlu1 %1850  ;;  %v1849_v54 = vpop.permute.xlu0 %1848  ;;  %v1891_v11 = vsel %vm1555_vm9, %v1845_v17, %v1890_v16  ;;  %v2356_v17 = vld [vmem:[%s18115_s5 + $0x8] sm:$0xff]  ;;  %v3296_v16 = vld [vmem:[%s18117_s7 + $0x30] sm:$0xff] }
 0x268   : > { %v1875_v61 = vrot.slane %v1851_v44, 4  ;;  %v1874_v0 = vrot.slane %v1849_v54, 4 }
 0x269   : > { %2418 = vperm.xlu1 %11359, %v2364_v38   ;;  %2413 = vperm.xlu0 %11360, %v2363_v9  }
 0x26a   : > { %v1892_v2 = vsel %vm1884_vm10, %v1874_v0, %v1875_v61  ;;  %v3295_v61 = vld [vmem:[%s18117_s7 + $0x28] sm:$0xff]  ;;  %v3294_v0 = vld [vmem:[%s18117_s7 + $0x20] sm:$0xff] }
 0x26b   : > { %v1893_v20 = vsel %vm1555_vm9, %v1849_v54, %v1892_v2  ;;  %v3297_v54 = vld [vmem:[%s18117_s7 + $0x38] sm:$0xff] }
 0x26c   : > { %v10559_v7 = vcombine.high %v1891_v11, %v1893_v20  ;;  %v10558_v24 = vcombine.low %v1891_v11, %v1893_v20  ;;  %v3293_v2 = vld [vmem:[%s18117_s7 + $0x18] sm:$0xff]  ;;  %v3290_v11 = vld [vmem:[%s18117_s7] sm:$0xff] }
 0x26d   : > { %2408 = vperm.xlu1 %11359, %v2362_v51   ;;  %2403 = vperm.xlu0 %11360, %v2361_v6   ;;  %v3292_v51 = vld [vmem:[%s18117_s7 + $0x10] sm:$0xff]  ;;  %v3291_v6 = vld [vmem:[%s18117_s7 + $0x8] sm:$0xff] }
 0x26e   : > { %2820 = vmatprep.subr.bf16.mxu0 %v10559_v7 }
 0x26f   : > { %v2090_v29 = vpop.permute.xlu1 %2089  ;;  %2821 = vmatpush1.bf16.msra.mxu0 %v10558_v24  ;;  %v2088_v55 = vpop.permute.xlu0 %2087 }
 0x270   : > { %v2116_v22 = vrot.slane %v2090_v29, 4  ;;  %v2115_v10 = vrot.slane %v2088_v55, 4 }
 0x271   : > { %2398 = vperm.xlu1 %11359, %v2360_v57   ;;  %2393 = vperm.xlu0 %11360, %v2359_v34  }
 0x272   : > { %v2131_v18 = vsel %vm1884_vm10, %v2115_v10, %v2116_v22 }
 0x273   : > { %v2094_v21 = vpop.permute.xlu1 %2093  ;;  %v2092_v37 = vpop.permute.xlu0 %2091  ;;  %v2132_v4 = vsel %vm1555_vm9, %v2088_v55, %v2131_v18 }
 0x274   : > { %v2118_v56 = vrot.slane %v2094_v21, 4  ;;  %v2117_v53 = vrot.slane %v2092_v37, 4 }
 0x275   : > { %2388 = vperm.xlu1 %11359, %v2358_v19   ;;  %2383 = vperm.xlu0 %11360, %v2357_v35  }
 0x276   : > { %v2133_v26 = vsel %vm1884_vm10, %v2117_v53, %v2118_v56  ;;  %v11521_v56 = vld [vmem:[%s13720_s19 + $0x4] ss:$8 sps:$4 sm:$0xff]  }
 0x277   : > { %v2134_v38 = vsel %vm1555_vm9, %v2092_v37, %v2133_v26 }
 0x278   : > { %v10561_v9 = vcombine.high %v2132_v4, %v2134_v38  ;;  %v10560_v44 = vcombine.low %v2132_v4, %v2134_v38 }
 0x279   : > { %2378 = vperm.xlu1 %11359, %v2356_v17   ;;  %2373 = vperm.xlu0 %11360, %v2355_v5   ;;  %v11523_v17 = vld [vmem:[%s13720_s19] ss:$8 sps:$4 sm:$0xff]  }
 0x27a   : > { %2933 = vmatprep.subr.bf16.mxu1 %v10561_v9 }
 0x27b   : > { %2934 = vmatpush1.bf16.msra.mxu1 %v10560_v44 }
 0x27d   : > { %3343 = vperm.xlu1 %11359, %v3297_v54   ;;  %3338 = vperm.xlu0 %11360, %v3296_v16  }
 0x281   : > { %3333 = vperm.xlu1 %11359, %v3295_v61   ;;  %3328 = vperm.xlu0 %11360, %v3294_v0  }
 0x285   : > { %3323 = vperm.xlu1 %11359, %v3293_v2   ;;  %3318 = vperm.xlu0 %11360, %v3292_v51  }
 0x289   : > { %3313 = vperm.xlu1 %11359, %v3291_v6   ;;  %3308 = vperm.xlu0 %11360, %v3290_v11  }
 0x28b   : > { %v1839_v20 = vpop.permute.xlu1 %1838  ;;  %v1837_v7 = vpop.permute.xlu0 %1836 }
 0x28c   : > { %v1869_v24 = vrot.slane %v1839_v20, 4  ;;  %v1868_v57 = vrot.slane %v1837_v7, 4 }
 0x28e   : > { %v1885_v55 = vsel %vm1884_vm10, %v1868_v57, %v1869_v24  ;;  %v11524_v24 = vld [vmem:[%s13720_s19 + $0x14] ss:$8 sps:$4 sm:$0xff]  }
 0x28f   : > { %v1843_v34 = vpop.permute.xlu1 %1842  ;;  %v1841_v29 = vpop.permute.xlu0 %1840  ;;  %v1887_v35 = vsel %vm1555_vm9, %v1837_v7, %v1885_v55 }
 0x290   : > { %v1871_v22 = vrot.slane %v1843_v34, 4  ;;  %v1870_v10 = vrot.slane %v1841_v29, 4 }
 0x292   : > { %v1888_v19 = vsel %vm1884_vm10, %v1870_v10, %v1871_v22 }
 0x293   : > { %v1889_v21 = vsel %vm1555_vm9, %v1841_v29, %v1888_v19  ;;  %v11526_v19 = vld [vmem:[%s13720_s19 + $0x10] ss:$8 sps:$4 sm:$0xff]  }
 0x294   : > { %v10555_v37 = vcombine.high %v1887_v35, %v1889_v21  ;;  %v10554_v18 = vcombine.low %v1887_v35, %v1889_v21 }
 0x296   : > { %2822 = vmatprep.subr.bf16.mxu0 %v10555_v37 }
 0x297   : > { %v2082_v53 = vpop.permute.xlu1 %2081  ;;  %2823 = vmatpush1.bf16.msra.mxu0 %v10554_v18  ;;  %v2080_v26 = vpop.permute.xlu0 %2079 }
 0x298   : > { %v2112_v5 = vrot.slane %v2082_v53, 4  ;;  %v2111_v4 = vrot.slane %v2080_v26, 4  ;;  %2830 = vmatprep.subr.bf16.mxu0 %v11521_v56 }
 0x29a   : > { %v2127_v44 = vsel %vm1884_vm10, %v2111_v4, %v2112_v5 }
 0x29b   : > { %v2086_v38 = vpop.permute.xlu1 %2085  ;;  %v2084_v9 = vpop.permute.xlu0 %2083  ;;  %2831 = vmatpush2.bf16.msra.mxu0 %v11523_v17  ;;  %v2128_v0 = vsel %vm1555_vm9, %v2080_v26, %v2127_v44 }
 0x29c   : > { %v2114_v54 = vrot.slane %v2086_v38, 4  ;;  %v2113_v16 = vrot.slane %v2084_v9, 4 }
 0x29e   : > { %v2129_v61 = vsel %vm1884_vm10, %v2113_v16, %v2114_v54 }
 0x29f   : > { %v2130_v2 = vsel %vm1555_vm9, %v2084_v9, %v2129_v61  ;;  %v11363_v51 = vpop.permute.xlu1 %11362  ;;  %v1991_v6 = vpop.permute.xlu0 %1990 }
 0x2a0   : > { %v11365_v11 = vunpack.i.h.bf16 %v11363_v51  ;;  %v11364_v20 = vunpack.i.l.bf16 %v11363_v51  ;;  %v10557_v7 = vcombine.high %v2128_v0, %v2130_v2  ;;  %v10556_v57 = vcombine.low %v2128_v0, %v2130_v2 }
 0x2a1   : > { %v2010_v55 = vrot.slane %v1991_v6, 4 }
 0x2a2   : > { %v2013_v34 = vrot.slane %v11365_v11, 4  ;;  %v2011_v29 = vrot.slane %v11364_v20, 4  ;;  %2935 = vmatprep.subr.bf16.mxu1 %v10557_v7 }
 0x2a3   : > { %v2232_v22 = vpop.permute.xlu1 %2231  ;;  %2936 = vmatpush1.bf16.msra.mxu1 %v10556_v57  ;;  %v1995_v10 = vpop.permute.xlu0 %1994 }
 0x2a4   : > { %v2027_v35 = vsel %vm1884_vm10, %v2010_v55, %v2011_v29  ;;  %v2012_v21 = vrot.slane %v1995_v10, 4  ;;  %2943 = vmatprep.subr.bf16.mxu1 %v11524_v24  ;;  %v2251_v9 = vrot.slane %v2232_v22, 4 }
 0x2a5   : > { %v2028_v18 = vsel %vm806_vm8, %v1991_v6, %v2027_v35 }
 0x2a6   : > { %v2029_v37 = vsel %vm1884_vm10, %v2012_v21, %v2013_v34 }
 0x2a7   : > { %v2030_v56 = vsel %vm806_vm8, %v1995_v10, %v2029_v37  ;;  %v2236_v53 = vpop.permute.xlu1 %2235  ;;  %v11368_v26 = vpop.permute.xlu0 %11367  ;;  %2944 = vmatpush2.bf16.msra.mxu1 %v11526_v19 }
 0x2a8   : > { %v11370_v17 = vunpack.i.h.bf16 %v11368_v26  ;;  %v11369_v5 = vunpack.i.l.bf16 %v11368_v26  ;;  %v10599_v4 = vcombine.high %v2028_v18, %v2030_v56  ;;  %v10598_v38 = vcombine.low %v2028_v18, %v2030_v56 }
 0x2a9   : > { %v2253_v16 = vrot.slane %v2236_v53, 4 }
 0x2aa   : > { %v2254_v44 = vrot.slane %v11370_v17, 4  ;;  %v2252_v54 = vrot.slane %v11369_v5, 4  ;;  %2832 = vmatprep.subr.bf16.mxu0 %v10599_v4 }
 0x2ab   : > { %v11373_v61 = vpop.permute.xlu1 %11372  ;;  %2833 = vmatpush2.bf16.msra.mxu0 %v10598_v38  ;;  %v1983_v0 = vpop.permute.xlu0 %1982 }
 0x2ac   : > { %v11375_v2 = vunpack.i.h.bf16 %v11373_v61  ;;  %v11374_v51 = vunpack.i.l.bf16 %v11373_v61  ;;  %v2267_v6 = vsel %vm1884_vm10, %v2251_v9, %v2252_v54  ;;  %v2269_v20 = vsel %vm1884_vm10, %v2253_v16, %v2254_v44 }
 0x2ad   : > { %v2268_v11 = vsel %vm806_vm8, %v2232_v22, %v2267_v6  ;;  %v2006_v57 = vrot.slane %v1983_v0, 4  ;;  %v2270_v34 = vsel %vm806_vm8, %v2236_v53, %v2269_v20 }
 0x2ae   : > { %v2009_v7 = vrot.slane %v11375_v2, 4  ;;  %v2007_v24 = vrot.slane %v11374_v51, 4  ;;  %v10601_v10 = vcombine.high %v2268_v11, %v2270_v34  ;;  %v10600_v19 = vcombine.low %v2268_v11, %v2270_v34 }
 0x2af   : > { %v2224_v29 = vpop.permute.xlu1 %2223  ;;  %v1987_v55 = vpop.permute.xlu0 %1986 }
 0x2b0   : > { %v2023_v35 = vsel %vm1884_vm10, %v2006_v57, %v2007_v24  ;;  %v2008_v21 = vrot.slane %v1987_v55, 4  ;;  %2945 = vmatprep.subr.bf16.mxu1 %v10601_v10  ;;  %v2247_v38 = vrot.slane %v2224_v29, 4 }
 0x2b1   : > { %2946 = vmatpush2.bf16.msra.mxu1 %v10600_v19  ;;  %v2024_v22 = vsel %vm806_vm8, %v1983_v0, %v2023_v35 }
 0x2b2   : > { %v2025_v37 = vsel %vm1884_vm10, %v2008_v21, %v2009_v7 }
 0x2b3   : > { %v2026_v18 = vsel %vm806_vm8, %v1987_v55, %v2025_v37  ;;  %v2228_v56 = vpop.permute.xlu1 %2227  ;;  %v11378_v26 = vpop.permute.xlu0 %11377 }
 0x2b4   : > { %v11380_v17 = vunpack.i.h.bf16 %v11378_v26  ;;  %v11379_v5 = vunpack.i.l.bf16 %v11378_v26  ;;  %v10595_v53 = vcombine.high %v2024_v22, %v2026_v18  ;;  %v10594_v4 = vcombine.low %v2024_v22, %v2026_v18 }
 0x2b5   : > { %v2249_v54 = vrot.slane %v2228_v56, 4 }
 0x2b6   : > { %v2250_v9 = vrot.slane %v11380_v17, 4  ;;  %v2248_v44 = vrot.slane %v11379_v5, 4  ;;  %2834 = vmatprep.subr.bf16.mxu0 %v10595_v53 }
 0x2b7   : > { %v11383_v16 = vpop.permute.xlu1 %11382  ;;  %2835 = vmatpush2.bf16.msra.mxu0 %v10594_v4  ;;  %v1975_v61 = vpop.permute.xlu0 %1974 }
 0x2b8   : > { %v11385_v2 = vunpack.i.h.bf16 %v11383_v16  ;;  %v11384_v51 = vunpack.i.l.bf16 %v11383_v16  ;;  %v2263_v0 = vsel %vm1884_vm10, %v2247_v38, %v2248_v44  ;;  %v2265_v11 = vsel %vm1884_vm10, %v2249_v54, %v2250_v9 }
 0x2b9   : > { %v2264_v6 = vsel %vm806_vm8, %v2224_v29, %v2263_v0  ;;  %v2002_v24 = vrot.slane %v1975_v61, 4  ;;  %v2266_v57 = vsel %vm806_vm8, %v2228_v56, %v2265_v11 }
 0x2ba   : > { %v2005_v20 = vrot.slane %v11385_v2, 4  ;;  %v2003_v7 = vrot.slane %v11384_v51, 4  ;;  %v10597_v10 = vcombine.high %v2264_v6, %v2266_v57  ;;  %v10596_v19 = vcombine.low %v2264_v6, %v2266_v57 }
 0x2bb   : > { %v2216_v34 = vpop.permute.xlu1 %2215  ;;  %v1979_v55 = vpop.permute.xlu0 %1978 }
 0x2bc   : > { %v2019_v35 = vsel %vm1884_vm10, %v2002_v24, %v2003_v7  ;;  %v2004_v21 = vrot.slane %v1979_v55, 4  ;;  %2947 = vmatprep.subr.bf16.mxu1 %v10597_v10  ;;  %v2243_v4 = vrot.slane %v2216_v34, 4 }
 0x2bd   : > { %2948 = vmatpush2.bf16.msra.mxu1 %v10596_v19  ;;  %v2020_v29 = vsel %vm806_vm8, %v1975_v61, %v2019_v35 }
 0x2be   : > { %v2021_v37 = vsel %vm1884_vm10, %v2004_v21, %v2005_v20 }
 0x2bf   : > { %v2022_v22 = vsel %vm806_vm8, %v1979_v55, %v2021_v37  ;;  %v2220_v18 = vpop.permute.xlu1 %2219  ;;  %v11388_v26 = vpop.permute.xlu0 %11387 }
 0x2c0   : > { %v11390_v17 = vunpack.i.h.bf16 %v11388_v26  ;;  %v11389_v5 = vunpack.i.l.bf16 %v11388_v26  ;;  %v10591_v56 = vcombine.high %v2020_v29, %v2022_v22  ;;  %v10590_v53 = vcombine.low %v2020_v29, %v2022_v22 }
 0x2c1   : > { %v2245_v44 = vrot.slane %v2220_v18, 4 }
 0x2c2   : > { %v2246_v38 = vrot.slane %v11390_v17, 4  ;;  %v2244_v9 = vrot.slane %v11389_v5, 4  ;;  %2836 = vmatprep.subr.bf16.mxu0 %v10591_v56 }
 0x2c3   : > { %v11393_v54 = vpop.permute.xlu1 %11392  ;;  %2837 = vmatpush2.bf16.msra.mxu0 %v10590_v53  ;;  %v1967_v16 = vpop.permute.xlu0 %1966 }
 0x2c4   : > { %v11395_v2 = vunpack.i.h.bf16 %v11393_v54  ;;  %v11394_v51 = vunpack.i.l.bf16 %v11393_v54  ;;  %v2259_v61 = vsel %vm1884_vm10, %v2243_v4, %v2244_v9  ;;  %v2261_v6 = vsel %vm1884_vm10, %v2245_v44, %v2246_v38  ;;  %v11527_v44 = vld [vmem:[%s18114_s4] ss:$8 sps:$4 sm:$0xff]   ;;  %v11530_v54 = vld [vmem:[%s18114_s4 + $0x14] ss:$8 sps:$4 sm:$0xff]  }
 0x2c5   : > { %v2260_v0 = vsel %vm806_vm8, %v2216_v34, %v2259_v61  ;;  %v1998_v7 = vrot.slane %v1967_v16, 4  ;;  %v2262_v24 = vsel %vm806_vm8, %v2220_v18, %v2261_v6 }
 0x2c6   : > { %v2001_v11 = vrot.slane %v11395_v2, 4  ;;  %v1999_v20 = vrot.slane %v11394_v51, 4  ;;  %v10593_v10 = vcombine.high %v2260_v0, %v2262_v24  ;;  %v10592_v19 = vcombine.low %v2260_v0, %v2262_v24  ;;  %v11536_v24 = vld [vmem:[%s18114_s4 + $0x34] ss:$8 sps:$4 sm:$0xff]  }
 0x2c7   : > { %v2208_v57 = vpop.permute.xlu1 %2207  ;;  %v1971_v55 = vpop.permute.xlu0 %1970 }
 0x2c8   : > { %v2014_v35 = vsel %vm1884_vm10, %v1998_v7, %v1999_v20  ;;  %v2000_v21 = vrot.slane %v1971_v55, 4  ;;  %2949 = vmatprep.subr.bf16.mxu1 %v10593_v10  ;;  %v2239_v53 = vrot.slane %v2208_v57, 4  ;;  %v11533_v20 = vld [vmem:[%s18114_s4 + $0x24] ss:$8 sps:$4 sm:$0xff]   ;;  %v11535_v7 = vld [vmem:[%s18114_s4 + $0x20] ss:$8 sps:$4 sm:$0xff]  }
 0x2c9   : > { %2950 = vmatpush2.bf16.msra.mxu1 %v10592_v19  ;;  %v2016_v34 = vsel %vm806_vm8, %v1967_v16, %v2014_v35  ;;  %v11541_v10 = vld [vmem:[%s18114_s4 + $0x40] ss:$8 sps:$4 sm:$0xff]   ;;  %v11542_v19 = vld [vmem:[%s18114_s4 + $0x54] ss:$8 sps:$4 sm:$0xff]   ;;  %v11544_v35 = vld [vmem:[%s18114_s4 + $0x50] ss:$8 sps:$4 sm:$0xff]  }
 0x2ca   : > { %v2017_v37 = vsel %vm1884_vm10, %v2000_v21, %v2001_v11  ;;  %v11532_v11 = vld [vmem:[%s18114_s4 + $0x10] ss:$8 sps:$4 sm:$0xff]   ;;  %v11545_v21 = vld [vmem:[%s18114_s4 + $0x64] ss:$8 sps:$4 sm:$0xff]  }
 0x2cb   : > { %v2018_v29 = vsel %vm806_vm8, %v1971_v55, %v2017_v37  ;;  %v2212_v22 = vpop.permute.xlu1 %2211  ;;  %v11398_v26 = vpop.permute.xlu0 %11397  ;;  %v11539_v55 = vld [vmem:[%s18114_s4 + $0x44] ss:$8 sps:$4 sm:$0xff]   ;;  %v11547_v37 = vld [vmem:[%s18114_s4 + $0x60] ss:$8 sps:$4 sm:$0xff]  }
 0x2cc   : > { %v11400_v17 = vunpack.i.h.bf16 %v11398_v26  ;;  %v11399_v5 = vunpack.i.l.bf16 %v11398_v26  ;;  %v10587_v18 = vcombine.high %v2016_v34, %v2018_v29  ;;  %v10586_v56 = vcombine.low %v2016_v34, %v2018_v29  ;;  %v11548_v34 = vld [vmem:[%s18114_s4 + $0x74] ss:$8 sps:$4 sm:$0xff]   ;;  %v11550_v29 = vld [vmem:[%s18114_s4 + $0x70] ss:$8 sps:$4 sm:$0xff]  }
 0x2cd   : > { %v2241_v4 = vrot.slane %v2212_v22, 4 }
 0x2ce   : > { %v2242_v38 = vrot.slane %v11400_v17, 4  ;;  %v2240_v9 = vrot.slane %v11399_v5, 4  ;;  %2838 = vmatprep.subr.bf16.mxu0 %v10587_v18 }
 0x2cf   : > { %2839 = vmatpush2.bf16.msra.mxu0 %v10586_v56 }
 0x2d0   : > { %v2255_v16 = vsel %vm1884_vm10, %v2239_v53, %v2240_v9  ;;  %v2257_v2 = vsel %vm1884_vm10, %v2241_v4, %v2242_v38 }
 0x2d1   : > { %v2256_v51 = vsel %vm806_vm8, %v2208_v57, %v2255_v16  ;;  %v2258_v61 = vsel %vm806_vm8, %v2212_v22, %v2257_v2  ;;  %v11538_v57 = vld [vmem:[%s18114_s4 + $0x30] ss:$8 sps:$4 sm:$0xff]   ;;  %v18274_v22 = vmov 0  }
 0x2d2   : > { %2841 = vmatmul.mubr.bf16.vlgmr.msra.gmra.mxu0 %v11527_v44  ;;  %v10589_v0 = vcombine.high %v2256_v51, %v2258_v61  ;;  %v10588_v6 = vcombine.low %v2256_v51, %v2258_v61 }
 0x2d3   : > { %10607 = vmatprep.mubr.msk.bf16.mxu0 %vm2783_vm11, %v11530_v54 }
 0x2d4   : > { %2951 = vmatprep.subr.bf16.mxu1 %v10589_v0 }
 0x2d5   : > { %2952 = vmatpush2.bf16.msra.mxu1 %v10588_v6 }
 0x2d8   : > { %2954 = vmatmul.mubr.bf16.vlgmr.msra.gmra.mxu1 %v11527_v44  ;;  %v13972_v26 = vpop.permute.xlu0 %2443  ;;  %v13974_v17 = vpop.permute.xlu1 %2448 }
 0x2d9   : > { %10615 = vmatprep.mubr.msk.bf16.mxu1 %vm2783_vm11, %v11530_v54 }
 0x2da   : > { %2851 = vmatmul.mubr.bf16.gmra.mxu0 %v11532_v11 }
 0x2db   : > { %10608 = vmatprep.mubr.msk.bf16.mxu0 %vm2783_vm11, %v11533_v20 }
 0x2dc   : > { %v13976_v5 = vpop.permute.xlu0 %2433  ;;  %v13978_v18 = vpop.permute.xlu1 %2438 }
 0x2e0   : > { %2964 = vmatmul.mubr.bf16.gmra.mxu1 %v11532_v11  ;;  %v13980_v56 = vpop.permute.xlu0 %2423  ;;  %v13982_v53 = vpop.permute.xlu1 %2428 }
 0x2e1   : > { %10616 = vmatprep.mubr.msk.bf16.mxu1 %vm2783_vm11, %v11533_v20 }
 0x2e2   : > { %2861 = vmatmul.mubr.bf16.gmra.mxu0 %v11535_v7 }
 0x2e3   : > { %10609 = vmatprep.mubr.msk.bf16.mxu0 %vm2783_vm11, %v11536_v24 }
 0x2e4   : > { %v13984_v4 = vpop.permute.xlu0 %2413  ;;  %v13986_v38 = vpop.permute.xlu1 %2418 }
 0x2e8   : > { %2974 = vmatmul.mubr.bf16.gmra.mxu1 %v11535_v7  ;;  %v13988_v9 = vpop.permute.xlu0 %2403  ;;  %v13990_v44 = vpop.permute.xlu1 %2408 }
 0x2e9   : > { %10617 = vmatprep.mubr.msk.bf16.mxu1 %vm2783_vm11, %v11536_v24 }
 0x2ea   : > { %2871 = vmatmul.mubr.bf16.gmra.mxu0 %v11538_v57 }
 0x2eb   : > { %10610 = vmatprep.mubr.msk.bf16.mxu0 %vm2783_vm11, %v11539_v55 }
 0x2ec   : > { %v13992_v2 = vpop.permute.xlu0 %2393  ;;  %v13994_v61 = vpop.permute.xlu1 %2398 }
 0x2f0   : > { %2984 = vmatmul.mubr.bf16.gmra.mxu1 %v11538_v57  ;;  %v13998_v7 = vpop.permute.xlu0 %2383 }
 0x2f1   : > { %10618 = vmatprep.mubr.msk.bf16.mxu1 %vm2783_vm11, %v11539_v55  ;;  %v14000_v55 = vpop.permute.xlu1 %2388 }
 0x2f2   : > { %2881 = vmatmul.mubr.bf16.gmra.mxu0 %v11541_v10 }
 0x2f3   : > { %10611 = vmatprep.mubr.msk.bf16.mxu0 %vm2783_vm11, %v11542_v19 }
 0x2f5   : > { %v14009_v40 = vpop.permute.xlu1 %2378 }
 0x2f8   : > { %2994 = vmatmul.mubr.bf16.gmra.mxu1 %v11541_v10 }
 0x2f9   : > { %10619 = vmatprep.mubr.msk.bf16.mxu1 %vm2783_vm11, %v11542_v19 }
 0x2fa   : > { %2891 = vmatmul.mubr.bf16.gmra.mxu0 %v11544_v35 }
 0x2fb   : > { %10612 = vmatprep.mubr.msk.bf16.mxu0 %vm2783_vm11, %v11545_v21 }
 0x300   : > { %3004 = vmatmul.mubr.bf16.gmra.mxu1 %v11544_v35 }
 0x301   : > { %10620 = vmatprep.mubr.msk.bf16.mxu1 %vm2783_vm11, %v11545_v21 }
 0x302   : > { %2901 = vmatmul.mubr.bf16.gmra.mxu0 %v11547_v37 }
 0x303   : > { %10613 = vmatprep.mubr.msk.bf16.mxu0 %vm2783_vm11, %v11548_v34 }
 0x308   : > { %3014 = vmatmul.mubr.bf16.gmra.mxu1 %v11547_v37  ;;  %v14004_v37 = vpop.permute.xlu0 %2373 }
 0x309   : > { %10621 = vmatprep.mubr.msk.bf16.mxu1 %vm2783_vm11, %v11548_v34 }
 0x30a   : > { %2911 = vmatmul.mubr.bf16.gmra.mxu0 %v11550_v29 }
 0x30b   : > { %3483 = vmatprep.mubr.bf16.mxu0 %v18274_v22 }
 0x310   : > { %3024 = vmatmul.mubr.bf16.gmra.mxu1 %v11550_v29 }
 0x311   : > { %3596 = vmatprep.mubr.bf16.mxu1 %v18274_v22 }
 0x392   : > { %v2842_v54 = vpop.f32.mrf.mxu0 }
 0x393   : > { %v2843_v34 = vadd.f32 %v2842_v54, %v14004_v37 }
 0x394   : > { %v2844_v16 = vpop.f32.mrf.mxu0 }
 0x395   : > { %v2845_v31 = vadd.f32 %v2844_v16, %v14004_v37  ;;  %11659 = vtanh.f32 %v2843_v34 }
 0x396   : > { %v2846_v51 = vpop.f32.mrf.mxu0 }
 0x397   : > { %v2847_v33 = vadd.f32 %v2846_v51, %v14009_v40  ;;  %11661 = vtanh.f32 %v2845_v31 }
 0x398   : > { %v2848_v0 = vpop.f32.mrf.mxu0  ;;  %v2955_v6 = vpop.f32.mrf.mxu1 }
 0x399   : > { %v2849_v60 = vadd.f32 %v2848_v0, %v14009_v40  ;;  %v2956_v1 = vadd.f32 %v2955_v6, %v14004_v37  ;;  %11663 = vtanh.f32 %v2847_v33 }
 0x39a   : > { %v2852_v11 = vpop.f32.mrf.mxu0  ;;  %v13996_v20 = vpop.f32.mrf.mxu1 }
 0x39b   : > { %v2853_v54 = vadd.f32 %v2852_v11, %v13998_v7  ;;  %11665 = vtanh.f32 %v2849_v60 }
 0x39c   : > { %v2854_v24 = vpop.f32.mrf.mxu0  ;;  %v2959_v57 = vpop.f32.mrf.mxu1  ;;  %11667 = vtanh.f32 %v2956_v1 }
 0x39d   : > { %v2855_v45 = vadd.f32 %v2854_v24, %v13998_v7  ;;  %v2960_v51 = vadd.f32 %v2959_v57, %v14009_v40  ;;  %11669 = vtanh.f32 %v2853_v54 }
 0x39e   : > { %v2856_v10 = vpop.f32.mrf.mxu0  ;;  %v14002_v19 = vpop.f32.mrf.mxu1 }
 0x39f   : > { %v2857_v0 = vadd.f32 %v2856_v10, %v14000_v55  ;;  %11671 = vtanh.f32 %v2855_v45 }
 0x3a0   : > { %v2858_v35 = vpop.f32.mrf.mxu0  ;;  %v2965_v21 = vpop.f32.mrf.mxu1  ;;  %11673 = vtanh.f32 %v2960_v51 }
 0x3a1   : > { %v2859_v6 = vadd.f32 %v2858_v35, %v14000_v55  ;;  %v2966_v31 = vadd.f32 %v2965_v21, %v13998_v7  ;;  %11675 = vtanh.f32 %v2857_v0 }
 0x3a2   : > { %v2862_v29 = vpop.f32.mrf.mxu0  ;;  %v14007_v8 = vpop.f32.mrf.mxu1 }
 0x3a3   : > { %v2863_v24 = vadd.f32 %v2862_v29, %v13992_v2  ;;  %11677 = vtanh.f32 %v2859_v6 }
 0x3a4   : > { %v2864_v52 = vpop.f32.mrf.mxu0  ;;  %v2969_v13 = vpop.f32.mrf.mxu1  ;;  %11679 = vtanh.f32 %v2966_v31 }
 0x3a5   : > { %v2865_v60 = vadd.f32 %v2864_v52, %v13992_v2  ;;  %v2970_v10 = vadd.f32 %v2969_v13, %v14000_v55  ;;  %11681 = vtanh.f32 %v2863_v24  ;;  %v14031_v52 = vpop.eup %11659 }
 0x3a6   : > { %v2866_v58 = vpop.f32.mrf.mxu0  ;;  %v14015_v27 = vpop.f32.mrf.mxu1 }
 0x3a7   : > { %v2867_v54 = vadd.f32 %v2866_v58, %v13994_v61  ;;  %11683 = vtanh.f32 %v2865_v60  ;;  %v14035_v31 = vpop.eup %11661 }
 0x3a8   : > { %v2868_v62 = vpop.f32.mrf.mxu0  ;;  %v2975_v16 = vpop.f32.mrf.mxu1  ;;  %11685 = vtanh.f32 %v2970_v10  ;;  %18275 = vst [vmem:[#allocation43_spill] sm:$0xff] %v14035_v31 }
 0x3a9   : > { %v2869_v21 = vadd.f32 %v2868_v62, %v13994_v61  ;;  %v2976_v51 = vadd.f32 %v2975_v16, %v13992_v2  ;;  %11687 = vtanh.f32 %v2867_v54  ;;  %v14040_v60 = vpop.eup %11663 }
 0x3aa   : > { %v2872_v34 = vpop.f32.mrf.mxu0  ;;  %v2977_v42 = vpop.f32.mrf.mxu1 }
 0x3ab   : > { %v2873_v6 = vadd.f32 %v2872_v34, %v13988_v9  ;;  %v2978_v58 = vadd.f32 %v2977_v42, %v13992_v2  ;;  %11689 = vtanh.f32 %v2869_v21  ;;  %v14042_v50 = vpop.eup %11665 }
 0x3ac   : > { %v2874_v11 = vpop.f32.mrf.mxu0  ;;  %v2979_v33 = vpop.f32.mrf.mxu1  ;;  %18276 = vst [vmem:[#allocation44_spill] sm:$0xff] %v14042_v50  ;;  %11691 = vtanh.f32 %v2976_v51 }
 0x3ad   : > { %v2875_v10 = vadd.f32 %v2874_v11, %v13988_v9  ;;  %11693 = vtanh.f32 %v2873_v6  ;;  %v2980_v42 = vadd.f32 %v2979_v33, %v13994_v61 }
 0x3ae   : > { %v2876_v57 = vpop.f32.mrf.mxu0  ;;  %v2981_v1 = vpop.f32.mrf.mxu1  ;;  %11695 = vtanh.f32 %v2978_v58 }
 0x3af   : > { %v2877_v21 = vadd.f32 %v2876_v57, %v13990_v44  ;;  %v2982_v6 = vadd.f32 %v2981_v1, %v13994_v61 }
 0x3b0   : > { %v2878_v35 = vpop.f32.mrf.mxu0  ;;  %v2985_v45 = vpop.f32.mrf.mxu1 }
 0x3b1   : > { %v2879_v57 = vadd.f32 %v2878_v35, %v13990_v44 }
 0x3b2   : > { %v2882_v29 = vpop.f32.mrf.mxu0  ;;  %v14029_v0 = vpop.f32.mrf.mxu1 }
 0x3b3   : > { %v2883_v13 = vadd.f32 %v2882_v29, %v13984_v4  ;;  %v14047_v29 = vpop.eup %11667 }
 0x3b4   : > { %v2884_v24 = vpop.f32.mrf.mxu0  ;;  %v14038_v62 = vpop.f32.mrf.mxu1 }
 0x3b5   : > { %v3066_v16 = vsub.f32 0.0, %v2883_v13  ;;  %v14051_v28 = vpop.eup %11669 }
 0x3b6   : > { %v2886_v34 = vpop.f32.mrf.mxu0  ;;  %v14045_v32 = vpop.f32.mrf.mxu1 }
 0x3b7   : > { %v3098_v2 = vmul.f32 1.442695, %v3066_v16  ;;  %v2887_v54 = vadd.f32 %v2886_v34, %v13986_v38  ;;  %v14054_v41 = vpop.eup %11671  ;;  %v2992_v59 = vadd.f32 %v14045_v32, %v13990_v44 }
 0x3b8   : > { %v2888_v13 = vpop.f32.mrf.mxu0  ;;  %v2995_v51 = vpop.f32.mrf.mxu1 }
 0x3b9   : > { %11697 = vpow2.f32 %v3098_v2  ;;  %v3070_v11 = vsub.f32 0.0, %v2887_v54  ;;  %v14056_v48 = vpop.eup %11673  ;;  %v2996_v33 = vadd.f32 %v2995_v51, %v13984_v4 }
 0x3ba   : > { %11699 = vtanh.f32 %v2875_v10  ;;  %v2892_v16 = vpop.f32.mrf.mxu0  ;;  %v2997_v34 = vpop.f32.mrf.mxu1 }
 0x3bb   : > { %v14060_v15 = vpop.eup %11675  ;;  %11701 = vtanh.f32 %v2980_v42  ;;  %v3106_v58 = vmul.f32 1.442695, %v3070_v11  ;;  %v2893_v43 = vadd.f32 %v2892_v16, %v13980_v56  ;;  %v3068_v2 = vsub.f32 0.0, %v2996_v33 }
 0x3bc   : > { %v14064_v30 = vpop.eup %11677  ;;  %11703 = vtanh.f32 %v2877_v21  ;;  %v2894_v54 = vpop.f32.mrf.mxu0  ;;  %v2986_v42 = vadd.f32 %v2985_v45, %v13988_v9  ;;  %v2885_v21 = vadd.f32 %v2884_v24, %v13984_v4  ;;  %v2990_v24 = vadd.f32 %v14038_v62, %v13990_v44 }
 0x3bd   : > { %v2999_v10 = vpop.f32.mrf.mxu1  ;;  %v14066_v46 = vpop.eup %11679  ;;  %11705 = vpow2.f32 %v3106_v58  ;;  %v3074_v61 = vsub.f32 0.0, %v2893_v43  ;;  %v3102_v51 = vmul.f32 1.442695, %v3068_v2  ;;  %v2889_v43 = vadd.f32 %v2888_v13, %v13986_v38 }
 0x3be   : > { %v14068_v1 = vpop.eup %11681  ;;  %11707 = vtanh.f32 %v2982_v6  ;;  %v3000_v35 = vadd.f32 %v2999_v10, %v13986_v38  ;;  %v2896_v11 = vpop.f32.mrf.mxu0  ;;  %v2988_v10 = vadd.f32 %v14029_v0, %v13988_v9  ;;  %v3067_v3 = vsub.f32 0.0, %v2885_v21 }
 0x3bf   : > { %v3001_v16 = vpop.f32.mrf.mxu1  ;;  %v14072_v47 = vpop.eup %11683  ;;  %11709 = vtanh.f32 %v2879_v57  ;;  %v3114_v33 = vmul.f32 1.442695, %v3074_v61  ;;  %v2897_v63 = vadd.f32 %v2896_v11, %v13982_v53  ;;  %v2998_v39 = vadd.f32 %v2997_v34, %v13984_v4 }
 0x3c0   : > { %v14076_v58 = vpop.eup %11685  ;;  %11711 = vpow2.f32 %v3102_v51  ;;  %v3072_v6 = vsub.f32 0.0, %v3000_v35  ;;  %v2898_v45 = vpop.f32.mrf.mxu0  ;;  %v3071_v0 = vsub.f32 0.0, %v2889_v43  ;;  %v3002_v4 = vadd.f32 %v3001_v16, %v13986_v38 }
 0x3c1   : > { %v3005_v2 = vpop.f32.mrf.mxu1  ;;  %v14079_v49 = vpop.eup %11687  ;;  %11713 = vpow2.f32 %v3114_v33  ;;  %v3078_v57 = vsub.f32 0.0, %v2897_v63 }
 0x3c2   : > { %v14083_v23 = vpop.eup %11689  ;;  %11715 = vtanh.f32 %v2986_v42  ;;  %v3110_v61 = vmul.f32 1.442695, %v3072_v6  ;;  %v3006_v13 = vadd.f32 %v3005_v2, %v13980_v56  ;;  %v2902_v51 = vpop.f32.mrf.mxu0  ;;  %v2895_v42 = vadd.f32 %v2894_v54, %v13980_v56 }
 0x3c3   : > { %v3007_v35 = vpop.f32.mrf.mxu1  ;;  %v14088_v11 = vpop.eup %11691  ;;  %v3122_v36 = vmul.f32 1.442695, %v3078_v57  ;;  %v2903_v9 = vadd.f32 %v2902_v51, %v13976_v5  ;;  %v3100_v54 = vmul.f32 1.442695, %v3067_v3  ;;  %v3108_v14 = vmul.f32 1.442695, %v3071_v0 }
 0x3c4   : > { %v14092_v63 = vpop.eup %11693  ;;  %11717 = vpow2.f32 %v3110_v61  ;;  %v3076_v62 = vsub.f32 0.0, %v3006_v13  ;;  %v2904_v33 = vpop.f32.mrf.mxu0  ;;  %v3069_v61 = vsub.f32 0.0, %v2998_v39  ;;  %v3075_v22 = vsub.f32 0.0, %v2895_v42 }
 0x3c5   : > { %v3009_v6 = vpop.f32.mrf.mxu1  ;;  %v14095_v2 = vpop.eup %11695  ;;  %11719 = vpow2.f32 %v3122_v36  ;;  %v3082_v34 = vsub.f32 0.0, %v2903_v9  ;;  %v3073_v16 = vsub.f32 0.0, %v3002_v4 }
 0x3c6   : > { %18277 = vst [vmem:[#allocation45_spill] sm:$0xff] %v14095_v2  ;;  %v11698_v21 = vpop.eup %11697  ;;  %11721 = vtanh.f32 %v2988_v10  ;;  %v3118_v57 = vmul.f32 1.442695, %v3076_v62  ;;  %v2906_v51 = vpop.f32.mrf.mxu0  ;;  %v3104_v3 = vmul.f32 1.442695, %v3069_v61  ;;  %v3010_v31 = vadd.f32 %v3009_v6, %v13982_v53 }
 0x3c7   : > { %v3011_v43 = vpop.f32.mrf.mxu1  ;;  %v14100_v12 = vpop.eup %11699  ;;  %11723 = vtanh.f32 %v2990_v24  ;;  %v3130_v13 = vmul.f32 1.442695, %v3082_v34  ;;  %v3162_v44 = vadd.f32 1.0, %v11698_v21  ;;  %v2899_v24 = vadd.f32 %v2898_v45, %v13982_v53 }
 0x3c8   : > { %v14102_v25 = vpop.eup %11701  ;;  %11725 = vpow2.f32 %v3118_v57  ;;  %v2908_v32 = vpop.f32.mrf.mxu0  ;;  %v3116_v42 = vmul.f32 1.442695, %v3075_v22  ;;  %v3008_v34 = vadd.f32 %v3007_v35, %v13980_v56  ;;  %v3112_v4 = vmul.f32 1.442695, %v3073_v16 }
 0x3c9   : > { %v3015_v36 = vpop.f32.mrf.mxu1  ;;  %v14104_v38 = vpop.eup %11703  ;;  %11727 = vtanh.f32 %v2992_v59  ;;  %v2907_v22 = vadd.f32 %v2906_v51, %v13978_v18 }
 0x3ca   : > { %v11706_v10 = vpop.eup %11705  ;;  %11729 = vpow2.f32 %v3130_v13  ;;  %v2912_v57 = vpop.f32.mrf.mxu0  ;;  %v2905_v13 = vadd.f32 %v2904_v33, %v13976_v5  ;;  %v3077_v35 = vsub.f32 0.0, %v3008_v34  ;;  %v3080_v33 = vsub.f32 0.0, %v3010_v31 }
 0x3cb   : > { %v3017_v9 = vpop.f32.mrf.mxu1  ;;  %v14106_v62 = vpop.eup %11707  ;;  %11731 = vpow2.f32 %v3100_v54  ;;  %v3166_v39 = vadd.f32 1.0, %v11706_v10  ;;  %v3016_v31 = vadd.f32 %v3015_v36, %v13976_v5 }
 0x3cc   : > { %18278 = vst [vmem:[#allocation46_spill] sm:$0xff] %v14106_v62  ;;  %v14109_v0 = vpop.eup %11709  ;;  %11733 = vpow2.f32 %v3108_v14  ;;  %v3079_v14 = vsub.f32 0.0, %v2899_v24  ;;  %v2914_v2 = vpop.f32.mrf.mxu0  ;;  %v3083_v16 = vsub.f32 0.0, %v2905_v13  ;;  %v3086_v24 = vsub.f32 0.0, %v2907_v22 }
 0x3cd   : > { %v3019_v21 = vpop.f32.mrf.mxu1  ;;  %v11712_v59 = vpop.eup %11711  ;;  %11735 = vrcp.f32 %v3162_v44  ;;  %v2913_v13 = vadd.f32 %v2912_v57, %v13972_v26 }
 0x3ce   : > { %v11714_v54 = vpop.eup %11713  ;;  %11737 = vrcp.f32 %v3166_v39  ;;  %v3164_v61 = vadd.f32 1.0, %v11712_v59  ;;  %v3012_v39 = vadd.f32 %v3011_v43, %v13982_v53  ;;  %v2909_v59 = vadd.f32 %v2908_v32, %v13978_v18 }
 0x3cf   : > { %v14114_v10 = vpop.eup %11715  ;;  %v3170_v45 = vadd.f32 1.0, %v11714_v54  ;;  %11739 = vpow2.f32 %v3104_v3  ;;  %v3021_v56 = vpop.f32.mrf.mxu1  ;;  %v3124_v51 = vmul.f32 1.442695, %v3079_v14  ;;  %v3126_v53 = vmul.f32 1.442695, %v3080_v33 }
 0x3d0   : > { %18279 = vst [vmem:[#allocation47_spill] sm:$0xff] %v14114_v10  ;;  %11741 = vpow2.f32 %v3116_v42  ;;  %v3132_v32 = vmul.f32 1.442695, %v3083_v16  ;;  %v3018_v14 = vadd.f32 %v3017_v9, %v13976_v5  ;;  %v3138_v10 = vmul.f32 1.442695, %v3086_v24 }
 0x3d1   : > { %v11718_v44 = vpop.eup %11717  ;;  %11743 = vpow2.f32 %v3112_v4  ;;  %v3025_v42 = vpop.f32.mrf.mxu1  ;;  %v3120_v4 = vmul.f32 1.442695, %v3077_v35  ;;  %v2915_v35 = vadd.f32 %v2914_v2, %v13972_v26  ;;  %v3020_v36 = vadd.f32 %v3019_v21, %v13978_v18 }
 0x3d2   : > { %v11720_v50 = vpop.eup %11719  ;;  %11745 = vrcp.f32 %v3164_v61  ;;  %v3168_v6 = vadd.f32 1.0, %v11718_v44  ;;  %v2916_v61 = vpop.f32.mrf.mxu0  ;;  %v3084_v33 = vsub.f32 0.0, %v3016_v31  ;;  %v3022_v9 = vadd.f32 %v3021_v56, %v13978_v18 }
 0x3d3   : > { %v14119_v54 = vpop.eup %11721  ;;  %11747 = vrcp.f32 %v3170_v45  ;;  %v3174_v3 = vadd.f32 1.0, %v11720_v50  ;;  %v3081_v45 = vsub.f32 0.0, %v3012_v39  ;;  %v3087_v50 = vsub.f32 0.0, %v2909_v59 }
 0x3d4   : > { %18280 = vst [vmem:[#allocation48_spill] sm:$0xff] %v14119_v54  ;;  %v14121_v34 = vpop.eup %11723  ;;  %11749 = vrcp.f32 %v3168_v6  ;;  %v3027_v6 = vpop.f32.mrf.mxu1  ;;  %v2917_v5 = vadd.f32 %v2916_v61, %v13974_v17  ;;  %v3026_v61 = vadd.f32 %v3025_v42, %v13972_v26 }
 0x3d5   : > { %v11726_v44 = vpop.eup %11725  ;;  %11751 = vrcp.f32 %v3174_v3  ;;  %v3090_v3 = vsub.f32 0.0, %v2913_v13  ;;  %v3128_v2 = vmul.f32 1.442695, %v3081_v45  ;;  %v3140_v21 = vmul.f32 1.442695, %v3087_v50 }
 0x3d6   : > { %v14125_v43 = vpop.eup %11727  ;;  %11753 = vpow2.f32 %v3124_v51  ;;  %v3172_v62 = vadd.f32 1.0, %v11726_v44  ;;  %v3085_v51 = vsub.f32 0.0, %v3018_v14  ;;  %v3091_v44 = vsub.f32 0.0, %v2915_v35  ;;  %v3029_v13 = vpop.f32.mrf.mxu1 }
 0x3d7   : > { %18281 = vst [vmem:[#allocation49_spill] sm:$0xff] %v14125_v43  ;;  %v11730_v22 = vpop.eup %11729  ;;  %11755 = vpow2.f32 %v3120_v4  ;;  %v2918_v43 = vpop.f32.mrf.mxu0  ;;  %v3088_v4 = vsub.f32 0.0, %v3020_v36  ;;  %v3094_v56 = vsub.f32 0.0, %v2917_v5  ;;  %v3028_v45 = vadd.f32 %v3027_v6, %v13972_v26 }
 0x3d8   : > { %v14130_v57 = vpop.eup %11731  ;;  %v3178_v39 = vadd.f32 1.0, %v11730_v22  ;;  %11757 = vpow2.f32 %v3126_v53  ;;  %v2919_v31 = vadd.f32 %v2918_v43, %v13974_v17  ;;  %v3134_v53 = vmul.f32 1.442695, %v3084_v33  ;;  %v3031_v33 = vpop.f32.mrf.mxu1 }
 0x3d9   : > { %v14132_v16 = vpop.eup %11733  ;;  %11759 = vpow2.f32 %v3132_v32  ;;  %v3146_v22 = vmul.f32 1.442695, %v3090_v3  ;;  %v3089_v32 = vsub.f32 0.0, %v3022_v9  ;;  %v3148_v35 = vmul.f32 1.442695, %v3091_v44 }
 0x3da   : > { %v11736_v59 = vpop.eup %11735  ;;  %11761 = vpow2.f32 %v3138_v10  ;;  %v3136_v10 = vmul.f32 1.442695, %v3085_v51  ;;  %v3142_v42 = vmul.f32 1.442695, %v3088_v4  ;;  %v3095_v36 = vsub.f32 0.0, %v2919_v31 }
 0x3db   : > { %v11738_v24 = vpop.eup %11737  ;;  %11763 = vrcp.f32 %v3172_v62  ;;  %v14144_v43 = vmul.f32 %v11736_v59, %v14031_v52  ;;  %v3030_v26 = vadd.f32 %v3029_v13, %v13974_v17  ;;  %v3154_v52 = vmul.f32 1.442695, %v3094_v56 }
 0x3dc   : > { %v14137_v54 = vpop.eup %11739  ;;  %11765 = vrcp.f32 %v3178_v39  ;;  %v14147_v14 = vmul.f32 %v11738_v24, %v14040_v60  ;;  %v3092_v39 = vsub.f32 0.0, %v3026_v61  ;;  %v3144_v9 = vmul.f32 1.442695, %v3089_v32 }
 0x3dd   : > { %v11742_v18 = vpop.eup %11741  ;;  %11767 = vpow2.f32 %v3128_v2  ;;  %v3093_v60 = vsub.f32 0.0, %v3028_v45  ;;  %v3032_v2 = vadd.f32 %v3031_v33, %v13974_v17  ;;  %v3156_v24 = vmul.f32 1.442695, %v3095_v36 }
 0x3de   : > { %v14141_v50 = vpop.eup %11743  ;;  %11769 = vpow2.f32 %v3140_v21  ;;  %v3274_v6 = vpack.c.bf16 %v14147_v14, %v14144_v43  ;;  %v3150_v13 = vmul.f32 1.442695, %v3092_v39  ;;  %v11552_v43 = vld [vmem:[%s18116_s6 + $0x8] sm:$0xff]   ;;  %v11553_v14 = vld [vmem:[%s18116_s6 + $0x10] sm:$0xff]  }
 0x3df   : > { %v11746_v62 = vpop.eup %11745  ;;  %11771 = vpow2.f32 %v3134_v53  ;;  %v3096_v53 = vsub.f32 0.0, %v3030_v26  ;;  %v3097_v61 = vsub.f32 0.0, %v3032_v2 }
 0x3e0   : > { %v11748_v3 = vpop.eup %11747  ;;  %11773 = vpow2.f32 %v3146_v22  ;;  %v14154_v21 = vmul.f32 %v11746_v62, %v14047_v29  ;;  %v3167_v62 = vadd.f32 1.0, %v14132_v16 }
 0x3e1   : > { %v11750_v5 = vpop.eup %11749  ;;  %11775 = vpow2.f32 %v3136_v10  ;;  %v14160_v44 = vmul.f32 %v11748_v3, %v14051_v28  ;;  %v3152_v28 = vmul.f32 1.442695, %v3093_v60  ;;  %v3158_v45 = vmul.f32 1.442695, %v3096_v53 }
 0x3e2   : > { %v11752_v59 = vpop.eup %11751  ;;  %v14157_v51 = vmul.f32 %v11750_v5, %v14056_v48  ;;  %11777 = vpow2.f32 %v3148_v35  ;;  %v3160_v36 = vmul.f32 1.442695, %v3097_v61  ;;  %v3171_v3 = vadd.f32 1.0, %v11742_v18 }
 0x3e3   : > { %v14163_v4 = vmul.f32 %v11752_v59, %v14060_v15  ;;  %v11754_v31 = vpop.eup %11753  ;;  %11779 = vpow2.f32 %v3142_v42 }
 0x3e4   : > { %v3276_v17 = vpack.c.bf16 %v14157_v51, %v14154_v21  ;;  %v14167_v29 = vpop.eup %11755  ;;  %11781 = vpow2.f32 %v3154_v52  ;;  %v4027_v21 = vld [vmem:[#allocation2 + $0xcc] sm:$0xf] }
 0x3e5   : > { %v3278_v48 = vpack.c.bf16 %v14163_v4, %v14160_v44  ;;  %v11758_v22 = vpop.eup %11757  ;;  %11783 = vpow2.f32 %v3144_v9  ;;  %v18289_v4 = vmov 0   ;;  %v4029_v51 = vld [vmem:[#allocation2 + $0xec] sm:$0xf] }
 0x3e6   : > { %v11760_v56 = vpop.eup %11759  ;;  %v3176_v15 = vadd.f32 1.0, %v11758_v22  ;;  %11785 = vpow2.f32 %v3156_v24 }
 0x3e7   : > { %v11762_v32 = vpop.eup %11761  ;;  %11787 = vpow2.f32 %v3150_v13  ;;  %v3179_v26 = vadd.f32 1.0, %v11760_v56  ;;  %v3175_v56 = vadd.f32 1.0, %v11754_v31 }
 0x3e8   : > { %v11764_v10 = vpop.eup %11763  ;;  %11789 = vrcp.f32 %v3176_v15  ;;  %v3182_v35 = vadd.f32 1.0, %v11762_v32 }
 0x3e9   : > { %v11766_v42 = vpop.eup %11765  ;;  %11791 = vpow2.f32 %v3152_v28 }
 0x3ea   : > { %v11768_v33 = vpop.eup %11767  ;;  %11793 = vrcp.f32 %v3182_v35  ;;  %v14179_v31 = vmul.f32 %v11766_v42, %v14068_v1 }
 0x3eb   : > { %v11770_v39 = vpop.eup %11769  ;;  %11795 = vpow2.f32 %v3158_v45 }
 0x3ec   : > { %v11772_v5 = vpop.eup %11771  ;;  %11797 = vrcp.f32 %v3167_v62  ;;  %v3183_v52 = vadd.f32 1.0, %v11770_v39 }
 0x3ed   : > { %v11774_v9 = vpop.eup %11773  ;;  %v3180_v60 = vadd.f32 1.0, %v11772_v5  ;;  %11799 = vpow2.f32 %v3160_v36 }
 0x3ee   : > { %v11776_v59 = vpop.eup %11775  ;;  %11801 = vrcp.f32 %v3171_v3  ;;  %v3186_v18 = vadd.f32 1.0, %v11774_v9  ;;  %v14173_v3 = vmul.f32 %v11764_v10, %v14066_v46 }
 0x3ef   : > { %v11778_v16 = vpop.eup %11777  ;;  %11803 = vrcp.f32 %v3179_v26  ;;  %v3181_v32 = vadd.f32 1.0, %v11776_v59 }
 0x3f0   : > { %v11780_v2 = vpop.eup %11779  ;;  %11805 = vrcp.f32 %v3183_v52  ;;  %v3187_v24 = vadd.f32 1.0, %v11778_v16  ;;  %v3163_v16 = vadd.f32 1.0, %v14130_v57  ;;  %v2968_v57 = vadd.f32 %v14007_v8, %v13998_v7 }
 0x3f1   : > { %v11782_v13 = vpop.eup %11781  ;;  %11807 = vrcp.f32 %v3180_v60  ;;  %v3184_v53 = vadd.f32 1.0, %v11780_v2  ;;  %v3177_v2 = vadd.f32 1.0, %v11768_v33 }
 0x3f2   : > { %v11784_v22 = vpop.eup %11783  ;;  %11809 = vrcp.f32 %v3187_v24  ;;  %v3190_v28 = vadd.f32 1.0, %v11782_v13  ;;  %v2972_v13 = vadd.f32 %v14015_v27, %v14000_v55  ;;  %v3165_v55 = vadd.f32 1.0, %v14137_v54 }
 0x3f3   : > { %v11786_v61 = vpop.eup %11785  ;;  %11811 = vrcp.f32 %v3184_v53  ;;  %v3185_v35 = vadd.f32 1.0, %v11784_v22  ;;  %v3173_v53 = vadd.f32 1.0, %v14167_v29 }
 0x3f4   : > { %v11788_v15 = vpop.eup %11787  ;;  %11813 = vrcp.f32 %v3190_v28  ;;  %v3191_v45 = vadd.f32 1.0, %v11786_v61  ;;  %v3169_v61 = vadd.f32 1.0, %v14141_v50  ;;  %v2958_v50 = vadd.f32 %v13996_v20, %v14004_v37 }
 0x3f5   : > { %v11790_v62 = vpop.eup %11789  ;;  %11815 = vrcp.f32 %v3186_v18  ;;  %v3188_v9 = vadd.f32 1.0, %v11788_v15 }
 0x3f6   : > { %v11792_v36 = vpop.eup %11791  ;;  %11817 = vrcp.f32 %v3191_v45  ;;  %v14176_v39 = vmul.f32 %v11790_v62, %v14076_v58 }
 0x3f7   : > { %v11794_v26 = vpop.eup %11793  ;;  %11819 = vrcp.f32 %v3175_v56  ;;  %v3189_v5 = vadd.f32 1.0, %v11792_v36  ;;  %v2962_v56 = vadd.f32 %v14002_v19, %v14009_v40 }
 0x3f8   : > { %v11796_v52 = vpop.eup %11795  ;;  %11821 = vrcp.f32 %v3181_v32  ;;  %v14182_v60 = vmul.f32 %v11794_v26, %v14079_v49  ;;  %v3280_v59 = vpack.c.bf16 %v14176_v39, %v14173_v3  ;;  %v4025_v3 = vld [vmem:[#allocation2 + $0xac] sm:$0xf]  ;;  %v4268_v39 = vld [vmem:[#allocation2 + $0xdc] sm:$0xf] }
 0x3f9   : > { %v14186_v46 = vpop.eup %11797  ;;  %11823 = vrcp.f32 %v3185_v35  ;;  %v3192_v58 = vadd.f32 1.0, %v11796_v52 }
 0x3fa   : > { %v11800_v10 = vpop.eup %11799  ;;  %11825 = vrcp.f32 %v3189_v5  ;;  %v3282_v1 = vpack.c.bf16 %v14182_v60, %v14179_v31 }
 0x3fb   : > { %v11802_v42 = vpop.eup %11801  ;;  %11827 = vrcp.f32 %v3192_v58  ;;  %v3193_v24 = vadd.f32 1.0, %v11800_v10  ;;  %v18282_v58 = vld [vmem:[#allocation48_spill] sm:$0xff] }
 0x3fc   : > { %v11804_v49 = vpop.eup %11803  ;;  %11829 = vrcp.f32 %v3188_v9 }
 0x3fd   : > { %v11806_v18 = vpop.eup %11805  ;;  %11831 = vrcp.f32 %v3193_v24  ;;  %v3243_v37 = vmul.f32 %v11804_v49, %v14072_v47  ;;  %v18283_v47 = vld [vmem:[#allocation49_spill] sm:$0xff] }
 0x3fe   : > { %v11808_v22 = vpop.eup %11807  ;;  %11833 = vrcp.f32 %v3163_v16 }
 0x3ff   : > { %v11810_v28 = vpop.eup %11809  ;;  %11835 = vrcp.f32 %v3177_v2  ;;  %v14201_v29 = vmul.f32 %v11808_v22, %v14088_v11  ;;  %v18284_v2 = vld [vmem:[#allocation46_spill] sm:$0xff] }
 0x400   : > { %v11812_v33 = vpop.eup %11811  ;;  %11837 = vtanh.f32 %v2972_v13  ;;  %v3251_v11 = vmul.f32 %v11810_v28, %v14100_v12 }
 0x401   : > { %v11814_v27 = vpop.eup %11813  ;;  %11839 = vrcp.f32 %v3173_v53  ;;  %v14204_v15 = vmul.f32 %v11812_v33, %v14102_v25  ;;  %v3247_v25 = vmul.f32 %v11806_v18, %v14083_v23  ;;  %v3235_v23 = vmul.f32 %v11802_v42, %v14054_v41  ;;  %v18285_v18 = vld [vmem:[#allocation47_spill] sm:$0xff] }
 0x402   : > { %v11816_v8 = vpop.eup %11815  ;;  %11841 = vtanh.f32 %v2968_v57  ;;  %v3254_v40 = vmul.f32 %v11814_v27, %v14104_v38  ;;  %v18288_v33 = vld [vmem:[#allocation43_spill] sm:$0xff] }
 0x403   : > { %v11818_v7 = vpop.eup %11817  ;;  %11843 = vrcp.f32 %v3169_v61  ;;  %v3284_v19 = vpack.c.bf16 %v14204_v15, %v14201_v29  ;;  %v3250_v62 = vmul.f32 %v11816_v8, %v14092_v63  ;;  %v3283_v5 = vpack.c.bf16 %v3247_v25, %v3243_v37  ;;  %v14275_v25 = vpop.permute.xlu1 %3343 }
 0x404   : > { %v11820_v54 = vpop.eup %11819  ;;  %11845 = vtanh.f32 %v2962_v56  ;;  %v3255_v32 = vmul.f32 %v11818_v7, %v14109_v0 }
 0x405   : > { %v11822_v45 = vpop.eup %11821  ;;  %11847 = vrcp.f32 %v3165_v55  ;;  %v3286_v36 = vpack.c.bf16 %v3254_v40, %v3250_v62  ;;  %v3239_v12 = vmul.f32 %v11820_v54, %v14064_v30  ;;  %v18286_v30 = vld [vmem:[#allocation44_spill] sm:$0xff] }
 0x406   : > { %v11824_v35 = vpop.eup %11823  ;;  %v3287_v20 = vpack.c.bf16 %v3255_v32, %v3251_v11  ;;  %11849 = vtanh.f32 %v2958_v50  ;;  %v3231_v22 = vmul.f32 %v14186_v46, %v18286_v30  ;;  %v11551_v40 = vld [vmem:[%s18116_s6] sm:$0xff]   ;;  %v14273_v32 = vpop.permute.xlu0 %3338 }
 0x407   : > { %v11826_v38 = vpop.eup %11825  ;;  %v3249_v24 = vmul.f32 %v11824_v35, %v18284_v2  ;;  %v3279_v13 = vpack.c.bf16 %v3239_v12, %v3235_v23  ;;  %v14279_v62 = vpop.permute.xlu1 %3333  ;;  %v18295_v2 = vld [vmem:[#allocation37_spill] sm:$0xff] }
 0x408   : > { %v11828_v26 = vpop.eup %11827  ;;  %3459 = vmatprep.subr.bf16.mxu0 %v3287_v20  ;;  %v3253_v10 = vmul.f32 %v11826_v38, %v18282_v58 }
 0x409   : > { %v11830_v52 = vpop.eup %11829  ;;  %3460 = vmatpush1.bf16.msra.mxu0 %v3286_v36  ;;  %v3256_v63 = vmul.f32 %v11828_v26, %v14121_v34  ;;  %v18287_v34 = vld [vmem:[#allocation45_spill] sm:$0xff] }
 0x40a   : > { %v11832_v0 = vpop.eup %11831  ;;  %3461 = vmatprep.subr.bf16.mxu0 %v3283_v5  ;;  %v3252_v53 = vmul.f32 %v11830_v52, %v18285_v18  ;;  %v3245_v42 = vmul.f32 %v11822_v45, %v18287_v34  ;;  %v14277_v45 = vpop.permute.xlu0 %3328  ;;  %v18291_v5 = vld [vmem:[#allocation35_spill] sm:$0xff] }
 0x40b   : > { %v11834_v9 = vpop.eup %11833  ;;  %v3257_v16 = vmul.f32 %v11832_v0, %v18283_v47  ;;  %v14283_v20 = vpop.permute.xlu1 %3323 }
 0x40c   : > { %v11836_v49 = vpop.eup %11835  ;;  %v3288_v61 = vpack.c.bf16 %v3256_v63, %v3252_v53  ;;  %v3227_v56 = vmul.f32 %v11834_v9, %v18288_v33  ;;  %v3285_v55 = vpack.c.bf16 %v3249_v24, %v3245_v42  ;;  %v18292_v63 = vld [vmem:[#allocation36_spill] sm:$0xff]  ;;  %v18297_v42 = vld [vmem:[#allocation39_spill] sm:$0xff] }
 0x40d   : > { %v11838_v57 = vpop.eup %11837  ;;  %3462 = vmatpush1.bf16.msra.mxu0 %v3282_v1  ;;  %v3289_v41 = vpack.c.bf16 %v3257_v16, %v3253_v10 }
 0x40e   : > { %v11840_v28 = vpop.eup %11839  ;;  %3463 = vmatprep.subr.bf16.mxu0 %v3279_v13  ;;  %v3241_v29 = vmul.f32 %v11838_v57, %v11836_v49  ;;  %v3275_v46 = vpack.c.bf16 %v3231_v22, %v3227_v56  ;;  %v14281_v35 = vpop.permute.xlu0 %3318  ;;  %v18296_v22 = vld [vmem:[#allocation38_spill] sm:$0xff] }
 0x40f   : > { %v11842_v27 = vpop.eup %11841  ;;  %3572 = vmatprep.subr.bf16.mxu1 %v3289_v41  ;;  %v3314_v0 = vpop.permute.xlu1 %3313 }
 0x410   : > { %v11844_v15 = vpop.eup %11843  ;;  %3573 = vmatpush1.bf16.msra.mxu1 %v3288_v61  ;;  %v3237_v31 = vmul.f32 %v11842_v27, %v11840_v28 }
 0x411   : > { %v11846_v8 = vpop.eup %11845  ;;  %3574 = vmatprep.subr.bf16.mxu1 %v3285_v55  ;;  %3464 = vmatpush1.bf16.msra.mxu0 %v3278_v48  ;;  %v4023_v48 = vld [vmem:[#allocation2 + $0x8c] sm:$0xf]  ;;  %v18300_v55 = vld [vmem:[#allocation27_spill] sm:$0xff] }
 0x412   : > { %v11848_v60 = vpop.eup %11847  ;;  %3465 = vmatprep.subr.bf16.mxu0 %v3275_v46  ;;  %v3281_v1 = vpack.c.bf16 %v3241_v29, %v3237_v31  ;;  %v3233_v7 = vmul.f32 %v11846_v8, %v11844_v15  ;;  %v3309_v37 = vpop.permute.xlu0 %3308  ;;  %v18301_v8 = vld [vmem:[#allocation40_spill] sm:$0xff] }
 0x413   : > { %v11850_v50 = vpop.eup %11849 }
 0x414   : > { %3575 = vmatpush1.bf16.msra.mxu1 %v3284_v19  ;;  %v3229_v54 = vmul.f32 %v11850_v50, %v11848_v60  ;;  %v4270_v19 = vld [vmem:[#allocation2 + $0xfc] sm:$0xf]  ;;  %v18302_v50 = vld [vmem:[#allocation28_spill] sm:$0xff] }
 0x415   : > { %3576 = vmatprep.subr.bf16.mxu1 %v3281_v1  ;;  %3466 = vmatpush1.bf16.msra.mxu0 %v3274_v6  ;;  %v11554_v6 = vld [vmem:[%s18116_s6 + $0x18] sm:$0xff]   ;;  %v11406_v11 = vpack.i.bf16 %v4270_v19, %v4268_v39  ;;  %v18308_v39 = vld [vmem:[#allocation29_spill] sm:$0xff] }
 0x416   : > { %v3277_v44 = vpack.c.bf16 %v3233_v7, %v3229_v54 }
 0x417   : > { %11407 = vrot.lane.b32.xlu0 %v11406_v11, %s18290_s13 }
 0x418   : > { %3577 = vmatpush1.bf16.msra.mxu1 %v3280_v59  ;;  %10630 = vmatmul.mubr.msk.bf16.vlgmr.msra.gmra.mxu0 %vm3426_vm12, %v11551_v40  ;;  %v11411_v59 = vpack.i.bf16 %v4025_v3, %v4023_v48 }
 0x419   : > { %3578 = vmatprep.subr.bf16.mxu1 %v3277_v44  ;;  %3493 = vmatprep.mubr.bf16.mxu0 %v18289_v4 }
 0x41c   : > { %3579 = vmatpush1.bf16.msra.mxu1 %v3276_v17  ;;  %v11401_v17 = vpack.i.bf16 %v4029_v51, %v4027_v21 }
 0x41e   : > { %11402 = vrot.lane.b32.xlu1 %v11401_v17, %s18290_s13 }
 0x41f   : > { %10638 = vmatmul.mubr.msk.bf16.vlgmr.msra.gmra.mxu1 %vm3426_vm12, %v11551_v40 }
 0x420   : > { %10631 = vmatmul.mubr.msk.bf16.gmra.mxu0 %vm3426_vm12, %v11552_v43  ;;  %3606 = vmatprep.mubr.bf16.mxu1 %v18289_v4 }
 0x421   : > { %3503 = vmatprep.mubr.bf16.mxu0 %v18289_v4 }
 0x422   : > { %11412 = vrot.lane.b32.xlu1 %v11411_v59, %s18290_s13 }
 0x427   : > { %10639 = vmatmul.mubr.msk.bf16.gmra.mxu1 %vm3426_vm12, %v11552_v43 }
 0x428   : > { %10632 = vmatmul.mubr.msk.bf16.gmra.mxu0 %vm3426_vm12, %v11553_v14  ;;  %3616 = vmatprep.mubr.bf16.mxu1 %v18289_v4 }
 0x429   : > { %3513 = vmatprep.mubr.bf16.mxu0 %v18289_v4 }
 0x42f   : > { %10640 = vmatmul.mubr.msk.bf16.gmra.mxu1 %vm3426_vm12, %v11553_v14 }
 0x430   : > { %10633 = vmatmul.mubr.msk.bf16.gmra.mxu0 %vm3426_vm12, %v11554_v6  ;;  %3626 = vmatprep.mubr.bf16.mxu1 %v18289_v4 }
 0x431   : > { %3523 = vmatprep.mubr.bf16.mxu0 %v18289_v4 }
 0x437   : > { %10641 = vmatmul.mubr.msk.bf16.gmra.mxu1 %vm3426_vm12, %v11554_v6  ;;  %v18305_v6 = vld [vmem:[#allocation41_spill] sm:$0xff] }
 0x438   : > { %3636 = vmatprep.mubr.bf16.mxu1 %v18289_v4 }
 0x4d8   : > { %v3485_v38 = vpop.f32.mrf.mxu0 }
 0x4d9   : > { %v3486_v36 = vadd.f32 %v3485_v38, %v3309_v37  ;;  %v18309_v38 = vld [vmem:[#allocation42_spill] sm:$0xff] }
 0x4da   : > { %v3487_v26 = vpop.f32.mrf.mxu0 }
 0x4db   : > { %v3677_v12 = vadd.f32 %v3486_v36, %v18291_v5  ;;  %v3488_v52 = vadd.f32 %v3487_v26, %v3309_v37 }
 0x4dc   : > { %v3489_v23 = vpop.f32.mrf.mxu0 }
 0x4dd   : > { %v3678_v9 = vadd.f32 %v3488_v52, %v18292_v63  ;;  %v3490_v58 = vadd.f32 %v3489_v23, %v3314_v0  ;;  %v14287_v47 = vmul.f32 0.70710677, %v3677_v12 }
 0x4de   : > { %v3491_v10 = vpop.f32.mrf.mxu0 }
 0x4df   : > { %18293 = vst [vmem:[#allocation48_spill] sm:$0xff] %v14287_v47  ;;  %v14289_v16 = vmul.f32 0.70710677, %v3678_v9  ;;  %v3681_v24 = vadd.f32 %v3490_v58, %v18295_v2  ;;  %v3492_v49 = vadd.f32 %v3491_v10, %v3314_v0  ;;  %v3598_v13 = vpop.f32.mrf.mxu1  ;;  %v18313_v10 = vld [vmem:[#allocation31_spill] sm:$0xff] }
 0x4e0   : > { %v3599_v18 = vadd.f32 %v3598_v13, %v3309_v37  ;;  %v3495_v53 = vpop.f32.mrf.mxu0 }
 0x4e1   : > { %18294 = vst [vmem:[#allocation49_spill] sm:$0xff] %v14289_v16  ;;  %v14294_v30 = vpack.c.bf16 %v14289_v16, %v14287_v47  ;;  %v3682_v57 = vadd.f32 %v3492_v49, %v18296_v22  ;;  %v3496_v41 = vadd.f32 %v3495_v53, %v14281_v35  ;;  %v3600_v34 = vpop.f32.mrf.mxu1  ;;  %v14300_v56 = vmul.f32 0.70710677, %v3681_v24 }
 0x4e2   : > { %v3679_v28 = vadd.f32 %v3599_v18, %v18297_v42  ;;  %v3601_v61 = vadd.f32 %v3600_v34, %v3309_v37  ;;  %v3497_v33 = vpop.f32.mrf.mxu0 }
 0x4e3   : > { %3829 = vst [vmem:[#allocation2 + $0x4] sm:$0xff] %v14294_v30  ;;  %18298 = vst [vmem:[#allocation46_spill] sm:$0xff] %v14300_v56  ;;  %v14302_v27 = vmul.f32 0.70710677, %v3682_v57  ;;  %v3685_v29 = vadd.f32 %v3496_v41, %v18300_v55  ;;  %v3498_v15 = vadd.f32 %v3497_v33, %v14281_v35  ;;  %v3602_v46 = vpop.f32.mrf.mxu1  ;;  %v18316_v57 = vld [vmem:[#allocation19_spill] sm:$0xff] }
 0x4e4   : > { %v3680_v31 = vadd.f32 %v3601_v61, %v18301_v8  ;;  %v3603_v60 = vadd.f32 %v3602_v46, %v3314_v0  ;;  %v3499_v1 = vpop.f32.mrf.mxu0  ;;  %v14313_v43 = vmul.f32 0.70710677, %v3679_v28  ;;  %v18317_v28 = vld [vmem:[#allocation32_spill] sm:$0xff] }
 0x4e5   : > { %18299 = vst [vmem:[#allocation47_spill] sm:$0xff] %v14302_v27  ;;  %v14309_v7 = vpack.c.bf16 %v14302_v27, %v14300_v56  ;;  %v3686_v40 = vadd.f32 %v3498_v15, %v18302_v50  ;;  %v3500_v54 = vadd.f32 %v3499_v1, %v14283_v20  ;;  %v3604_v44 = vpop.f32.mrf.mxu1  ;;  %v14319_v48 = vmul.f32 0.70710677, %v3685_v29  ;;  %v18318_v15 = vld [vmem:[#allocation20_spill] sm:$0xff]  ;;  %v18321_v50 = vld [vmem:[#allocation33_spill] sm:$0xff] }
 0x4e6   : > { %18303 = vst [vmem:[#allocation44_spill] sm:$0xff] %v14313_v43  ;;  %v14315_v14 = vmul.f32 0.70710677, %v3680_v31  ;;  %v3683_v21 = vadd.f32 %v3603_v60, %v18305_v6  ;;  %v3605_v51 = vadd.f32 %v3604_v44, %v3314_v0  ;;  %v3501_v17 = vpop.f32.mrf.mxu0  ;;  %v18311_v0 = vld [vmem:[#allocation30_spill] sm:$0xff] }
 0x4e7   : > { %3830 = vst [vmem:[#allocation2 + $0x24] sm:$0xff] %v14309_v7  ;;  %18306 = vst [vmem:[#allocation43_spill] sm:$0xff] %v14319_v48  ;;  %v14321_v3 = vmul.f32 0.70710677, %v3686_v40  ;;  %v3689_v59 = vadd.f32 %v3500_v54, %v18308_v39  ;;  %v3502_v19 = vadd.f32 %v3501_v17, %v14283_v20  ;;  %v3608_v11 = vpop.f32.mrf.mxu1 }
 0x4e8   : > { %18304 = vst [vmem:[#allocation45_spill] sm:$0xff] %v14315_v14  ;;  %v14327_v37 = vpack.c.bf16 %v14315_v14, %v14313_v43  ;;  %v3684_v36 = vadd.f32 %v3605_v51, %v18309_v38  ;;  %v3609_v26 = vadd.f32 %v3608_v11, %v14281_v35  ;;  %v3505_v5 = vpop.f32.mrf.mxu0  ;;  %v14335_v52 = vmul.f32 0.70710677, %v3683_v21  ;;  %v18324_v51 = vld [vmem:[#allocation21_spill] sm:$0xff]  ;;  %v18325_v11 = vld [vmem:[#allocation34_spill] sm:$0xff] }
 0x4e9   : > { %18307 = vst [vmem:[#allocation35_spill] sm:$0xff] %v14321_v3  ;;  %v14333_v12 = vpack.c.bf16 %v14321_v3, %v14319_v48  ;;  %v3690_v23 = vadd.f32 %v3502_v19, %v18311_v0  ;;  %v3506_v63 = vadd.f32 %v3505_v5, %v14277_v45  ;;  %v3610_v9 = vpop.f32.mrf.mxu1  ;;  %v14345_v53 = vmul.f32 0.70710677, %v3689_v59  ;;  %v18326_v5 = vld [vmem:[#allocation22_spill] sm:$0xff] }
 0x4ea   : > { %18310 = vst [vmem:[#allocation36_spill] sm:$0xff] %v14335_v52  ;;  %3877 = vst [vmem:[#allocation2 + $0x14] sm:$0xff] %v14327_v37  ;;  %v14340_v58 = vmul.f32 0.70710677, %v3684_v36  ;;  %v3687_v2 = vadd.f32 %v3609_v26, %v18313_v10  ;;  %v3611_v24 = vadd.f32 %v3610_v9, %v14281_v35  ;;  %v3507_v49 = vpop.f32.mrf.mxu0  ;;  %v3886_v13 = vld [vmem:[#allocation2 + $0x8] sm:$0xf] }
 0x4eb   : > { %v3885_v18 = vld [vmem:[#allocation2] sm:$0xff]  ;;  %3831 = vst [vmem:[#allocation2 + $0x44] sm:$0xff] %v14333_v12  ;;  %18314 = vst [vmem:[#allocation38_spill] sm:$0xff] %v14345_v53  ;;  %v14347_v22 = vmul.f32 0.70710677, %v3690_v23  ;;  %v3693_v41 = vadd.f32 %v3506_v63, %v18316_v57  ;;  %v3508_v34 = vadd.f32 %v3507_v49, %v14277_v45  ;;  %v3612_v42 = vpop.f32.mrf.mxu1  ;;  %3919 = vrot.lane.b32.xlu1 %v3886_v13, %s18232_s21 }
 0x4ec   : > { %18312 = vst [vmem:[#allocation37_spill] sm:$0xff] %v14340_v58  ;;  %3917 = vrot.lane.b32.xlu0 %v3885_v18, %s18232_s21  ;;  %v14355_v35 = vpack.c.bf16 %v14340_v58, %v14335_v52  ;;  %v3688_v61 = vadd.f32 %v3611_v24, %v18317_v28  ;;  %v3613_v33 = vadd.f32 %v3612_v42, %v14283_v20  ;;  %v3509_v55 = vpop.f32.mrf.mxu0  ;;  %v14366_v60 = vmul.f32 0.70710677, %v3687_v2  ;;  %v18329_v49 = vld [vmem:[#allocation23_spill] sm:$0xff] }
 0x4ed   : > { %18315 = vst [vmem:[#allocation39_spill] sm:$0xff] %v14347_v22  ;;  %v14361_v29 = vpack.c.bf16 %v14347_v22, %v14345_v53  ;;  %v3694_v46 = vadd.f32 %v3508_v34, %v18318_v15  ;;  %v3510_v8 = vadd.f32 %v3509_v55, %v14279_v62  ;;  %v3614_v31 = vpop.f32.mrf.mxu1  ;;  %v14373_v6 = vmul.f32 0.70710677, %v3693_v41  ;;  %v18332_v42 = vld [vmem:[#allocation11_spill] sm:$0xff] }
 0x4ee   : > { %3878 = vst [vmem:[#allocation2 + $0x34] sm:$0xff] %v14355_v35  ;;  %18319 = vst [vmem:[#allocation27_spill] sm:$0xff] %v14366_v60  ;;  %v14368_v1 = vmul.f32 0.70710677, %v3688_v61  ;;  %v3691_v40 = vadd.f32 %v3613_v33, %v18321_v50  ;;  %v3615_v54 = vadd.f32 %v3614_v31, %v14283_v20  ;;  %v3511_v44 = vpop.f32.mrf.mxu0  ;;  %v18334_v50 = vld [vmem:[#allocation12_spill] sm:$0xff] }
 0x4ef   : > { %3832 = vst [vmem:[#allocation2 + $0x64] sm:$0xff] %v14361_v29  ;;  %18322 = vst [vmem:[#allocation28_spill] sm:$0xff] %v14373_v6  ;;  %v14375_v21 = vmul.f32 0.70710677, %v3694_v46  ;;  %v3697_v17 = vadd.f32 %v3510_v8, %v18324_v51  ;;  %v3512_v39 = vadd.f32 %v3511_v44, %v14279_v62  ;;  %v3618_v59 = vpop.f32.mrf.mxu1  ;;  %v3888_v51 = vld [vmem:[#allocation2 + $0x28] sm:$0xf] }
 0x4f0   : > { %18320 = vst [vmem:[#allocation40_spill] sm:$0xff] %v14368_v1  ;;  %v14381_v19 = vpack.c.bf16 %v14368_v1, %v14366_v60  ;;  %v3692_v38 = vadd.f32 %v3615_v54, %v18325_v11  ;;  %v3619_v20 = vadd.f32 %v3618_v59, %v14277_v45  ;;  %v3515_v36 = vpop.f32.mrf.mxu0  ;;  %v14392_v2 = vmul.f32 0.70710677, %v3691_v40  ;;  %v18337_v11 = vld [vmem:[#allocation25_spill] sm:$0xff] }
 0x4f1   : > { %18323 = vst [vmem:[#allocation41_spill] sm:$0xff] %v14375_v21  ;;  %v14387_v26 = vpack.c.bf16 %v14375_v21, %v14373_v6  ;;  %v3698_v0 = vadd.f32 %v3512_v39, %v18326_v5  ;;  %v3516_v23 = vadd.f32 %v3515_v36, %v14273_v32  ;;  %v3620_v63 = vpop.f32.mrf.mxu1  ;;  %v4128_v9 = vld [vmem:[#allocation2 + $0x18] sm:$0xf]  ;;  %v4127_v10 = vld [vmem:[#allocation2 + $0x10] sm:$0xff]  ;;  %v14401_v41 = vmul.f32 0.70710677, %v3697_v17 }
 0x4f2   : > { %3879 = vst [vmem:[#allocation2 + $0x54] sm:$0xff] %v14381_v19  ;;  %18327 = vst [vmem:[#allocation29_spill] sm:$0xff] %v14392_v2  ;;  %v14394_v24 = vmul.f32 0.70710677, %v3692_v38  ;;  %v3695_v13 = vadd.f32 %v3619_v20, %v18329_v49  ;;  %v3621_v18 = vadd.f32 %v3620_v63, %v14277_v45  ;;  %4161 = vrot.lane.b32.xlu1 %v4128_v9, %s18232_s21  ;;  %4159 = vrot.lane.b32.xlu0 %v4127_v10, %s18232_s21  ;;  %v3517_v57 = vpop.f32.mrf.mxu0  ;;  %v18333_v45 = vld [vmem:[#allocation24_spill] sm:$0xff] }
 0x4f3   : > { %3833 = vst [vmem:[#allocation2 + $0x84] sm:$0xff] %v14387_v26  ;;  %18330 = vst [vmem:[#allocation30_spill] sm:$0xff] %v14401_v41  ;;  %v14403_v34 = vmul.f32 0.70710677, %v3698_v0  ;;  %v3701_v28 = vadd.f32 %v3516_v23, %v18332_v42  ;;  %v3518_v61 = vadd.f32 %v3517_v57, %v14273_v32  ;;  %v3622_v33 = vpop.f32.mrf.mxu1  ;;  %v3887_v17 = vld [vmem:[#allocation2 + $0x20] sm:$0xff] }
 0x4f4   : > { %18328 = vst [vmem:[#allocation42_spill] sm:$0xff] %v14394_v24  ;;  %v14409_v55 = vpack.c.bf16 %v14394_v24, %v14392_v2  ;;  %v3696_v15 = vadd.f32 %v3621_v18, %v18333_v45  ;;  %v3623_v46 = vadd.f32 %v3622_v33, %v14279_v62  ;;  %v3519_v8 = vpop.f32.mrf.mxu0  ;;  %v14420_v39 = vmul.f32 0.70710677, %v3695_v13  ;;  %v18340_v23 = vld [vmem:[#allocation15_spill] sm:$0xff]  ;;  %v18342_v42 = vld [vmem:[#allocation16_spill] sm:$0xff] }
 0x4f5   : > { %18331 = vst [vmem:[#allocation31_spill] sm:$0xff] %v14403_v34  ;;  %v14415_v31 = vpack.c.bf16 %v14403_v34, %v14401_v41  ;;  %v3702_v40 = vadd.f32 %v3518_v61, %v18334_v50  ;;  %v3520_v54 = vadd.f32 %v3519_v8, %v14275_v25  ;;  %v3624_v44 = vpop.f32.mrf.mxu1  ;;  %v14429_v5 = vmul.f32 0.70710677, %v3701_v28  ;;  %v4130_v33 = vld [vmem:[#allocation2 + $0x38] sm:$0xf]  ;;  %v4129_v45 = vld [vmem:[#allocation2 + $0x30] sm:$0xff] }
 0x4f6   : > { %3880 = vst [vmem:[#allocation2 + $0x74] sm:$0xff] %v14409_v55  ;;  %18335 = vst [vmem:[#allocation19_spill] sm:$0xff] %v14420_v39  ;;  %v14422_v59 = vmul.f32 0.70710677, %v3696_v15  ;;  %v3699_v38 = vadd.f32 %v3623_v46, %v18337_v11  ;;  %v3625_v20 = vadd.f32 %v3624_v44, %v14279_v62  ;;  %3923 = vrot.lane.b32.xlu1 %v3888_v51, %s18232_s21  ;;  %3921 = vrot.lane.b32.xlu0 %v3887_v17, %s18232_s21  ;;  %v3521_v36 = vpop.f32.mrf.mxu0  ;;  %v18341_v62 = vld [vmem:[#allocation26_spill] sm:$0xff]  ;;  %v18345_v8 = vld [vmem:[#allocation13_spill] sm:$0xff] }
 0x4f7   : > { %3834 = vst [vmem:[#allocation2 + $0xa4] sm:$0xff] %v14415_v31  ;;  %18338 = vst [vmem:[#allocation20_spill] sm:$0xff] %v14429_v5  ;;  %v14431_v0 = vmul.f32 0.70710677, %v3702_v40  ;;  %v3705_v63 = vadd.f32 %v3520_v54, %v18340_v23  ;;  %v3522_v9 = vadd.f32 %v3521_v36, %v14275_v25  ;;  %v3628_v10 = vpop.f32.mrf.mxu1  ;;  %v18348_v11 = vld [vmem:[#allocation14_spill] sm:$0xff] }
 0x4f8   : > { %18336 = vst [vmem:[#allocation32_spill] sm:$0xff] %v14422_v59  ;;  %v14437_v49 = vpack.c.bf16 %v14422_v59, %v14420_v39  ;;  %v3700_v13 = vadd.f32 %v3625_v20, %v18341_v62  ;;  %v3629_v18 = vadd.f32 %v3628_v10, %v14273_v32  ;;  %v14447_v15 = vmul.f32 0.70710677, %v3699_v38  ;;  %v3890_v23 = vld [vmem:[#allocation2 + $0x48] sm:$0xf] }
 0x4f9   : > { %18339 = vst [vmem:[#allocation33_spill] sm:$0xff] %v14431_v0  ;;  %v14443_v57 = vpack.c.bf16 %v14431_v0, %v14429_v5  ;;  %v3706_v28 = vadd.f32 %v3522_v9, %v18342_v42  ;;  %v3630_v61 = vpop.f32.mrf.mxu1  ;;  %v14456_v54 = vmul.f32 0.70710677, %v3705_v63  ;;  %v3889_v9 = vld [vmem:[#allocation2 + $0x40] sm:$0xff]  ;;  %v18351_v62 = vld [vmem:[#allocation17_spill] sm:$0xff] }
 0x4fa   : > { %3881 = vst [vmem:[#allocation2 + $0x94] sm:$0xff] %v14437_v49  ;;  %18343 = vst [vmem:[#allocation21_spill] sm:$0xff] %v14447_v15  ;;  %v14449_v46 = vmul.f32 0.70710677, %v3700_v13  ;;  %v3703_v50 = vadd.f32 %v3629_v18, %v18345_v8  ;;  %v3631_v40 = vadd.f32 %v3630_v61, %v14273_v32  ;;  %4165 = vrot.lane.b32.xlu1 %v4130_v33, %s18232_s21  ;;  %4163 = vrot.lane.b32.xlu0 %v4129_v45, %s18232_s21  ;;  %v18352_v33 = vld [vmem:[#allocation18_spill] sm:$0xff] }
 0x4fb   : > { %3835 = vst [vmem:[#allocation2 + $0xc4] sm:$0xff] %v14443_v57  ;;  %18346 = vst [vmem:[#allocation22_spill] sm:$0xff] %v14456_v54  ;;  %v14458_v44 = vmul.f32 0.70710677, %v3706_v28  ;;  %v3632_v51 = vpop.f32.mrf.mxu1  ;;  %v12456_v28 = vpack.c.bf16 %v14456_v54, %v14429_v5  ;;  %v4132_v8 = vld [vmem:[#allocation2 + $0x58] sm:$0xf] }
 0x4fc   : > { %18344 = vst [vmem:[#allocation34_spill] sm:$0xff] %v14449_v46  ;;  %v14462_v17 = vpack.c.bf16 %v14449_v46, %v14447_v15  ;;  %v3704_v38 = vadd.f32 %v3631_v40, %v18348_v11  ;;  %v3633_v20 = vadd.f32 %v3632_v51, %v14275_v25  ;;  %v14471_v63 = vmul.f32 0.70710677, %v3703_v50 }
 0x4fd   : > { %18347 = vst [vmem:[#allocation23_spill] sm:$0xff] %v14458_v44  ;;  %v14468_v32 = vpack.c.bf16 %v14458_v44, %v14456_v54  ;;  %v3634_v36 = vpop.f32.mrf.mxu1  ;;  %v12455_v42 = vpack.c.bf16 %v14458_v44, %v14431_v0  ;;  %v12457_v51 = vpack.c.bf16 %v14403_v34, %v14375_v21 }
 0x4fe   : > { %3882 = vst [vmem:[#allocation2 + $0xb4] sm:$0xff] %v14462_v17  ;;  %18349 = vst [vmem:[#allocation11_spill] sm:$0xff] %v14471_v63  ;;  %v14473_v10 = vmul.f32 0.70710677, %v3704_v38  ;;  %v3707_v13 = vadd.f32 %v3633_v20, %v18351_v62  ;;  %v3635_v18 = vadd.f32 %v3634_v36, %v14275_v25  ;;  %3927 = vrot.lane.b32.xlu1 %v3890_v23, %s18232_s21  ;;  %3925 = vrot.lane.b32.xlu0 %v3889_v9, %s18232_s21  ;;  %v4131_v25 = vld [vmem:[#allocation2 + $0x50] sm:$0xff]  ;;  %v3891_v20 = vld [vmem:[#allocation2 + $0x60] sm:$0xff] }
 0x4ff   : > { %3836 = vst [vmem:[#allocation2 + $0xe4] sm:$0xff] %v14468_v32  ;;  %4889 = vmatprep.subr.bf16.mxu0 %v12455_v42  ;;  %v3892_v38 = vld [vmem:[#allocation2 + $0x68] sm:$0xf]  ;;  %v12458_v36 = vpack.c.bf16 %v14401_v41, %v14373_v6  ;;  %v12459_v23 = vpack.c.bf16 %v14347_v22, %v14321_v3  ;;  %v12462_v42 = vpack.c.bf16 %v14449_v46, %v14422_v59 }
 0x500   : > { %18350 = vst [vmem:[#allocation24_spill] sm:$0xff] %v14473_v10  ;;  %v14486_v61 = vpack.c.bf16 %v14473_v10, %v14471_v63  ;;  %v3708_v45 = vadd.f32 %v3635_v18, %v18352_v33  ;;  %v14490_v50 = vmul.f32 0.70710677, %v3707_v13  ;;  %4890 = vmatpush1.bf16.msra.mxu0 %v12456_v28  ;;  %v4134_v13 = vld [vmem:[#allocation2 + $0x78] sm:$0xf]  ;;  %v4133_v18 = vld [vmem:[#allocation2 + $0x70] sm:$0xff]  ;;  %v12463_v28 = vpack.c.bf16 %v14345_v53, %v14319_v48 }
 0x501   : > { %4891 = vmatprep.subr.bf16.mxu0 %v12457_v51  ;;  %v12464_v33 = vpack.c.bf16 %v14302_v27, %v14289_v16  ;;  %v12466_v51 = vpack.c.bf16 %v14394_v24, %v14368_v1 }
 0x502   : > { %3883 = vst [vmem:[#allocation2 + $0xd4] sm:$0xff] %v14486_v61  ;;  %18353 = vst [vmem:[#allocation12_spill] sm:$0xff] %v14490_v50  ;;  %v14492_v40 = vmul.f32 0.70710677, %v3708_v45  ;;  %4169 = vrot.lane.b32.xlu1 %v4132_v8, %s18232_s21  ;;  %4167 = vrot.lane.b32.xlu0 %v4131_v25, %s18232_s21  ;;  %v12461_v62 = vpack.c.bf16 %v14490_v50, %v14471_v63  ;;  %v12465_v45 = vpack.c.bf16 %v14447_v15, %v14420_v39  ;;  %v3894_v8 = vld [vmem:[#allocation2 + $0x88] sm:$0xf] }
 0x503   : > { %v3893_v25 = vld [vmem:[#allocation2 + $0x80] sm:$0xff] }
 0x504   : > { %18354 = vst [vmem:[#allocation25_spill] sm:$0xff] %v14492_v40  ;;  %v14500_v11 = vpack.c.bf16 %v14492_v40, %v14490_v50  ;;  %v12460_v9 = vpack.c.bf16 %v14492_v40, %v14473_v10  ;;  %4892 = vmatpush1.bf16.msra.mxu0 %v12458_v36  ;;  %v4136_v36 = vld [vmem:[#allocation2 + $0x98] sm:$0xf] }
 0x505   : > { %4893 = vmatprep.subr.bf16.mxu0 %v12459_v23  ;;  %v4135_v23 = vld [vmem:[#allocation2 + $0x90] sm:$0xff] }
 0x506   : > { %3884 = vst [vmem:[#allocation2 + $0xf4] sm:$0xff] %v14500_v11  ;;  %3931 = vrot.lane.b32.xlu1 %v3892_v38, %s18232_s21  ;;  %3929 = vrot.lane.b32.xlu0 %v3891_v20, %s18232_s21  ;;  %v12467_v38 = vpack.c.bf16 %v14300_v56, %v14287_v47  ;;  %v12468_v20 = vpack.c.bf16 %v14392_v2, %v14366_v60 }
 0x507   : > { %5002 = vmatprep.subr.bf16.mxu1 %v12460_v9  ;;  %v12469_v9 = vpack.c.bf16 %v14340_v58, %v14315_v14 }
 0x508   : > { %5003 = vmatpush1.bf16.msra.mxu1 %v12461_v62  ;;  %4894 = vmatpush1.bf16.msra.mxu0 %v12463_v28  ;;  %v12470_v62 = vpack.c.bf16 %v14335_v52, %v14313_v43  ;;  %v4137_v28 = vld [vmem:[#allocation2 + $0xb0] sm:$0xff] }
 0x509   : > { %5004 = vmatprep.subr.bf16.mxu1 %v12462_v42  ;;  %4895 = vmatprep.subr.bf16.mxu0 %v12464_v33  ;;  %v4138_v42 = vld [vmem:[#allocation2 + $0xb8] sm:$0xf]  ;;  %v3898_v33 = vld [vmem:[#allocation2 + $0xc8] sm:$0xf] }
 0x50a   : > { %4173 = vrot.lane.b32.xlu1 %v4134_v13, %s18232_s21  ;;  %4171 = vrot.lane.b32.xlu0 %v4133_v18, %s18232_s21  ;;  %v3896_v13 = vld [vmem:[#allocation2 + $0xa8] sm:$0xf]  ;;  %v3895_v18 = vld [vmem:[#allocation2 + $0xa0] sm:$0xff] }
 0x50c   : > { %5005 = vmatpush1.bf16.msra.mxu1 %v12465_v45  ;;  %4896 = vmatpush1.bf16.msra.mxu0 %v12467_v38  ;;  %v4139_v45 = vld [vmem:[#allocation2 + $0xd0] sm:$0xff]  ;;  %v4019_v38 = vld [vmem:[#allocation2 + $0x4c] sm:$0xf] }
 0x50d   : > { %5006 = vmatprep.subr.bf16.mxu1 %v12466_v51  ;;  %v3899_v51 = vld [vmem:[#allocation2 + $0xe0] sm:$0xff] }
 0x50e   : > { %3935 = vrot.lane.b32.xlu1 %v3894_v8, %s18232_s21  ;;  %3933 = vrot.lane.b32.xlu0 %v3893_v25, %s18232_s21  ;;  %v3900_v8 = vld [vmem:[#allocation2 + $0xe8] sm:$0xf]  ;;  %v4142_v25 = vld [vmem:[#allocation2 + $0xf8] sm:$0xf] }
 0x510   : > { %5007 = vmatpush1.bf16.msra.mxu1 %v12468_v20  ;;  %v4264_v20 = vld [vmem:[#allocation2 + $0x9c] sm:$0xf] }
 0x511   : > { %5008 = vmatprep.subr.bf16.mxu1 %v12469_v9 }
 0x512   : > { %4177 = vrot.lane.b32.xlu1 %v4136_v36, %s18232_s21  ;;  %4175 = vrot.lane.b32.xlu0 %v4135_v23, %s18232_s21  ;;  %v4266_v36 = vld [vmem:[#allocation2 + $0xbc] sm:$0xf] }
 0x513   : > { %v11416_v9 = vpack.i.bf16 %v4266_v36, %v4264_v20  ;;  %v10686_v20 = vld [vmem:[%s18115_s5 + $0xc0] sm:$0xff] }
 0x514   : > { %5009 = vmatpush1.bf16.msra.mxu1 %v12470_v62  ;;  %v11556_v62 = vld [vmem:[%s18116_s6 + $0x28] sm:$0xff]  }
 0x516   : > { %4303 = vrot.lane.b32.xlu1 %v14437_v49, %s18290_s13  ;;  %4062 = vrot.lane.b32.xlu0 %v14387_v26, %s18290_s13  ;;  %v4140_v49 = vld [vmem:[#allocation2 + $0xd8] sm:$0xf]  ;;  %v3897_v26 = vld [vmem:[#allocation2 + $0xc0] sm:$0xff] }
 0x51a   : > { %3939 = vrot.lane.b32.xlu1 %v3896_v13, %s18232_s21  ;;  %3937 = vrot.lane.b32.xlu0 %v3895_v18, %s18232_s21  ;;  %v4262_v13 = vld [vmem:[#allocation2 + $0x7c] sm:$0xf]  ;;  %v11557_v18 = vld [vmem:[%s18116_s6 + $0x30] sm:$0xff]  }
 0x51e   : > { %4181 = vrot.lane.b32.xlu1 %v4138_v42, %s18232_s21  ;;  %4179 = vrot.lane.b32.xlu0 %v4137_v28, %s18232_s21  ;;  %v4015_v28 = vld [vmem:[#allocation2 + $0xc] sm:$0xf] }
 0x522   : > { %3943 = vrot.lane.b32.xlu1 %v3898_v33, %s18232_s21  ;;  %4066 = vrot.lane.b32.xlu0 %v14415_v31, %s18290_s13  ;;  %v11555_v31 = vld [vmem:[%s18116_s6 + $0x20] sm:$0xff]   ;;  %v4017_v33 = vld [vmem:[#allocation2 + $0x2c] sm:$0xf] }
 0x523   : > { %10634 = vmatmul.mubr.msk.bf16.gmra.mxu0 %vm3426_vm12, %v11555_v31  ;;  %10642 = vmatmul.mubr.msk.bf16.gmra.mxu1 %vm3426_vm12, %v11555_v31  ;;  %v10687_v31 = vld [vmem:[%s18115_s5 + $0xc8] sm:$0xff] }
 0x524   : > { %3533 = vmatprep.mubr.bf16.mxu0 %v18289_v4  ;;  %3646 = vmatprep.mubr.bf16.mxu1 %v18289_v4 }
 0x526   : > { %4185 = vrot.lane.b32.xlu1 %v4140_v49, %s18232_s21  ;;  %3941 = vrot.lane.b32.xlu0 %v3897_v26, %s18232_s21  ;;  %v14630_v26 = vpop.permute.xlu0 %11407 }
 0x52a   : > { %4311 = vrot.lane.b32.xlu1 %v14486_v61, %s18290_s13  ;;  %4183 = vrot.lane.b32.xlu0 %v4139_v45, %s18232_s21  ;;  %v4021_v61 = vld [vmem:[#allocation2 + $0x6c] sm:$0xf]  ;;  %v10689_v45 = vld [vmem:[%s18115_s5 + $0xd8] sm:$0xff] }
 0x52b   : > { %v11421_v23 = vpack.i.bf16 %v4021_v61, %v4019_v38  ;;  %10635 = vmatmul.mubr.msk.bf16.gmra.mxu0 %vm3426_vm12, %v11556_v62  ;;  %10643 = vmatmul.mubr.msk.bf16.gmra.mxu1 %vm3426_vm12, %v11556_v62  ;;  %v10685_v61 = vld [vmem:[%s18115_s5 + $0xb8] sm:$0xff] }
 0x52c   : > { %3543 = vmatprep.mubr.bf16.mxu0 %v18289_v4  ;;  %3656 = vmatprep.mubr.bf16.mxu1 %v18289_v4 }
 0x52e   : > { %3947 = vrot.lane.b32.xlu1 %v3900_v8, %s18232_s21  ;;  %4070 = vrot.lane.b32.xlu0 %v14443_v57, %s18290_s13  ;;  %v4141_v57 = vld [vmem:[#allocation2 + $0xf0] sm:$0xff]  ;;  %v10690_v8 = vld [vmem:[%s18115_s5 + $0xe0] sm:$0xff] }
 0x532   : > { %4189 = vrot.lane.b32.xlu1 %v4142_v25, %s18232_s21  ;;  %3945 = vrot.lane.b32.xlu0 %v3899_v51, %s18232_s21  ;;  %v10688_v25 = vld [vmem:[%s18115_s5 + $0xd0] sm:$0xff] }
 0x533   : > { %10636 = vmatmul.mubr.msk.bf16.gmra.mxu0 %vm3426_vm12, %v11557_v18  ;;  %10644 = vmatmul.mubr.msk.bf16.gmra.mxu1 %vm3426_vm12, %v11557_v18  ;;  %v10682_v18 = vld [vmem:[%s18115_s5 + $0xa0] sm:$0xff] }
 0x534   : > { %3553 = vmatprep.mubr.bf16.mxu0 %v18289_v4  ;;  %3666 = vmatprep.mubr.bf16.mxu1 %v18289_v4 }
 0x536   : > { %4307 = vrot.lane.b32.xlu1 %v14462_v17, %s18290_s13  ;;  %4187 = vrot.lane.b32.xlu0 %v4141_v57, %s18232_s21  ;;  %v4260_v17 = vld [vmem:[#allocation2 + $0x5c] sm:$0xf] }
 0x537   : > { %v11426_v42 = vpack.i.bf16 %v4262_v13, %v4260_v17  ;;  %v10681_v13 = vld [vmem:[%s18115_s5 + $0x98] sm:$0xff] }
 0x53a   : > { %11422 = vrot.lane.b32.xlu1 %v11421_v23, %s18290_s13  ;;  %11417 = vrot.lane.b32.xlu0 %v11416_v9, %s18290_s13  ;;  %v10683_v23 = vld [vmem:[%s18115_s5 + $0xa8] sm:$0xff]  ;;  %v10684_v9 = vld [vmem:[%s18115_s5 + $0xb0] sm:$0xff] }
 0x53e   : > { %4295 = vrot.lane.b32.xlu1 %v14381_v19, %s18290_s13  ;;  %4054 = vrot.lane.b32.xlu0 %v14333_v12, %s18290_s13  ;;  %v11431_v12 = vpack.i.bf16 %v4017_v33, %v4015_v28  ;;  %v4256_v19 = vld [vmem:[#allocation2 + $0x1c] sm:$0xf]  ;;  %v10679_v33 = vld [vmem:[%s18115_s5 + $0x88] sm:$0xff] }
 0x542   : > { %4299 = vrot.lane.b32.xlu1 %v14409_v55, %s18290_s13  ;;  %4058 = vrot.lane.b32.xlu0 %v14361_v29, %s18290_s13  ;;  %v11558_v29 = vld [vmem:[%s18116_s6 + $0x38] sm:$0xff]  }
 0x543   : > { %10637 = vmatmul.mubr.msk.bf16.gmra.mxu0 %vm3426_vm12, %v11558_v29  ;;  %10645 = vmatmul.mubr.msk.bf16.gmra.mxu1 %vm3426_vm12, %v11558_v29  ;;  %v4258_v55 = vld [vmem:[#allocation2 + $0x3c] sm:$0xf] }
 0x546   : > { %4315 = vrot.lane.b32.xlu1 %v14500_v11, %s18290_s13  ;;  %11427 = vrot.lane.b32.xlu0 %v11426_v42, %s18290_s13  ;;  %v11561_v11 = vld [vmem:[%s18114_s4 + $0x84] ss:$8 sps:$4 sm:$0xff]  }
 0x547   : > { %10762 = vmatprep.mubr.msk.bf16.mxu0 %vm2783_vm11, %v11561_v11  ;;  %10770 = vmatprep.mubr.msk.bf16.mxu1 %vm2783_vm11, %v11561_v11  ;;  %v10678_v11 = vld [vmem:[%s18115_s5 + $0x80] sm:$0xff] }
 0x54a   : > { %11432 = vrot.lane.b32.xlu1 %v11431_v12, %s18290_s13  ;;  %4074 = vrot.lane.b32.xlu0 %v14468_v32, %s18290_s13  ;;  %v11436_v32 = vpack.i.bf16 %v4258_v55, %v4256_v19  ;;  %v10680_v12 = vld [vmem:[%s18115_s5 + $0x90] sm:$0xff]  ;;  %v10801_v55 = vld [vmem:[%s18117_s7 + $0xb8] sm:$0xff] }
 0x54e   : > { %4287 = vrot.lane.b32.xlu1 %v14327_v37, %s18290_s13  ;;  %4046 = vrot.lane.b32.xlu0 %v14294_v30, %s18290_s13  ;;  %v10693_v37 = vld [vmem:[%s18115_s5 + $0xf8] sm:$0xff]  ;;  %v14619_v30 = vpop.permute.xlu1 %11402 }
 0x54f   : > { %v11405_v46 = vunpack.i.h.bf16 %v14619_v30 }
 0x551   : > { %v14753_v1 = vrot.slane %v11405_v46, 4 }
 0x552   : > { %4291 = vrot.lane.b32.xlu1 %v14355_v35, %s18290_s13  ;;  %4050 = vrot.lane.b32.xlu0 %v14309_v7, %s18290_s13  ;;  %v10691_v35 = vld [vmem:[%s18115_s5 + $0xe8] sm:$0xff]  ;;  %v10692_v7 = vld [vmem:[%s18115_s5 + $0xf0] sm:$0xff]  ;;  %v14628_v49 = vpop.permute.xlu1 %11412 }
 0x556   : > { %4530 = vperm.xlu1 %11359, %v10693_v37   ;;  %11437 = vrot.lane.b32.xlu0 %v11436_v32, %s18290_s13  ;;  %s10433_s13 = sshll.u32 %s427_s30, 4  ;;  %s18067_s13 = int_to_ptr.vmem [resolvable:$true] %s10433_s13 }
 0x557   : > { %p12510_p0 = scmp.lt.s32.totalorder %s18067_s13, %s12508_s20 }
 0x55a   : > { %4520 = vperm.xlu1 %11359, %v10691_v35   ;;  %4525 = vperm.xlu0 %11360, %v10692_v7   ;;  %v10799_v35 = vld [vmem:[%s18117_s7 + $0xa8] sm:$0xff]  ;;  %v10800_v7 = vld [vmem:[%s18117_s7 + $0xb0] sm:$0xff] }
 0x55d   : > { %v14644_v51 = vpop.permute.xlu1 %3919 }
 0x55e   : > { %4510 = vperm.xlu1 %11359, %v10689_v45   ;;  %4515 = vperm.xlu0 %11360, %v10690_v8   ;;  %v14646_v38 = vpop.permute.xlu0 %3917 }
 0x55f   : > { %v3949_v54 = vrot.slane %v14646_v38, 4 }
 0x562   : > { %4500 = vperm.xlu1 %11359, %v10687_v31   ;;  %4505 = vperm.xlu0 %11360, %v10688_v25   ;;  %v10797_v31 = vld [vmem:[%s18117_s7 + $0x98] sm:$0xff]  ;;  %v10798_v25 = vld [vmem:[%s18117_s7 + $0xa0] sm:$0xff] }
 0x564   : > { %v14654_v36 = vpop.permute.xlu1 %4161  ;;  %v14656_v57 = vpop.permute.xlu0 %4159 }
 0x566   : > { %4490 = vperm.xlu1 %11359, %v10685_v61   ;;  %4495 = vperm.xlu0 %11360, %v10686_v20  }
 0x568   : > { %v14664_v62 = vpop.permute.xlu1 %3923  ;;  %v14666_v17 = vpop.permute.xlu0 %3921 }
 0x569   : > { %v3952_v15 = vrot.slane %v14664_v62, 4  ;;  %v3951_v0 = vrot.slane %v14666_v17, 4 }
 0x56a   : > { %4480 = vperm.xlu1 %11359, %v10683_v23   ;;  %4485 = vperm.xlu0 %11360, %v10684_v9   ;;  %v10795_v23 = vld [vmem:[%s18117_s7 + $0x88] sm:$0xff]  ;;  %v10796_v9 = vld [vmem:[%s18117_s7 + $0x90] sm:$0xff] }
 0x56c   : > { %v14674_v42 = vpop.permute.xlu1 %4165  ;;  %v14676_v28 = vpop.permute.xlu0 %4163 }
 0x56e   : > { %4470 = vperm.xlu1 %11359, %v10681_v13   ;;  %4475 = vperm.xlu0 %11360, %v10682_v18  }
 0x570   : > { %v14684_v29 = vpop.permute.xlu1 %3927  ;;  %v14686_v19 = vpop.permute.xlu0 %3925 }
 0x571   : > { %v3954_v59 = vrot.slane %v14684_v29, 4  ;;  %v3953_v5 = vrot.slane %v14686_v19, 4 }
 0x572   : > { %4460 = vperm.xlu1 %11359, %v10679_v33   ;;  %4465 = vperm.xlu0 %11360, %v10680_v12   ;;  %v10794_v33 = vld [vmem:[%s18117_s7 + $0x80] sm:$0xff] }
 0x573   : > { %v3970_v24 = vsel %vm1884_vm10, %v3953_v5, %v3954_v59 }
 0x574   : > { %v14694_v32 = vpop.permute.xlu1 %4169  ;;  %v14696_v37 = vpop.permute.xlu0 %4167 }
 0x576   : > { %5426 = vperm.xlu1 %11359, %v10801_v55   ;;  %4455 = vperm.xlu0 %11360, %v10678_v11  }
 0x578   : > { %v14704_v45 = vpop.permute.xlu1 %3931  ;;  %v14706_v8 = vpop.permute.xlu0 %3929 }
 0x579   : > { %v3956_v62 = vrot.slane %v14704_v45, 4  ;;  %v3955_v6 = vrot.slane %v14706_v8, 4 }
 0x57a   : > { %5416 = vperm.xlu1 %11359, %v10799_v35   ;;  %5421 = vperm.xlu0 %11360, %v10800_v7  }
 0x57c   : > { %v14714_v61 = vpop.permute.xlu1 %4173  ;;  %v14716_v20 = vpop.permute.xlu0 %4171 }
 0x57e   : > { %5406 = vperm.xlu1 %11359, %v10797_v31   ;;  %5411 = vperm.xlu0 %11360, %v10798_v25  }
 0x580   : > { %v3936_v13 = vpop.permute.xlu1 %3935  ;;  %v14724_v18 = vpop.permute.xlu0 %3933 }
 0x581   : > { %v3958_v29 = vrot.slane %v3936_v13, 4  ;;  %v3957_v60 = vrot.slane %v14724_v18, 4  ;;  %v3972_v13 = vsel %vm1884_vm10, %v3955_v6, %v3956_v62  ;;  %v4197_v62 = vrot.slane %v14716_v20, 4 }
 0x582   : > { %5396 = vperm.xlu1 %11359, %v10795_v23   ;;  %5401 = vperm.xlu0 %11360, %v10796_v9  }
 0x584   : > { %v14729_v12 = vpop.permute.xlu1 %4177  ;;  %v14731_v55 = vpop.permute.xlu0 %4175 }
 0x585   : > { %v4199_v59 = vrot.slane %v14731_v55, 4 }
 0x586   : > { %5391 = vperm.xlu0 %11360, %v10794_v33   ;;  %v3950_v33 = vrot.slane %v14644_v51, 4 }
 0x588   : > { %v14733_v11 = vpop.permute.xlu1 %4303  ;;  %v14735_v35 = vpop.permute.xlu0 %4062  ;;  %v14760_v58 = vsel %vm1884_vm10, %v3949_v54, %v3950_v33  ;;  %v3974_v33 = vsel %vm1884_vm10, %v3957_v60, %v3958_v29 }
 0x58c   : > { %v3940_v7 = vpop.permute.xlu1 %3939  ;;  %v3938_v31 = vpop.permute.xlu0 %3937 }
 0x58d   : > { %v3960_v41 = vrot.slane %v3940_v7, 4  ;;  %v3959_v2 = vrot.slane %v3938_v31, 4  ;;  %v3968_v7 = vsel %vm1884_vm10, %v3951_v0, %v3952_v15  ;;  %v4200_v0 = vrot.slane %v14729_v12, 4 }
 0x58e   : > { %v4198_v12 = vrot.slane %v14714_v61, 4 }
 0x58f   : > { %v3976_v51 = vsel %vm1884_vm10, %v3959_v2, %v3960_v41  ;;  %v4215_v61 = vsel %vm1884_vm10, %v4199_v59, %v4200_v0  ;;  %v4192_v0 = vrot.slane %v14654_v36, 4  ;;  %v4191_v59 = vrot.slane %v14656_v57, 4 }
 0x590   : > { %v4182_v25 = vpop.permute.xlu1 %4181  ;;  %v14737_v40 = vpop.permute.xlu0 %4179  ;;  %v3977_v2 = vsel %vm3966_vm13, %v3938_v31, %v3976_v51  ;;  %v3973_v51 = vsel %vm3966_vm13, %v14706_v8, %v3972_v13  ;;  %v3971_v8 = vsel %vm3966_vm13, %v14686_v19, %v3970_v24 }
 0x591   : > { %v4202_v48 = vrot.slane %v4182_v25, 4 }
 0x594   : > { %v3944_v23 = vpop.permute.xlu1 %3943  ;;  %v14739_v9 = vpop.permute.xlu0 %4066 }
 0x595   : > { %v3962_v22 = vrot.slane %v3944_v23, 4  ;;  %v4201_v23 = vrot.slane %v14737_v40, 4 }
 0x598   : > { %v4186_v50 = vpop.permute.xlu1 %4185  ;;  %v3942_v10 = vpop.permute.xlu0 %3941 }
 0x599   : > { %v3961_v21 = vrot.slane %v3942_v10, 4  ;;  %v4204_v54 = vrot.slane %v4186_v50, 4 }
 0x59b   : > { %v3978_v45 = vsel %vm1884_vm10, %v3961_v21, %v3962_v22 }
 0x59c   : > { %v14741_v63 = vpop.permute.xlu1 %4311  ;;  %v4184_v44 = vpop.permute.xlu0 %4183  ;;  %v3979_v22 = vsel %vm3966_vm13, %v3942_v10, %v3978_v45  ;;  %v4196_v10 = vrot.slane %v14694_v32, 4  ;;  %v4194_v32 = vrot.slane %v14674_v42, 4  ;;  %v4193_v45 = vrot.slane %v14676_v28, 4 }
 0x59d   : > { %v4203_v46 = vrot.slane %v4184_v44, 4  ;;  %v4216_v42 = vsel %vm3966_vm13, %v14731_v55, %v4215_v61  ;;  %v11410_v55 = vunpack.i.h.bf16 %v14630_v26 }
 0x59f   : > { %v4219_v21 = vsel %vm1884_vm10, %v4203_v46, %v4204_v54 }
 0x5a0   : > { %v3948_v39 = vpop.permute.xlu1 %3947  ;;  %v14750_v34 = vpop.permute.xlu0 %4070  ;;  %v4220_v29 = vsel %vm3966_vm13, %v4184_v44, %v4219_v21  ;;  %v4213_v44 = vsel %vm1884_vm10, %v4197_v62, %v4198_v12  ;;  %v3969_v21 = vsel %vm3966_vm13, %v14666_v17, %v3968_v7  ;;  %v18356_v17 = vunpack.i.h.bf16 %v14628_v49 }
 0x5a1   : > { %v3964_v3 = vrot.slane %v3948_v39, 4 }
 0x5a2   : > { %v4089_v7 = vrot.slane %v18356_v17, 4 }
 0x5a4   : > { %v4190_v53 = vpop.permute.xlu1 %4189  ;;  %v3946_v52 = vpop.permute.xlu0 %3945 }
 0x5a5   : > { %v3963_v14 = vrot.slane %v3946_v52, 4  ;;  %v4206_v15 = vrot.slane %v4190_v53, 4 }
 0x5a7   : > { %v3980_v5 = vsel %vm1884_vm10, %v3963_v14, %v3964_v3  ;;  %v3975_v14 = vsel %vm3966_vm13, %v14724_v18, %v3974_v33  ;;  %v4217_v3 = vsel %vm1884_vm10, %v4201_v23, %v4202_v48 }
 0x5a8   : > { %v3981_v6 = vsel %vm3966_vm13, %v3946_v52, %v3980_v5  ;;  %v14776_v41 = vpop.permute.xlu1 %4307  ;;  %v4188_v39 = vpop.permute.xlu0 %4187  ;;  %v4195_v52 = vrot.slane %v14696_v37, 4  ;;  %v10719_v53 = vcombine.high %v3975_v14, %v3977_v2  ;;  %v4218_v23 = vsel %vm3966_vm13, %v14737_v40, %v4217_v3 }
 0x5a9   : > { %v10722_v50 = vcombine.low %v3979_v22, %v3981_v6  ;;  %v4205_v60 = vrot.slane %v4188_v39, 4  ;;  %v10723_v25 = vcombine.high %v3979_v22, %v3981_v6  ;;  %v10718_v13 = vcombine.low %v3975_v14, %v3977_v2 }
 0x5aa   : > { %v10715_v5 = vcombine.high %v3971_v8, %v3973_v51  ;;  %v18355_v22 = vunpack.i.l.bf16 %v14619_v30  ;;  %v4211_v24 = vsel %vm1884_vm10, %v4195_v52, %v4196_v10  ;;  %v10721_v36 = vcombine.high %v4216_v42, %v4218_v23 }
 0x5ab   : > { %v4221_v31 = vsel %vm1884_vm10, %v4205_v60, %v4206_v15  ;;  %4897 = vmatprep.subr.bf16.mxu0 %v10723_v25  ;;  %v11414_v6 = vunpack.i.l.bf16 %v14628_v49  ;;  %v4214_v30 = vsel %vm3966_vm13, %v14716_v20, %v4213_v44  ;;  %v11409_v15 = vunpack.i.l.bf16 %v14630_v26 }
 0x5ac   : > { %v4222_v46 = vsel %vm3966_vm13, %v4188_v39, %v4221_v31  ;;  %v14791_v18 = vpop.permute.xlu1 %11422  ;;  %4898 = vmatpush1.bf16.msra.mxu0 %v10722_v50  ;;  %v14793_v48 = vpop.permute.xlu0 %11417  ;;  %v4091_v40 = vrot.slane %v18355_v22, 4  ;;  %v4209_v39 = vsel %vm1884_vm10, %v4193_v45, %v4194_v32  ;;  %v3967_v50 = vsel %vm3966_vm13, %v14646_v38, %v14760_v58 }
 0x5ad   : > { %v10724_v54 = vcombine.low %v4220_v29, %v4222_v46  ;;  %4899 = vmatprep.subr.bf16.mxu0 %v10719_v53  ;;  %v10725_v33 = vcombine.high %v4220_v29, %v4222_v46  ;;  %v10714_v60 = vcombine.low %v3971_v8, %v3973_v51  ;;  %v4207_v25 = vsel %vm1884_vm10, %v4191_v59, %v4192_v0 }
 0x5ae   : > { %v4212_v12 = vsel %vm3966_vm13, %v14696_v37, %v4211_v24  ;;  %v10720_v62 = vcombine.low %v4216_v42, %v4218_v23  ;;  %v10711_v20 = vcombine.high %v3967_v50, %v3969_v21  ;;  %v4210_v14 = vsel %vm3966_vm13, %v14676_v28, %v4209_v39  ;;  %v12427_v42 = vld [vmem:[%s13720_s19 + $0x4] ss:$8 sps:$4 sm:$0xff]  }
 0x5af   : > { %5010 = vmatprep.subr.bf16.mxu1 %v10725_v33  ;;  %v4086_v49 = vrot.slane %v14735_v35, 4  ;;  %v4088_v26 = vrot.slane %v14739_v9, 4  ;;  %v10717_v38 = vcombine.high %v4212_v12, %v4214_v30  ;;  %v4087_v10 = vrot.slane %v11414_v6, 4 }
 0x5b0   : > { %v14811_v19 = vpop.permute.xlu1 %4295  ;;  %4900 = vmatpush1.bf16.msra.mxu0 %v10718_v13  ;;  %v14813_v2 = vpop.permute.xlu0 %4054  ;;  %5011 = vmatpush1.bf16.msra.mxu1 %v10724_v54  ;;  %v4331_v52 = vrot.slane %v14741_v63, 4  ;;  %v4090_v37 = vrot.slane %v14750_v34, 4  ;;  %v11420_v31 = vunpack.i.h.bf16 %v14793_v48  ;;  %v4334_v28 = vrot.slane %v11410_v55, 4 }
 0x5b1   : > { %4901 = vmatprep.subr.bf16.mxu0 %v10715_v5  ;;  %5012 = vmatprep.subr.bf16.mxu1 %v10721_v36  ;;  %v4208_v53 = vsel %vm3966_vm13, %v14656_v57, %v4207_v25  ;;  %v10710_v51 = vcombine.low %v3967_v50, %v3969_v21  ;;  %v11419_v61 = vunpack.i.l.bf16 %v14793_v48  ;;  %v4332_v29 = vrot.slane %v11409_v15, 4  ;;  %v12428_v15 = vld [vmem:[%s13720_s19] ss:$8 sps:$4 sm:$0xff]  }
 0x5b2   : > { %v10712_v46 = vcombine.low %v4208_v53, %v4210_v14  ;;  %v10716_v32 = vcombine.low %v4212_v12, %v4214_v30  ;;  %v10713_v45 = vcombine.high %v4208_v53, %v4210_v14  ;;  %v4103_v23 = vsel %vm1884_vm10, %v4086_v49, %v4087_v10 }
 0x5b3   : > { %v4105_v54 = vsel %vm1884_vm10, %v4088_v26, %v4089_v7  ;;  %v11425_v8 = vunpack.i.h.bf16 %v14791_v18  ;;  %v11424_v44 = vunpack.i.l.bf16 %v14791_v18  ;;  %v4347_v33 = vsel %vm1884_vm10, %v4331_v52, %v4332_v29 }
 0x5b4   : > { %v14833_v3 = vpop.permute.xlu1 %4299  ;;  %4902 = vmatpush1.bf16.msra.mxu0 %v10714_v60  ;;  %v14835_v58 = vpop.permute.xlu0 %4058  ;;  %5013 = vmatpush1.bf16.msra.mxu1 %v10720_v62  ;;  %v4107_v48 = vsel %vm1884_vm10, %v4090_v37, %v4091_v40  ;;  %v4330_v0 = vrot.slane %v11420_v31, 4  ;;  %v4327_v5 = vrot.slane %v14733_v11, 4  ;;  %v4328_v22 = vrot.slane %v11419_v61, 4  ;;  %v12430_v61 = vld [vmem:[%s13720_s19 + $0x10] ss:$8 sps:$4 sm:$0xff]  }
 0x5b5   : > { %4903 = vmatprep.subr.bf16.mxu0 %v10711_v20  ;;  %5014 = vmatprep.subr.bf16.mxu1 %v10717_v38  ;;  %v14853_v18 = vsel %vm1008_vm7, %v14735_v35, %v4103_v23  ;;  %v14857_v36 = vsel %vm1008_vm7, %v14739_v9, %v4105_v54  ;;  %v4329_v40 = vrot.slane %v14776_v41, 4  ;;  %v4348_v55 = vsel %vm1008_vm7, %v14741_v63, %v4347_v33 }
 0x5b6   : > { %v4108_v39 = vsel %vm1008_vm7, %v14750_v34, %v4107_v48  ;;  %v4085_v30 = vrot.slane %v11425_v8, 4  ;;  %v4083_v17 = vrot.slane %v11424_v44, 4  ;;  %v4084_v9 = vrot.slane %v14835_v58, 4  ;;  %v12429_v34 = vld [vmem:[%s13720_s19 + $0x14] ss:$8 sps:$4 sm:$0xff]  }
 0x5b7   : > { %v4345_v25 = vsel %vm1884_vm10, %v4329_v40, %v4330_v0  ;;  %v4082_v63 = vrot.slane %v14813_v2, 4  ;;  %v4343_v20 = vsel %vm1884_vm10, %v4327_v5, %v4328_v22  ;;  %v4323_v14 = vrot.slane %v14811_v19, 4 }
 0x5b8   : > { %v4316_v13 = vpop.permute.xlu1 %4315  ;;  %4904 = vmatpush1.bf16.msra.mxu0 %v10710_v51  ;;  %v11428_v57 = vpop.permute.xlu0 %11427  ;;  %5015 = vmatpush1.bf16.msra.mxu1 %v10716_v32  ;;  %v4325_v10 = vrot.slane %v14833_v3, 4  ;;  %v4101_v53 = vsel %vm1884_vm10, %v4084_v9, %v4085_v30 }
 0x5b9   : > { %v4333_v59 = vrot.slane %v4316_v13, 4  ;;  %4911 = vmatprep.subr.bf16.mxu0 %v12427_v42  ;;  %v11430_v21 = vunpack.i.h.bf16 %v11428_v57  ;;  %v11429_v24 = vunpack.i.l.bf16 %v11428_v57  ;;  %5016 = vmatprep.subr.bf16.mxu1 %v10713_v45  ;;  %v10751_v45 = vcombine.high %v14853_v18, %v14857_v36 }
 0x5ba   : > { %v4102_v57 = vsel %vm1008_vm7, %v14835_v58, %v4101_v53  ;;  %v10750_v42 = vcombine.low %v14853_v18, %v14857_v36  ;;  %v11577_v53 = vld [vmem:[%s18114_s4 + $0xe4] ss:$8 sps:$4 sm:$0xff]  }
 0x5bb   : > { %v4349_v6 = vsel %vm1884_vm10, %v4333_v59, %v4334_v28  ;;  %v4326_v12 = vrot.slane %v11430_v21, 4  ;;  %v4324_v62 = vrot.slane %v11429_v24, 4  ;;  %v4346_v28 = vsel %vm1008_vm7, %v14776_v41, %v4345_v25 }
 0x5bc   : > { %v11433_v7 = vpop.permute.xlu1 %11432  ;;  %v4075_v35 = vpop.permute.xlu0 %4074  ;;  %4912 = vmatpush2.bf16.msra.mxu0 %v12428_v15  ;;  %v4350_v50 = vsel %vm1008_vm7, %v4316_v13, %v4349_v6  ;;  %5017 = vmatpush1.bf16.msra.mxu1 %v10712_v46  ;;  %v4344_v46 = vsel %vm1008_vm7, %v14733_v11, %v4343_v20  ;;  %v11562_v20 = vld [vmem:[%s18114_s4 + $0x94] ss:$8 sps:$4 sm:$0xff]  }
 0x5bd   : > { %v4092_v60 = vrot.slane %v4075_v35, 4  ;;  %5024 = vmatprep.subr.bf16.mxu1 %v12429_v34  ;;  %v11435_v49 = vunpack.i.h.bf16 %v11433_v7  ;;  %v11434_v26 = vunpack.i.l.bf16 %v11433_v7  ;;  %v10757_v31 = vcombine.high %v4348_v55, %v4350_v50  ;;  %v11559_v34 = vld [vmem:[%s18114_s4 + $0x80] ss:$8 sps:$4 sm:$0xff]  }
 0x5be   : > { %v4339_v23 = vsel %vm1884_vm10, %v4323_v14, %v4324_v62  ;;  %v4341_v41 = vsel %vm1884_vm10, %v4325_v10, %v4326_v12  ;;  %v10756_v54 = vcombine.low %v4348_v55, %v4350_v50  ;;  %v10753_v33 = vcombine.high %v4344_v46, %v4346_v28  ;;  %v11564_v14 = vld [vmem:[%s18114_s4 + $0x90] ss:$8 sps:$4 sm:$0xff]  }
 0x5bf   : > { %v4109_v38 = vsel %vm1884_vm10, %v4092_v60, %v14753_v1  ;;  %v4099_v1 = vsel %vm1884_vm10, %v4082_v63, %v4083_v17  ;;  %v4081_v8 = vrot.slane %v11435_v49, 4  ;;  %v4079_v44 = vrot.slane %v11434_v26, 4  ;;  %v11565_v49 = vld [vmem:[%s18114_s4 + $0xa4] ss:$8 sps:$4 sm:$0xff]   ;;  %v11567_v26 = vld [vmem:[%s18114_s4 + $0xa0] ss:$8 sps:$4 sm:$0xff]  }
 0x5c0   : > { %v4110_v52 = vsel %vm1008_vm7, %v4075_v35, %v4109_v38  ;;  %v4047_v37 = vpop.permute.xlu0 %4046  ;;  %5025 = vmatpush2.bf16.msra.mxu1 %v12430_v61  ;;  %v4288_v32 = vpop.permute.xlu1 %4287  ;;  %v4340_v0 = vsel %vm1008_vm7, %v14811_v19, %v4339_v23  ;;  %v4342_v59 = vsel %vm1008_vm7, %v14833_v3, %v4341_v41  ;;  %v4100_v5 = vsel %vm1008_vm7, %v14813_v2, %v4099_v1  ;;  %v11568_v38 = vld [vmem:[%s18114_s4 + $0xb4] ss:$8 sps:$4 sm:$0xff]   ;;  %v11570_v10 = vld [vmem:[%s18114_s4 + $0xb0] ss:$8 sps:$4 sm:$0xff]  }
 0x5c1   : > { %v10754_v51 = vcombine.low %v4108_v39, %v4110_v52  ;;  %v10755_v29 = vcombine.high %v4108_v39, %v4110_v52  ;;  %5026 = vmatprep.subr.bf16.mxu1 %v10757_v31  ;;  %v4078_v13 = vrot.slane %v4047_v37, 4  ;;  %v10752_v21 = vcombine.low %v4344_v46, %v4346_v28  ;;  %v11571_v52 = vld [vmem:[%s18114_s4 + $0xc4] ss:$8 sps:$4 sm:$0xff]   ;;  %v11574_v31 = vld [vmem:[%s18114_s4 + $0xd4] ss:$8 sps:$4 sm:$0xff]  }
 0x5c2   : > { %v10747_v24 = vcombine.high %v4100_v5, %v4102_v57  ;;  %v10749_v55 = vcombine.high %v4340_v0, %v4342_v59  ;;  %v10746_v18 = vcombine.low %v4100_v5, %v4102_v57  ;;  %v4319_v36 = vrot.slane %v4288_v32, 4  ;;  %v11576_v28 = vld [vmem:[%s18114_s4 + $0xd0] ss:$8 sps:$4 sm:$0xff]   ;;  %v11580_v61 = vld [vmem:[%s18114_s4 + $0xf4] ss:$8 sps:$4 sm:$0xff]  }
 0x5c3   : > { %4913 = vmatprep.subr.bf16.mxu0 %v10755_v29  ;;  %v4094_v58 = vsel %vm1884_vm10, %v4078_v13, %v4079_v44  ;;  %v10748_v30 = vcombine.low %v4340_v0, %v4342_v59  ;;  %v11582_v29 = vld [vmem:[%s18114_s4 + $0xf0] ss:$8 sps:$4 sm:$0xff]  }
 0x5c4   : > { %4914 = vmatpush2.bf16.msra.mxu0 %v10754_v51  ;;  %v4051_v11 = vpop.permute.xlu0 %4050  ;;  %5027 = vmatpush2.bf16.msra.mxu1 %v10756_v54  ;;  %v4292_v40 = vpop.permute.xlu1 %4291  ;;  %v4096_v2 = vsel %vm1008_vm7, %v4047_v37, %v4094_v58  ;;  %v11573_v37 = vld [vmem:[%s18114_s4 + $0xc0] ss:$8 sps:$4 sm:$0xff]  }
 0x5c5   : > { %v4080_v48 = vrot.slane %v4051_v11, 4  ;;  %4915 = vmatprep.subr.bf16.mxu0 %v10751_v45  ;;  %5028 = vmatprep.subr.bf16.mxu1 %v10753_v33  ;;  %v4321_v17 = vrot.slane %v4292_v40, 4  ;;  %v11579_v51 = vld [vmem:[%s18114_s4 + $0xe0] ss:$8 sps:$4 sm:$0xff]  }
 0x5c7   : > { %v4097_v22 = vsel %vm1884_vm10, %v4080_v48, %v4081_v8 }
 0x5c8   : > { %v4098_v6 = vsel %vm1008_vm7, %v4051_v11, %v4097_v22  ;;  %4916 = vmatpush2.bf16.msra.mxu0 %v10750_v42  ;;  %v11438_v19 = vpop.permute.xlu0 %11437  ;;  %5029 = vmatpush2.bf16.msra.mxu1 %v10752_v21 }
 0x5c9   : > { %v11440_v3 = vunpack.i.h.bf16 %v11438_v19  ;;  %v11439_v39 = vunpack.i.l.bf16 %v11438_v19  ;;  %4917 = vmatprep.subr.bf16.mxu0 %v10747_v24  ;;  %5030 = vmatprep.subr.bf16.mxu1 %v10749_v55  ;;  %v10743_v15 = vcombine.high %v4096_v2, %v4098_v6  ;;  %v10742_v60 = vcombine.low %v4096_v2, %v4098_v6 }
 0x5cb   : > { %v4322_v7 = vrot.slane %v11440_v3, 4  ;;  %v4320_v35 = vrot.slane %v11439_v39, 4 }
 0x5cc   : > { %4918 = vmatpush2.bf16.msra.mxu0 %v10746_v18  ;;  %5031 = vmatpush2.bf16.msra.mxu1 %v10748_v30 }
 0x5cd   : > { %4919 = vmatprep.subr.bf16.mxu0 %v10743_v15  ;;  %v4335_v9 = vsel %vm1884_vm10, %v4319_v36, %v4320_v35  ;;  %v4337_v50 = vsel %vm1884_vm10, %v4321_v17, %v4322_v7 }
 0x5ce   : > { %v4336_v25 = vsel %vm1008_vm7, %v4288_v32, %v4335_v9  ;;  %v4338_v63 = vsel %vm1008_vm7, %v4292_v40, %v4337_v50 }
 0x5cf   : > { %v10744_v12 = vcombine.low %v4336_v25, %v4338_v63  ;;  %v10745_v62 = vcombine.high %v4336_v25, %v4338_v63 }
 0x5d0   : > { %4920 = vmatpush2.bf16.msra.mxu0 %v10742_v60 }
 0x5d1   : > { %5032 = vmatprep.subr.bf16.mxu1 %v10745_v62  ;;  %v15007_v21 = vpop.permute.xlu1 %4530 }
 0x5d2   : > { %5033 = vmatpush2.bf16.msra.mxu1 %v10744_v12 }
 0x5d3   : > { %4922 = vmatmul.mubr.bf16.vlgmr.msra.gmra.mxu0 %v11559_v34 }
 0x5d4   : > { %10763 = vmatprep.mubr.msk.bf16.mxu0 %vm2783_vm11, %v11562_v20 }
 0x5d5   : > { %5035 = vmatmul.mubr.bf16.vlgmr.msra.gmra.mxu1 %v11559_v34  ;;  %v15003_v58 = vpop.permute.xlu0 %4525  ;;  %v15017_v55 = vpop.permute.xlu1 %4520 }
 0x5d6   : > { %10771 = vmatprep.mubr.msk.bf16.mxu1 %vm2783_vm11, %v11562_v20 }
 0x5d9   : > { %v15013_v6 = vpop.permute.xlu0 %4515  ;;  %v15027_v2 = vpop.permute.xlu1 %4510 }
 0x5db   : > { %4932 = vmatmul.mubr.bf16.gmra.mxu0 %v11564_v14 }
 0x5dc   : > { %10764 = vmatprep.mubr.msk.bf16.mxu0 %vm2783_vm11, %v11565_v49 }
 0x5dd   : > { %5045 = vmatmul.mubr.bf16.gmra.mxu1 %v11564_v14  ;;  %v15023_v18 = vpop.permute.xlu0 %4505  ;;  %v15037_v15 = vpop.permute.xlu1 %4500 }
 0x5de   : > { %10772 = vmatprep.mubr.msk.bf16.mxu1 %vm2783_vm11, %v11565_v49 }
 0x5e1   : > { %v15033_v7 = vpop.permute.xlu0 %4495  ;;  %v15047_v63 = vpop.permute.xlu1 %4490 }
 0x5e3   : > { %4942 = vmatmul.mubr.bf16.gmra.mxu0 %v11567_v26  ;;  %v14967_v46 = vpop.f32.mrf.mxu0  ;;  %v14969_v1 = vpop.f32.mrf.mxu1 }
 0x5e4   : > { %10765 = vmatprep.mubr.msk.bf16.mxu0 %vm2783_vm11, %v11568_v38  ;;  %18357 = vst [vmem:[#allocation15_spill] sm:$0xff] %v14967_v46  ;;  %18358 = vst [vmem:[#allocation26_spill] sm:$0xff] %v14969_v1 }
 0x5e5   : > { %5055 = vmatmul.mubr.bf16.gmra.mxu1 %v11567_v26  ;;  %v14971_v32 = vpop.f32.mrf.mxu0  ;;  %v14973_v45 = vpop.f32.mrf.mxu1 }
 0x5e6   : > { %10773 = vmatprep.mubr.msk.bf16.mxu1 %vm2783_vm11, %v11568_v38  ;;  %18359 = vst [vmem:[#allocation16_spill] sm:$0xff] %v14971_v32  ;;  %18360 = vst [vmem:[#allocation13_spill] sm:$0xff] %v14973_v45  ;;  %v15043_v60 = vpop.permute.xlu0 %4485  ;;  %v15055_v38 = vpop.permute.xlu1 %4480 }
 0x5e7   : > { %v14975_v23 = vpop.f32.mrf.mxu0  ;;  %v14977_v41 = vpop.f32.mrf.mxu1 }
 0x5e8   : > { %18361 = vst [vmem:[#allocation14_spill] sm:$0xff] %v14975_v23  ;;  %18362 = vst [vmem:[#allocation17_spill] sm:$0xff] %v14977_v41 }
 0x5e9   : > { %v14979_v54 = vpop.f32.mrf.mxu0  ;;  %v14981_v8 = vpop.f32.mrf.mxu1 }
 0x5ea   : > { %18363 = vst [vmem:[#allocation18_spill] sm:$0xff] %v14979_v54  ;;  %18364 = vst [vmem:[#allocation50_spill] sm:$0xff] %v14981_v8  ;;  %v15051_v14 = vpop.permute.xlu0 %4475 }
 0x5eb   : > { %4952 = vmatmul.mubr.bf16.gmra.mxu0 %v11570_v10  ;;  %v14983_v44 = vpop.f32.mrf.mxu0  ;;  %v14985_v13 = vpop.f32.mrf.mxu1 }
 0x5ec   : > { %10766 = vmatprep.mubr.msk.bf16.mxu0 %vm2783_vm11, %v11571_v52  ;;  %18365 = vst [vmem:[#allocation51_spill] sm:$0xff] %v14983_v44  ;;  %18366 = vst [vmem:[#allocation52_spill] sm:$0xff] %v14985_v13 }
 0x5ed   : > { %5065 = vmatmul.mubr.bf16.gmra.mxu1 %v11570_v10  ;;  %v14987_v57 = vpop.f32.mrf.mxu0  ;;  %v14989_v11 = vpop.f32.mrf.mxu1 }
 0x5ee   : > { %10774 = vmatprep.mubr.msk.bf16.mxu1 %vm2783_vm11, %v11571_v52  ;;  %18367 = vst [vmem:[#allocation53_spill] sm:$0xff] %v14987_v57  ;;  %18368 = vst [vmem:[#allocation54_spill] sm:$0xff] %v14989_v11 }
 0x5ef   : > { %v14991_v33 = vpop.f32.mrf.mxu0  ;;  %v14993_v48 = vpop.f32.mrf.mxu1 }
 0x5f0   : > { %18369 = vst [vmem:[#allocation55_spill] sm:$0xff] %v14991_v33  ;;  %18370 = vst [vmem:[#allocation56_spill] sm:$0xff] %v14993_v48 }
 0x5f1   : > { %v14995_v0 = vpop.f32.mrf.mxu0  ;;  %v14997_v59 = vpop.f32.mrf.mxu1 }
 0x5f2   : > { %18371 = vst [vmem:[#allocation57_spill] sm:$0xff] %v14995_v0  ;;  %18372 = vst [vmem:[#allocation58_spill] sm:$0xff] %v14997_v59 }
 0x5f3   : > { %4962 = vmatmul.mubr.bf16.gmra.mxu0 %v11573_v37  ;;  %v14999_v42 = vpop.f32.mrf.mxu0  ;;  %v15001_v5 = vpop.f32.mrf.mxu1 }
 0x5f4   : > { %10767 = vmatprep.mubr.msk.bf16.mxu0 %vm2783_vm11, %v11574_v31  ;;  %18373 = vst [vmem:[#allocation59_spill] sm:$0xff] %v14999_v42  ;;  %18374 = vst [vmem:[#allocation60_spill] sm:$0xff] %v15001_v5 }
 0x5f5   : > { %5075 = vmatmul.mubr.bf16.gmra.mxu1 %v11573_v37  ;;  %v15005_v22 = vpop.f32.mrf.mxu0  ;;  %v15009_v24 = vpop.f32.mrf.mxu1 }
 0x5f6   : > { %10775 = vmatprep.mubr.msk.bf16.mxu1 %vm2783_vm11, %v11574_v31  ;;  %18375 = vst [vmem:[#allocation61_spill] sm:$0xff] %v15005_v22  ;;  %18376 = vst [vmem:[#allocation62_spill] sm:$0xff] %v15009_v24 }
 0x5f7   : > { %v15011_v40 = vpop.f32.mrf.mxu0  ;;  %v15015_v19 = vpop.f32.mrf.mxu1 }
 0x5f8   : > { %18377 = vst [vmem:[#allocation63_spill] sm:$0xff] %v15011_v40  ;;  %18378 = vst [vmem:[#allocation64_spill] sm:$0xff] %v15015_v19 }
 0x5f9   : > { %v15019_v3 = vpop.f32.mrf.mxu0  ;;  %v15021_v39 = vpop.f32.mrf.mxu1 }
 0x5fa   : > { %18379 = vst [vmem:[#allocation65_spill] sm:$0xff] %v15019_v3  ;;  %18380 = vst [vmem:[#allocation66_spill] sm:$0xff] %v15021_v39 }
 0x5fb   : > { %4972 = vmatmul.mubr.bf16.gmra.mxu0 %v11576_v28 }
 0x5fc   : > { %10768 = vmatprep.mubr.msk.bf16.mxu0 %vm2783_vm11, %v11577_v53 }
 0x5fd   : > { %5085 = vmatmul.mubr.bf16.gmra.mxu1 %v11576_v28  ;;  %v15059_v28 = vpop.permute.xlu0 %4465 }
 0x5fe   : > { %10776 = vmatprep.mubr.msk.bf16.mxu1 %vm2783_vm11, %v11577_v53 }
 0x601   : > { %v15065_v46 = vpop.permute.xlu0 %4455 }
 0x603   : > { %4982 = vmatmul.mubr.bf16.gmra.mxu0 %v11579_v51  ;;  %v15025_v36 = vpop.f32.mrf.mxu0  ;;  %v15029_v30 = vpop.f32.mrf.mxu1 }
 0x604   : > { %10769 = vmatprep.mubr.msk.bf16.mxu0 %vm2783_vm11, %v11580_v61  ;;  %18381 = vst [vmem:[#allocation67_spill] sm:$0xff] %v15025_v36  ;;  %18382 = vst [vmem:[#allocation68_spill] sm:$0xff] %v15029_v30 }
 0x605   : > { %5095 = vmatmul.mubr.bf16.gmra.mxu1 %v11579_v51  ;;  %v15031_v17 = vpop.f32.mrf.mxu0  ;;  %v15035_v35 = vpop.f32.mrf.mxu1 }
 0x606   : > { %10777 = vmatprep.mubr.msk.bf16.mxu1 %vm2783_vm11, %v11580_v61  ;;  %18383 = vst [vmem:[#allocation69_spill] sm:$0xff] %v15031_v17  ;;  %18384 = vst [vmem:[#allocation70_spill] sm:$0xff] %v15035_v35  ;;  %v15061_v61 = vpop.permute.xlu1 %4470 }
 0x607   : > { %v15039_v9 = vpop.f32.mrf.mxu0  ;;  %v15041_v50 = vpop.f32.mrf.mxu1 }
 0x608   : > { %18385 = vst [vmem:[#allocation71_spill] sm:$0xff] %v15039_v9  ;;  %18386 = vst [vmem:[#allocation72_spill] sm:$0xff] %v15041_v50 }
 0x609   : > { %v15045_v25 = vpop.f32.mrf.mxu0  ;;  %v15049_v12 = vpop.f32.mrf.mxu1 }
 0x60a   : > { %18387 = vst [vmem:[#allocation73_spill] sm:$0xff] %v15045_v25  ;;  %18388 = vst [vmem:[#allocation74_spill] sm:$0xff] %v15049_v12  ;;  %v15070_v23 = vpop.permute.xlu1 %4460 }
 0x60b   : > { %4992 = vmatmul.mubr.bf16.gmra.mxu0 %v11582_v29 }
 0x60c   : > { %5565 = vmatprep.mubr.bf16.mxu0 %v18289_v4 }
 0x60d   : > { %5105 = vmatmul.mubr.bf16.gmra.mxu1 %v11582_v29 }
 0x60e   : > { %5678 = vmatprep.mubr.bf16.mxu1 %v18289_v4 }
 0x693   : > { %v4923_v62 = vpop.f32.mrf.mxu0 }
 0x694   : > { %v4924_v8 = vadd.f32 %v4923_v62, %v15065_v46 }
 0x695   : > { %v4925_v34 = vpop.f32.mrf.mxu0  ;;  %v5036_v20 = vpop.f32.mrf.mxu1 }
 0x696   : > { %v4926_v11 = vadd.f32 %v4925_v34, %v15065_v46  ;;  %v5037_v13 = vadd.f32 %v5036_v20, %v15065_v46  ;;  %11851 = vtanh.f32 %v4924_v8 }
 0x697   : > { %v4927_v49 = vpop.f32.mrf.mxu0  ;;  %v15053_v26 = vpop.f32.mrf.mxu1 }
 0x698   : > { %v4928_v59 = vadd.f32 %v4927_v49, %v15070_v23  ;;  %11853 = vtanh.f32 %v4926_v11 }
 0x699   : > { %v4929_v10 = vpop.f32.mrf.mxu0  ;;  %v5040_v52 = vpop.f32.mrf.mxu1  ;;  %11855 = vtanh.f32 %v5037_v13 }
 0x69a   : > { %v4930_v48 = vadd.f32 %v4929_v10, %v15070_v23  ;;  %v5041_v62 = vadd.f32 %v5040_v52, %v15070_v23  ;;  %11857 = vtanh.f32 %v4928_v59 }
 0x69b   : > { %v4933_v37 = vpop.f32.mrf.mxu0  ;;  %v15057_v31 = vpop.f32.mrf.mxu1 }
 0x69c   : > { %v4934_v24 = vadd.f32 %v4933_v37, %v15059_v28  ;;  %11859 = vtanh.f32 %v4930_v48 }
 0x69d   : > { %v4935_v53 = vpop.f32.mrf.mxu0  ;;  %v5046_v51 = vpop.f32.mrf.mxu1  ;;  %11861 = vtanh.f32 %v5041_v62 }
 0x69e   : > { %v4936_v34 = vadd.f32 %v4935_v53, %v15059_v28  ;;  %v5047_v20 = vadd.f32 %v5046_v51, %v15059_v28  ;;  %11863 = vtanh.f32 %v4934_v24 }
 0x69f   : > { %v4937_v29 = vpop.f32.mrf.mxu0  ;;  %v15063_v45 = vpop.f32.mrf.mxu1 }
 0x6a0   : > { %v4938_v10 = vadd.f32 %v4937_v29, %v15061_v61  ;;  %11865 = vtanh.f32 %v4936_v34 }
 0x6a1   : > { %v4939_v1 = vpop.f32.mrf.mxu0  ;;  %v5050_v32 = vpop.f32.mrf.mxu1  ;;  %11867 = vtanh.f32 %v5047_v20 }
 0x6a2   : > { %v4940_v11 = vadd.f32 %v4939_v1, %v15061_v61  ;;  %v5051_v37 = vadd.f32 %v5050_v32, %v15061_v61  ;;  %11869 = vtanh.f32 %v4938_v10 }
 0x6a3   : > { %v4943_v41 = vpop.f32.mrf.mxu0  ;;  %v15068_v54 = vpop.f32.mrf.mxu1 }
 0x6a4   : > { %v4944_v59 = vadd.f32 %v4943_v41, %v15051_v14  ;;  %11871 = vtanh.f32 %v4940_v11  ;;  %v15098_v20 = vpop.eup %11851 }
 0x6a5   : > { %v4945_v57 = vpop.f32.mrf.mxu0  ;;  %v5056_v44 = vpop.f32.mrf.mxu1  ;;  %11873 = vtanh.f32 %v5051_v37 }
 0x6a6   : > { %v4946_v51 = vadd.f32 %v4945_v57, %v15051_v14  ;;  %v5057_v24 = vadd.f32 %v5056_v44, %v15051_v14  ;;  %11875 = vtanh.f32 %v4944_v59  ;;  %v15101_v10 = vpop.eup %11853 }
 0x6a7   : > { %v4947_v0 = vpop.f32.mrf.mxu0  ;;  %v5058_v33 = vpop.f32.mrf.mxu1  ;;  %18389 = vst [vmem:[#allocation75_spill] sm:$0xff] %v15101_v10 }
 0x6a8   : > { %v4948_v32 = vadd.f32 %v4947_v0, %v15055_v38  ;;  %v5059_v41 = vadd.f32 %v5058_v33, %v15051_v14  ;;  %11877 = vtanh.f32 %v4946_v51  ;;  %v15104_v42 = vpop.eup %11855 }
 0x6a9   : > { %v4949_v5 = vpop.f32.mrf.mxu0  ;;  %v5060_v22 = vpop.f32.mrf.mxu1  ;;  %11879 = vtanh.f32 %v5057_v24 }
 0x6aa   : > { %v4950_v44 = vadd.f32 %v4949_v5, %v15055_v38  ;;  %11881 = vtanh.f32 %v4948_v32  ;;  %v15107_v14 = vpop.eup %11857  ;;  %v5061_v59 = vadd.f32 %v5060_v22, %v15055_v38 }
 0x6ab   : > { %v4953_v49 = vpop.f32.mrf.mxu0  ;;  %v5062_v8 = vpop.f32.mrf.mxu1  ;;  %11883 = vtanh.f32 %v5059_v41 }
 0x6ac   : > { %v15110_v39 = vpop.eup %11859  ;;  %v4954_v24 = vadd.f32 %v4953_v49, %v15043_v60  ;;  %11885 = vtanh.f32 %v4950_v44  ;;  %v5063_v30 = vadd.f32 %v5062_v8, %v15055_v38 }
 0x6ad   : > { %v4955_v52 = vpop.f32.mrf.mxu0  ;;  %v5066_v13 = vpop.f32.mrf.mxu1  ;;  %18390 = vst [vmem:[#allocation76_spill] sm:$0xff] %v15110_v39 }
 0x6ae   : > { %v15114_v40 = vpop.eup %11861  ;;  %v4956_v44 = vadd.f32 %v4955_v52, %v15043_v60 }
 0x6af   : > { %v15084_v53 = vpop.f32.mrf.mxu0  ;;  %v15086_v48 = vpop.f32.mrf.mxu1 }
 0x6b1   : > { %v15090_v29 = vpop.f32.mrf.mxu0  ;;  %v15092_v1 = vpop.f32.mrf.mxu1 }
 0x6b3   : > { %v4963_v62 = vpop.f32.mrf.mxu0  ;;  %v15096_v34 = vpop.f32.mrf.mxu1 }
 0x6b4   : > { %v4964_v57 = vadd.f32 %v4963_v62, %v15033_v7 }
 0x6b5   : > { %v4965_v11 = vpop.f32.mrf.mxu0  ;;  %v5076_v37 = vpop.f32.mrf.mxu1 }
 0x6b6   : > { %v5147_v0 = vsub.f32 0.0, %v4964_v57  ;;  %v5077_v33 = vadd.f32 %v5076_v37, %v15033_v7  ;;  %v15116_v37 = vpop.eup %11863 }
 0x6b7   : > { %v4967_v51 = vpop.f32.mrf.mxu0  ;;  %v5078_v62 = vpop.f32.mrf.mxu1 }
 0x6b8   : > { %v5179_v5 = vmul.f32 1.442695, %v5147_v0  ;;  %v5149_v19 = vsub.f32 0.0, %v5077_v33  ;;  %v4968_v3 = vadd.f32 %v4967_v51, %v15037_v15  ;;  %v15118_v35 = vpop.eup %11865 }
 0x6b9   : > { %v4969_v32 = vpop.f32.mrf.mxu0  ;;  %v5080_v57 = vpop.f32.mrf.mxu1 }
 0x6ba   : > { %11887 = vpow2.f32 %v5179_v5  ;;  %v5183_v41 = vmul.f32 1.442695, %v5149_v19  ;;  %v5151_v22 = vsub.f32 0.0, %v4968_v3  ;;  %v5081_v49 = vadd.f32 %v5080_v57, %v15037_v15  ;;  %v15122_v51 = vpop.eup %11867 }
 0x6bb   : > { %11889 = vtanh.f32 %v5061_v59  ;;  %v4973_v0 = vpop.f32.mrf.mxu0  ;;  %v5082_v33 = vpop.f32.mrf.mxu1  ;;  %v5067_v19 = vadd.f32 %v5066_v13, %v15043_v60  ;;  %v4958_v13 = vadd.f32 %v15084_v53, %v15047_v63 }
 0x6bc   : > { %11891 = vtanh.f32 %v4954_v24  ;;  %v5187_v17 = vmul.f32 1.442695, %v5151_v22  ;;  %v4974_v36 = vadd.f32 %v4973_v0, %v15023_v18  ;;  %v15126_v5 = vpop.eup %11869  ;;  %v5153_v3 = vsub.f32 0.0, %v5081_v49 }
 0x6bd   : > { %11893 = vpow2.f32 %v5183_v41  ;;  %v4975_v59 = vpop.f32.mrf.mxu0  ;;  %v5086_v38 = vpop.f32.mrf.mxu1 }
 0x6be   : > { %v15129_v8 = vpop.eup %11871  ;;  %11895 = vpow2.f32 %v5187_v17  ;;  %v5155_v57 = vsub.f32 0.0, %v4974_v36  ;;  %v5191_v24 = vmul.f32 1.442695, %v5153_v3  ;;  %v5087_v52 = vadd.f32 %v5086_v38, %v15023_v18 }
 0x6bf   : > { %v15131_v12 = vpop.eup %11873  ;;  %11897 = vtanh.f32 %v5063_v30  ;;  %v4977_v22 = vpop.f32.mrf.mxu0  ;;  %v5069_v36 = vadd.f32 %v15086_v48, %v15043_v60  ;;  %v4966_v30 = vadd.f32 %v4965_v11, %v15033_v7  ;;  %v4960_v48 = vadd.f32 %v15090_v29, %v15047_v63 }
 0x6c0   : > { %v5088_v0 = vpop.f32.mrf.mxu1  ;;  %v15134_v50 = vpop.eup %11875  ;;  %11899 = vtanh.f32 %v4956_v44  ;;  %v5195_v41 = vmul.f32 1.442695, %v5155_v57  ;;  %v4978_v49 = vadd.f32 %v4977_v22, %v15027_v2  ;;  %v5157_v17 = vsub.f32 0.0, %v5087_v52 }
 0x6c1   : > { %v15139_v25 = vpop.eup %11877  ;;  %11901 = vtanh.f32 %v5067_v19  ;;  %v4979_v3 = vpop.f32.mrf.mxu0  ;;  %v5079_v44 = vadd.f32 %v5078_v62, %v15033_v7  ;;  %v5071_v7 = vadd.f32 %v15092_v1, %v15047_v63  ;;  %v5148_v62 = vsub.f32 0.0, %v4966_v30 }
 0x6c2   : > { %v5090_v38 = vpop.f32.mrf.mxu1  ;;  %v15144_v9 = vpop.eup %11879  ;;  %11903 = vpow2.f32 %v5191_v24  ;;  %v5159_v53 = vsub.f32 0.0, %v4978_v49  ;;  %v5199_v22 = vmul.f32 1.442695, %v5157_v17  ;;  %v4970_v24 = vadd.f32 %v4969_v32, %v15037_v15 }
 0x6c3   : > { %v15147_v57 = vpop.eup %11881  ;;  %11905 = vpow2.f32 %v5195_v41  ;;  %v5091_v19 = vadd.f32 %v5090_v38, %v15027_v2  ;;  %v4983_v43 = vpop.f32.mrf.mxu0  ;;  %v5073_v38 = vadd.f32 %v15096_v34, %v15047_v63  ;;  %v5083_v29 = vadd.f32 %v5082_v33, %v15037_v15 }
 0x6c4   : > { %v15150_v27 = vpop.f32.mrf.mxu1  ;;  %v15152_v60 = vpop.eup %11883  ;;  %11907 = vtanh.f32 %v4958_v13  ;;  %v5203_v11 = vmul.f32 1.442695, %v5159_v53  ;;  %v5150_v13 = vsub.f32 0.0, %v5079_v44  ;;  %v4976_v1 = vadd.f32 %v4975_v59, %v15023_v18 }
 0x6c5   : > { %18391 = vst [vmem:[#allocation77_spill] sm:$0xff] %v15152_v60  ;;  %11909 = vtanh.f32 %v5069_v36  ;;  %v5161_v52 = vsub.f32 0.0, %v5091_v19  ;;  %v4985_v41 = vpop.f32.mrf.mxu0  ;;  %v15159_v17 = vpop.eup %11885  ;;  %v5181_v63 = vmul.f32 1.442695, %v5148_v62  ;;  %v5152_v34 = vsub.f32 0.0, %v4970_v24 }
 0x6c6   : > { %v5096_v49 = vpop.f32.mrf.mxu1  ;;  %11911 = vpow2.f32 %v5199_v22  ;;  %v5089_v15 = vadd.f32 %v5088_v0, %v15023_v18  ;;  %v5185_v22 = vmul.f32 1.442695, %v5150_v13  ;;  %v4984_v4 = vadd.f32 %v4983_v43, %v15013_v6 }
 0x6c7   : > { %v11888_v56 = vpop.eup %11887  ;;  %11913 = vpow2.f32 %v5203_v11  ;;  %v5207_v36 = vmul.f32 1.442695, %v5161_v52  ;;  %v4987_v30 = vpop.f32.mrf.mxu0  ;;  %v5154_v11 = vsub.f32 0.0, %v5083_v29  ;;  %v5156_v52 = vsub.f32 0.0, %v4976_v1 }
 0x6c8   : > { %v15165_v53 = vpop.eup %11889  ;;  %11915 = vtanh.f32 %v4960_v48  ;;  %v5243_v32 = vadd.f32 1.0, %v11888_v56  ;;  %v15167_v19 = vpop.f32.mrf.mxu1  ;;  %v5189_v24 = vmul.f32 1.442695, %v5152_v34  ;;  %v4980_v18 = vadd.f32 %v4979_v3, %v15027_v2 }
 0x6c9   : > { %v15169_v16 = vpop.eup %11891  ;;  %11917 = vtanh.f32 %v5071_v7  ;;  %v4989_v33 = vpop.f32.mrf.mxu0  ;;  %v5193_v1 = vmul.f32 1.442695, %v5154_v11  ;;  %v5163_v43 = vsub.f32 0.0, %v4984_v4  ;;  %v4988_v11 = vadd.f32 %v4987_v30, %v15017_v55 }
 0x6ca   : > { %v11894_v44 = vpop.eup %11893  ;;  %11919 = vtanh.f32 %v5073_v38  ;;  %v5100_v7 = vpop.f32.mrf.mxu1  ;;  %v5158_v38 = vsub.f32 0.0, %v5089_v15  ;;  %v5160_v34 = vsub.f32 0.0, %v4980_v18 }
 0x6cb   : > { %v11896_v59 = vpop.eup %11895  ;;  %11921 = vpow2.f32 %v5207_v36  ;;  %v5245_v56 = vadd.f32 1.0, %v11894_v44  ;;  %v4993_v13 = vpop.f32.mrf.mxu0  ;;  %v5197_v36 = vmul.f32 1.442695, %v5156_v52 }
 0x6cc   : > { %v15172_v47 = vpop.eup %11897  ;;  %11923 = vrcp.f32 %v5243_v32  ;;  %v5247_v48 = vadd.f32 1.0, %v11896_v59  ;;  %v5097_v59 = vadd.f32 %v5096_v49, %v15013_v6  ;;  %v5102_v10 = vpop.f32.mrf.mxu1  ;;  %v5201_v15 = vmul.f32 1.442695, %v5158_v38 }
 0x6cd   : > { %18392 = vst [vmem:[#allocation78_spill] sm:$0xff] %v15172_v47  ;;  %v15175_v62 = vpop.eup %11899  ;;  %11925 = vpow2.f32 %v5181_v63  ;;  %v4995_v52 = vpop.f32.mrf.mxu0  ;;  %v5211_v49 = vmul.f32 1.442695, %v5163_v43  ;;  %v5101_v38 = vadd.f32 %v5100_v7, %v15017_v55  ;;  %v5205_v30 = vmul.f32 1.442695, %v5160_v34 }
 0x6ce   : > { %v15178_v0 = vpop.eup %11901  ;;  %11927 = vrcp.f32 %v5247_v48  ;;  %v5165_v48 = vsub.f32 0.0, %v5097_v59  ;;  %v4994_v43 = vadd.f32 %v4993_v13, %v15003_v58  ;;  %v15200_v7 = vadd.f32 %v15150_v27, %v15027_v2 }
 0x6cf   : > { %18393 = vst [vmem:[#allocation79_spill] sm:$0xff] %v15178_v0  ;;  %v11904_v29 = vpop.eup %11903  ;;  %11929 = vpow2.f32 %v5185_v22  ;;  %v4986_v22 = vadd.f32 %v4985_v41, %v15013_v6  ;;  %v4997_v0 = vpop.f32.mrf.mxu0  ;;  %v5103_v13 = vadd.f32 %v5102_v10, %v15017_v55 }
 0x6d0   : > { %v11906_v32 = vpop.eup %11905  ;;  %11931 = vrcp.f32 %v5245_v56  ;;  %v5249_v44 = vadd.f32 1.0, %v11904_v29  ;;  %v4990_v29 = vadd.f32 %v4989_v33, %v15017_v55  ;;  %v5099_v33 = vadd.f32 %v15167_v19, %v15013_v6 }
 0x6d1   : > { %v15181_v63 = vpop.eup %11907  ;;  %11933 = vpow2.f32 %v5189_v24  ;;  %v5251_v3 = vadd.f32 1.0, %v11906_v32  ;;  %v5106_v24 = vpop.f32.mrf.mxu1  ;;  %v5164_v39 = vsub.f32 0.0, %v4986_v22  ;;  %v5171_v2 = vsub.f32 0.0, %v4994_v43 }
 0x6d2   : > { %v15183_v60 = vpop.eup %11909  ;;  %11935 = vrcp.f32 %v5249_v44  ;;  %v5166_v27 = vsub.f32 0.0, %v5099_v33 }
 0x6d3   : > { %v11912_v56 = vpop.eup %11911  ;;  %11937 = vpow2.f32 %v5193_v1  ;;  %v5167_v1 = vsub.f32 0.0, %v4988_v11  ;;  %v5108_v34 = vpop.f32.mrf.mxu1  ;;  %v5213_v6 = vmul.f32 1.442695, %v5164_v39 }
 0x6d4   : > { %v11914_v4 = vpop.eup %11913  ;;  %11939 = vpow2.f32 %v5197_v36  ;;  %v5253_v18 = vadd.f32 1.0, %v11912_v56  ;;  %v5169_v56 = vsub.f32 0.0, %v5101_v38  ;;  %v5107_v38 = vadd.f32 %v5106_v24, %v15003_v58 }
 0x6d5   : > { %v15188_v32 = vpop.eup %11915  ;;  %11941 = vrcp.f32 %v5251_v3  ;;  %v5255_v44 = vadd.f32 1.0, %v11914_v4  ;;  %v5215_v3 = vmul.f32 1.442695, %v5165_v48  ;;  %v4996_v4 = vadd.f32 %v4995_v52, %v15003_v58  ;;  %v5110_v52 = vpop.f32.mrf.mxu1 }
 0x6d6   : > { %v15191_v41 = vpop.eup %11917  ;;  %11943 = vpow2.f32 %v5201_v15  ;;  %v5168_v15 = vsub.f32 0.0, %v4990_v29  ;;  %v5219_v19 = vmul.f32 1.442695, %v5167_v1  ;;  %v4998_v48 = vadd.f32 %v4997_v0, %v15007_v21 }
 0x6d7   : > { %v15193_v36 = vpop.eup %11919  ;;  %11945 = vrcp.f32 %v5255_v44  ;;  %v5223_v10 = vmul.f32 1.442695, %v5169_v56  ;;  %v5170_v0 = vsub.f32 0.0, %v5103_v13  ;;  %v5109_v43 = vadd.f32 %v5108_v34, %v15003_v58  ;;  %v5112_v13 = vpop.f32.mrf.mxu1 }
 0x6d8   : > { %v11922_v59 = vpop.eup %11921  ;;  %11947 = vpow2.f32 %v5211_v49  ;;  %v4999_v49 = vpop.f32.mrf.mxu0 }
 0x6d9   : > { %v11924_v22 = vpop.eup %11923  ;;  %11949 = vrcp.f32 %v5253_v18  ;;  %v5257_v11 = vadd.f32 1.0, %v11922_v59  ;;  %v5221_v18 = vmul.f32 1.442695, %v5168_v15  ;;  %v5000_v1 = vadd.f32 %v4999_v49, %v15007_v21 }
 0x6da   : > { %v15203_v44 = vpop.eup %11925  ;;  %11951 = vpow2.f32 %v5205_v30  ;;  %v15211_v59 = vmul.f32 %v11924_v22, %v15098_v20  ;;  %v5172_v30 = vsub.f32 0.0, %v4996_v4  ;;  %v5217_v15 = vmul.f32 1.442695, %v5166_v27 }
 0x6db   : > { %v11928_v47 = vpop.eup %11927  ;;  %11953 = vrcp.f32 %v5257_v11  ;;  %v5227_v22 = vmul.f32 1.442695, %v5171_v2  ;;  %v5173_v11 = vsub.f32 0.0, %v5107_v38  ;;  %v5225_v27 = vmul.f32 1.442695, %v5170_v0 }
 0x6dc   : > { %v15207_v29 = vpop.eup %11929  ;;  %v15214_v39 = vmul.f32 %v11928_v47, %v15107_v14  ;;  %11955 = vpow2.f32 %v5215_v3  ;;  %v5175_v47 = vsub.f32 0.0, %v4998_v48  ;;  %v5111_v14 = vadd.f32 %v5110_v52, %v15007_v21 }
 0x6dd   : > { %v11932_v55 = vpop.eup %11931  ;;  %11957 = vpow2.f32 %v5219_v19  ;;  %v5229_v34 = vmul.f32 1.442695, %v5172_v30  ;;  %v5176_v19 = vsub.f32 0.0, %v5000_v1  ;;  %v5174_v2 = vsub.f32 0.0, %v5109_v43 }
 0x6de   : > { %v15217_v33 = vpop.eup %11933  ;;  %v5356_v24 = vpack.c.bf16 %v15214_v39, %v15211_v59  ;;  %11959 = vpow2.f32 %v5213_v6  ;;  %v15226_v56 = vmul.f32 %v11932_v55, %v15104_v42  ;;  %v5235_v42 = vmul.f32 1.442695, %v5175_v47  ;;  %v11585_v59 = vld [vmem:[%s18116_s6 + $0x50] sm:$0xff]   ;;  %v11586_v39 = vld [vmem:[%s18116_s6 + $0x58] sm:$0xff]  }
 0x6df   : > { %v11936_v20 = vpop.eup %11935  ;;  %11961 = vpow2.f32 %v5221_v18  ;;  %v5177_v38 = vsub.f32 0.0, %v5111_v14  ;;  %v5231_v18 = vmul.f32 1.442695, %v5173_v11  ;;  %v5113_v55 = vadd.f32 %v5112_v13, %v15007_v21 }
 0x6e0   : > { %v15223_v3 = vpop.eup %11937  ;;  %v15229_v4 = vmul.f32 %v11936_v20, %v15114_v40  ;;  %11963 = vpow2.f32 %v5223_v10  ;;  %v5162_v40 = vsub.f32 0.0, %v15200_v7  ;;  %v5237_v10 = vmul.f32 1.442695, %v5176_v19 }
 0x6e1   : > { %v11940_v58 = vpop.eup %11939  ;;  %11965 = vpow2.f32 %v5217_v15  ;;  %v5233_v20 = vmul.f32 1.442695, %v5174_v2  ;;  %v5239_v47 = vmul.f32 1.442695, %v5177_v38  ;;  %v5178_v14 = vsub.f32 0.0, %v5113_v55 }
 0x6e2   : > { %v11942_v49 = vpop.eup %11941  ;;  %v5358_v48 = vpack.c.bf16 %v15229_v4, %v15226_v56  ;;  %11967 = vpow2.f32 %v5227_v22  ;;  %v5209_v11 = vmul.f32 1.442695, %v5162_v40  ;;  %v5248_v38 = vadd.f32 1.0, %v15217_v33  ;;  %v6111_v56 = vld [vmem:[#allocation2 + $0xec] sm:$0xf] }
 0x6e3   : > { %v15233_v6 = vpop.eup %11943  ;;  %11969 = vpow2.f32 %v5229_v34  ;;  %v15238_v1 = vmul.f32 %v11942_v49, %v15116_v37  ;;  %v5241_v2 = vmul.f32 1.442695, %v5178_v14 }
 0x6e4   : > { %v11946_v52 = vpop.eup %11945  ;;  %11971 = vpow2.f32 %v5225_v27 }
 0x6e5   : > { %v11948_v30 = vpop.eup %11947  ;;  %v15241_v0 = vmul.f32 %v11946_v52, %v15126_v5  ;;  %11973 = vpow2.f32 %v5235_v42 }
 0x6e6   : > { %v11950_v43 = vpop.eup %11949  ;;  %v5259_v21 = vadd.f32 1.0, %v11948_v30  ;;  %11975 = vpow2.f32 %v5231_v18 }
 0x6e7   : > { %v11952_v15 = vpop.eup %11951  ;;  %v5360_v7 = vpack.c.bf16 %v15241_v0, %v15238_v1  ;;  %11977 = vpow2.f32 %v5237_v10  ;;  %v15246_v37 = vmul.f32 %v11950_v43, %v15122_v51  ;;  %v18399_v0 = vmov 0  }
 0x6e8   : > { %v11954_v22 = vpop.eup %11953  ;;  %11979 = vpow2.f32 %v5233_v20 }
 0x6e9   : > { %v15249_v5 = vmul.f32 %v11954_v22, %v15131_v12  ;;  %v11956_v34 = vpop.eup %11955  ;;  %11981 = vpow2.f32 %v5239_v47  ;;  %v5252_v12 = vadd.f32 1.0, %v11940_v58 }
 0x6ea   : > { %v11958_v19 = vpop.eup %11957  ;;  %v5261_v13 = vadd.f32 1.0, %v11956_v34  ;;  %11983 = vrcp.f32 %v5259_v21 }
 0x6eb   : > { %v5362_v49 = vpack.c.bf16 %v15249_v5, %v15246_v37  ;;  %v5263_v27 = vadd.f32 1.0, %v11958_v19  ;;  %v11960_v42 = vpop.eup %11959  ;;  %11985 = vpow2.f32 %v5209_v11  ;;  %v5256_v11 = vadd.f32 1.0, %v11952_v15  ;;  %v6107_v37 = vld [vmem:[#allocation2 + $0xac] sm:$0xf]  ;;  %v6350_v5 = vld [vmem:[#allocation2 + $0xdc] sm:$0xf] }
 0x6ec   : > { %v11962_v51 = vpop.eup %11961  ;;  %v5260_v18 = vadd.f32 1.0, %v11960_v42 }
 0x6ed   : > { %11987 = vrcp.f32 %v5263_v27  ;;  %v11964_v52 = vpop.eup %11963  ;;  %v5264_v10 = vadd.f32 1.0, %v11962_v51 }
 0x6ee   : > { %11989 = vrcp.f32 %v5261_v13  ;;  %v11966_v40 = vpop.eup %11965  ;;  %v5265_v55 = vadd.f32 1.0, %v11964_v52 }
 0x6ef   : > { %11991 = vpow2.f32 %v5241_v2  ;;  %v11968_v30 = vpop.eup %11967  ;;  %v5262_v19 = vadd.f32 1.0, %v11966_v40 }
 0x6f0   : > { %11993 = vrcp.f32 %v5248_v38  ;;  %v11970_v43 = vpop.eup %11969  ;;  %v5267_v33 = vadd.f32 1.0, %v11968_v30 }
 0x6f1   : > { %11995 = vrcp.f32 %v5265_v55  ;;  %v11972_v20 = vpop.eup %11971  ;;  %v5268_v47 = vadd.f32 1.0, %v11970_v43 }
 0x6f2   : > { %11997 = vrcp.f32 %v5252_v12  ;;  %v11974_v22 = vpop.eup %11973  ;;  %v5266_v2 = vadd.f32 1.0, %v11972_v20 }
 0x6f3   : > { %11999 = vrcp.f32 %v5260_v18  ;;  %v11976_v21 = vpop.eup %11975  ;;  %v5271_v14 = vadd.f32 1.0, %v11974_v22 }
 0x6f4   : > { %12001 = vrcp.f32 %v5264_v10  ;;  %v11978_v58 = vpop.eup %11977  ;;  %v5269_v18 = vadd.f32 1.0, %v11976_v21  ;;  %v5244_v10 = vadd.f32 1.0, %v15203_v44 }
 0x6f5   : > { %12003 = vrcp.f32 %v5268_v47  ;;  %v11980_v34 = vpop.eup %11979  ;;  %v5272_v13 = vadd.f32 1.0, %v11978_v58 }
 0x6f6   : > { %12005 = vrcp.f32 %v5271_v14  ;;  %v11982_v27 = vpop.eup %11981  ;;  %v5270_v52 = vadd.f32 1.0, %v11980_v34 }
 0x6f7   : > { %12007 = vrcp.f32 %v5267_v33  ;;  %v11984_v42 = vpop.eup %11983  ;;  %v5273_v38 = vadd.f32 1.0, %v11982_v27 }
 0x6f8   : > { %12009 = vrcp.f32 %v5272_v13  ;;  %v11986_v51 = vpop.eup %11985  ;;  %v15255_v15 = vmul.f32 %v11984_v42, %v15134_v50  ;;  %v5053_v50 = vadd.f32 %v15068_v54, %v15061_v61 }
 0x6f9   : > { %12011 = vrcp.f32 %v5256_v11  ;;  %v5258_v20 = vadd.f32 1.0, %v11986_v51  ;;  %v5049_v11 = vadd.f32 %v15063_v45, %v15059_v28  ;;  %v5039_v28 = vadd.f32 %v15053_v26, %v15065_v46 }
 0x6fa   : > { %v11988_v12 = vpop.eup %11987  ;;  %12013 = vrcp.f32 %v5262_v19  ;;  %v5250_v19 = vadd.f32 1.0, %v15223_v3 }
 0x6fb   : > { %v11990_v55 = vpop.eup %11989  ;;  %12015 = vrcp.f32 %v5266_v2  ;;  %v15258_v40 = vmul.f32 %v11988_v12, %v15147_v57  ;;  %v5254_v57 = vadd.f32 1.0, %v15233_v6 }
 0x6fc   : > { %v11992_v30 = vpop.eup %11991  ;;  %12017 = vrcp.f32 %v5273_v38  ;;  %v15269_v44 = vmul.f32 %v11990_v55, %v15144_v9  ;;  %v5043_v9 = vadd.f32 %v15057_v31, %v15070_v23 }
 0x6fd   : > { %v15261_v43 = vpop.eup %11993  ;;  %12019 = vrcp.f32 %v5270_v52  ;;  %v5274_v47 = vadd.f32 1.0, %v11992_v30  ;;  %v5364_v22 = vpack.c.bf16 %v15258_v40, %v15255_v15 }
 0x6fe   : > { %v11996_v33 = vpop.eup %11995  ;;  %12021 = vrcp.f32 %v5269_v18 }
 0x6ff   : > { %v11998_v21 = vpop.eup %11997  ;;  %12023 = vrcp.f32 %v5274_v47  ;;  %v15272_v14 = vmul.f32 %v11996_v33, %v15165_v53  ;;  %v5246_v53 = vadd.f32 1.0, %v15207_v29  ;;  %v18395_v33 = vld [vmem:[#allocation79_spill] sm:$0xff] }
 0x700   : > { %v12000_v58 = vpop.eup %11999  ;;  %12025 = vrcp.f32 %v5244_v10  ;;  %v18394_v10 = vld [vmem:[#allocation78_spill] sm:$0xff] }
 0x701   : > { %v12002_v34 = vpop.eup %12001  ;;  %12027 = vrcp.f32 %v5258_v20  ;;  %v5366_v54 = vpack.c.bf16 %v15272_v14, %v15269_v44  ;;  %v5324_v52 = vmul.f32 %v12000_v58, %v15139_v25  ;;  %v6352_v44 = vld [vmem:[#allocation2 + $0xfc] sm:$0xf] }
 0x702   : > { %v12004_v61 = vpop.eup %12003  ;;  %12029 = vtanh.f32 %v5053_v50  ;;  %v5328_v31 = vmul.f32 %v12002_v34, %v15159_v17  ;;  %v11446_v14 = vpack.i.bf16 %v6352_v44, %v6350_v5 }
 0x703   : > { %v12006_v6 = vpop.eup %12005  ;;  %12031 = vrcp.f32 %v5254_v57  ;;  %v5332_v2 = vmul.f32 %v12004_v61, %v15175_v62 }
 0x704   : > { %v12008_v13 = vpop.eup %12007  ;;  %12033 = vtanh.f32 %v5049_v11  ;;  %v5335_v3 = vmul.f32 %v12006_v6, %v15181_v63  ;;  %v5365_v12 = vpack.c.bf16 %v5328_v31, %v5324_v52  ;;  %11447 = vrot.lane.b32.xlu0 %v11446_v14, %s12572_s22 }
 0x705   : > { %v12010_v45 = vpop.eup %12009  ;;  %12035 = vrcp.f32 %v5250_v19  ;;  %v5331_v29 = vmul.f32 %v12008_v13, %v15169_v16  ;;  %v5316_v16 = vmul.f32 %v11998_v21, %v15118_v35  ;;  %v18397_v19 = vld [vmem:[#allocation77_spill] sm:$0xff] }
 0x706   : > { %v12012_v27 = vpop.eup %12011  ;;  %12037 = vtanh.f32 %v5043_v9  ;;  %v5336_v23 = vmul.f32 %v12010_v45, %v15188_v32 }
 0x707   : > { %v12014_v42 = vpop.eup %12013  ;;  %12039 = vrcp.f32 %v5246_v53  ;;  %v5368_v26 = vpack.c.bf16 %v5335_v3, %v5331_v29  ;;  %v5320_v62 = vmul.f32 %v12012_v27, %v15129_v8  ;;  %v18396_v8 = vld [vmem:[#allocation76_spill] sm:$0xff] }
 0x708   : > { %v12016_v38 = vpop.eup %12015  ;;  %v5369_v51 = vpack.c.bf16 %v5336_v23, %v5332_v2  ;;  %12041 = vtanh.f32 %v5039_v28  ;;  %v5312_v58 = vmul.f32 %v15261_v43, %v18396_v8  ;;  %v11583_v3 = vld [vmem:[%s18116_s6 + $0x40] sm:$0xff]   ;;  %v15352_v2 = vpop.permute.xlu1 %5426 }
 0x709   : > { %v12018_v46 = vpop.eup %12017  ;;  %v5330_v20 = vmul.f32 %v12016_v38, %v18394_v10  ;;  %v5361_v57 = vpack.c.bf16 %v5320_v62, %v5316_v16 }
 0x70a   : > { %v12020_v63 = vpop.eup %12019  ;;  %5541 = vmatprep.subr.bf16.mxu0 %v5369_v51  ;;  %v5337_v17 = vmul.f32 %v12018_v46, %v15191_v41  ;;  %v5326_v41 = vmul.f32 %v12014_v42, %v18397_v19 }
 0x70b   : > { %v12022_v18 = vpop.eup %12021  ;;  %5542 = vmatpush1.bf16.msra.mxu0 %v5368_v26  ;;  %v5334_v30 = vmul.f32 %v12020_v63, %v15183_v60  ;;  %v18400_v26 = vld [vmem:[#allocation48_spill] sm:$0xff] }
 0x70c   : > { %v12024_v32 = vpop.eup %12023  ;;  %5543 = vmatprep.subr.bf16.mxu0 %v5365_v12  ;;  %v5333_v50 = vmul.f32 %v12022_v18, %v18395_v33  ;;  %v5367_v9 = vpack.c.bf16 %v5330_v20, %v5326_v41  ;;  %v15356_v31 = vpop.permute.xlu1 %5416  ;;  %v18404_v20 = vld [vmem:[#allocation46_spill] sm:$0xff]  ;;  %v18406_v41 = vld [vmem:[#allocation44_spill] sm:$0xff] }
 0x70d   : > { %v12026_v55 = vpop.eup %12025  ;;  %v5338_v25 = vmul.f32 %v12024_v32, %v15193_v36  ;;  %v18398_v36 = vld [vmem:[#allocation75_spill] sm:$0xff]  ;;  %v18401_v32 = vld [vmem:[#allocation49_spill] sm:$0xff] }
 0x70e   : > { %v12028_v47 = vpop.eup %12027  ;;  %v5370_v60 = vpack.c.bf16 %v5337_v17, %v5333_v50  ;;  %v5308_v21 = vmul.f32 %v12026_v55, %v18398_v36 }
 0x70f   : > { %v12030_v11 = vpop.eup %12029  ;;  %v5371_v34 = vpack.c.bf16 %v5338_v25, %v5334_v30  ;;  %5544 = vmatpush1.bf16.msra.mxu0 %v5364_v22 }
 0x710   : > { %v12032_v35 = vpop.eup %12031  ;;  %5545 = vmatprep.subr.bf16.mxu0 %v5361_v57  ;;  %v5322_v6 = vmul.f32 %v12030_v11, %v12028_v47  ;;  %v5357_v43 = vpack.c.bf16 %v5312_v58, %v5308_v21  ;;  %v15360_v29 = vpop.permute.xlu1 %5406  ;;  %v18405_v11 = vld [vmem:[#allocation47_spill] sm:$0xff] }
 0x711   : > { %v12034_v61 = vpop.eup %12033  ;;  %5654 = vmatprep.subr.bf16.mxu1 %v5371_v34 }
 0x712   : > { %v12036_v53 = vpop.eup %12035  ;;  %5655 = vmatpush1.bf16.msra.mxu1 %v5370_v60  ;;  %v5318_v45 = vmul.f32 %v12034_v61, %v12032_v35 }
 0x713   : > { %v12038_v13 = vpop.eup %12037  ;;  %5656 = vmatprep.subr.bf16.mxu1 %v5367_v9  ;;  %5546 = vmatpush1.bf16.msra.mxu0 %v5360_v7  ;;  %v11584_v7 = vld [vmem:[%s18116_s6 + $0x48] sm:$0xff]  }
 0x714   : > { %v12040_v15 = vpop.eup %12039  ;;  %5547 = vmatprep.subr.bf16.mxu0 %v5357_v43  ;;  %v5363_v40 = vpack.c.bf16 %v5322_v6, %v5318_v45  ;;  %v5314_v22 = vmul.f32 %v12038_v13, %v12036_v53  ;;  %v5397_v62 = vpop.permute.xlu1 %5396  ;;  %v18409_v6 = vld [vmem:[#allocation43_spill] sm:$0xff]  ;;  %v18410_v13 = vld [vmem:[#allocation45_spill] sm:$0xff] }
 0x715   : > { %v12042_v28 = vpop.eup %12041 }
 0x716   : > { %5657 = vmatpush1.bf16.msra.mxu1 %v5366_v54  ;;  %v5310_v27 = vmul.f32 %v12042_v28, %v12040_v15  ;;  %v15350_v54 = vpop.permute.xlu0 %5421 }
 0x717   : > { %5658 = vmatprep.subr.bf16.mxu1 %v5363_v40  ;;  %5548 = vmatpush1.bf16.msra.mxu0 %v5356_v24  ;;  %v6109_v24 = vld [vmem:[#allocation2 + $0xcc] sm:$0xf] }
 0x718   : > { %v5359_v1 = vpack.c.bf16 %v5314_v22, %v5310_v27  ;;  %v11441_v4 = vpack.i.bf16 %v6111_v56, %v6109_v24 }
 0x71a   : > { %5659 = vmatpush1.bf16.msra.mxu1 %v5362_v49  ;;  %10818 = vmatmul.mubr.msk.bf16.vlgmr.msra.gmra.mxu0 %vm3426_vm12, %v11583_v3  ;;  %v15354_v23 = vpop.permute.xlu0 %5411 }
 0x71b   : > { %5660 = vmatprep.subr.bf16.mxu1 %v5359_v1  ;;  %5575 = vmatprep.mubr.bf16.mxu0 %v18399_v0 }
 0x71c   : > { %11442 = vrot.lane.b32.xlu1 %v11441_v4, %s12572_s22 }
 0x71e   : > { %5661 = vmatpush1.bf16.msra.mxu1 %v5358_v48  ;;  %v6105_v48 = vld [vmem:[#allocation2 + $0x8c] sm:$0xf]  ;;  %v15358_v42 = vpop.permute.xlu0 %5401 }
 0x71f   : > { %v11451_v49 = vpack.i.bf16 %v6107_v37, %v6105_v48 }
 0x721   : > { %10826 = vmatmul.mubr.msk.bf16.vlgmr.msra.gmra.mxu1 %vm3426_vm12, %v11583_v3  ;;  %11452 = vrot.lane.b32.xlu1 %v11451_v49, %s12572_s22  ;;  %v18411_v3 = vld [vmem:[#allocation35_spill] sm:$0xff]  ;;  %v18417_v49 = vld [vmem:[#allocation38_spill] sm:$0xff] }
 0x722   : > { %10819 = vmatmul.mubr.msk.bf16.gmra.mxu0 %vm3426_vm12, %v11584_v7  ;;  %5688 = vmatprep.mubr.bf16.mxu1 %v18399_v0  ;;  %v5392_v38 = vpop.permute.xlu0 %5391 }
 0x723   : > { %5585 = vmatprep.mubr.bf16.mxu0 %v18399_v0 }
 0x729   : > { %10827 = vmatmul.mubr.msk.bf16.gmra.mxu1 %vm3426_vm12, %v11584_v7 }
 0x72a   : > { %10820 = vmatmul.mubr.msk.bf16.gmra.mxu0 %vm3426_vm12, %v11585_v59  ;;  %5698 = vmatprep.mubr.bf16.mxu1 %v18399_v0 }
 0x72b   : > { %5595 = vmatprep.mubr.bf16.mxu0 %v18399_v0 }
 0x731   : > { %10828 = vmatmul.mubr.msk.bf16.gmra.mxu1 %vm3426_vm12, %v11585_v59 }
 0x732   : > { %10821 = vmatmul.mubr.msk.bf16.gmra.mxu0 %vm3426_vm12, %v11586_v39  ;;  %5708 = vmatprep.mubr.bf16.mxu1 %v18399_v0 }
 0x733   : > { %5605 = vmatprep.mubr.bf16.mxu0 %v18399_v0 }
 0x739   : > { %10829 = vmatmul.mubr.msk.bf16.gmra.mxu1 %vm3426_vm12, %v11586_v39  ;;  %v18414_v39 = vld [vmem:[#allocation36_spill] sm:$0xff] }
 0x73a   : > { %5718 = vmatprep.mubr.bf16.mxu1 %v18399_v0 }
 0x7da   : > { %v5567_v51 = vpop.f32.mrf.mxu0 }
 0x7db   : > { %v5568_v52 = vadd.f32 %v5567_v51, %v5392_v38  ;;  %v18418_v51 = vld [vmem:[#allocation37_spill] sm:$0xff] }
 0x7dc   : > { %v5569_v46 = vpop.f32.mrf.mxu0 }
 0x7dd   : > { %v5759_v63 = vadd.f32 %v5568_v52, %v18400_v26  ;;  %v5570_v12 = vadd.f32 %v5569_v46, %v5392_v38 }
 0x7de   : > { %v5571_v18 = vpop.f32.mrf.mxu0 }
 0x7df   : > { %v5760_v17 = vadd.f32 %v5570_v12, %v18401_v32  ;;  %v5572_v16 = vadd.f32 %v5571_v18, %v5397_v62  ;;  %v15364_v30 = vmul.f32 0.70710677, %v5759_v63  ;;  %v18420_v18 = vld [vmem:[#allocation39_spill] sm:$0xff] }
 0x7e0   : > { %v5573_v55 = vpop.f32.mrf.mxu0 }
 0x7e1   : > { %18402 = vst [vmem:[#allocation78_spill] sm:$0xff] %v15364_v30  ;;  %v15366_v25 = vmul.f32 0.70710677, %v5760_v17  ;;  %v5680_v10 = vpop.f32.mrf.mxu1  ;;  %v5763_v47 = vadd.f32 %v5572_v16, %v18404_v20  ;;  %v5574_v33 = vadd.f32 %v5573_v55, %v5397_v62  ;;  %v18422_v55 = vld [vmem:[#allocation27_spill] sm:$0xff] }
 0x7e2   : > { %v5681_v50 = vadd.f32 %v5680_v10, %v5392_v38  ;;  %v5577_v57 = vpop.f32.mrf.mxu0 }
 0x7e3   : > { %18403 = vst [vmem:[#allocation79_spill] sm:$0xff] %v15366_v25  ;;  %v15371_v8 = vpack.c.bf16 %v15366_v25, %v15364_v30  ;;  %v5682_v58 = vpop.f32.mrf.mxu1  ;;  %v5764_v34 = vadd.f32 %v5574_v33, %v18405_v11  ;;  %v5578_v19 = vadd.f32 %v5577_v57, %v15358_v42  ;;  %v15377_v21 = vmul.f32 0.70710677, %v5763_v47 }
 0x7e4   : > { %v5761_v35 = vadd.f32 %v5681_v50, %v18406_v41  ;;  %v5683_v60 = vadd.f32 %v5682_v58, %v5392_v38  ;;  %v5579_v36 = vpop.f32.mrf.mxu0 }
 0x7e5   : > { %5911 = vst [vmem:[#allocation2 + $0x4] sm:$0xff] %v15371_v8  ;;  %18407 = vst [vmem:[#allocation76_spill] sm:$0xff] %v15377_v21  ;;  %v15379_v61 = vmul.f32 0.70710677, %v5764_v34  ;;  %v5684_v9 = vpop.f32.mrf.mxu1  ;;  %v5767_v53 = vadd.f32 %v5578_v19, %v18409_v6  ;;  %v5580_v43 = vadd.f32 %v5579_v36, %v15358_v42  ;;  %v18425_v34 = vld [vmem:[#allocation28_spill] sm:$0xff] }
 0x7e6   : > { %v5762_v45 = vadd.f32 %v5683_v60, %v18410_v13  ;;  %v5685_v15 = vadd.f32 %v5684_v9, %v5397_v62  ;;  %v5581_v40 = vpop.f32.mrf.mxu0  ;;  %v15390_v7 = vmul.f32 0.70710677, %v5761_v35  ;;  %v18426_v35 = vld [vmem:[#allocation40_spill] sm:$0xff] }
 0x7e7   : > { %18408 = vst [vmem:[#allocation77_spill] sm:$0xff] %v15379_v61  ;;  %v15386_v22 = vpack.c.bf16 %v15379_v61, %v15377_v21  ;;  %v5686_v28 = vpop.f32.mrf.mxu1  ;;  %v5768_v27 = vadd.f32 %v5580_v43, %v18411_v3  ;;  %v5582_v1 = vadd.f32 %v5581_v40, %v15360_v29  ;;  %v15396_v48 = vmul.f32 0.70710677, %v5767_v53  ;;  %v18427_v43 = vld [vmem:[#allocation41_spill] sm:$0xff] }
 0x7e8   : > { %18412 = vst [vmem:[#allocation75_spill] sm:$0xff] %v15390_v7  ;;  %v15392_v59 = vmul.f32 0.70710677, %v5762_v45  ;;  %v5765_v24 = vadd.f32 %v5685_v15, %v18414_v39  ;;  %v5687_v56 = vadd.f32 %v5686_v28, %v5397_v62  ;;  %v5583_v4 = vpop.f32.mrf.mxu0  ;;  %v18430_v28 = vld [vmem:[#allocation29_spill] sm:$0xff] }
 0x7e9   : > { %5912 = vst [vmem:[#allocation2 + $0x24] sm:$0xff] %v15386_v22  ;;  %18415 = vst [vmem:[#allocation49_spill] sm:$0xff] %v15396_v48  ;;  %v15398_v37 = vmul.f32 0.70710677, %v5768_v27  ;;  %v5690_v5 = vpop.f32.mrf.mxu1  ;;  %v5771_v44 = vadd.f32 %v5582_v1, %v18417_v49  ;;  %v5584_v14 = vadd.f32 %v5583_v4, %v15360_v29  ;;  %v18433_v4 = vld [vmem:[#allocation30_spill] sm:$0xff] }
 0x7ea   : > { %18413 = vst [vmem:[#allocation48_spill] sm:$0xff] %v15392_v59  ;;  %v15404_v38 = vpack.c.bf16 %v15392_v59, %v15390_v7  ;;  %v5766_v52 = vadd.f32 %v5687_v56, %v18418_v51  ;;  %v5691_v46 = vadd.f32 %v5690_v5, %v15358_v42  ;;  %v5587_v26 = vpop.f32.mrf.mxu0  ;;  %v15408_v63 = vmul.f32 0.70710677, %v5765_v24 }
 0x7eb   : > { %18416 = vst [vmem:[#allocation46_spill] sm:$0xff] %v15398_v37  ;;  %v15412_v12 = vpack.c.bf16 %v15398_v37, %v15396_v48  ;;  %v5692_v62 = vpop.f32.mrf.mxu1  ;;  %v5772_v32 = vadd.f32 %v5584_v14, %v18420_v18  ;;  %v5588_v17 = vadd.f32 %v5587_v26, %v15354_v23  ;;  %v15422_v57 = vmul.f32 0.70710677, %v5771_v44  ;;  %v18434_v14 = vld [vmem:[#allocation42_spill] sm:$0xff] }
 0x7ec   : > { %18419 = vst [vmem:[#allocation47_spill] sm:$0xff] %v15408_v63  ;;  %5959 = vst [vmem:[#allocation2 + $0x14] sm:$0xff] %v15404_v38  ;;  %v15417_v16 = vmul.f32 0.70710677, %v5766_v52  ;;  %v5769_v10 = vadd.f32 %v5691_v46, %v18422_v55  ;;  %v5693_v20 = vadd.f32 %v5692_v62, %v15358_v42  ;;  %v5589_v47 = vpop.f32.mrf.mxu0  ;;  %v5968_v33 = vld [vmem:[#allocation2 + $0x8] sm:$0xf] }
 0x7ed   : > { %v5967_v50 = vld [vmem:[#allocation2] sm:$0xff]  ;;  %5913 = vst [vmem:[#allocation2 + $0x44] sm:$0xff] %v15412_v12  ;;  %18423 = vst [vmem:[#allocation43_spill] sm:$0xff] %v15422_v57  ;;  %v15424_v58 = vmul.f32 0.70710677, %v5772_v32  ;;  %v5694_v11 = vpop.f32.mrf.mxu1  ;;  %v5775_v19 = vadd.f32 %v5588_v17, %v18425_v34  ;;  %v5590_v41 = vadd.f32 %v5589_v47, %v15354_v23  ;;  %6001 = vrot.lane.b32.xlu1 %v5968_v33, %s12573_s27 }
 0x7ee   : > { %18421 = vst [vmem:[#allocation44_spill] sm:$0xff] %v15417_v16  ;;  %5999 = vrot.lane.b32.xlu0 %v5967_v50, %s12573_s27  ;;  %v15432_v42 = vpack.c.bf16 %v15417_v16, %v15408_v63  ;;  %v5770_v60 = vadd.f32 %v5693_v20, %v18426_v35  ;;  %v5695_v36 = vadd.f32 %v5694_v11, %v15360_v29  ;;  %v5591_v9 = vpop.f32.mrf.mxu0  ;;  %v15443_v15 = vmul.f32 0.70710677, %v5769_v10  ;;  %v18435_v62 = vld [vmem:[#allocation31_spill] sm:$0xff]  ;;  %v18441_v35 = vld [vmem:[#allocation20_spill] sm:$0xff] }
 0x7ef   : > { %18424 = vst [vmem:[#allocation45_spill] sm:$0xff] %v15424_v58  ;;  %v15438_v6 = vpack.c.bf16 %v15424_v58, %v15422_v57  ;;  %v5696_v53 = vpop.f32.mrf.mxu1  ;;  %v5776_v13 = vadd.f32 %v5590_v41, %v18427_v43  ;;  %v5592_v45 = vadd.f32 %v5591_v9, %v15356_v31  ;;  %v15450_v39 = vmul.f32 0.70710677, %v5775_v19  ;;  %v18438_v47 = vld [vmem:[#allocation19_spill] sm:$0xff] }
 0x7f0   : > { %5960 = vst [vmem:[#allocation2 + $0x34] sm:$0xff] %v15432_v42  ;;  %18428 = vst [vmem:[#allocation35_spill] sm:$0xff] %v15443_v15  ;;  %v15445_v40 = vmul.f32 0.70710677, %v5770_v60  ;;  %v5773_v3 = vadd.f32 %v5695_v36, %v18430_v28  ;;  %v5697_v27 = vadd.f32 %v5696_v53, %v15360_v29  ;;  %v5593_v1 = vpop.f32.mrf.mxu0 }
 0x7f1   : > { %5914 = vst [vmem:[#allocation2 + $0x64] sm:$0xff] %v15438_v6  ;;  %18431 = vst [vmem:[#allocation38_spill] sm:$0xff] %v15450_v39  ;;  %v15452_v24 = vmul.f32 0.70710677, %v5776_v13  ;;  %v5700_v56 = vpop.f32.mrf.mxu1  ;;  %v5779_v5 = vadd.f32 %v5592_v45, %v18433_v4  ;;  %v5594_v49 = vadd.f32 %v5593_v1, %v15356_v31  ;;  %v5970_v1 = vld [vmem:[#allocation2 + $0x28] sm:$0xf] }
 0x7f2   : > { %18429 = vst [vmem:[#allocation36_spill] sm:$0xff] %v15445_v40  ;;  %v15458_v44 = vpack.c.bf16 %v15445_v40, %v15443_v15  ;;  %v5774_v51 = vadd.f32 %v5697_v27, %v18434_v14  ;;  %v5701_v29 = vadd.f32 %v5700_v56, %v15354_v23  ;;  %v5597_v52 = vpop.f32.mrf.mxu0  ;;  %v15469_v10 = vmul.f32 0.70710677, %v5773_v3  ;;  %v18443_v3 = vld [vmem:[#allocation33_spill] sm:$0xff]  ;;  %v5969_v56 = vld [vmem:[#allocation2 + $0x20] sm:$0xff] }
 0x7f3   : > { %18432 = vst [vmem:[#allocation37_spill] sm:$0xff] %v15452_v24  ;;  %v15464_v46 = vpack.c.bf16 %v15452_v24, %v15450_v39  ;;  %v5702_v26 = vpop.f32.mrf.mxu1  ;;  %v5780_v18 = vadd.f32 %v5594_v49, %v18435_v62  ;;  %v6210_v32 = vld [vmem:[#allocation2 + $0x18] sm:$0xf]  ;;  %v6209_v17 = vld [vmem:[#allocation2 + $0x10] sm:$0xff]  ;;  %v5598_v55 = vadd.f32 %v5597_v52, %v15350_v54  ;;  %v15478_v34 = vmul.f32 0.70710677, %v5779_v5 }
 0x7f4   : > { %5961 = vst [vmem:[#allocation2 + $0x54] sm:$0xff] %v15458_v44  ;;  %18436 = vst [vmem:[#allocation39_spill] sm:$0xff] %v15469_v10  ;;  %v15471_v20 = vmul.f32 0.70710677, %v5774_v51  ;;  %v5777_v33 = vadd.f32 %v5701_v29, %v18438_v47  ;;  %v5703_v50 = vadd.f32 %v5702_v26, %v15354_v23  ;;  %6243 = vrot.lane.b32.xlu1 %v6210_v32, %s12573_s27  ;;  %6241 = vrot.lane.b32.xlu0 %v6209_v17, %s12573_s27  ;;  %v5599_v11 = vpop.f32.mrf.mxu0  ;;  %v18442_v23 = vld [vmem:[#allocation32_spill] sm:$0xff]  ;;  %v18446_v14 = vld [vmem:[#allocation21_spill] sm:$0xff] }
 0x7f5   : > { %5915 = vst [vmem:[#allocation2 + $0x84] sm:$0xff] %v15464_v46  ;;  %18439 = vst [vmem:[#allocation28_spill] sm:$0xff] %v15478_v34  ;;  %v15480_v19 = vmul.f32 0.70710677, %v5780_v18  ;;  %v5704_v41 = vpop.f32.mrf.mxu1  ;;  %v5783_v60 = vadd.f32 %v5598_v55, %v18441_v35  ;;  %v5600_v36 = vadd.f32 %v5599_v11, %v15350_v54  ;;  %v18449_v32 = vld [vmem:[#allocation22_spill] sm:$0xff]  ;;  %v18451_v35 = vld [vmem:[#allocation23_spill] sm:$0xff] }
 0x7f6   : > { %18437 = vst [vmem:[#allocation27_spill] sm:$0xff] %v15471_v20  ;;  %v15486_v9 = vpack.c.bf16 %v15471_v20, %v15469_v10  ;;  %v5778_v53 = vadd.f32 %v5703_v50, %v18442_v23  ;;  %v5705_v43 = vadd.f32 %v5704_v41, %v15356_v31  ;;  %v5601_v13 = vpop.f32.mrf.mxu0  ;;  %v15497_v5 = vmul.f32 0.70710677, %v5777_v33 }
 0x7f7   : > { %18440 = vst [vmem:[#allocation40_spill] sm:$0xff] %v15480_v19  ;;  %v15492_v45 = vpack.c.bf16 %v15480_v19, %v15478_v34  ;;  %v5706_v28 = vpop.f32.mrf.mxu1  ;;  %v5784_v27 = vadd.f32 %v5600_v36, %v18443_v3  ;;  %v5602_v4 = vadd.f32 %v5601_v13, %v15352_v2  ;;  %v15506_v26 = vmul.f32 0.70710677, %v5783_v60  ;;  %v6212_v36 = vld [vmem:[#allocation2 + $0x38] sm:$0xf]  ;;  %v6211_v23 = vld [vmem:[#allocation2 + $0x30] sm:$0xff] }
 0x7f8   : > { %5962 = vst [vmem:[#allocation2 + $0x74] sm:$0xff] %v15486_v9  ;;  %18444 = vst [vmem:[#allocation41_spill] sm:$0xff] %v15497_v5  ;;  %v15499_v49 = vmul.f32 0.70710677, %v5778_v53  ;;  %v5781_v51 = vadd.f32 %v5705_v43, %v18446_v14  ;;  %v5707_v29 = vadd.f32 %v5706_v28, %v15356_v31  ;;  %6005 = vrot.lane.b32.xlu1 %v5970_v1, %s12573_s27  ;;  %6003 = vrot.lane.b32.xlu0 %v5969_v56, %s12573_s27  ;;  %v5603_v52 = vpop.f32.mrf.mxu0  ;;  %v18450_v31 = vld [vmem:[#allocation34_spill] sm:$0xff]  ;;  %v18454_v13 = vld [vmem:[#allocation11_spill] sm:$0xff] }
 0x7f9   : > { %5916 = vst [vmem:[#allocation2 + $0xa4] sm:$0xff] %v15492_v45  ;;  %18447 = vst [vmem:[#allocation30_spill] sm:$0xff] %v15506_v26  ;;  %v15508_v62 = vmul.f32 0.70710677, %v5784_v27  ;;  %v5710_v18 = vpop.f32.mrf.mxu1  ;;  %v5787_v17 = vadd.f32 %v5602_v4, %v18449_v32  ;;  %v5604_v55 = vadd.f32 %v5603_v52, %v15352_v2  ;;  %v18457_v14 = vld [vmem:[#allocation24_spill] sm:$0xff] }
 0x7fa   : > { %18445 = vst [vmem:[#allocation29_spill] sm:$0xff] %v15499_v49  ;;  %v15514_v47 = vpack.c.bf16 %v15499_v49, %v15497_v5  ;;  %v5782_v33 = vadd.f32 %v5707_v29, %v18450_v31  ;;  %v5711_v50 = vadd.f32 %v5710_v18, %v15350_v54  ;;  %v15524_v53 = vmul.f32 0.70710677, %v5781_v51  ;;  %v5972_v18 = vld [vmem:[#allocation2 + $0x48] sm:$0xf]  ;;  %v5971_v32 = vld [vmem:[#allocation2 + $0x40] sm:$0xff] }
 0x7fb   : > { %18448 = vst [vmem:[#allocation42_spill] sm:$0xff] %v15508_v62  ;;  %v15520_v11 = vpack.c.bf16 %v15508_v62, %v15506_v26  ;;  %v5712_v41 = vpop.f32.mrf.mxu1  ;;  %v5788_v60 = vadd.f32 %v5604_v55, %v18451_v35  ;;  %v15533_v27 = vmul.f32 0.70710677, %v5787_v17  ;;  %v18460_v31 = vld [vmem:[#allocation12_spill] sm:$0xff] }
 0x7fc   : > { %5963 = vst [vmem:[#allocation2 + $0x94] sm:$0xff] %v15514_v47  ;;  %18452 = vst [vmem:[#allocation31_spill] sm:$0xff] %v15524_v53  ;;  %v15526_v43 = vmul.f32 0.70710677, %v5782_v33  ;;  %v5785_v28 = vadd.f32 %v5711_v50, %v18454_v13  ;;  %v5713_v3 = vadd.f32 %v5712_v41, %v15350_v54  ;;  %6247 = vrot.lane.b32.xlu1 %v6212_v36, %s12573_s27  ;;  %6245 = vrot.lane.b32.xlu0 %v6211_v23, %s12573_s27  ;;  %v18461_v36 = vld [vmem:[#allocation25_spill] sm:$0xff] }
 0x7fd   : > { %5917 = vst [vmem:[#allocation2 + $0xc4] sm:$0xff] %v15520_v11  ;;  %18455 = vst [vmem:[#allocation20_spill] sm:$0xff] %v15533_v27  ;;  %v15535_v1 = vmul.f32 0.70710677, %v5788_v60  ;;  %v5714_v56 = vpop.f32.mrf.mxu1  ;;  %v12472_v35 = vpack.c.bf16 %v15533_v27, %v15506_v26  ;;  %v6214_v13 = vld [vmem:[#allocation2 + $0x58] sm:$0xf] }
 0x7fe   : > { %18453 = vst [vmem:[#allocation19_spill] sm:$0xff] %v15526_v43  ;;  %v15539_v4 = vpack.c.bf16 %v15526_v43, %v15524_v53  ;;  %v5786_v51 = vadd.f32 %v5713_v3, %v18457_v14  ;;  %v5715_v29 = vadd.f32 %v5714_v56, %v15352_v2  ;;  %v15548_v17 = vmul.f32 0.70710677, %v5785_v28 }
 0x7ff   : > { %18456 = vst [vmem:[#allocation32_spill] sm:$0xff] %v15535_v1  ;;  %v15545_v54 = vpack.c.bf16 %v15535_v1, %v15533_v27  ;;  %v5716_v52 = vpop.f32.mrf.mxu1  ;;  %v12471_v41 = vpack.c.bf16 %v15535_v1, %v15508_v62  ;;  %v12473_v56 = vpack.c.bf16 %v15480_v19, %v15452_v24 }
 0x800   : > { %5964 = vst [vmem:[#allocation2 + $0xb4] sm:$0xff] %v15539_v4  ;;  %18458 = vst [vmem:[#allocation33_spill] sm:$0xff] %v15548_v17  ;;  %v15550_v55 = vmul.f32 0.70710677, %v5786_v51  ;;  %v5789_v33 = vadd.f32 %v5715_v29, %v18460_v31  ;;  %v5717_v50 = vadd.f32 %v5716_v52, %v15352_v2  ;;  %6009 = vrot.lane.b32.xlu1 %v5972_v18, %s12573_s27  ;;  %6007 = vrot.lane.b32.xlu0 %v5971_v32, %s12573_s27  ;;  %v6213_v2 = vld [vmem:[#allocation2 + $0x50] sm:$0xff]  ;;  %v5973_v29 = vld [vmem:[#allocation2 + $0x60] sm:$0xff] }
 0x801   : > { %5918 = vst [vmem:[#allocation2 + $0xe4] sm:$0xff] %v15545_v54  ;;  %6971 = vmatprep.subr.bf16.mxu0 %v12471_v41  ;;  %v5974_v51 = vld [vmem:[#allocation2 + $0x68] sm:$0xf]  ;;  %v12474_v52 = vpack.c.bf16 %v15478_v34, %v15450_v39  ;;  %v12477_v31 = vpack.c.bf16 %v15424_v58, %v15398_v37  ;;  %v12478_v41 = vpack.c.bf16 %v15526_v43, %v15499_v49 }
 0x802   : > { %18459 = vst [vmem:[#allocation21_spill] sm:$0xff] %v15550_v55  ;;  %v15563_v60 = vpack.c.bf16 %v15550_v55, %v15548_v17  ;;  %v5790_v23 = vadd.f32 %v5717_v50, %v18461_v36  ;;  %v15567_v28 = vmul.f32 0.70710677, %v5789_v33  ;;  %6972 = vmatpush1.bf16.msra.mxu0 %v12472_v35  ;;  %v6216_v33 = vld [vmem:[#allocation2 + $0x78] sm:$0xf]  ;;  %v6215_v50 = vld [vmem:[#allocation2 + $0x70] sm:$0xff]  ;;  %v12479_v35 = vpack.c.bf16 %v15422_v57, %v15396_v48 }
 0x803   : > { %6973 = vmatprep.subr.bf16.mxu0 %v12473_v56  ;;  %v12480_v36 = vpack.c.bf16 %v15379_v61, %v15366_v25  ;;  %v12482_v56 = vpack.c.bf16 %v15471_v20, %v15445_v40 }
 0x804   : > { %5965 = vst [vmem:[#allocation2 + $0xd4] sm:$0xff] %v15563_v60  ;;  %18462 = vst [vmem:[#allocation22_spill] sm:$0xff] %v15567_v28  ;;  %v15569_v3 = vmul.f32 0.70710677, %v5790_v23  ;;  %6251 = vrot.lane.b32.xlu1 %v6214_v13, %s12573_s27  ;;  %6249 = vrot.lane.b32.xlu0 %v6213_v2, %s12573_s27  ;;  %v12476_v32 = vpack.c.bf16 %v15567_v28, %v15548_v17  ;;  %v12481_v23 = vpack.c.bf16 %v15524_v53, %v15497_v5  ;;  %v5976_v13 = vld [vmem:[#allocation2 + $0x88] sm:$0xf] }
 0x805   : > { %v5975_v2 = vld [vmem:[#allocation2 + $0x80] sm:$0xff] }
 0x806   : > { %18463 = vst [vmem:[#allocation34_spill] sm:$0xff] %v15569_v3  ;;  %v15577_v14 = vpack.c.bf16 %v15569_v3, %v15567_v28  ;;  %v12475_v18 = vpack.c.bf16 %v15569_v3, %v15550_v55  ;;  %6974 = vmatpush1.bf16.msra.mxu0 %v12474_v52  ;;  %v6218_v52 = vld [vmem:[#allocation2 + $0x98] sm:$0xf] }
 0x807   : > { %6975 = vmatprep.subr.bf16.mxu0 %v12477_v31  ;;  %v12486_v31 = vpack.c.bf16 %v15408_v63, %v15390_v7 }
 0x808   : > { %5966 = vst [vmem:[#allocation2 + $0xf4] sm:$0xff] %v15577_v14  ;;  %6013 = vrot.lane.b32.xlu1 %v5974_v51, %s12573_s27  ;;  %6011 = vrot.lane.b32.xlu0 %v5973_v29, %s12573_s27  ;;  %v12483_v51 = vpack.c.bf16 %v15377_v21, %v15364_v30  ;;  %v12484_v29 = vpack.c.bf16 %v15469_v10, %v15443_v15 }
 0x809   : > { %7084 = vmatprep.subr.bf16.mxu1 %v12475_v18  ;;  %v6217_v18 = vld [vmem:[#allocation2 + $0x90] sm:$0xff] }
 0x80a   : > { %7085 = vmatpush1.bf16.msra.mxu1 %v12476_v32  ;;  %6976 = vmatpush1.bf16.msra.mxu0 %v12479_v35  ;;  %v12485_v32 = vpack.c.bf16 %v15417_v16, %v15392_v59  ;;  %v6219_v35 = vld [vmem:[#allocation2 + $0xb0] sm:$0xff] }
 0x80b   : > { %7086 = vmatprep.subr.bf16.mxu1 %v12478_v41  ;;  %6977 = vmatprep.subr.bf16.mxu0 %v12480_v36  ;;  %v6220_v41 = vld [vmem:[#allocation2 + $0xb8] sm:$0xf]  ;;  %v5980_v36 = vld [vmem:[#allocation2 + $0xc8] sm:$0xf] }
 0x80c   : > { %6255 = vrot.lane.b32.xlu1 %v6216_v33, %s12573_s27  ;;  %6253 = vrot.lane.b32.xlu0 %v6215_v50, %s12573_s27  ;;  %v5978_v33 = vld [vmem:[#allocation2 + $0xa8] sm:$0xf]  ;;  %v5977_v50 = vld [vmem:[#allocation2 + $0xa0] sm:$0xff] }
 0x80e   : > { %7087 = vmatpush1.bf16.msra.mxu1 %v12481_v23  ;;  %6978 = vmatpush1.bf16.msra.mxu0 %v12483_v51  ;;  %v6221_v23 = vld [vmem:[#allocation2 + $0xd0] sm:$0xff]  ;;  %v6101_v51 = vld [vmem:[#allocation2 + $0x4c] sm:$0xf] }
 0x80f   : > { %7088 = vmatprep.subr.bf16.mxu1 %v12482_v56  ;;  %v5981_v56 = vld [vmem:[#allocation2 + $0xe0] sm:$0xff] }
 0x810   : > { %6017 = vrot.lane.b32.xlu1 %v5976_v13, %s12573_s27  ;;  %6015 = vrot.lane.b32.xlu0 %v5975_v2, %s12573_s27  ;;  %v5982_v13 = vld [vmem:[#allocation2 + $0xe8] sm:$0xf]  ;;  %v6224_v2 = vld [vmem:[#allocation2 + $0xf8] sm:$0xf] }
 0x812   : > { %7089 = vmatpush1.bf16.msra.mxu1 %v12484_v29  ;;  %v6346_v29 = vld [vmem:[#allocation2 + $0x9c] sm:$0xf] }
 0x813   : > { %7090 = vmatprep.subr.bf16.mxu1 %v12485_v32 }
 0x814   : > { %6259 = vrot.lane.b32.xlu1 %v6218_v52, %s12573_s27  ;;  %6257 = vrot.lane.b32.xlu0 %v6217_v18, %s12573_s27  ;;  %v6348_v52 = vld [vmem:[#allocation2 + $0xbc] sm:$0xf] }
 0x815   : > { %v11456_v32 = vpack.i.bf16 %v6348_v52, %v6346_v29  ;;  %v10874_v29 = vld [vmem:[%s18115_s5 + $0x140] sm:$0xff] }
 0x816   : > { %7091 = vmatpush1.bf16.msra.mxu1 %v12486_v31  ;;  %v11588_v31 = vld [vmem:[%s18116_s6 + $0x68] sm:$0xff]  }
 0x818   : > { %6385 = vrot.lane.b32.xlu1 %v15514_v47, %s12572_s22  ;;  %6144 = vrot.lane.b32.xlu0 %v15464_v46, %s12572_s22  ;;  %v6222_v47 = vld [vmem:[#allocation2 + $0xd8] sm:$0xf]  ;;  %v5979_v46 = vld [vmem:[#allocation2 + $0xc0] sm:$0xff] }
 0x81c   : > { %6021 = vrot.lane.b32.xlu1 %v5978_v33, %s12573_s27  ;;  %6019 = vrot.lane.b32.xlu0 %v5977_v50, %s12573_s27  ;;  %v6344_v33 = vld [vmem:[#allocation2 + $0x7c] sm:$0xf]  ;;  %v11589_v50 = vld [vmem:[%s18116_s6 + $0x70] sm:$0xff]  }
 0x820   : > { %6263 = vrot.lane.b32.xlu1 %v6220_v41, %s12573_s27  ;;  %6261 = vrot.lane.b32.xlu0 %v6219_v35, %s12573_s27  ;;  %v6097_v35 = vld [vmem:[#allocation2 + $0xc] sm:$0xf] }
 0x824   : > { %6025 = vrot.lane.b32.xlu1 %v5980_v36, %s12573_s27  ;;  %6148 = vrot.lane.b32.xlu0 %v15492_v45, %s12572_s22  ;;  %v11587_v45 = vld [vmem:[%s18116_s6 + $0x60] sm:$0xff]   ;;  %v6099_v36 = vld [vmem:[#allocation2 + $0x2c] sm:$0xf] }
 0x825   : > { %10822 = vmatmul.mubr.msk.bf16.gmra.mxu0 %vm3426_vm12, %v11587_v45  ;;  %10830 = vmatmul.mubr.msk.bf16.gmra.mxu1 %vm3426_vm12, %v11587_v45 }
 0x826   : > { %5615 = vmatprep.mubr.bf16.mxu0 %v18399_v0  ;;  %5728 = vmatprep.mubr.bf16.mxu1 %v18399_v0 }
 0x828   : > { %6267 = vrot.lane.b32.xlu1 %v6222_v47, %s12573_s27  ;;  %6023 = vrot.lane.b32.xlu0 %v5979_v46, %s12573_s27  ;;  %v15691_v47 = vpop.permute.xlu1 %11442  ;;  %v15707_v46 = vpop.permute.xlu0 %11447 }
 0x82c   : > { %6393 = vrot.lane.b32.xlu1 %v15563_v60, %s12572_s22  ;;  %6265 = vrot.lane.b32.xlu0 %v6221_v23, %s12573_s27  ;;  %v6103_v60 = vld [vmem:[#allocation2 + $0x6c] sm:$0xf]  ;;  %v10877_v23 = vld [vmem:[%s18115_s5 + $0x158] sm:$0xff] }
 0x82d   : > { %v11461_v18 = vpack.i.bf16 %v6103_v60, %v6101_v51  ;;  %10823 = vmatmul.mubr.msk.bf16.gmra.mxu0 %vm3426_vm12, %v11588_v31  ;;  %10831 = vmatmul.mubr.msk.bf16.gmra.mxu1 %vm3426_vm12, %v11588_v31  ;;  %v10876_v51 = vld [vmem:[%s18115_s5 + $0x150] sm:$0xff]  ;;  %v10873_v60 = vld [vmem:[%s18115_s5 + $0x138] sm:$0xff] }
 0x82e   : > { %5625 = vmatprep.mubr.bf16.mxu0 %v18399_v0  ;;  %5738 = vmatprep.mubr.bf16.mxu1 %v18399_v0 }
 0x830   : > { %6029 = vrot.lane.b32.xlu1 %v5982_v13, %s12573_s27  ;;  %6152 = vrot.lane.b32.xlu0 %v15520_v11, %s12572_s22  ;;  %v6223_v11 = vld [vmem:[#allocation2 + $0xf0] sm:$0xff]  ;;  %v10878_v13 = vld [vmem:[%s18115_s5 + $0x160] sm:$0xff] }
 0x834   : > { %6271 = vrot.lane.b32.xlu1 %v6224_v2, %s12573_s27  ;;  %6027 = vrot.lane.b32.xlu0 %v5981_v56, %s12573_s27  ;;  %v10875_v56 = vld [vmem:[%s18115_s5 + $0x148] sm:$0xff] }
 0x835   : > { %10824 = vmatmul.mubr.msk.bf16.gmra.mxu0 %vm3426_vm12, %v11589_v50  ;;  %10832 = vmatmul.mubr.msk.bf16.gmra.mxu1 %vm3426_vm12, %v11589_v50  ;;  %v10870_v50 = vld [vmem:[%s18115_s5 + $0x120] sm:$0xff] }
 0x836   : > { %5635 = vmatprep.mubr.bf16.mxu0 %v18399_v0  ;;  %5748 = vmatprep.mubr.bf16.mxu1 %v18399_v0 }
 0x838   : > { %6389 = vrot.lane.b32.xlu1 %v15539_v4, %s12572_s22  ;;  %6269 = vrot.lane.b32.xlu0 %v6223_v11, %s12573_s27  ;;  %v6342_v4 = vld [vmem:[#allocation2 + $0x5c] sm:$0xf]  ;;  %s12574_s27 = smov 120  }
 0x839   : > { %v11466_v41 = vpack.i.bf16 %v6344_v33, %v6342_v4  ;;  %v10869_v33 = vld [vmem:[%s18115_s5 + $0x118] sm:$0xff] }
 0x83c   : > { %11462 = vrot.lane.b32.xlu1 %v11461_v18, %s12572_s22  ;;  %11457 = vrot.lane.b32.xlu0 %v11456_v32, %s12572_s22  ;;  %v10871_v18 = vld [vmem:[%s18115_s5 + $0x128] sm:$0xff]  ;;  %v10872_v32 = vld [vmem:[%s18115_s5 + $0x130] sm:$0xff] }
 0x840   : > { %6377 = vrot.lane.b32.xlu1 %v15458_v44, %s12572_s22  ;;  %6136 = vrot.lane.b32.xlu0 %v15412_v12, %s12572_s22  ;;  %v11471_v12 = vpack.i.bf16 %v6099_v36, %v6097_v35  ;;  %v6338_v44 = vld [vmem:[#allocation2 + $0x1c] sm:$0xf]  ;;  %v10867_v36 = vld [vmem:[%s18115_s5 + $0x108] sm:$0xff] }
 0x844   : > { %6381 = vrot.lane.b32.xlu1 %v15486_v9, %s12572_s22  ;;  %6140 = vrot.lane.b32.xlu0 %v15438_v6, %s12572_s22  ;;  %v11590_v6 = vld [vmem:[%s18116_s6 + $0x78] sm:$0xff]  }
 0x845   : > { %10825 = vmatmul.mubr.msk.bf16.gmra.mxu0 %vm3426_vm12, %v11590_v6  ;;  %10833 = vmatmul.mubr.msk.bf16.gmra.mxu1 %vm3426_vm12, %v11590_v6  ;;  %v6340_v9 = vld [vmem:[#allocation2 + $0x3c] sm:$0xf] }
 0x848   : > { %6397 = vrot.lane.b32.xlu1 %v15577_v14, %s12572_s22  ;;  %11467 = vrot.lane.b32.xlu0 %v11466_v41, %s12572_s22  ;;  %v11593_v14 = vld [vmem:[%s18114_s4 + $0x104] ss:$8 sps:$4 sm:$0xff]  }
 0x849   : > { %10950 = vmatprep.mubr.msk.bf16.mxu0 %vm2783_vm11, %v11593_v14  ;;  %10958 = vmatprep.mubr.msk.bf16.mxu1 %vm2783_vm11, %v11593_v14  ;;  %v10866_v14 = vld [vmem:[%s18115_s5 + $0x100] sm:$0xff] }
 0x84c   : > { %11472 = vrot.lane.b32.xlu1 %v11471_v12, %s12572_s22  ;;  %6156 = vrot.lane.b32.xlu0 %v15545_v54, %s12572_s22  ;;  %v11476_v54 = vpack.i.bf16 %v6340_v9, %v6338_v44  ;;  %v10868_v12 = vld [vmem:[%s18115_s5 + $0x110] sm:$0xff]  ;;  %v10989_v9 = vld [vmem:[%s18117_s7 + $0x138] sm:$0xff] }
 0x850   : > { %6369 = vrot.lane.b32.xlu1 %v15404_v38, %s12572_s22  ;;  %6128 = vrot.lane.b32.xlu0 %v15371_v8, %s12572_s22  ;;  %v10881_v38 = vld [vmem:[%s18115_s5 + $0x178] sm:$0xff]  ;;  %v10879_v8 = vld [vmem:[%s18115_s5 + $0x168] sm:$0xff] }
 0x854   : > { %6373 = vrot.lane.b32.xlu1 %v15432_v42, %s12572_s22  ;;  %6132 = vrot.lane.b32.xlu0 %v15386_v22, %s12572_s22  ;;  %v10880_v22 = vld [vmem:[%s18115_s5 + $0x170] sm:$0xff]  ;;  %v15705_v42 = vpop.permute.xlu1 %11452 }
 0x858   : > { %6612 = vperm.xlu1 %11359, %v10881_v38   ;;  %11477 = vrot.lane.b32.xlu0 %v11476_v54, %s12572_s22  ;;  %s12509_s22 = scalar_lea.vmem %s12508_s20, 128 }
 0x85c   : > { %6602 = vperm.xlu1 %11359, %v10879_v8   ;;  %6607 = vperm.xlu0 %11360, %v10880_v22   ;;  %v10987_v8 = vld [vmem:[%s18117_s7 + $0x128] sm:$0xff]  ;;  %v10988_v22 = vld [vmem:[%s18117_s7 + $0x130] sm:$0xff] }
 0x85f   : > { %v15715_v45 = vpop.permute.xlu1 %6001 }
 0x860   : > { %6592 = vperm.xlu1 %11359, %v10877_v23   ;;  %6597 = vperm.xlu0 %11360, %v10878_v13   ;;  %v15717_v2 = vpop.permute.xlu0 %5999  ;;  %v6032_v27 = vrot.slane %v15715_v45, 4 }
 0x861   : > { %v6031_v53 = vrot.slane %v15717_v2, 4 }
 0x863   : > { %v15842_v16 = vsel %vm1884_vm10, %v6031_v53, %v6032_v27 }
 0x864   : > { %6582 = vperm.xlu1 %11359, %v10875_v56   ;;  %6587 = vperm.xlu0 %11360, %v10876_v51   ;;  %v10985_v56 = vld [vmem:[%s18117_s7 + $0x118] sm:$0xff]  ;;  %v10986_v51 = vld [vmem:[%s18117_s7 + $0x120] sm:$0xff] }
 0x866   : > { %v15731_v52 = vpop.permute.xlu1 %6243  ;;  %v15733_v11 = vpop.permute.xlu0 %6241 }
 0x868   : > { %6572 = vperm.xlu1 %11359, %v10873_v60   ;;  %6577 = vperm.xlu0 %11360, %v10874_v29  }
 0x86a   : > { %v15741_v31 = vpop.permute.xlu1 %6005  ;;  %v15743_v4 = vpop.permute.xlu0 %6003 }
 0x86b   : > { %v6034_v62 = vrot.slane %v15741_v31, 4  ;;  %v6033_v49 = vrot.slane %v15743_v4, 4 }
 0x86c   : > { %6562 = vperm.xlu1 %11359, %v10871_v18   ;;  %6567 = vperm.xlu0 %11360, %v10872_v32   ;;  %v10983_v18 = vld [vmem:[%s18117_s7 + $0x108] sm:$0xff]  ;;  %v10984_v32 = vld [vmem:[%s18117_s7 + $0x110] sm:$0xff] }
 0x86e   : > { %v15751_v41 = vpop.permute.xlu1 %6247  ;;  %v15753_v35 = vpop.permute.xlu0 %6245 }
 0x870   : > { %6552 = vperm.xlu1 %11359, %v10869_v33   ;;  %6557 = vperm.xlu0 %11360, %v10870_v50  }
 0x872   : > { %v15761_v6 = vpop.permute.xlu1 %6009  ;;  %v15763_v44 = vpop.permute.xlu0 %6007 }
 0x873   : > { %v6036_v26 = vrot.slane %v15761_v6, 4  ;;  %v6035_v5 = vrot.slane %v15763_v44, 4 }
 0x874   : > { %6542 = vperm.xlu1 %11359, %v10867_v36   ;;  %6547 = vperm.xlu0 %11360, %v10868_v12   ;;  %v10982_v36 = vld [vmem:[%s18117_s7 + $0x100] sm:$0xff] }
 0x876   : > { %v15771_v54 = vpop.permute.xlu1 %6251  ;;  %v15773_v38 = vpop.permute.xlu0 %6249 }
 0x878   : > { %7508 = vperm.xlu1 %11359, %v10989_v9   ;;  %6537 = vperm.xlu0 %11360, %v10866_v14  }
 0x87a   : > { %v15781_v23 = vpop.permute.xlu1 %6013  ;;  %v15783_v13 = vpop.permute.xlu0 %6011 }
 0x87b   : > { %v6038_v40 = vrot.slane %v15781_v23, 4  ;;  %v6037_v31 = vrot.slane %v15783_v13, 4 }
 0x87c   : > { %7498 = vperm.xlu1 %11359, %v10987_v8   ;;  %7503 = vperm.xlu0 %11360, %v10988_v22  }
 0x87d   : > { %v6054_v59 = vsel %vm1884_vm10, %v6037_v31, %v6038_v40 }
 0x87e   : > { %v15791_v60 = vpop.permute.xlu1 %6255  ;;  %v15793_v29 = vpop.permute.xlu0 %6253 }
 0x880   : > { %7488 = vperm.xlu1 %11359, %v10985_v56   ;;  %7493 = vperm.xlu0 %11360, %v10986_v51  }
 0x882   : > { %v6018_v33 = vpop.permute.xlu1 %6017  ;;  %v15801_v50 = vpop.permute.xlu0 %6015 }
 0x883   : > { %v6040_v6 = vrot.slane %v6018_v33, 4  ;;  %v6039_v15 = vrot.slane %v15801_v50, 4 }
 0x884   : > { %7478 = vperm.xlu1 %11359, %v10983_v18   ;;  %7483 = vperm.xlu0 %11360, %v10984_v32  }
 0x886   : > { %v15806_v12 = vpop.permute.xlu1 %6259  ;;  %v15808_v9 = vpop.permute.xlu0 %6257 }
 0x888   : > { %7473 = vperm.xlu0 %11360, %v10982_v36   ;;  %v11445_v36 = vunpack.i.h.bf16 %v15691_v47 }
 0x88a   : > { %v15810_v14 = vpop.permute.xlu1 %6385  ;;  %v15812_v8 = vpop.permute.xlu0 %6144  ;;  %v15834_v34 = vrot.slane %v11445_v36, 4  ;;  %v6052_v36 = vsel %vm1884_vm10, %v6035_v5, %v6036_v26  ;;  %v6282_v5 = vrot.slane %v15806_v12, 4  ;;  %v6281_v26 = vrot.slane %v15808_v9, 4 }
 0x88b   : > { %v6280_v12 = vrot.slane %v15791_v60, 4 }
 0x88c   : > { %v6297_v60 = vsel %vm1884_vm10, %v6281_v26, %v6282_v5  ;;  %v6274_v26 = vrot.slane %v15731_v52, 4 }
 0x88e   : > { %v6022_v22 = vpop.permute.xlu1 %6021  ;;  %v6020_v56 = vpop.permute.xlu0 %6019 }
 0x88f   : > { %v6042_v10 = vrot.slane %v6022_v22, 4  ;;  %v6041_v24 = vrot.slane %v6020_v56, 4  ;;  %v6050_v22 = vsel %vm1884_vm10, %v6033_v49, %v6034_v62  ;;  %v6056_v49 = vsel %vm1884_vm10, %v6039_v15, %v6040_v6 }
 0x890   : > { %v6279_v6 = vrot.slane %v15793_v29, 4 }
 0x891   : > { %v6058_v23 = vsel %vm1884_vm10, %v6041_v24, %v6042_v10 }
 0x892   : > { %v15814_v51 = vpop.permute.xlu1 %6263  ;;  %v15816_v3 = vpop.permute.xlu0 %6261  ;;  %v6059_v24 = vsel %vm6048_vm14, %v6020_v56, %v6058_v23 }
 0x893   : > { %v6283_v53 = vrot.slane %v15816_v3, 4 }
 0x896   : > { %v6026_v18 = vpop.permute.xlu1 %6025  ;;  %v15818_v32 = vpop.permute.xlu0 %6148 }
 0x897   : > { %v6044_v58 = vrot.slane %v6026_v18, 4  ;;  %v6284_v18 = vrot.slane %v15814_v51, 4 }
 0x89a   : > { %v6268_v28 = vpop.permute.xlu1 %6267  ;;  %v6024_v55 = vpop.permute.xlu0 %6023 }
 0x89b   : > { %v6043_v43 = vrot.slane %v6024_v55, 4  ;;  %v6286_v27 = vrot.slane %v6268_v28, 4 }
 0x89d   : > { %v6060_v37 = vsel %vm1884_vm10, %v6043_v43, %v6044_v58 }
 0x89e   : > { %v15820_v17 = vpop.permute.xlu1 %6393  ;;  %v15822_v1 = vpop.permute.xlu0 %6265  ;;  %v6061_v58 = vsel %vm6048_vm14, %v6024_v55, %v6060_v37  ;;  %v6299_v37 = vsel %vm1884_vm10, %v6283_v53, %v6284_v18  ;;  %v6278_v55 = vrot.slane %v15771_v54, 4  ;;  %v6276_v18 = vrot.slane %v15751_v41, 4 }
 0x89f   : > { %v6285_v45 = vrot.slane %v15822_v1, 4  ;;  %v6275_v53 = vrot.slane %v15753_v35, 4  ;;  %v6298_v41 = vsel %vm6048_vm14, %v15808_v9, %v6297_v60  ;;  %v11449_v9 = vunpack.i.l.bf16 %v15707_v46 }
 0x8a1   : > { %v6301_v10 = vsel %vm1884_vm10, %v6285_v45, %v6286_v27  ;;  %v6055_v45 = vsel %vm6048_vm14, %v15783_v13, %v6054_v59  ;;  %v6300_v27 = vsel %vm6048_vm14, %v15816_v3, %v6299_v37  ;;  %v6053_v13 = vsel %vm6048_vm14, %v15763_v44, %v6052_v36 }
 0x8a2   : > { %v6030_v19 = vpop.permute.xlu1 %6029  ;;  %v15832_v20 = vpop.permute.xlu0 %6152  ;;  %v6302_v23 = vsel %vm6048_vm14, %v15822_v1, %v6301_v10  ;;  %v6295_v1 = vsel %vm1884_vm10, %v6279_v6, %v6280_v12  ;;  %v18464_v10 = vunpack.i.l.bf16 %v15691_v47  ;;  %v10909_v52 = vcombine.high %v6298_v41, %v6300_v27 }
 0x8a3   : > { %v6046_v39 = vrot.slane %v6030_v19, 4  ;;  %v6296_v47 = vsel %vm6048_vm14, %v15793_v29, %v6295_v1  ;;  %v10902_v12 = vcombine.low %v6053_v13, %v6055_v45  ;;  %v10908_v29 = vcombine.low %v6298_v41, %v6300_v27 }
 0x8a4   : > { %v6173_v3 = vrot.slane %v18464_v10, 4  ;;  %v6409_v10 = vrot.slane %v15810_v14, 4 }
 0x8a6   : > { %v6272_v57 = vpop.permute.xlu1 %6271  ;;  %v6028_v63 = vpop.permute.xlu0 %6027 }
 0x8a7   : > { %v6045_v33 = vrot.slane %v6028_v63, 4  ;;  %v6288_v28 = vrot.slane %v6272_v57, 4 }
 0x8a9   : > { %v6062_v62 = vsel %vm1884_vm10, %v6045_v33, %v6046_v39  ;;  %v6057_v39 = vsel %vm6048_vm14, %v15801_v50, %v6056_v49 }
 0x8aa   : > { %v6063_v40 = vsel %vm6048_vm14, %v6028_v63, %v6062_v62  ;;  %v15860_v19 = vpop.permute.xlu1 %6389  ;;  %v6270_v43 = vpop.permute.xlu0 %6269  ;;  %v6277_v63 = vrot.slane %v15773_v38, 4  ;;  %v10907_v57 = vcombine.high %v6057_v39, %v6059_v24  ;;  %v10906_v49 = vcombine.low %v6057_v39, %v6059_v24 }
 0x8ab   : > { %v10910_v51 = vcombine.low %v6061_v58, %v6063_v40  ;;  %v6287_v15 = vrot.slane %v6270_v43, 4  ;;  %v10911_v31 = vcombine.high %v6061_v58, %v6063_v40  ;;  %v6273_v62 = vrot.slane %v15733_v11, 4 }
 0x8ac   : > { %v10903_v58 = vcombine.high %v6053_v13, %v6055_v45  ;;  %v6051_v40 = vsel %vm6048_vm14, %v15743_v4, %v6050_v22  ;;  %v6293_v44 = vsel %vm1884_vm10, %v6277_v63, %v6278_v55  ;;  %v18465_v4 = vunpack.i.h.bf16 %v15705_v42 }
 0x8ad   : > { %v6303_v56 = vsel %vm1884_vm10, %v6287_v15, %v6288_v28  ;;  %6979 = vmatprep.subr.bf16.mxu0 %v10911_v31  ;;  %v6291_v28 = vsel %vm1884_vm10, %v6275_v53, %v6276_v18  ;;  %v6049_v31 = vsel %vm6048_vm14, %v15717_v2, %v15842_v16  ;;  %v6294_v6 = vsel %vm6048_vm14, %v15773_v38, %v6293_v44 }
 0x8ae   : > { %v6304_v50 = vsel %vm6048_vm14, %v6270_v43, %v6303_v56  ;;  %v15876_v33 = vpop.permute.xlu1 %11462  ;;  %6980 = vmatpush1.bf16.msra.mxu0 %v10910_v51  ;;  %v15878_v54 = vpop.permute.xlu0 %11457  ;;  %v11450_v43 = vunpack.i.h.bf16 %v15707_v46  ;;  %v6171_v22 = vrot.slane %v18465_v4, 4  ;;  %v18466_v51 = vunpack.i.l.bf16 %v15705_v42 }
 0x8af   : > { %v10912_v59 = vcombine.low %v6302_v23, %v6304_v50  ;;  %6981 = vmatprep.subr.bf16.mxu0 %v10907_v57  ;;  %v10913_v5 = vcombine.high %v6302_v23, %v6304_v50  ;;  %v6289_v46 = vsel %vm1884_vm10, %v6273_v62, %v6274_v26  ;;  %v10899_v39 = vcombine.high %v6049_v31, %v6051_v40 }
 0x8b0   : > { %v6169_v15 = vrot.slane %v18466_v51, 4  ;;  %v6292_v37 = vsel %vm6048_vm14, %v15753_v35, %v6291_v28  ;;  %v6168_v55 = vrot.slane %v15812_v8, 4  ;;  %v6170_v42 = vrot.slane %v15818_v32, 4 }
 0x8b1   : > { %7092 = vmatprep.subr.bf16.mxu1 %v10913_v5  ;;  %v10905_v2 = vcombine.high %v6294_v6, %v6296_v47  ;;  %v6416_v56 = vrot.slane %v11450_v43, 4  ;;  %v6413_v57 = vrot.slane %v15820_v17, 4  ;;  %v6172_v38 = vrot.slane %v15832_v20, 4 }
 0x8b2   : > { %v15896_v36 = vpop.permute.xlu1 %6377  ;;  %6982 = vmatpush1.bf16.msra.mxu0 %v10906_v49  ;;  %v15898_v24 = vpop.permute.xlu0 %6136  ;;  %7093 = vmatpush1.bf16.msra.mxu1 %v10912_v59  ;;  %v11460_v45 = vunpack.i.h.bf16 %v15878_v54  ;;  %v6414_v35 = vrot.slane %v11449_v9, 4  ;;  %v6290_v60 = vsel %vm6048_vm14, %v15733_v11, %v6289_v46  ;;  %v10898_v23 = vcombine.low %v6049_v31, %v6051_v40 }
 0x8b3   : > { %6983 = vmatprep.subr.bf16.mxu0 %v10903_v58  ;;  %7094 = vmatprep.subr.bf16.mxu1 %v10909_v52  ;;  %v11459_v50 = vunpack.i.l.bf16 %v15878_v54  ;;  %v10900_v18 = vcombine.low %v6290_v60, %v6292_v37  ;;  %v10904_v53 = vcombine.low %v6294_v6, %v6296_v47  ;;  %v10901_v27 = vcombine.high %v6290_v60, %v6292_v37  ;;  %v12431_v58 = vld [vmem:[%s13720_s19 + $0x4] ss:$8 sps:$4 sm:$0xff]  }
 0x8b4   : > { %v6185_v59 = vsel %vm1884_vm10, %v6168_v55, %v6169_v15  ;;  %v6187_v13 = vsel %vm1884_vm10, %v6170_v42, %v6171_v22  ;;  %v11465_v1 = vunpack.i.h.bf16 %v15876_v33  ;;  %v11464_v49 = vunpack.i.l.bf16 %v15876_v33  ;;  %v12432_v15 = vld [vmem:[%s13720_s19] ss:$8 sps:$4 sm:$0xff]  }
 0x8b5   : > { %v6429_v26 = vsel %vm1884_vm10, %v6413_v57, %v6414_v35  ;;  %v6189_v54 = vsel %vm1884_vm10, %v6172_v38, %v6173_v3  ;;  %v6412_v62 = vrot.slane %v11460_v45, 4  ;;  %v6410_v40 = vrot.slane %v11459_v50, 4  ;;  %v12434_v50 = vld [vmem:[%s13720_s19 + $0x10] ss:$8 sps:$4 sm:$0xff]  }
 0x8b6   : > { %v15919_v63 = vpop.permute.xlu1 %6381  ;;  %6984 = vmatpush1.bf16.msra.mxu0 %v10902_v12  ;;  %v15921_v16 = vpop.permute.xlu0 %6140  ;;  %7095 = vmatpush1.bf16.msra.mxu1 %v10908_v29  ;;  %v15939_v33 = vsel %vm6177_vm15, %v15812_v8, %v6185_v59  ;;  %v15943_v43 = vsel %vm6177_vm15, %v15818_v32, %v6187_v13  ;;  %v6411_v3 = vrot.slane %v15860_v19, 4  ;;  %v6430_v28 = vsel %vm6177_vm15, %v15820_v17, %v6429_v26 }
 0x8b7   : > { %6985 = vmatprep.subr.bf16.mxu0 %v10899_v39  ;;  %7096 = vmatprep.subr.bf16.mxu1 %v10905_v2  ;;  %v6190_v47 = vsel %vm6177_vm15, %v15832_v20, %v6189_v54  ;;  %v6167_v4 = vrot.slane %v11465_v1, 4  ;;  %v6165_v22 = vrot.slane %v11464_v49, 4  ;;  %v6166_v32 = vrot.slane %v15921_v16, 4  ;;  %v12433_v20 = vld [vmem:[%s13720_s19 + $0x14] ss:$8 sps:$4 sm:$0xff]  }
 0x8b8   : > { %v6427_v46 = vsel %vm1884_vm10, %v6411_v3, %v6412_v62  ;;  %v6164_v17 = vrot.slane %v15898_v24, 4  ;;  %v6425_v39 = vsel %vm1884_vm10, %v6409_v10, %v6410_v40  ;;  %v6405_v37 = vrot.slane %v15896_v36, 4 }
 0x8b9   : > { %v6428_v35 = vsel %vm6177_vm15, %v15860_v19, %v6427_v46  ;;  %v6183_v60 = vsel %vm1884_vm10, %v6166_v32, %v6167_v4  ;;  %v10939_v59 = vcombine.high %v15939_v33, %v15943_v43  ;;  %v10938_v10 = vcombine.low %v15939_v33, %v15943_v43 }
 0x8ba   : > { %v6398_v5 = vpop.permute.xlu1 %6397  ;;  %6986 = vmatpush1.bf16.msra.mxu0 %v10898_v23  ;;  %v11468_v11 = vpop.permute.xlu0 %11467  ;;  %7097 = vmatpush1.bf16.msra.mxu1 %v10904_v53  ;;  %v6426_v53 = vsel %vm6177_vm15, %v15810_v14, %v6425_v39  ;;  %v6184_v26 = vsel %vm6177_vm15, %v15921_v16, %v6183_v60  ;;  %v11591_v39 = vld [vmem:[%s18114_s4 + $0x100] ss:$8 sps:$4 sm:$0xff]   ;;  %v11608_v60 = vld [vmem:[%s18114_s4 + $0x150] ss:$8 sps:$4 sm:$0xff]  }
 0x8bb   : > { %v6415_v41 = vrot.slane %v6398_v5, 4  ;;  %6993 = vmatprep.subr.bf16.mxu0 %v12431_v58  ;;  %v11470_v44 = vunpack.i.h.bf16 %v11468_v11  ;;  %v11469_v52 = vunpack.i.l.bf16 %v11468_v11  ;;  %7098 = vmatprep.subr.bf16.mxu1 %v10901_v27  ;;  %v10941_v54 = vcombine.high %v6426_v53, %v6428_v35 }
 0x8bd   : > { %v6431_v9 = vsel %vm1884_vm10, %v6415_v41, %v6416_v56  ;;  %v6408_v6 = vrot.slane %v11470_v44, 4  ;;  %v6406_v29 = vrot.slane %v11469_v52, 4  ;;  %v6407_v56 = vrot.slane %v15919_v63, 4 }
 0x8be   : > { %v11473_v51 = vpop.permute.xlu1 %11472  ;;  %v6157_v8 = vpop.permute.xlu0 %6156  ;;  %6994 = vmatpush2.bf16.msra.mxu0 %v12432_v15  ;;  %v6432_v31 = vsel %vm6177_vm15, %v6398_v5, %v6431_v9  ;;  %7099 = vmatpush1.bf16.msra.mxu1 %v10900_v18  ;;  %v10940_v52 = vcombine.low %v6426_v53, %v6428_v35  ;;  %v11606_v35 = vld [vmem:[%s18114_s4 + $0x154] ss:$8 sps:$4 sm:$0xff]   ;;  %v11614_v53 = vld [vmem:[%s18114_s4 + $0x170] ss:$8 sps:$4 sm:$0xff]  }
 0x8bf   : > { %v6174_v12 = vrot.slane %v6157_v8, 4  ;;  %7106 = vmatprep.subr.bf16.mxu1 %v12433_v20  ;;  %v11475_v55 = vunpack.i.h.bf16 %v11473_v51  ;;  %v11474_v42 = vunpack.i.l.bf16 %v11473_v51  ;;  %v10945_v45 = vcombine.high %v6430_v28, %v6432_v31 }
 0x8c0   : > { %v6421_v13 = vsel %vm1884_vm10, %v6405_v37, %v6406_v29  ;;  %v6423_v19 = vsel %vm1884_vm10, %v6407_v56, %v6408_v6  ;;  %v10944_v1 = vcombine.low %v6430_v28, %v6432_v31  ;;  %v11594_v37 = vld [vmem:[%s18114_s4 + $0x114] ss:$8 sps:$4 sm:$0xff]  }
 0x8c1   : > { %v6191_v2 = vsel %vm1884_vm10, %v6174_v12, %v15834_v34  ;;  %v6181_v34 = vsel %vm1884_vm10, %v6164_v17, %v6165_v22  ;;  %v6163_v49 = vrot.slane %v11475_v55, 4  ;;  %v6161_v5 = vrot.slane %v11474_v42, 4  ;;  %v11596_v55 = vld [vmem:[%s18114_s4 + $0x110] ss:$8 sps:$4 sm:$0xff]   ;;  %v11597_v42 = vld [vmem:[%s18114_s4 + $0x124] ss:$8 sps:$4 sm:$0xff]  }
 0x8c2   : > { %v6192_v57 = vsel %vm6177_vm15, %v6157_v8, %v6191_v2  ;;  %v6129_v38 = vpop.permute.xlu0 %6128  ;;  %7107 = vmatpush2.bf16.msra.mxu1 %v12434_v50  ;;  %v6370_v27 = vpop.permute.xlu1 %6369  ;;  %v6422_v41 = vsel %vm6177_vm15, %v15896_v36, %v6421_v13  ;;  %v6424_v58 = vsel %vm6177_vm15, %v15919_v63, %v6423_v19  ;;  %v6182_v40 = vsel %vm6177_vm15, %v15898_v24, %v6181_v34  ;;  %v11599_v2 = vld [vmem:[%s18114_s4 + $0x120] ss:$8 sps:$4 sm:$0xff]   ;;  %v11600_v56 = vld [vmem:[%s18114_s4 + $0x134] ss:$8 sps:$4 sm:$0xff]  }
 0x8c3   : > { %v10942_v23 = vcombine.low %v6190_v47, %v6192_v57  ;;  %v10943_v18 = vcombine.high %v6190_v47, %v6192_v57  ;;  %7108 = vmatprep.subr.bf16.mxu1 %v10945_v45  ;;  %v6160_v11 = vrot.slane %v6129_v38, 4  ;;  %v10935_v3 = vcombine.high %v6182_v40, %v6184_v26  ;;  %v11602_v57 = vld [vmem:[%s18114_s4 + $0x130] ss:$8 sps:$4 sm:$0xff]   ;;  %v11605_v45 = vld [vmem:[%s18114_s4 + $0x140] ss:$8 sps:$4 sm:$0xff]  }
 0x8c4   : > { %v10937_v47 = vcombine.high %v6422_v41, %v6424_v58  ;;  %v10934_v33 = vcombine.low %v6182_v40, %v6184_v26  ;;  %v6401_v43 = vrot.slane %v6370_v27, 4  ;;  %v10936_v22 = vcombine.low %v6422_v41, %v6424_v58  ;;  %v11611_v50 = vld [vmem:[%s18114_s4 + $0x160] ss:$8 sps:$4 sm:$0xff]  }
 0x8c5   : > { %6995 = vmatprep.subr.bf16.mxu0 %v10943_v18  ;;  %v6176_v16 = vsel %vm1884_vm10, %v6160_v11, %v6161_v5  ;;  %v11612_v18 = vld [vmem:[%s18114_s4 + $0x174] ss:$8 sps:$4 sm:$0xff]  }
 0x8c6   : > { %6996 = vmatpush2.bf16.msra.mxu0 %v10942_v23  ;;  %v6133_v14 = vpop.permute.xlu0 %6132  ;;  %7109 = vmatpush2.bf16.msra.mxu1 %v10944_v1  ;;  %v6374_v9 = vpop.permute.xlu1 %6373  ;;  %v6178_v24 = vsel %vm6177_vm15, %v6129_v38, %v6176_v16  ;;  %v11603_v38 = vld [vmem:[%s18114_s4 + $0x144] ss:$8 sps:$4 sm:$0xff]  }
 0x8c7   : > { %v6162_v62 = vrot.slane %v6133_v14, 4  ;;  %6997 = vmatprep.subr.bf16.mxu0 %v10939_v59  ;;  %7110 = vmatprep.subr.bf16.mxu1 %v10941_v54  ;;  %v6403_v51 = vrot.slane %v6374_v9, 4  ;;  %v11609_v23 = vld [vmem:[%s18114_s4 + $0x164] ss:$8 sps:$4 sm:$0xff]  }
 0x8c9   : > { %v6179_v44 = vsel %vm1884_vm10, %v6162_v62, %v6163_v49 }
 0x8ca   : > { %v6180_v28 = vsel %vm6177_vm15, %v6133_v14, %v6179_v44  ;;  %6998 = vmatpush2.bf16.msra.mxu0 %v10938_v10  ;;  %v11478_v36 = vpop.permute.xlu0 %11477  ;;  %7111 = vmatpush2.bf16.msra.mxu1 %v10940_v52 }
 0x8cb   : > { %v11480_v63 = vunpack.i.h.bf16 %v11478_v36  ;;  %v11479_v4 = vunpack.i.l.bf16 %v11478_v36  ;;  %6999 = vmatprep.subr.bf16.mxu0 %v10935_v3  ;;  %7112 = vmatprep.subr.bf16.mxu1 %v10937_v47  ;;  %v10931_v32 = vcombine.high %v6178_v24, %v6180_v28  ;;  %v10930_v46 = vcombine.low %v6178_v24, %v6180_v28 }
 0x8cd   : > { %v6404_v8 = vrot.slane %v11480_v63, 4  ;;  %v6402_v15 = vrot.slane %v11479_v4, 4 }
 0x8ce   : > { %7000 = vmatpush2.bf16.msra.mxu0 %v10934_v33  ;;  %7113 = vmatpush2.bf16.msra.mxu1 %v10936_v22 }
 0x8cf   : > { %7001 = vmatprep.subr.bf16.mxu0 %v10931_v32  ;;  %v6417_v31 = vsel %vm1884_vm10, %v6401_v43, %v6402_v15  ;;  %v6419_v12 = vsel %vm1884_vm10, %v6403_v51, %v6404_v8 }
 0x8d0   : > { %v6418_v17 = vsel %vm6177_vm15, %v6370_v27, %v6417_v31  ;;  %v6420_v6 = vsel %vm6177_vm15, %v6374_v9, %v6419_v12 }
 0x8d1   : > { %v10932_v29 = vcombine.low %v6418_v17, %v6420_v6  ;;  %v10933_v20 = vcombine.high %v6418_v17, %v6420_v6 }
 0x8d2   : > { %7002 = vmatpush2.bf16.msra.mxu0 %v10930_v46 }
 0x8d3   : > { %7114 = vmatprep.subr.bf16.mxu1 %v10933_v20  ;;  %v16093_v3 = vpop.permute.xlu1 %6612 }
 0x8d4   : > { %7115 = vmatpush2.bf16.msra.mxu1 %v10932_v29 }
 0x8d5   : > { %7004 = vmatmul.mubr.bf16.vlgmr.msra.gmra.mxu0 %v11591_v39 }
 0x8d6   : > { %10951 = vmatprep.mubr.msk.bf16.mxu0 %vm2783_vm11, %v11594_v37 }
 0x8d7   : > { %7117 = vmatmul.mubr.bf16.vlgmr.msra.gmra.mxu1 %v11591_v39  ;;  %v16089_v44 = vpop.permute.xlu0 %6607  ;;  %v16103_v63 = vpop.permute.xlu1 %6602 }
 0x8d8   : > { %10959 = vmatprep.mubr.msk.bf16.mxu1 %vm2783_vm11, %v11594_v37 }
 0x8db   : > { %v16099_v36 = vpop.permute.xlu0 %6597  ;;  %v16113_v22 = vpop.permute.xlu1 %6592 }
 0x8dd   : > { %7014 = vmatmul.mubr.bf16.gmra.mxu0 %v11596_v55 }
 0x8de   : > { %10952 = vmatprep.mubr.msk.bf16.mxu0 %vm2783_vm11, %v11597_v42 }
 0x8df   : > { %7127 = vmatmul.mubr.bf16.gmra.mxu1 %v11596_v55  ;;  %v16109_v43 = vpop.permute.xlu0 %6587  ;;  %v16123_v31 = vpop.permute.xlu1 %6582 }
 0x8e0   : > { %10960 = vmatprep.mubr.msk.bf16.mxu1 %vm2783_vm11, %v11597_v42 }
 0x8e3   : > { %v16119_v15 = vpop.permute.xlu0 %6577  ;;  %v16133_v29 = vpop.permute.xlu1 %6572 }
 0x8e5   : > { %7024 = vmatmul.mubr.bf16.gmra.mxu0 %v11599_v2  ;;  %v16053_v34 = vpop.f32.mrf.mxu0  ;;  %v16055_v27 = vpop.f32.mrf.mxu1 }
 0x8e6   : > { %10953 = vmatprep.mubr.msk.bf16.mxu0 %vm2783_vm11, %v11600_v56  ;;  %18467 = vst [vmem:[#allocation23_spill] sm:$0xff] %v16053_v34  ;;  %18468 = vst [vmem:[#allocation11_spill] sm:$0xff] %v16055_v27 }
 0x8e7   : > { %7137 = vmatmul.mubr.bf16.gmra.mxu1 %v11599_v2  ;;  %v16057_v59 = vpop.f32.mrf.mxu0  ;;  %v16059_v13 = vpop.f32.mrf.mxu1 }
 0x8e8   : > { %10961 = vmatprep.mubr.msk.bf16.mxu1 %vm2783_vm11, %v11600_v56  ;;  %18469 = vst [vmem:[#allocation24_spill] sm:$0xff] %v16057_v59  ;;  %18470 = vst [vmem:[#allocation12_spill] sm:$0xff] %v16059_v13  ;;  %v16129_v17 = vpop.permute.xlu0 %6567 }
 0x8e9   : > { %v16061_v19 = vpop.f32.mrf.mxu0  ;;  %v16063_v1 = vpop.f32.mrf.mxu1 }
 0x8ea   : > { %18471 = vst [vmem:[#allocation25_spill] sm:$0xff] %v16061_v19  ;;  %18472 = vst [vmem:[#allocation80_spill] sm:$0xff] %v16063_v1 }
 0x8eb   : > { %v16065_v49 = vpop.f32.mrf.mxu0  ;;  %v16067_v5 = vpop.f32.mrf.mxu1 }
 0x8ec   : > { %18473 = vst [vmem:[#allocation81_spill] sm:$0xff] %v16065_v49  ;;  %18474 = vst [vmem:[#allocation82_spill] sm:$0xff] %v16067_v5  ;;  %v16137_v42 = vpop.permute.xlu0 %6557 }
 0x8ed   : > { %7034 = vmatmul.mubr.bf16.gmra.mxu0 %v11602_v57  ;;  %v16069_v11 = vpop.f32.mrf.mxu0  ;;  %v16071_v26 = vpop.f32.mrf.mxu1 }
 0x8ee   : > { %10954 = vmatprep.mubr.msk.bf16.mxu0 %vm2783_vm11, %v11603_v38  ;;  %18475 = vst [vmem:[#allocation83_spill] sm:$0xff] %v16069_v11  ;;  %18476 = vst [vmem:[#allocation84_spill] sm:$0xff] %v16071_v26 }
 0x8ef   : > { %7147 = vmatmul.mubr.bf16.gmra.mxu1 %v11602_v57  ;;  %v16073_v14 = vpop.f32.mrf.mxu0  ;;  %v16075_v54 = vpop.f32.mrf.mxu1 }
 0x8f0   : > { %10962 = vmatprep.mubr.msk.bf16.mxu1 %vm2783_vm11, %v11603_v38  ;;  %18477 = vst [vmem:[#allocation85_spill] sm:$0xff] %v16073_v14  ;;  %18478 = vst [vmem:[#allocation86_spill] sm:$0xff] %v16075_v54  ;;  %v16141_v57 = vpop.permute.xlu1 %6562 }
 0x8f1   : > { %v16077_v62 = vpop.f32.mrf.mxu0  ;;  %v16079_v41 = vpop.f32.mrf.mxu1 }
 0x8f2   : > { %18479 = vst [vmem:[#allocation87_spill] sm:$0xff] %v16077_v62  ;;  %18480 = vst [vmem:[#allocation88_spill] sm:$0xff] %v16079_v41 }
 0x8f3   : > { %v16081_v58 = vpop.f32.mrf.mxu0  ;;  %v16083_v10 = vpop.f32.mrf.mxu1 }
 0x8f4   : > { %18481 = vst [vmem:[#allocation89_spill] sm:$0xff] %v16081_v58  ;;  %18482 = vst [vmem:[#allocation90_spill] sm:$0xff] %v16083_v10 }
 0x8f5   : > { %7044 = vmatmul.mubr.bf16.gmra.mxu0 %v11605_v45  ;;  %v16085_v40 = vpop.f32.mrf.mxu0  ;;  %v16087_v16 = vpop.f32.mrf.mxu1 }
 0x8f6   : > { %10955 = vmatprep.mubr.msk.bf16.mxu0 %vm2783_vm11, %v11606_v35  ;;  %18483 = vst [vmem:[#allocation91_spill] sm:$0xff] %v16085_v40  ;;  %18484 = vst [vmem:[#allocation92_spill] sm:$0xff] %v16087_v16 }
 0x8f7   : > { %7157 = vmatmul.mubr.bf16.gmra.mxu1 %v11605_v45  ;;  %v16091_v52 = vpop.f32.mrf.mxu0  ;;  %v16095_v9 = vpop.f32.mrf.mxu1 }
 0x8f8   : > { %10963 = vmatprep.mubr.msk.bf16.mxu1 %vm2783_vm11, %v11606_v35  ;;  %18485 = vst [vmem:[#allocation93_spill] sm:$0xff] %v16091_v52  ;;  %18486 = vst [vmem:[#allocation94_spill] sm:$0xff] %v16095_v9 }
 0x8f9   : > { %v16097_v28 = vpop.f32.mrf.mxu0  ;;  %v16101_v47 = vpop.f32.mrf.mxu1 }
 0x8fa   : > { %18487 = vst [vmem:[#allocation95_spill] sm:$0xff] %v16097_v28  ;;  %18488 = vst [vmem:[#allocation96_spill] sm:$0xff] %v16101_v47 }
 0x8fb   : > { %v16105_v4 = vpop.f32.mrf.mxu0  ;;  %v16107_v33 = vpop.f32.mrf.mxu1 }
 0x8fc   : > { %18489 = vst [vmem:[#allocation97_spill] sm:$0xff] %v16105_v4  ;;  %18490 = vst [vmem:[#allocation98_spill] sm:$0xff] %v16107_v33 }
 0x8fd   : > { %7054 = vmatmul.mubr.bf16.gmra.mxu0 %v11608_v60 }
 0x8fe   : > { %10956 = vmatprep.mubr.msk.bf16.mxu0 %vm2783_vm11, %v11609_v23 }
 0x8ff   : > { %7167 = vmatmul.mubr.bf16.gmra.mxu1 %v11608_v60 }
 0x900   : > { %10964 = vmatprep.mubr.msk.bf16.mxu1 %vm2783_vm11, %v11609_v23  ;;  %v16145_v23 = vpop.permute.xlu0 %6547 }
 0x904   : > { %v16151_v5 = vpop.permute.xlu0 %6537 }
 0x905   : > { %7064 = vmatmul.mubr.bf16.gmra.mxu0 %v11611_v50  ;;  %v16111_v24 = vpop.f32.mrf.mxu0  ;;  %v16115_v51 = vpop.f32.mrf.mxu1 }
 0x906   : > { %10957 = vmatprep.mubr.msk.bf16.mxu0 %vm2783_vm11, %v11612_v18  ;;  %18491 = vst [vmem:[#allocation99_spill] sm:$0xff] %v16111_v24  ;;  %18492 = vst [vmem:[#allocation100_spill] sm:$0xff] %v16115_v51 }
 0x907   : > { %7177 = vmatmul.mubr.bf16.gmra.mxu1 %v11611_v50  ;;  %v16117_v8 = vpop.f32.mrf.mxu0  ;;  %v16121_v32 = vpop.f32.mrf.mxu1 }
 0x908   : > { %10965 = vmatprep.mubr.msk.bf16.mxu1 %vm2783_vm11, %v11612_v18  ;;  %18493 = vst [vmem:[#allocation101_spill] sm:$0xff] %v16117_v8  ;;  %18494 = vst [vmem:[#allocation102_spill] sm:$0xff] %v16121_v32 }
 0x909   : > { %v16125_v12 = vpop.f32.mrf.mxu0  ;;  %v16127_v46 = vpop.f32.mrf.mxu1 }
 0x90a   : > { %18495 = vst [vmem:[#allocation103_spill] sm:$0xff] %v16125_v12  ;;  %18496 = vst [vmem:[#allocation104_spill] sm:$0xff] %v16127_v46 }
 0x90b   : > { %v16131_v6 = vpop.f32.mrf.mxu0  ;;  %v16135_v20 = vpop.f32.mrf.mxu1 }
 0x90c   : > { %18497 = vst [vmem:[#allocation105_spill] sm:$0xff] %v16131_v6  ;;  %18498 = vst [vmem:[#allocation106_spill] sm:$0xff] %v16135_v20 }
 0x90d   : > { %7074 = vmatmul.mubr.bf16.gmra.mxu0 %v11614_v53 }
 0x90e   : > { %7647 = vmatprep.mubr.bf16.mxu0 %v18399_v0 }
 0x90f   : > { %7187 = vmatmul.mubr.bf16.gmra.mxu1 %v11614_v53  ;;  %v16147_v53 = vpop.permute.xlu1 %6552 }
 0x910   : > { %7760 = vmatprep.mubr.bf16.mxu1 %v18399_v0 }
 0x913   : > { %v16156_v54 = vpop.permute.xlu1 %6542 }
 0x995   : > { %v7005_v39 = vpop.f32.mrf.mxu0 }
 0x996   : > { %v7006_v1 = vadd.f32 %v7005_v39, %v16151_v5 }
 0x997   : > { %v7007_v37 = vpop.f32.mrf.mxu0  ;;  %v7118_v55 = vpop.f32.mrf.mxu1 }
 0x998   : > { %v7008_v26 = vadd.f32 %v7007_v37, %v16151_v5  ;;  %v7119_v14 = vadd.f32 %v7118_v55, %v16151_v5  ;;  %12043 = vtanh.f32 %v7006_v1 }
 0x999   : > { %v7009_v2 = vpop.f32.mrf.mxu0  ;;  %v16139_v56 = vpop.f32.mrf.mxu1 }
 0x99a   : > { %v7010_v41 = vadd.f32 %v7009_v2, %v16156_v54  ;;  %12045 = vtanh.f32 %v7008_v26 }
 0x99b   : > { %v7011_v38 = vpop.f32.mrf.mxu0  ;;  %v7122_v45 = vpop.f32.mrf.mxu1  ;;  %12047 = vtanh.f32 %v7119_v14 }
 0x99c   : > { %v7012_v58 = vadd.f32 %v7011_v38, %v16156_v54  ;;  %v7123_v39 = vadd.f32 %v7122_v45, %v16156_v54  ;;  %12049 = vtanh.f32 %v7010_v41 }
 0x99d   : > { %v7015_v35 = vpop.f32.mrf.mxu0  ;;  %v16143_v60 = vpop.f32.mrf.mxu1 }
 0x99e   : > { %v7016_v16 = vadd.f32 %v7015_v35, %v16145_v23  ;;  %12051 = vtanh.f32 %v7012_v58 }
 0x99f   : > { %v7017_v50 = vpop.f32.mrf.mxu0  ;;  %v7128_v18 = vpop.f32.mrf.mxu1  ;;  %12053 = vtanh.f32 %v7123_v39 }
 0x9a0   : > { %v7018_v37 = vadd.f32 %v7017_v50, %v16145_v23  ;;  %v7129_v55 = vadd.f32 %v7128_v18, %v16145_v23  ;;  %12055 = vtanh.f32 %v7016_v16 }
 0x9a1   : > { %v7019_v13 = vpop.f32.mrf.mxu0  ;;  %v16149_v27 = vpop.f32.mrf.mxu1 }
 0x9a2   : > { %v7020_v38 = vadd.f32 %v7019_v13, %v16147_v53  ;;  %12057 = vtanh.f32 %v7018_v37 }
 0x9a3   : > { %v7021_v59 = vpop.f32.mrf.mxu0  ;;  %v7132_v34 = vpop.f32.mrf.mxu1  ;;  %12059 = vtanh.f32 %v7129_v55 }
 0x9a4   : > { %v7022_v26 = vadd.f32 %v7021_v59, %v16147_v53  ;;  %v7133_v35 = vadd.f32 %v7132_v34, %v16147_v53  ;;  %12061 = vtanh.f32 %v7020_v38 }
 0x9a5   : > { %v7025_v49 = vpop.f32.mrf.mxu0  ;;  %v16154_v19 = vpop.f32.mrf.mxu1 }
 0x9a6   : > { %v7026_v41 = vadd.f32 %v7025_v49, %v16137_v42  ;;  %12063 = vtanh.f32 %v7022_v26  ;;  %v16184_v55 = vpop.eup %12043 }
 0x9a7   : > { %v7027_v11 = vpop.f32.mrf.mxu0  ;;  %v7138_v10 = vpop.f32.mrf.mxu1  ;;  %12065 = vtanh.f32 %v7133_v35 }
 0x9a8   : > { %v7028_v18 = vadd.f32 %v7027_v11, %v16137_v42  ;;  %v7139_v13 = vadd.f32 %v7138_v10, %v16137_v42  ;;  %12067 = vtanh.f32 %v7026_v41  ;;  %v16187_v38 = vpop.eup %12045 }
 0x9a9   : > { %v7029_v62 = vpop.f32.mrf.mxu0  ;;  %v7140_v9 = vpop.f32.mrf.mxu1  ;;  %18499 = vst [vmem:[#allocation107_spill] sm:$0xff] %v16187_v38 }
 0x9aa   : > { %v7030_v34 = vadd.f32 %v7029_v62, %v16141_v57  ;;  %v7141_v49 = vadd.f32 %v7140_v9, %v16137_v42  ;;  %12069 = vtanh.f32 %v7028_v18  ;;  %v16190_v33 = vpop.eup %12047 }
 0x9ab   : > { %v7031_v52 = vpop.f32.mrf.mxu0  ;;  %v7142_v40 = vpop.f32.mrf.mxu1  ;;  %12071 = vtanh.f32 %v7139_v13 }
 0x9ac   : > { %v7032_v10 = vadd.f32 %v7031_v52, %v16141_v57  ;;  %12073 = vtanh.f32 %v7030_v34  ;;  %v16193_v42 = vpop.eup %12049  ;;  %v7143_v41 = vadd.f32 %v7142_v40, %v16141_v57 }
 0x9ad   : > { %v7035_v2 = vpop.f32.mrf.mxu0  ;;  %v7144_v1 = vpop.f32.mrf.mxu1  ;;  %12075 = vtanh.f32 %v7141_v49 }
 0x9ae   : > { %v16196_v47 = vpop.eup %12051  ;;  %v7036_v13 = vadd.f32 %v7035_v2, %v16129_v17  ;;  %12077 = vtanh.f32 %v7032_v10  ;;  %v7145_v8 = vadd.f32 %v7144_v1, %v16141_v57 }
 0x9af   : > { %v7037_v45 = vpop.f32.mrf.mxu0  ;;  %v7148_v14 = vpop.f32.mrf.mxu1  ;;  %18500 = vst [vmem:[#allocation108_spill] sm:$0xff] %v16196_v47 }
 0x9b0   : > { %v16200_v32 = vpop.eup %12053  ;;  %v7038_v10 = vadd.f32 %v7037_v45, %v16129_v17 }
 0x9b1   : > { %v16170_v50 = vpop.f32.mrf.mxu0  ;;  %v16172_v58 = vpop.f32.mrf.mxu1 }
 0x9b3   : > { %v16176_v16 = vpop.f32.mrf.mxu0  ;;  %v16178_v59 = vpop.f32.mrf.mxu1 }
 0x9b5   : > { %v7045_v39 = vpop.f32.mrf.mxu0  ;;  %v16182_v37 = vpop.f32.mrf.mxu1 }
 0x9b6   : > { %v7046_v11 = vadd.f32 %v7045_v39, %v16119_v15 }
 0x9b7   : > { %v7047_v26 = vpop.f32.mrf.mxu0  ;;  %v7158_v35 = vpop.f32.mrf.mxu1 }
 0x9b8   : > { %v7229_v62 = vsub.f32 0.0, %v7046_v11  ;;  %v7159_v9 = vadd.f32 %v7158_v35, %v16119_v15  ;;  %v16202_v35 = vpop.eup %12055 }
 0x9b9   : > { %v7049_v18 = vpop.f32.mrf.mxu0  ;;  %v7160_v39 = vpop.f32.mrf.mxu1 }
 0x9ba   : > { %v7261_v52 = vmul.f32 1.442695, %v7229_v62  ;;  %v7231_v4 = vsub.f32 0.0, %v7159_v9  ;;  %v7050_v28 = vadd.f32 %v7049_v18, %v16123_v31  ;;  %v16204_v51 = vpop.eup %12057 }
 0x9bb   : > { %v7051_v34 = vpop.f32.mrf.mxu0  ;;  %v7162_v11 = vpop.f32.mrf.mxu1 }
 0x9bc   : > { %12079 = vpow2.f32 %v7261_v52  ;;  %v7265_v49 = vmul.f32 1.442695, %v7231_v4  ;;  %v7233_v40 = vsub.f32 0.0, %v7050_v28  ;;  %v7163_v2 = vadd.f32 %v7162_v11, %v16123_v31  ;;  %v16208_v18 = vpop.eup %12059 }
 0x9bd   : > { %12081 = vtanh.f32 %v7143_v41  ;;  %v7055_v62 = vpop.f32.mrf.mxu0  ;;  %v7164_v9 = vpop.f32.mrf.mxu1  ;;  %v7149_v28 = vadd.f32 %v7148_v14, %v16129_v17  ;;  %v7040_v14 = vadd.f32 %v16170_v50, %v16133_v29 }
 0x9be   : > { %12083 = vtanh.f32 %v7036_v13  ;;  %v7269_v24 = vmul.f32 1.442695, %v7233_v40  ;;  %v7056_v20 = vadd.f32 %v7055_v62, %v16109_v43  ;;  %v16212_v52 = vpop.eup %12061  ;;  %v7235_v4 = vsub.f32 0.0, %v7163_v2 }
 0x9bf   : > { %12085 = vpow2.f32 %v7265_v49  ;;  %v7057_v41 = vpop.f32.mrf.mxu0  ;;  %v7168_v57 = vpop.f32.mrf.mxu1 }
 0x9c0   : > { %v16215_v1 = vpop.eup %12063  ;;  %12087 = vpow2.f32 %v7269_v24  ;;  %v7237_v11 = vsub.f32 0.0, %v7056_v20  ;;  %v7273_v13 = vmul.f32 1.442695, %v7235_v4  ;;  %v7169_v45 = vadd.f32 %v7168_v57, %v16109_v43 }
 0x9c1   : > { %v16217_v46 = vpop.eup %12065  ;;  %12089 = vtanh.f32 %v7145_v8  ;;  %v7059_v40 = vpop.f32.mrf.mxu0  ;;  %v7151_v24 = vadd.f32 %v16172_v58, %v16129_v17  ;;  %v7048_v8 = vadd.f32 %v7047_v26, %v16119_v15  ;;  %v7042_v58 = vadd.f32 %v16176_v16, %v16133_v29 }
 0x9c2   : > { %v7170_v62 = vpop.f32.mrf.mxu1  ;;  %v16220_v6 = vpop.eup %12067  ;;  %12091 = vtanh.f32 %v7038_v10  ;;  %v7277_v49 = vmul.f32 1.442695, %v7237_v11  ;;  %v7060_v2 = vadd.f32 %v7059_v40, %v16113_v22  ;;  %v7239_v20 = vsub.f32 0.0, %v7169_v45 }
 0x9c3   : > { %v16225_v12 = vpop.eup %12069  ;;  %12093 = vtanh.f32 %v7149_v28  ;;  %v7061_v4 = vpop.f32.mrf.mxu0  ;;  %v7161_v10 = vadd.f32 %v7160_v39, %v16119_v15  ;;  %v7153_v15 = vadd.f32 %v16178_v59, %v16133_v29  ;;  %v7230_v39 = vsub.f32 0.0, %v7048_v8 }
 0x9c4   : > { %v7172_v57 = vpop.f32.mrf.mxu1  ;;  %v16230_v48 = vpop.eup %12071  ;;  %12095 = vpow2.f32 %v7273_v13  ;;  %v7241_v50 = vsub.f32 0.0, %v7060_v2  ;;  %v7281_v40 = vmul.f32 1.442695, %v7239_v20  ;;  %v7052_v13 = vadd.f32 %v7051_v34, %v16123_v31 }
 0x9c5   : > { %v16233_v11 = vpop.eup %12073  ;;  %12097 = vpow2.f32 %v7277_v49  ;;  %v7173_v28 = vadd.f32 %v7172_v57, %v16113_v22  ;;  %v7065_v7 = vpop.f32.mrf.mxu0  ;;  %v7155_v57 = vadd.f32 %v16182_v37, %v16133_v29  ;;  %v7165_v16 = vadd.f32 %v7164_v9, %v16123_v31 }
 0x9c6   : > { %v16236_v61 = vpop.f32.mrf.mxu1  ;;  %v16238_v17 = vpop.eup %12075  ;;  %12099 = vtanh.f32 %v7040_v14  ;;  %v7285_v26 = vmul.f32 1.442695, %v7241_v50  ;;  %v7232_v14 = vsub.f32 0.0, %v7161_v10  ;;  %v7058_v59 = vadd.f32 %v7057_v41, %v16109_v43 }
 0x9c7   : > { %18501 = vst [vmem:[#allocation109_spill] sm:$0xff] %v16238_v17  ;;  %12101 = vtanh.f32 %v7151_v24  ;;  %v7243_v45 = vsub.f32 0.0, %v7173_v28  ;;  %v7067_v49 = vpop.f32.mrf.mxu0  ;;  %v16245_v20 = vpop.eup %12077  ;;  %v7263_v29 = vmul.f32 1.442695, %v7230_v39  ;;  %v7234_v37 = vsub.f32 0.0, %v7052_v13 }
 0x9c8   : > { %v7178_v2 = vpop.f32.mrf.mxu1  ;;  %12103 = vpow2.f32 %v7281_v40  ;;  %v7171_v31 = vadd.f32 %v7170_v62, %v16109_v43  ;;  %v7267_v40 = vmul.f32 1.442695, %v7232_v14  ;;  %v7066_v0 = vadd.f32 %v7065_v7, %v16099_v36 }
 0x9c9   : > { %v12080_v21 = vpop.eup %12079  ;;  %12105 = vpow2.f32 %v7285_v26  ;;  %v7289_v24 = vmul.f32 1.442695, %v7243_v45  ;;  %v7069_v8 = vpop.f32.mrf.mxu0  ;;  %v7236_v26 = vsub.f32 0.0, %v7165_v16  ;;  %v7238_v45 = vsub.f32 0.0, %v7058_v59 }
 0x9ca   : > { %v16251_v50 = vpop.eup %12081  ;;  %12107 = vtanh.f32 %v7042_v58  ;;  %v7325_v34 = vadd.f32 1.0, %v12080_v21  ;;  %v16253_v28 = vpop.f32.mrf.mxu1  ;;  %v7271_v13 = vmul.f32 1.442695, %v7234_v37  ;;  %v7062_v43 = vadd.f32 %v7061_v4, %v16113_v22 }
 0x9cb   : > { %v16255_v25 = vpop.eup %12083  ;;  %12109 = vtanh.f32 %v7153_v15  ;;  %v7071_v9 = vpop.f32.mrf.mxu0  ;;  %v7275_v59 = vmul.f32 1.442695, %v7236_v26  ;;  %v7245_v7 = vsub.f32 0.0, %v7066_v0  ;;  %v7070_v26 = vadd.f32 %v7069_v8, %v16103_v63 }
 0x9cc   : > { %v12086_v10 = vpop.eup %12085  ;;  %12111 = vtanh.f32 %v7155_v57  ;;  %v7182_v15 = vpop.f32.mrf.mxu1  ;;  %v7240_v57 = vsub.f32 0.0, %v7171_v31  ;;  %v7242_v37 = vsub.f32 0.0, %v7062_v43 }
 0x9cd   : > { %v12088_v41 = vpop.eup %12087  ;;  %12113 = vpow2.f32 %v7289_v24  ;;  %v7327_v21 = vadd.f32 1.0, %v12086_v10  ;;  %v7075_v14 = vpop.f32.mrf.mxu0  ;;  %v7279_v24 = vmul.f32 1.442695, %v7238_v45 }
 0x9ce   : > { %v16258_v30 = vpop.eup %12089  ;;  %12115 = vrcp.f32 %v7325_v34  ;;  %v7329_v58 = vadd.f32 1.0, %v12088_v41  ;;  %v7179_v41 = vadd.f32 %v7178_v2, %v16099_v36  ;;  %v7184_v38 = vpop.f32.mrf.mxu1  ;;  %v7283_v31 = vmul.f32 1.442695, %v7240_v57 }
 0x9cf   : > { %18502 = vst [vmem:[#allocation110_spill] sm:$0xff] %v16258_v30  ;;  %v16261_v39 = vpop.eup %12091  ;;  %12117 = vpow2.f32 %v7263_v29  ;;  %v7077_v45 = vpop.f32.mrf.mxu0  ;;  %v7293_v2 = vmul.f32 1.442695, %v7245_v7  ;;  %v7183_v57 = vadd.f32 %v7182_v15, %v16103_v63  ;;  %v7287_v8 = vmul.f32 1.442695, %v7242_v37 }
 0x9d0   : > { %v16264_v62 = vpop.eup %12093  ;;  %12119 = vrcp.f32 %v7329_v58  ;;  %v7247_v58 = vsub.f32 0.0, %v7179_v41  ;;  %v7076_v7 = vadd.f32 %v7075_v14, %v16089_v44  ;;  %v16286_v15 = vadd.f32 %v16236_v61, %v16113_v22 }
 0x9d1   : > { %18503 = vst [vmem:[#allocation111_spill] sm:$0xff] %v16264_v62  ;;  %v12096_v16 = vpop.eup %12095  ;;  %12121 = vpow2.f32 %v7267_v40  ;;  %v7068_v40 = vadd.f32 %v7067_v49, %v16099_v36  ;;  %v7079_v62 = vpop.f32.mrf.mxu0  ;;  %v7185_v14 = vadd.f32 %v7184_v38, %v16103_v63 }
 0x9d2   : > { %v12098_v34 = vpop.eup %12097  ;;  %12123 = vrcp.f32 %v7327_v21  ;;  %v7331_v10 = vadd.f32 1.0, %v12096_v16  ;;  %v7072_v16 = vadd.f32 %v7071_v9, %v16103_v63  ;;  %v7181_v9 = vadd.f32 %v16253_v28, %v16099_v36 }
 0x9d3   : > { %v16267_v29 = vpop.eup %12099  ;;  %12125 = vpow2.f32 %v7271_v13  ;;  %v7333_v4 = vadd.f32 1.0, %v12098_v34  ;;  %v7188_v13 = vpop.f32.mrf.mxu1  ;;  %v7246_v47 = vsub.f32 0.0, %v7068_v40  ;;  %v7253_v22 = vsub.f32 0.0, %v7076_v7 }
 0x9d4   : > { %v16269_v17 = vpop.eup %12101  ;;  %12127 = vrcp.f32 %v7331_v10  ;;  %v7248_v61 = vsub.f32 0.0, %v7181_v9 }
 0x9d5   : > { %v12104_v21 = vpop.eup %12103  ;;  %12129 = vpow2.f32 %v7275_v59  ;;  %v7249_v59 = vsub.f32 0.0, %v7070_v26  ;;  %v7190_v37 = vpop.f32.mrf.mxu1  ;;  %v7295_v36 = vmul.f32 1.442695, %v7246_v47 }
 0x9d6   : > { %v12106_v0 = vpop.eup %12105  ;;  %12131 = vpow2.f32 %v7279_v24  ;;  %v7335_v43 = vadd.f32 1.0, %v12104_v21  ;;  %v7251_v21 = vsub.f32 0.0, %v7183_v57  ;;  %v7189_v57 = vadd.f32 %v7188_v13, %v16089_v44 }
 0x9d7   : > { %v16274_v34 = vpop.eup %12107  ;;  %12133 = vrcp.f32 %v7333_v4  ;;  %v7337_v10 = vadd.f32 1.0, %v12106_v0  ;;  %v7297_v4 = vmul.f32 1.442695, %v7247_v58  ;;  %v7078_v0 = vadd.f32 %v7077_v45, %v16089_v44  ;;  %v7192_v45 = vpop.f32.mrf.mxu1 }
 0x9d8   : > { %v16277_v49 = vpop.eup %12109  ;;  %12135 = vpow2.f32 %v7283_v31  ;;  %v7250_v31 = vsub.f32 0.0, %v7072_v16  ;;  %v7301_v28 = vmul.f32 1.442695, %v7249_v59  ;;  %v7080_v58 = vadd.f32 %v7079_v62, %v16093_v3 }
 0x9d9   : > { %v16279_v24 = vpop.eup %12111  ;;  %12137 = vrcp.f32 %v7337_v10  ;;  %v7305_v38 = vmul.f32 1.442695, %v7251_v21  ;;  %v7252_v62 = vsub.f32 0.0, %v7185_v14  ;;  %v7191_v7 = vadd.f32 %v7190_v37, %v16089_v44  ;;  %v7194_v14 = vpop.f32.mrf.mxu1 }
 0x9da   : > { %v12114_v41 = vpop.eup %12113  ;;  %12139 = vpow2.f32 %v7293_v2  ;;  %v7081_v2 = vpop.f32.mrf.mxu0 }
 0x9db   : > { %v12116_v40 = vpop.eup %12115  ;;  %12141 = vrcp.f32 %v7335_v43  ;;  %v7339_v26 = vadd.f32 1.0, %v12114_v41  ;;  %v7303_v43 = vmul.f32 1.442695, %v7250_v31  ;;  %v7082_v59 = vadd.f32 %v7081_v2, %v16093_v3 }
 0x9dc   : > { %v16289_v10 = vpop.eup %12117  ;;  %12143 = vpow2.f32 %v7287_v8  ;;  %v16297_v41 = vmul.f32 %v12116_v40, %v16184_v55  ;;  %v7254_v8 = vsub.f32 0.0, %v7078_v0  ;;  %v7299_v31 = vmul.f32 1.442695, %v7248_v61 }
 0x9dd   : > { %v12120_v30 = vpop.eup %12119  ;;  %12145 = vrcp.f32 %v7339_v26  ;;  %v7309_v40 = vmul.f32 1.442695, %v7253_v22  ;;  %v7255_v26 = vsub.f32 0.0, %v7189_v57  ;;  %v7307_v61 = vmul.f32 1.442695, %v7252_v62 }
 0x9de   : > { %v16293_v16 = vpop.eup %12121  ;;  %v16300_v47 = vmul.f32 %v12120_v30, %v16193_v42  ;;  %12147 = vpow2.f32 %v7297_v4  ;;  %v7257_v30 = vsub.f32 0.0, %v7080_v58  ;;  %v7193_v42 = vadd.f32 %v7192_v45, %v16093_v3 }
 0x9df   : > { %v12124_v63 = vpop.eup %12123  ;;  %12149 = vpow2.f32 %v7301_v28  ;;  %v7311_v37 = vmul.f32 1.442695, %v7254_v8  ;;  %v7258_v28 = vsub.f32 0.0, %v7082_v59  ;;  %v7256_v22 = vsub.f32 0.0, %v7191_v7 }
 0x9e0   : > { %v16303_v9 = vpop.eup %12125  ;;  %v7438_v13 = vpack.c.bf16 %v16300_v47, %v16297_v41  ;;  %12151 = vpow2.f32 %v7295_v36  ;;  %v16312_v21 = vmul.f32 %v12124_v63, %v16190_v33  ;;  %v7317_v33 = vmul.f32 1.442695, %v7257_v30  ;;  %v11617_v41 = vld [vmem:[%s18116_s6 + $0x90] sm:$0xff]   ;;  %v11618_v47 = vld [vmem:[%s18116_s6 + $0x98] sm:$0xff]  }
 0x9e1   : > { %v12128_v55 = vpop.eup %12127  ;;  %12153 = vpow2.f32 %v7303_v43  ;;  %v7259_v57 = vsub.f32 0.0, %v7193_v42  ;;  %v7313_v43 = vmul.f32 1.442695, %v7255_v26  ;;  %v7195_v63 = vadd.f32 %v7194_v14, %v16093_v3 }
 0x9e2   : > { %v16309_v4 = vpop.eup %12129  ;;  %v16315_v0 = vmul.f32 %v12128_v55, %v16200_v32  ;;  %12155 = vpow2.f32 %v7305_v38  ;;  %v7244_v32 = vsub.f32 0.0, %v16286_v15  ;;  %v7319_v38 = vmul.f32 1.442695, %v7258_v28 }
 0x9e3   : > { %v12132_v44 = vpop.eup %12131  ;;  %12157 = vpow2.f32 %v7299_v31  ;;  %v7315_v55 = vmul.f32 1.442695, %v7256_v22  ;;  %v7321_v30 = vmul.f32 1.442695, %v7259_v57  ;;  %v7260_v42 = vsub.f32 0.0, %v7195_v63 }
 0x9e4   : > { %v12134_v2 = vpop.eup %12133  ;;  %v7440_v58 = vpack.c.bf16 %v16315_v0, %v16312_v21  ;;  %12159 = vpow2.f32 %v7309_v40  ;;  %v7291_v26 = vmul.f32 1.442695, %v7244_v32  ;;  %v7330_v57 = vadd.f32 1.0, %v16303_v9  ;;  %v8193_v21 = vld [vmem:[#allocation2 + $0xec] sm:$0xf] }
 0x9e5   : > { %v16319_v36 = vpop.eup %12135  ;;  %12161 = vpow2.f32 %v7311_v37  ;;  %v16324_v59 = vmul.f32 %v12134_v2, %v16202_v35  ;;  %v7323_v22 = vmul.f32 1.442695, %v7260_v42 }
 0x9e6   : > { %v12138_v45 = vpop.eup %12137  ;;  %12163 = vpow2.f32 %v7307_v61 }
 0x9e7   : > { %v12140_v8 = vpop.eup %12139  ;;  %v16327_v62 = vmul.f32 %v12138_v45, %v16212_v52  ;;  %12165 = vpow2.f32 %v7317_v33 }
 0x9e8   : > { %v12142_v7 = vpop.eup %12141  ;;  %v7341_v3 = vadd.f32 1.0, %v12140_v8  ;;  %12167 = vpow2.f32 %v7313_v43 }
 0x9e9   : > { %v12144_v31 = vpop.eup %12143  ;;  %v7442_v15 = vpack.c.bf16 %v16327_v62, %v16324_v59  ;;  %12169 = vpow2.f32 %v7319_v38  ;;  %v16332_v35 = vmul.f32 %v12142_v7, %v16208_v18  ;;  %v18509_v62 = vmov 0  }
 0x9ea   : > { %v12146_v40 = vpop.eup %12145  ;;  %12171 = vpow2.f32 %v7315_v55 }
 0x9eb   : > { %v16335_v52 = vmul.f32 %v12146_v40, %v16217_v46  ;;  %v12148_v37 = vpop.eup %12147  ;;  %12173 = vpow2.f32 %v7321_v30  ;;  %v7334_v46 = vadd.f32 1.0, %v12132_v44 }
 0x9ec   : > { %v12150_v28 = vpop.eup %12149  ;;  %v7343_v14 = vadd.f32 1.0, %v12148_v37  ;;  %12175 = vrcp.f32 %v7341_v3 }
 0x9ed   : > { %v7444_v2 = vpack.c.bf16 %v16335_v52, %v16332_v35  ;;  %v7345_v61 = vadd.f32 1.0, %v12150_v28  ;;  %v12152_v33 = vpop.eup %12151  ;;  %12177 = vpow2.f32 %v7291_v26  ;;  %v7338_v26 = vadd.f32 1.0, %v12144_v31  ;;  %v8189_v35 = vld [vmem:[#allocation2 + $0xac] sm:$0xf]  ;;  %v8432_v52 = vld [vmem:[#allocation2 + $0xdc] sm:$0xf] }
 0x9ee   : > { %v12154_v18 = vpop.eup %12153  ;;  %v7342_v43 = vadd.f32 1.0, %v12152_v33 }
 0x9ef   : > { %12179 = vrcp.f32 %v7345_v61  ;;  %v12156_v45 = vpop.eup %12155  ;;  %v7346_v38 = vadd.f32 1.0, %v12154_v18 }
 0x9f0   : > { %12181 = vrcp.f32 %v7343_v14  ;;  %v12158_v32 = vpop.eup %12157  ;;  %v7347_v63 = vadd.f32 1.0, %v12156_v45 }
 0x9f1   : > { %12183 = vpow2.f32 %v7323_v22  ;;  %v12160_v8 = vpop.eup %12159  ;;  %v7344_v28 = vadd.f32 1.0, %v12158_v32 }
 0x9f2   : > { %12185 = vrcp.f32 %v7330_v57  ;;  %v12162_v7 = vpop.eup %12161  ;;  %v7349_v9 = vadd.f32 1.0, %v12160_v8 }
 0x9f3   : > { %12187 = vrcp.f32 %v7347_v63  ;;  %v12164_v55 = vpop.eup %12163  ;;  %v7350_v30 = vadd.f32 1.0, %v12162_v7 }
 0x9f4   : > { %12189 = vrcp.f32 %v7334_v46  ;;  %v12166_v40 = vpop.eup %12165  ;;  %v7348_v22 = vadd.f32 1.0, %v12164_v55 }
 0x9f5   : > { %12191 = vrcp.f32 %v7342_v43  ;;  %v12168_v3 = vpop.eup %12167  ;;  %v7353_v42 = vadd.f32 1.0, %v12166_v40 }
 0x9f6   : > { %12193 = vrcp.f32 %v7346_v38  ;;  %v12170_v44 = vpop.eup %12169  ;;  %v7351_v43 = vadd.f32 1.0, %v12168_v3  ;;  %v7326_v38 = vadd.f32 1.0, %v16289_v10 }
 0x9f7   : > { %12195 = vrcp.f32 %v7350_v30  ;;  %v12172_v37 = vpop.eup %12171  ;;  %v7354_v14 = vadd.f32 1.0, %v12170_v44 }
 0x9f8   : > { %12197 = vrcp.f32 %v7353_v42  ;;  %v12174_v61 = vpop.eup %12173  ;;  %v7352_v45 = vadd.f32 1.0, %v12172_v37 }
 0x9f9   : > { %12199 = vrcp.f32 %v7349_v9  ;;  %v12176_v33 = vpop.eup %12175  ;;  %v7355_v57 = vadd.f32 1.0, %v12174_v61 }
 0x9fa   : > { %12201 = vrcp.f32 %v7354_v14  ;;  %v12178_v18 = vpop.eup %12177  ;;  %v16341_v31 = vmul.f32 %v12176_v33, %v16220_v6  ;;  %v7135_v6 = vadd.f32 %v16154_v19, %v16147_v53 }
 0x9fb   : > { %12203 = vrcp.f32 %v7338_v26  ;;  %v7340_v55 = vadd.f32 1.0, %v12178_v18  ;;  %v7131_v26 = vadd.f32 %v16149_v27, %v16145_v23  ;;  %v7121_v23 = vadd.f32 %v16139_v56, %v16151_v5 }
 0x9fc   : > { %v12180_v46 = vpop.eup %12179  ;;  %12205 = vrcp.f32 %v7344_v28  ;;  %v7332_v28 = vadd.f32 1.0, %v16309_v4 }
 0x9fd   : > { %v12182_v63 = vpop.eup %12181  ;;  %12207 = vrcp.f32 %v7348_v22  ;;  %v16344_v32 = vmul.f32 %v12180_v46, %v16233_v11  ;;  %v7336_v11 = vadd.f32 1.0, %v16319_v36 }
 0x9fe   : > { %v12184_v8 = vpop.eup %12183  ;;  %12209 = vrcp.f32 %v7355_v57  ;;  %v16355_v10 = vmul.f32 %v12182_v63, %v16230_v48  ;;  %v7125_v48 = vadd.f32 %v16143_v60, %v16156_v54 }
 0x9ff   : > { %v16347_v7 = vpop.eup %12185  ;;  %12211 = vrcp.f32 %v7352_v45  ;;  %v7356_v30 = vadd.f32 1.0, %v12184_v8  ;;  %v7446_v40 = vpack.c.bf16 %v16344_v32, %v16341_v31 }
 0xa00   : > { %v12188_v9 = vpop.eup %12187  ;;  %12213 = vrcp.f32 %v7351_v43 }
 0xa01   : > { %v12190_v3 = vpop.eup %12189  ;;  %12215 = vrcp.f32 %v7356_v30  ;;  %v16358_v42 = vmul.f32 %v12188_v9, %v16251_v50  ;;  %v7328_v50 = vadd.f32 1.0, %v16293_v16  ;;  %v18505_v9 = vld [vmem:[#allocation111_spill] sm:$0xff] }
 0xa02   : > { %v12192_v44 = vpop.eup %12191  ;;  %12217 = vrcp.f32 %v7326_v38  ;;  %v18504_v38 = vld [vmem:[#allocation110_spill] sm:$0xff] }
 0xa03   : > { %v12194_v37 = vpop.eup %12193  ;;  %12219 = vrcp.f32 %v7340_v55  ;;  %v7448_v19 = vpack.c.bf16 %v16358_v42, %v16355_v10  ;;  %v7406_v45 = vmul.f32 %v12192_v44, %v16225_v12  ;;  %v8434_v10 = vld [vmem:[#allocation2 + $0xfc] sm:$0xf] }
 0xa04   : > { %v12196_v53 = vpop.eup %12195  ;;  %12221 = vtanh.f32 %v7135_v6  ;;  %v7410_v60 = vmul.f32 %v12194_v37, %v16245_v20  ;;  %v11486_v42 = vpack.i.bf16 %v8434_v10, %v8432_v52 }
 0xa05   : > { %v12198_v36 = vpop.eup %12197  ;;  %12223 = vrcp.f32 %v7336_v11  ;;  %v7414_v22 = vmul.f32 %v12196_v53, %v16261_v39 }
 0xa06   : > { %v12200_v14 = vpop.eup %12199  ;;  %12225 = vtanh.f32 %v7131_v26  ;;  %v7417_v4 = vmul.f32 %v12198_v36, %v16267_v29  ;;  %v7447_v46 = vpack.c.bf16 %v7410_v60, %v7406_v45  ;;  %11487 = vrot.lane.b32.xlu0 %v11486_v42, %s12574_s27  ;;  %v11622_v60 = vld [vmem:[%s18116_s6 + $0xb8] sm:$0xff]  }
 0xa07   : > { %v12202_v27 = vpop.eup %12201  ;;  %12227 = vrcp.f32 %v7332_v28  ;;  %v7413_v16 = vmul.f32 %v12200_v14, %v16255_v25  ;;  %v7398_v25 = vmul.f32 %v12190_v3, %v16204_v51  ;;  %v18507_v28 = vld [vmem:[#allocation109_spill] sm:$0xff] }
 0xa08   : > { %v12204_v61 = vpop.eup %12203  ;;  %12229 = vtanh.f32 %v7125_v48  ;;  %v7418_v54 = vmul.f32 %v12202_v27, %v16274_v34 }
 0xa09   : > { %v12206_v33 = vpop.eup %12205  ;;  %12231 = vrcp.f32 %v7328_v50  ;;  %v7450_v56 = vpack.c.bf16 %v7417_v4, %v7413_v16  ;;  %v7402_v39 = vmul.f32 %v12204_v61, %v16215_v1  ;;  %v18506_v1 = vld [vmem:[#allocation108_spill] sm:$0xff]  ;;  %v16464_v16 = vpop.permute.xlu1 %7508 }
 0xa0a   : > { %v12208_v57 = vpop.eup %12207  ;;  %v7451_v18 = vpack.c.bf16 %v7418_v54, %v7414_v22  ;;  %12233 = vtanh.f32 %v7121_v23  ;;  %v7394_v44 = vmul.f32 %v16347_v7, %v18506_v1  ;;  %v11615_v4 = vld [vmem:[%s18116_s6 + $0x80] sm:$0xff]   ;;  %v11620_v22 = vld [vmem:[%s18116_s6 + $0xa8] sm:$0xff]   ;;  %v11621_v54 = vld [vmem:[%s18116_s6 + $0xb0] sm:$0xff]  }
 0xa0b   : > { %v12210_v5 = vpop.eup %12209  ;;  %v7412_v55 = vmul.f32 %v12208_v57, %v18504_v38  ;;  %v7443_v11 = vpack.c.bf16 %v7402_v39, %v7398_v25 }
 0xa0c   : > { %v12212_v29 = vpop.eup %12211  ;;  %7623 = vmatprep.subr.bf16.mxu0 %v7451_v18  ;;  %v7419_v20 = vmul.f32 %v12210_v5, %v16277_v49  ;;  %v7408_v49 = vmul.f32 %v12206_v33, %v18507_v28  ;;  %v16462_v33 = vpop.permute.xlu0 %7503 }
 0xa0d   : > { %v12214_v43 = vpop.eup %12213  ;;  %7624 = vmatpush1.bf16.msra.mxu0 %v7450_v56  ;;  %v7416_v8 = vmul.f32 %v12212_v29, %v16269_v17  ;;  %v16468_v18 = vpop.permute.xlu1 %7498 }
 0xa0e   : > { %v12216_v34 = vpop.eup %12215  ;;  %7625 = vmatprep.subr.bf16.mxu0 %v7447_v46  ;;  %v7415_v6 = vmul.f32 %v12214_v43, %v18505_v9  ;;  %v7449_v48 = vpack.c.bf16 %v7412_v55, %v7408_v49  ;;  %v18510_v43 = vld [vmem:[#allocation78_spill] sm:$0xff] }
 0xa0f   : > { %v12218_v63 = vpop.eup %12217  ;;  %v7420_v12 = vmul.f32 %v12216_v34, %v16279_v24  ;;  %v18508_v24 = vld [vmem:[#allocation107_spill] sm:$0xff] }
 0xa10   : > { %v12220_v30 = vpop.eup %12219  ;;  %v7452_v17 = vpack.c.bf16 %v7419_v20, %v7415_v6  ;;  %v7390_v3 = vmul.f32 %v12218_v63, %v18508_v24  ;;  %v16466_v57 = vpop.permute.xlu0 %7493 }
 0xa11   : > { %v12222_v26 = vpop.eup %12221  ;;  %v7453_v37 = vpack.c.bf16 %v7420_v12, %v7416_v8  ;;  %7626 = vmatpush1.bf16.msra.mxu0 %v7446_v40  ;;  %v16472_v5 = vpop.permute.xlu1 %7488  ;;  %v18511_v8 = vld [vmem:[#allocation79_spill] sm:$0xff] }
 0xa12   : > { %v12224_v51 = vpop.eup %12223  ;;  %7627 = vmatprep.subr.bf16.mxu0 %v7443_v11  ;;  %v7404_v36 = vmul.f32 %v12222_v26, %v12220_v30  ;;  %v7439_v7 = vpack.c.bf16 %v7394_v44, %v7390_v3  ;;  %v18512_v11 = vld [vmem:[#allocation76_spill] sm:$0xff]  ;;  %v18514_v3 = vld [vmem:[#allocation75_spill] sm:$0xff] }
 0xa13   : > { %v12226_v53 = vpop.eup %12225  ;;  %7736 = vmatprep.subr.bf16.mxu1 %v7453_v37 }
 0xa14   : > { %v12228_v50 = vpop.eup %12227  ;;  %7737 = vmatpush1.bf16.msra.mxu1 %v7452_v17  ;;  %v7400_v27 = vmul.f32 %v12226_v53, %v12224_v51  ;;  %v16470_v45 = vpop.permute.xlu0 %7483  ;;  %v18513_v51 = vld [vmem:[#allocation77_spill] sm:$0xff] }
 0xa15   : > { %v12230_v14 = vpop.eup %12229  ;;  %7738 = vmatprep.subr.bf16.mxu1 %v7449_v48  ;;  %7628 = vmatpush1.bf16.msra.mxu0 %v7442_v15  ;;  %v11616_v15 = vld [vmem:[%s18116_s6 + $0x88] sm:$0xff]   ;;  %v7479_v25 = vpop.permute.xlu1 %7478 }
 0xa16   : > { %v12232_v31 = vpop.eup %12231  ;;  %7629 = vmatprep.subr.bf16.mxu0 %v7439_v7  ;;  %v7445_v32 = vpack.c.bf16 %v7404_v36, %v7400_v27  ;;  %v7396_v40 = vmul.f32 %v12230_v14, %v12228_v50  ;;  %v18515_v27 = vld [vmem:[#allocation49_spill] sm:$0xff] }
 0xa17   : > { %v12234_v23 = vpop.eup %12233 }
 0xa18   : > { %7739 = vmatpush1.bf16.msra.mxu1 %v7448_v19  ;;  %v7392_v61 = vmul.f32 %v12234_v23, %v12232_v31  ;;  %v11619_v19 = vld [vmem:[%s18116_s6 + $0xa0] sm:$0xff]   ;;  %v7474_v56 = vpop.permute.xlu0 %7473 }
 0xa19   : > { %7740 = vmatprep.subr.bf16.mxu1 %v7445_v32  ;;  %7630 = vmatpush1.bf16.msra.mxu0 %v7438_v13  ;;  %v8191_v13 = vld [vmem:[#allocation2 + $0xcc] sm:$0xf] }
 0xa1a   : > { %v7441_v59 = vpack.c.bf16 %v7396_v40, %v7392_v61  ;;  %v11481_v0 = vpack.i.bf16 %v8193_v21, %v8191_v13  ;;  %v18516_v40 = vld [vmem:[#allocation48_spill] sm:$0xff] }
 0xa1c   : > { %7741 = vmatpush1.bf16.msra.mxu1 %v7444_v2  ;;  %11006 = vmatmul.mubr.msk.bf16.vlgmr.msra.gmra.mxu0 %vm3426_vm12, %v11615_v4 }
 0xa1d   : > { %7742 = vmatprep.subr.bf16.mxu1 %v7441_v59  ;;  %7657 = vmatprep.mubr.bf16.mxu0 %v18509_v62 }
 0xa1e   : > { %11482 = vrot.lane.b32.xlu1 %v11481_v0, %s12574_s27 }
 0xa20   : > { %7743 = vmatpush1.bf16.msra.mxu1 %v7440_v58  ;;  %v8187_v58 = vld [vmem:[#allocation2 + $0x8c] sm:$0xf] }
 0xa21   : > { %v11491_v2 = vpack.i.bf16 %v8189_v35, %v8187_v58  ;;  %v18518_v58 = vld [vmem:[#allocation47_spill] sm:$0xff] }
 0xa23   : > { %11014 = vmatmul.mubr.msk.bf16.vlgmr.msra.gmra.mxu1 %vm3426_vm12, %v11615_v4  ;;  %11492 = vrot.lane.b32.xlu1 %v11491_v2, %s12574_s27 }
 0xa24   : > { %11007 = vmatmul.mubr.msk.bf16.gmra.mxu0 %vm3426_vm12, %v11616_v15  ;;  %7770 = vmatprep.mubr.bf16.mxu1 %v18509_v62 }
 0xa25   : > { %7667 = vmatprep.mubr.bf16.mxu0 %v18509_v62 }
 0xa2b   : > { %11015 = vmatmul.mubr.msk.bf16.gmra.mxu1 %vm3426_vm12, %v11616_v15 }
 0xa2c   : > { %11008 = vmatmul.mubr.msk.bf16.gmra.mxu0 %vm3426_vm12, %v11617_v41  ;;  %7780 = vmatprep.mubr.bf16.mxu1 %v18509_v62 }
 0xa2d   : > { %7677 = vmatprep.mubr.bf16.mxu0 %v18509_v62 }
 0xa33   : > { %11016 = vmatmul.mubr.msk.bf16.gmra.mxu1 %vm3426_vm12, %v11617_v41  ;;  %v18517_v41 = vld [vmem:[#allocation46_spill] sm:$0xff] }
 0xa34   : > { %11009 = vmatmul.mubr.msk.bf16.gmra.mxu0 %vm3426_vm12, %v11618_v47  ;;  %7790 = vmatprep.mubr.bf16.mxu1 %v18509_v62 }
 0xa35   : > { %7687 = vmatprep.mubr.bf16.mxu0 %v18509_v62 }
 0xa3b   : > { %11017 = vmatmul.mubr.msk.bf16.gmra.mxu1 %vm3426_vm12, %v11618_v47 }
 0xa3c   : > { %7800 = vmatprep.mubr.bf16.mxu1 %v18509_v62  ;;  %11010 = vmatmul.mubr.msk.bf16.gmra.mxu0 %vm3426_vm12, %v11619_v19 }
 0xa3d   : > { %7697 = vmatprep.mubr.bf16.mxu0 %v18509_v62 }
 0xa43   : > { %11018 = vmatmul.mubr.msk.bf16.gmra.mxu1 %vm3426_vm12, %v11619_v19 }
 0xa44   : > { %7810 = vmatprep.mubr.bf16.mxu1 %v18509_v62  ;;  %11011 = vmatmul.mubr.msk.bf16.gmra.mxu0 %vm3426_vm12, %v11620_v22 }
 0xa45   : > { %7707 = vmatprep.mubr.bf16.mxu0 %v18509_v62 }
 0xa4b   : > { %11019 = vmatmul.mubr.msk.bf16.gmra.mxu1 %vm3426_vm12, %v11620_v22  ;;  %v18519_v22 = vld [vmem:[#allocation43_spill] sm:$0xff] }
 0xa4c   : > { %7820 = vmatprep.mubr.bf16.mxu1 %v18509_v62  ;;  %11012 = vmatmul.mubr.msk.bf16.gmra.mxu0 %vm3426_vm12, %v11621_v54 }
 0xa4d   : > { %7717 = vmatprep.mubr.bf16.mxu0 %v18509_v62 }
 0xa53   : > { %11020 = vmatmul.mubr.msk.bf16.gmra.mxu1 %vm3426_vm12, %v11621_v54 }
 0xa54   : > { %7830 = vmatprep.mubr.bf16.mxu1 %v18509_v62  ;;  %11013 = vmatmul.mubr.msk.bf16.gmra.mxu0 %vm3426_vm12, %v11622_v60 }
 0xa5b   : > { %11021 = vmatmul.mubr.msk.bf16.gmra.mxu1 %vm3426_vm12, %v11622_v60 }
 0xadc   : > { %v7649_v29 = vpop.f32.mrf.mxu0 }
 0xadd   : > { %v7650_v46 = vadd.f32 %v7649_v29, %v7474_v56  ;;  %v18520_v29 = vld [vmem:[#allocation44_spill] sm:$0xff] }
 0xade   : > { %v7651_v39 = vpop.f32.mrf.mxu0 }
 0xadf   : > { %v7841_v34 = vadd.f32 %v7650_v46, %v18510_v43  ;;  %v7652_v20 = vadd.f32 %v7651_v39, %v7474_v56 }
 0xae0   : > { %v7653_v63 = vpop.f32.mrf.mxu0 }
 0xae1   : > { %v7842_v12 = vadd.f32 %v7652_v20, %v18511_v8  ;;  %v7654_v38 = vadd.f32 %v7653_v63, %v7479_v25  ;;  %v16476_v30 = vmul.f32 0.70710677, %v7841_v34  ;;  %v18521_v63 = vld [vmem:[#allocation45_spill] sm:$0xff] }
 0xae2   : > { %v7655_v55 = vpop.f32.mrf.mxu0 }
 0xae3   : > { %v16478_v9 = vmul.f32 0.70710677, %v7842_v12  ;;  %v7762_v6 = vpop.f32.mrf.mxu1  ;;  %v7845_v1 = vadd.f32 %v7654_v38, %v18512_v11  ;;  %v7656_v44 = vadd.f32 %v7655_v55, %v7479_v25  ;;  %v18522_v55 = vld [vmem:[#allocation35_spill] sm:$0xff] }
 0xae4   : > { %v7763_v26 = vadd.f32 %v7762_v6, %v7474_v56  ;;  %v7659_v37 = vpop.f32.mrf.mxu0 }
 0xae5   : > { %v16483_v28 = vpack.c.bf16 %v16478_v9, %v16476_v30  ;;  %v7764_v49 = vpop.f32.mrf.mxu1  ;;  %v7846_v17 = vadd.f32 %v7656_v44, %v18513_v51  ;;  %v7660_v24 = vadd.f32 %v7659_v37, %v16470_v45  ;;  %v16489_v50 = vmul.f32 0.70710677, %v7845_v1 }
 0xae6   : > { %v7843_v53 = vadd.f32 %v7763_v26, %v18514_v3  ;;  %v7765_v48 = vadd.f32 %v7764_v49, %v7474_v56  ;;  %v7661_v36 = vpop.f32.mrf.mxu0 }
 0xae7   : > { %7993 = vst [vmem:[#allocation2 + $0x4] sm:$0xff] %v16483_v28  ;;  %v16491_v7 = vmul.f32 0.70710677, %v7846_v17  ;;  %v7766_v14 = vpop.f32.mrf.mxu1  ;;  %v7849_v31 = vadd.f32 %v7660_v24, %v18515_v27  ;;  %v7662_v32 = vadd.f32 %v7661_v36, %v16470_v45  ;;  %v18523_v17 = vld [vmem:[#allocation38_spill] sm:$0xff] }
 0xae8   : > { %v7844_v23 = vadd.f32 %v7765_v48, %v18516_v40  ;;  %v7767_v4 = vadd.f32 %v7766_v14, %v7479_v25  ;;  %v7663_v61 = vpop.f32.mrf.mxu0  ;;  %v16502_v21 = vmul.f32 0.70710677, %v7843_v53  ;;  %v18524_v53 = vld [vmem:[#allocation36_spill] sm:$0xff] }
 0xae9   : > { %v16498_v59 = vpack.c.bf16 %v16491_v7, %v16489_v50  ;;  %v7768_v15 = vpop.f32.mrf.mxu1  ;;  %v7850_v47 = vadd.f32 %v7662_v32, %v18517_v41  ;;  %v7664_v13 = vadd.f32 %v7663_v61, %v16472_v5  ;;  %v16508_v10 = vmul.f32 0.70710677, %v7849_v31  ;;  %v18525_v32 = vld [vmem:[#allocation37_spill] sm:$0xff] }
 0xaea   : > { %v16504_v0 = vmul.f32 0.70710677, %v7844_v23  ;;  %v7847_v35 = vadd.f32 %v7767_v4, %v18518_v58  ;;  %v7769_v52 = vadd.f32 %v7768_v15, %v7479_v25  ;;  %v7665_v2 = vpop.f32.mrf.mxu0  ;;  %v18526_v15 = vld [vmem:[#allocation39_spill] sm:$0xff] }
 0xaeb   : > { %7994 = vst [vmem:[#allocation2 + $0x24] sm:$0xff] %v16498_v59  ;;  %v16510_v42 = vmul.f32 0.70710677, %v7850_v47  ;;  %v7772_v19 = vpop.f32.mrf.mxu1  ;;  %v7853_v54 = vadd.f32 %v7664_v13, %v18519_v22  ;;  %v7666_v60 = vadd.f32 %v7665_v2, %v16472_v5  ;;  %v18527_v2 = vld [vmem:[#allocation28_spill] sm:$0xff] }
 0xaec   : > { %v16516_v56 = vpack.c.bf16 %v16504_v0, %v16502_v21  ;;  %v7848_v46 = vadd.f32 %v7769_v52, %v18520_v29  ;;  %v7773_v39 = vadd.f32 %v7772_v19, %v16470_v45  ;;  %v7669_v43 = vpop.f32.mrf.mxu0  ;;  %v16520_v34 = vmul.f32 0.70710677, %v7847_v35 }
 0xaed   : > { %v16524_v20 = vpack.c.bf16 %v16510_v42, %v16508_v10  ;;  %v7774_v25 = vpop.f32.mrf.mxu1  ;;  %v7854_v8 = vadd.f32 %v7666_v60, %v18521_v63  ;;  %v7670_v12 = vadd.f32 %v7669_v43, %v16466_v57  ;;  %v16534_v37 = vmul.f32 0.70710677, %v7853_v54  ;;  %v18528_v60 = vld [vmem:[#allocation27_spill] sm:$0xff] }
 0xaee   : > { %8041 = vst [vmem:[#allocation2 + $0x14] sm:$0xff] %v16516_v56  ;;  %v16529_v38 = vmul.f32 0.70710677, %v7848_v46  ;;  %v7851_v6 = vadd.f32 %v7773_v39, %v18522_v55  ;;  %v7775_v11 = vadd.f32 %v7774_v25, %v16470_v45  ;;  %v7671_v1 = vpop.f32.mrf.mxu0  ;;  %v8050_v44 = vld [vmem:[#allocation2 + $0x8] sm:$0xf]  ;;  %v8049_v26 = vld [vmem:[#allocation2] sm:$0xff] }
 0xaef   : > { %7995 = vst [vmem:[#allocation2 + $0x44] sm:$0xff] %v16524_v20  ;;  %v16536_v49 = vmul.f32 0.70710677, %v7854_v8  ;;  %v7776_v51 = vpop.f32.mrf.mxu1  ;;  %v7857_v24 = vadd.f32 %v7670_v12, %v18523_v17  ;;  %v7672_v3 = vadd.f32 %v7671_v1, %v16466_v57  ;;  %8083 = vrot.lane.b32.xlu1 %v8050_v44, %s12575_s29  ;;  %8081 = vrot.lane.b32.xlu0 %v8049_v26, %s12575_s29  ;;  %v18529_v25 = vld [vmem:[#allocation40_spill] sm:$0xff]  ;;  %v18530_v1 = vld [vmem:[#allocation41_spill] sm:$0xff] }
 0xaf0   : > { %v16544_v45 = vpack.c.bf16 %v16529_v38, %v16520_v34  ;;  %v7852_v48 = vadd.f32 %v7775_v11, %v18524_v53  ;;  %v7777_v36 = vadd.f32 %v7776_v51, %v16472_v5  ;;  %v7673_v14 = vpop.f32.mrf.mxu0  ;;  %v16555_v4 = vmul.f32 0.70710677, %v7851_v6  ;;  %v18531_v53 = vld [vmem:[#allocation30_spill] sm:$0xff] }
 0xaf1   : > { %v16550_v27 = vpack.c.bf16 %v16536_v49, %v16534_v37  ;;  %v7778_v31 = vpop.f32.mrf.mxu1  ;;  %v7858_v40 = vadd.f32 %v7672_v3, %v18525_v32  ;;  %v7674_v23 = vadd.f32 %v7673_v14, %v16468_v18  ;;  %v16562_v58 = vmul.f32 0.70710677, %v7857_v24 }
 0xaf2   : > { %8042 = vst [vmem:[#allocation2 + $0x34] sm:$0xff] %v16544_v45  ;;  %v16557_v61 = vmul.f32 0.70710677, %v7852_v48  ;;  %v7855_v41 = vadd.f32 %v7777_v36, %v18526_v15  ;;  %v7779_v47 = vadd.f32 %v7778_v31, %v16472_v5  ;;  %v7675_v13 = vpop.f32.mrf.mxu0 }
 0xaf3   : > { %7996 = vst [vmem:[#allocation2 + $0x64] sm:$0xff] %v16550_v27  ;;  %v16564_v35 = vmul.f32 0.70710677, %v7858_v40  ;;  %v7782_v52 = vpop.f32.mrf.mxu1  ;;  %v7861_v19 = vadd.f32 %v7674_v23, %v18527_v2  ;;  %v7676_v22 = vadd.f32 %v7675_v13, %v16468_v18  ;;  %v8052_v13 = vld [vmem:[#allocation2 + $0x28] sm:$0xf] }
 0xaf4   : > { %v16570_v54 = vpack.c.bf16 %v16557_v61, %v16555_v4  ;;  %v7856_v29 = vadd.f32 %v7779_v47, %v18528_v60  ;;  %v7783_v5 = vadd.f32 %v7782_v52, %v16466_v57  ;;  %v7679_v46 = vpop.f32.mrf.mxu0  ;;  %v16581_v6 = vmul.f32 0.70710677, %v7855_v41  ;;  %v18533_v41 = vld [vmem:[#allocation42_spill] sm:$0xff]  ;;  %v8051_v52 = vld [vmem:[#allocation2 + $0x20] sm:$0xff] }
 0xaf5   : > { %v16576_v39 = vpack.c.bf16 %v16564_v35, %v16562_v58  ;;  %v7784_v43 = vpop.f32.mrf.mxu1  ;;  %v7862_v63 = vadd.f32 %v7676_v22, %v18529_v25  ;;  %v8292_v8 = vld [vmem:[#allocation2 + $0x18] sm:$0xf]  ;;  %v8291_v12 = vld [vmem:[#allocation2 + $0x10] sm:$0xff]  ;;  %v7680_v55 = vadd.f32 %v7679_v46, %v16462_v33  ;;  %v16590_v17 = vmul.f32 0.70710677, %v7861_v19 }
 0xaf6   : > { %8043 = vst [vmem:[#allocation2 + $0x54] sm:$0xff] %v16570_v54  ;;  %v16583_v11 = vmul.f32 0.70710677, %v7856_v29  ;;  %v7859_v44 = vadd.f32 %v7783_v5, %v18530_v1  ;;  %v7785_v26 = vadd.f32 %v7784_v43, %v16466_v57  ;;  %8325 = vrot.lane.b32.xlu1 %v8292_v8, %s12575_s29  ;;  %8323 = vrot.lane.b32.xlu0 %v8291_v12, %s12575_s29  ;;  %v7681_v51 = vpop.f32.mrf.mxu0  ;;  %v18532_v57 = vld [vmem:[#allocation29_spill] sm:$0xff]  ;;  %v18534_v60 = vld [vmem:[#allocation31_spill] sm:$0xff]  ;;  %v18535_v8 = vld [vmem:[#allocation20_spill] sm:$0xff] }
 0xaf7   : > { %7997 = vst [vmem:[#allocation2 + $0x84] sm:$0xff] %v16576_v39  ;;  %v16592_v24 = vmul.f32 0.70710677, %v7862_v63  ;;  %v7786_v3 = vpop.f32.mrf.mxu1  ;;  %v7865_v48 = vadd.f32 %v7680_v55, %v18531_v53  ;;  %v7682_v36 = vadd.f32 %v7681_v51, %v16462_v33  ;;  %v18537_v53 = vld [vmem:[#allocation32_spill] sm:$0xff] }
 0xaf8   : > { %v16598_v14 = vpack.c.bf16 %v16583_v11, %v16581_v6  ;;  %v7860_v31 = vadd.f32 %v7785_v26, %v18532_v57  ;;  %v7787_v32 = vadd.f32 %v7786_v3, %v16468_v18  ;;  %v7683_v40 = vpop.f32.mrf.mxu0  ;;  %v16609_v19 = vmul.f32 0.70710677, %v7859_v44  ;;  %v18536_v44 = vld [vmem:[#allocation19_spill] sm:$0xff] }
 0xaf9   : > { %v16604_v23 = vpack.c.bf16 %v16592_v24, %v16590_v17  ;;  %v7788_v15 = vpop.f32.mrf.mxu1  ;;  %v7866_v47 = vadd.f32 %v7682_v36, %v18533_v41  ;;  %v7684_v2 = vadd.f32 %v7683_v40, %v16464_v16  ;;  %v7897_v43 = vmul.f32 0.70710677, %v7865_v48  ;;  %v8294_v48 = vld [vmem:[#allocation2 + $0x38] sm:$0xf]  ;;  %v8293_v57 = vld [vmem:[#allocation2 + $0x30] sm:$0xff] }
 0xafa   : > { %8044 = vst [vmem:[#allocation2 + $0x74] sm:$0xff] %v16598_v14  ;;  %v16611_v22 = vmul.f32 0.70710677, %v7860_v31  ;;  %v7863_v29 = vadd.f32 %v7787_v32, %v18534_v60  ;;  %v7789_v5 = vadd.f32 %v7788_v15, %v16468_v18  ;;  %8087 = vrot.lane.b32.xlu1 %v8052_v13, %s12575_s29  ;;  %8085 = vrot.lane.b32.xlu0 %v8051_v52, %s12575_s29  ;;  %v7685_v46 = vpop.f32.mrf.mxu0  ;;  %v18538_v40 = vld [vmem:[#allocation33_spill] sm:$0xff] }
 0xafb   : > { %7998 = vst [vmem:[#allocation2 + $0xa4] sm:$0xff] %v16604_v23  ;;  %v7898_v25 = vmul.f32 0.70710677, %v7866_v47  ;;  %v7792_v63 = vpop.f32.mrf.mxu1  ;;  %v7869_v12 = vadd.f32 %v7684_v2, %v18535_v8  ;;  %v7686_v55 = vadd.f32 %v7685_v46, %v16464_v16  ;;  %v18539_v60 = vld [vmem:[#allocation21_spill] sm:$0xff]  ;;  %v8053_v8 = vld [vmem:[#allocation2 + $0x40] sm:$0xff] }
 0xafc   : > { %v16622_v1 = vpack.c.bf16 %v16611_v22, %v16609_v19  ;;  %v7864_v18 = vadd.f32 %v7789_v5, %v18536_v44  ;;  %v7793_v26 = vadd.f32 %v7792_v63, %v16462_v33  ;;  %v16630_v31 = vmul.f32 0.70710677, %v7863_v29 }
 0xafd   : > { %v16626_v51 = vpack.c.bf16 %v7898_v25, %v7897_v43  ;;  %v7794_v3 = vpop.f32.mrf.mxu1  ;;  %v7870_v36 = vadd.f32 %v7686_v55, %v18537_v53  ;;  %v7901_v47 = vmul.f32 0.70710677, %v7869_v12 }
 0xafe   : > { %8045 = vst [vmem:[#allocation2 + $0x94] sm:$0xff] %v16622_v1  ;;  %v7896_v32 = vmul.f32 0.70710677, %v7864_v18  ;;  %v7867_v15 = vadd.f32 %v7793_v26, %v18538_v40  ;;  %v7795_v41 = vadd.f32 %v7794_v3, %v16462_v33  ;;  %8329 = vrot.lane.b32.xlu1 %v8294_v48, %s12575_s29  ;;  %8327 = vrot.lane.b32.xlu0 %v8293_v57, %s12575_s29  ;;  %v8054_v33 = vld [vmem:[#allocation2 + $0x48] sm:$0xf]  ;;  %v18540_v18 = vld [vmem:[#allocation22_spill] sm:$0xff] }
 0xaff   : > { %7999 = vst [vmem:[#allocation2 + $0xc4] sm:$0xff] %v16626_v51  ;;  %v7902_v13 = vmul.f32 0.70710677, %v7870_v36  ;;  %v7796_v52 = vpop.f32.mrf.mxu1  ;;  %v12487_v3 = vpack.c.bf16 %v7901_v47, %v7897_v43  ;;  %v18541_v48 = vld [vmem:[#allocation34_spill] sm:$0xff] }
 0xb00   : > { %v16638_v2 = vpack.c.bf16 %v7896_v32, %v16630_v31  ;;  %v7868_v29 = vadd.f32 %v7795_v41, %v18539_v60  ;;  %v7797_v5 = vadd.f32 %v7796_v52, %v16464_v16  ;;  %v7899_v55 = vmul.f32 0.70710677, %v7867_v15  ;;  %v8296_v40 = vld [vmem:[#allocation2 + $0x58] sm:$0xf]  ;;  %v8295_v41 = vld [vmem:[#allocation2 + $0x50] sm:$0xff] }
 0xb01   : > { %v16642_v46 = vpack.c.bf16 %v7902_v13, %v7901_v47  ;;  %v7798_v63 = vpop.f32.mrf.mxu1  ;;  %v12488_v53 = vpack.c.bf16 %v7902_v13, %v7898_v25  ;;  %v8056_v25 = vld [vmem:[#allocation2 + $0x68] sm:$0xf]  ;;  %v8055_v47 = vld [vmem:[#allocation2 + $0x60] sm:$0xff]  ;;  %v12490_v13 = vpack.c.bf16 %v16590_v17, %v16562_v58  ;;  %v12495_v58 = vpack.c.bf16 %v16534_v37, %v16508_v10 }
 0xb02   : > { %8046 = vst [vmem:[#allocation2 + $0xb4] sm:$0xff] %v16638_v2  ;;  %v7900_v44 = vmul.f32 0.70710677, %v7868_v29  ;;  %v7871_v12 = vadd.f32 %v7797_v5, %v18540_v18  ;;  %v7799_v26 = vadd.f32 %v7798_v63, %v16464_v16  ;;  %8091 = vrot.lane.b32.xlu1 %v8054_v33, %s12575_s29  ;;  %8089 = vrot.lane.b32.xlu0 %v8053_v8, %s12575_s29  ;;  %v8297_v5 = vld [vmem:[#allocation2 + $0x70] sm:$0xff]  ;;  %v8057_v33 = vld [vmem:[#allocation2 + $0x80] sm:$0xff] }
 0xb03   : > { %8000 = vst [vmem:[#allocation2 + $0xe4] sm:$0xff] %v16642_v46  ;;  %9053 = vmatprep.subr.bf16.mxu0 %v12488_v53  ;;  %v12489_v16 = vpack.c.bf16 %v16592_v24, %v16564_v35  ;;  %v12493_v35 = vpack.c.bf16 %v16536_v49, %v16510_v42  ;;  %v8298_v24 = vld [vmem:[#allocation2 + $0x78] sm:$0xf]  ;;  %v12494_v63 = vpack.c.bf16 %v7896_v32, %v16611_v22  ;;  %v8058_v49 = vld [vmem:[#allocation2 + $0x88] sm:$0xf] }
 0xb04   : > { %v16650_v36 = vpack.c.bf16 %v7900_v44, %v7899_v55  ;;  %v7872_v57 = vadd.f32 %v7799_v26, %v18541_v48  ;;  %v7903_v15 = vmul.f32 0.70710677, %v7871_v12  ;;  %9054 = vmatpush1.bf16.msra.mxu0 %v12487_v3  ;;  %v12496_v17 = vpack.c.bf16 %v16491_v7, %v16478_v9  ;;  %v8428_v32 = vld [vmem:[#allocation2 + $0x9c] sm:$0xf]  ;;  %v8179_v26 = vld [vmem:[#allocation2 + $0xc] sm:$0xf] }
 0xb05   : > { %9055 = vmatprep.subr.bf16.mxu0 %v12489_v16  ;;  %v12497_v42 = vpack.c.bf16 %v16630_v31, %v16609_v19  ;;  %v12498_v22 = vpack.c.bf16 %v16583_v11, %v16557_v61  ;;  %v12499_v10 = vpack.c.bf16 %v16489_v50, %v16476_v30  ;;  %v12500_v9 = vpack.c.bf16 %v16581_v6, %v16555_v4  ;;  %v8300_v7 = vld [vmem:[#allocation2 + $0x98] sm:$0xf]  ;;  %v8299_v37 = vld [vmem:[#allocation2 + $0x90] sm:$0xff]  ;;  %v8060_v50 = vld [vmem:[#allocation2 + $0xa8] sm:$0xf] }
 0xb06   : > { %8047 = vst [vmem:[#allocation2 + $0xd4] sm:$0xff] %v16650_v36  ;;  %v7904_v52 = vmul.f32 0.70710677, %v7872_v57  ;;  %8333 = vrot.lane.b32.xlu1 %v8296_v40, %s12575_s29  ;;  %8331 = vrot.lane.b32.xlu0 %v8295_v41, %s12575_s29  ;;  %v12491_v60 = vpack.c.bf16 %v7903_v15, %v7899_v55  ;;  %v12501_v19 = vpack.c.bf16 %v16529_v38, %v16504_v0  ;;  %v8059_v4 = vld [vmem:[#allocation2 + $0xa0] sm:$0xff]  ;;  %v8185_v31 = vld [vmem:[#allocation2 + $0x6c] sm:$0xf] }
 0xb07   : > { %v12502_v30 = vpack.c.bf16 %v16520_v34, %v16502_v21  ;;  %v8062_v21 = vld [vmem:[#allocation2 + $0xc8] sm:$0xf]  ;;  %v8061_v61 = vld [vmem:[#allocation2 + $0xc0] sm:$0xff]  ;;  %v8430_v8 = vld [vmem:[#allocation2 + $0xbc] sm:$0xf] }
 0xb08   : > { %v16658_v43 = vpack.c.bf16 %v7904_v52, %v7903_v15  ;;  %v12492_v29 = vpack.c.bf16 %v7904_v52, %v7900_v44  ;;  %9056 = vmatpush1.bf16.msra.mxu0 %v12490_v13  ;;  %v11496_v18 = vpack.i.bf16 %v8430_v8, %v8428_v32  ;;  %v8426_v12 = vld [vmem:[#allocation2 + $0x7c] sm:$0xf]  ;;  %v8181_v3 = vld [vmem:[#allocation2 + $0x2c] sm:$0xf]  ;;  %v11066_v57 = vld [vmem:[%s18115_s5 + $0x1e0] sm:$0xff] }
 0xb09   : > { %9057 = vmatprep.subr.bf16.mxu0 %v12493_v35  ;;  %v8302_v0 = vld [vmem:[#allocation2 + $0xb8] sm:$0xf]  ;;  %v8301_v38 = vld [vmem:[#allocation2 + $0xb0] sm:$0xff]  ;;  %v11063_v15 = vld [vmem:[%s18115_s5 + $0x1c8] sm:$0xff] }
 0xb0a   : > { %8048 = vst [vmem:[#allocation2 + $0xf4] sm:$0xff] %v16658_v43  ;;  %8095 = vrot.lane.b32.xlu1 %v8056_v25, %s12575_s29  ;;  %8093 = vrot.lane.b32.xlu0 %v8055_v47, %s12575_s29  ;;  %v8064_v6 = vld [vmem:[#allocation2 + $0xe8] sm:$0xf]  ;;  %v11065_v48 = vld [vmem:[%s18115_s5 + $0x1d8] sm:$0xff]  ;;  %v11064_v52 = vld [vmem:[%s18115_s5 + $0x1d0] sm:$0xff] }
 0xb0b   : > { %9166 = vmatprep.subr.bf16.mxu1 %v12492_v29  ;;  %v11061_v16 = vld [vmem:[%s18115_s5 + $0x1b8] sm:$0xff]  ;;  %v11059_v13 = vld [vmem:[%s18115_s5 + $0x1a8] sm:$0xff]  ;;  %v10806_v8 = vld [vmem:[%s18117_s7 + $0xe0] sm:$0xff] }
 0xb0c   : > { %9167 = vmatpush1.bf16.msra.mxu1 %v12491_v60  ;;  %9058 = vmatpush1.bf16.msra.mxu0 %v12495_v58  ;;  %v11060_v60 = vld [vmem:[%s18115_s5 + $0x1b0] sm:$0xff]  ;;  %v11185_v32 = vld [vmem:[%s18117_s7 + $0x1f8] sm:$0xff] }
 0xb0d   : > { %9168 = vmatprep.subr.bf16.mxu1 %v12494_v63  ;;  %9059 = vmatprep.subr.bf16.mxu0 %v12496_v17  ;;  %v8304_v34 = vld [vmem:[#allocation2 + $0xd8] sm:$0xf]  ;;  %v11055_v17 = vld [vmem:[%s18115_s5 + $0x188] sm:$0xff] }
 0xb0e   : > { %8337 = vrot.lane.b32.xlu1 %v8298_v24, %s12575_s29  ;;  %8335 = vrot.lane.b32.xlu0 %v8297_v5, %s12575_s29  ;;  %v11057_v24 = vld [vmem:[%s18115_s5 + $0x198] sm:$0xff]  ;;  %v11058_v5 = vld [vmem:[%s18115_s5 + $0x1a0] sm:$0xff] }
 0xb10   : > { %9169 = vmatpush1.bf16.msra.mxu1 %v12497_v42  ;;  %9060 = vmatpush1.bf16.msra.mxu0 %v12499_v10  ;;  %v11056_v42 = vld [vmem:[%s18115_s5 + $0x190] sm:$0xff]  ;;  %v11054_v10 = vld [vmem:[%s18115_s5 + $0x180] sm:$0xff] }
 0xb11   : > { %9170 = vmatprep.subr.bf16.mxu1 %v12498_v22  ;;  %v8306_v11 = vld [vmem:[#allocation2 + $0xf8] sm:$0xf]  ;;  %v8305_v55 = vld [vmem:[#allocation2 + $0xf0] sm:$0xff] }
 0xb12   : > { %8099 = vrot.lane.b32.xlu1 %v8058_v49, %s12575_s29  ;;  %8097 = vrot.lane.b32.xlu0 %v8057_v33, %s12575_s29  ;;  %v3305_v22 = vld [vmem:[%s18117_s7 + $0x78] sm:$0xff] }
 0xb14   : > { %9171 = vmatpush1.bf16.msra.mxu1 %v12500_v9 }
 0xb15   : > { %9172 = vmatprep.subr.bf16.mxu1 %v12501_v19  ;;  %v3304_v19 = vld [vmem:[%s18117_s7 + $0x70] sm:$0xff] }
 0xb16   : > { %8341 = vrot.lane.b32.xlu1 %v8300_v7, %s12575_s29  ;;  %8339 = vrot.lane.b32.xlu0 %v8299_v37, %s12575_s29  ;;  %v10809_v37 = vld [vmem:[%s18117_s7 + $0xf8] sm:$0xff] }
 0xb18   : > { %9173 = vmatpush1.bf16.msra.mxu1 %v12502_v30 }
 0xb1a   : > { %8467 = vrot.lane.b32.xlu1 %v16622_v1, %s12574_s27  ;;  %8226 = vrot.lane.b32.xlu0 %v16576_v39, %s12574_s27  ;;  %v8303_v39 = vld [vmem:[#allocation2 + $0xd0] sm:$0xff]  ;;  %v8183_v1 = vld [vmem:[#allocation2 + $0x4c] sm:$0xf] }
 0xb1b   : > { %v11501_v44 = vpack.i.bf16 %v8185_v31, %v8183_v1 }
 0xb1e   : > { %8103 = vrot.lane.b32.xlu1 %v8060_v50, %s12575_s29  ;;  %8101 = vrot.lane.b32.xlu0 %v8059_v4, %s12575_s29  ;;  %v10997_v4 = vld [vmem:[%s18117_s7 + $0x178] sm:$0xff] }
 0xb22   : > { %8345 = vrot.lane.b32.xlu1 %v8302_v0, %s12575_s29  ;;  %8343 = vrot.lane.b32.xlu0 %v8301_v38, %s12575_s29  ;;  %v10808_v0 = vld [vmem:[%s18117_s7 + $0xf0] sm:$0xff] }
 0xb26   : > { %8107 = vrot.lane.b32.xlu1 %v8062_v21, %s12575_s29  ;;  %8230 = vrot.lane.b32.xlu0 %v16604_v23, %s12574_s27  ;;  %v8063_v23 = vld [vmem:[#allocation2 + $0xe0] sm:$0xff] }
 0xb2a   : > { %8349 = vrot.lane.b32.xlu1 %v8304_v34, %s12575_s29  ;;  %8105 = vrot.lane.b32.xlu0 %v8061_v61, %s12575_s29  ;;  %v3303_v34 = vld [vmem:[%s18117_s7 + $0x68] sm:$0xff]  ;;  %v10996_v61 = vld [vmem:[%s18117_s7 + $0x170] sm:$0xff] }
 0xb2e   : > { %8475 = vrot.lane.b32.xlu1 %v16650_v36, %s12574_s27  ;;  %8347 = vrot.lane.b32.xlu0 %v8303_v39, %s12575_s29  ;;  %v16757_v36 = vpop.permute.xlu0 %11487 }
 0xb32   : > { %8111 = vrot.lane.b32.xlu1 %v8064_v6, %s12575_s29  ;;  %8234 = vrot.lane.b32.xlu0 %v16626_v51, %s12574_s27  ;;  %v8424_v51 = vld [vmem:[#allocation2 + $0x5c] sm:$0xf] }
 0xb36   : > { %8353 = vrot.lane.b32.xlu1 %v8306_v11, %s12575_s29  ;;  %8109 = vrot.lane.b32.xlu0 %v8063_v23, %s12575_s29  ;;  %v10807_v11 = vld [vmem:[%s18117_s7 + $0xe8] sm:$0xff]  ;;  %v3302_v23 = vld [vmem:[%s18117_s7 + $0x60] sm:$0xff] }
 0xb3a   : > { %8471 = vrot.lane.b32.xlu1 %v16638_v2, %s12574_s27  ;;  %8351 = vrot.lane.b32.xlu0 %v8305_v55, %s12575_s29  ;;  %v11506_v2 = vpack.i.bf16 %v8426_v12, %v8424_v51  ;;  %v11184_v51 = vld [vmem:[%s18117_s7 + $0x1f0] sm:$0xff]  ;;  %s11297_s29 = sshll.u32 %s12668_s11, 6  ;;  %s12503_s11 = scalar_lea.vmem %s18067_s13, 64 }
 0xb3b   : > { %s18065_s16 = scalar_lea.hbm %s18122_s12, %s11297_s29  ;;  %p12504_p11 = scmp.ne.s32.totalorder %s18067_s13, %s12503_s11 }
 0xb3c   : > { %p12511_p1 = scmp.lt.s32.totalorder %s12509_s22, %s12503_s11 }
 0xb3d   : > { %p12505_p12 = pnand %p12504_p11, %p12685_p5 }
 0xb3e   : > { %11502 = vrot.lane.b32.xlu1 %v11501_v44, %s12574_s27  ;;  %11497 = vrot.lane.b32.xlu0 %v11496_v18, %s12574_s27  ;;  %v10995_v18 = vld [vmem:[%s18117_s7 + $0x168] sm:$0xff]  ;;  %p12512_p2 = por %p12511_p1, %p12510_p0 }
 0xb3f   : > { %p12506_p13 = pneg %p12505_p12 }
 0xb41   : > { %p12513_p3 = pnand %p12512_p2, %p12506_p13 }
 0xb42   : > { %8459 = vrot.lane.b32.xlu1 %v16570_v54, %s12574_s27  ;;  %8218 = vrot.lane.b32.xlu0 %v16524_v20, %s12574_s27  ;;  %v11511_v54 = vpack.i.bf16 %v8181_v3, %v8179_v26  ;;  %v8420_v20 = vld [vmem:[#allocation2 + $0x1c] sm:$0xf]  ;;  %v10994_v3 = vld [vmem:[%s18117_s7 + $0x160] sm:$0xff] }
 0xb43   : > { %v3301_v26 = vld [vmem:[%s18117_s7 + $0x58] sm:$0xff] }
 0xb46   : > { %8463 = vrot.lane.b32.xlu1 %v16598_v14, %s12574_s27  ;;  %8222 = vrot.lane.b32.xlu0 %v16550_v27, %s12574_s27  ;;  %v8422_v27 = vld [vmem:[#allocation2 + $0x3c] sm:$0xf]  ;;  %v11625_v14 = vld [vmem:[%s18114_s4 + $0x184] ss:$8 sps:$4 sm:$0xff]  }
 0xb47   : > { %v11516_v53 = vpack.i.bf16 %v8422_v27, %v8420_v20  ;;  %11138 = vmatprep.mubr.msk.bf16.mxu0 %vm2783_vm11, %v11625_v14  ;;  %11146 = vmatprep.mubr.msk.bf16.mxu1 %vm2783_vm11, %v11625_v14  ;;  %v10805_v27 = vld [vmem:[%s18117_s7 + $0xd8] sm:$0xff]  ;;  %v3300_v14 = vld [vmem:[%s18117_s7 + $0x50] sm:$0xff] }
 0xb4a   : > { %8479 = vrot.lane.b32.xlu1 %v16658_v43, %s12574_s27  ;;  %11507 = vrot.lane.b32.xlu0 %v11506_v2, %s12574_s27  ;;  %v11062_v43 = vld [vmem:[%s18115_s5 + $0x1c0] sm:$0xff] }
 0xb4e   : > { %11512 = vrot.lane.b32.xlu1 %v11511_v54, %s12574_s27  ;;  %8238 = vrot.lane.b32.xlu0 %v16642_v46, %s12574_s27  ;;  %v16741_v46 = vpop.permute.xlu1 %11482 }
 0xb52   : > { %8451 = vrot.lane.b32.xlu1 %v16516_v56, %s12574_s27  ;;  %8210 = vrot.lane.b32.xlu0 %v16483_v28, %s12574_s27  ;;  %v11069_v56 = vld [vmem:[%s18115_s5 + $0x1f8] sm:$0xff]  ;;  %v11067_v28 = vld [vmem:[%s18115_s5 + $0x1e8] sm:$0xff] }
 0xb56   : > { %8455 = vrot.lane.b32.xlu1 %v16544_v45, %s12574_s27  ;;  %8214 = vrot.lane.b32.xlu0 %v16498_v59, %s12574_s27  ;;  %v11068_v59 = vld [vmem:[%s18115_s5 + $0x1f0] sm:$0xff]  ;;  %v16755_v45 = vpop.permute.xlu1 %11492 }
 0xb5a   : > { %8694 = vperm.xlu1 %11359, %v11069_v56   ;;  %11517 = vrot.lane.b32.xlu0 %v11516_v53, %s12574_s27 }
 0xb5e   : > { %8684 = vperm.xlu1 %11359, %v11067_v28   ;;  %8689 = vperm.xlu0 %11360, %v11068_v59   ;;  %v11183_v28 = vld [vmem:[%s18117_s7 + $0x1e8] sm:$0xff]  ;;  %v10804_v59 = vld [vmem:[%s18117_s7 + $0xd0] sm:$0xff] }
 0xb61   : > { %v16765_v40 = vpop.permute.xlu1 %8083  ;;  %v16767_v41 = vpop.permute.xlu0 %8081 }
 0xb62   : > { %8674 = vperm.xlu1 %11359, %v11065_v48   ;;  %8679 = vperm.xlu0 %11360, %v11066_v57  }
 0xb66   : > { %8664 = vperm.xlu1 %11359, %v11063_v15   ;;  %8669 = vperm.xlu0 %11360, %v11064_v52   ;;  %v10993_v15 = vld [vmem:[%s18117_s7 + $0x158] sm:$0xff]  ;;  %v11182_v52 = vld [vmem:[%s18117_s7 + $0x1e0] sm:$0xff] }
 0xb68   : > { %v16781_v25 = vpop.permute.xlu1 %8325  ;;  %v16783_v47 = vpop.permute.xlu0 %8323 }
 0xb6a   : > { %8654 = vperm.xlu1 %11359, %v11061_v16   ;;  %8659 = vperm.xlu0 %11360, %v11062_v43  }
 0xb6c   : > { %v16791_v29 = vpop.permute.xlu1 %8087  ;;  %v16793_v35 = vpop.permute.xlu0 %8085 }
 0xb6e   : > { %8644 = vperm.xlu1 %11359, %v11059_v13   ;;  %8649 = vperm.xlu0 %11360, %v11060_v60   ;;  %v8114_v13 = vrot.slane %v16765_v40, 4  ;;  %v8113_v60 = vrot.slane %v16767_v41, 4  ;;  %v11484_v40 = vunpack.i.l.bf16 %v16741_v46 }
 0xb70   : > { %v16801_v63 = vpop.permute.xlu1 %8329  ;;  %v16803_v58 = vpop.permute.xlu0 %8327 }
 0xb72   : > { %8634 = vperm.xlu1 %11359, %v11057_v24   ;;  %8639 = vperm.xlu0 %11360, %v11058_v5   ;;  %v8116_v24 = vrot.slane %v16791_v29, 4  ;;  %v8115_v5 = vrot.slane %v16793_v35, 4 }
 0xb74   : > { %v16811_v49 = vpop.permute.xlu1 %8091  ;;  %v16813_v33 = vpop.permute.xlu0 %8089 }
 0xb76   : > { %8624 = vperm.xlu1 %11359, %v11055_v17   ;;  %8629 = vperm.xlu0 %11360, %v11056_v42   ;;  %v3299_v17 = vld [vmem:[%s18117_s7 + $0x48] sm:$0xff]  ;;  %v10992_v42 = vld [vmem:[%s18117_s7 + $0x150] sm:$0xff] }
 0xb78   : > { %v16821_v9 = vpop.permute.xlu1 %8333  ;;  %v16823_v7 = vpop.permute.xlu0 %8331 }
 0xb7a   : > { %3383 = vperm.xlu1 %11359, %v3305_v22   ;;  %8619 = vperm.xlu0 %11360, %v11054_v10   ;;  %v11485_v22 = vunpack.i.h.bf16 %v16741_v46 }
 0xb7c   : > { %v16831_v30 = vpop.permute.xlu1 %8095  ;;  %v16833_v50 = vpop.permute.xlu0 %8093 }
 0xb7d   : > { %v8120_v29 = vrot.slane %v16831_v30, 4  ;;  %v8117_v30 = vrot.slane %v16813_v33, 4 }
 0xb7e   : > { %5466 = vperm.xlu1 %11359, %v10809_v37   ;;  %3378 = vperm.xlu0 %11360, %v3304_v19  }
 0xb80   : > { %v16841_v38 = vpop.permute.xlu1 %8337  ;;  %v16843_v21 = vpop.permute.xlu0 %8335 }
 0xb82   : > { %7548 = vperm.xlu1 %11359, %v10997_v4   ;;  %5461 = vperm.xlu0 %11360, %v10808_v0   ;;  %v8119_v0 = vrot.slane %v16833_v50, 4 }
 0xb84   : > { %v16851_v39 = vpop.permute.xlu1 %8099  ;;  %v16853_v6 = vpop.permute.xlu0 %8097 }
 0xb86   : > { %3373 = vperm.xlu1 %11359, %v3303_v34   ;;  %7543 = vperm.xlu0 %11360, %v10996_v61   ;;  %v11495_v61 = vunpack.i.h.bf16 %v16755_v45 }
 0xb88   : > { %v16861_v1 = vpop.permute.xlu1 %8341  ;;  %v16863_v31 = vpop.permute.xlu0 %8339 }
 0xb8a   : > { %5456 = vperm.xlu1 %11359, %v10807_v11   ;;  %3368 = vperm.xlu0 %11360, %v3302_v23   ;;  %v16938_v11 = vsel %vm1884_vm10, %v8113_v60, %v8114_v13  ;;  %v8122_v23 = vrot.slane %v16851_v39, 4  ;;  %v3298_v39 = vld [vmem:[%s18117_s7 + $0x40] sm:$0xff]  ;;  %v8362_v13 = vrot.slane %v16841_v38, 4  ;;  %v8361_v60 = vrot.slane %v16843_v21, 4  ;;  %v11181_v38 = vld [vmem:[%s18117_s7 + $0x1d8] sm:$0xff] }
 0xb8b   : > { %v8131_v46 = vsel %vm8130_vm0, %v16767_v41, %v16938_v11  ;;  %v9972_v11 = vld [vmem:[%s18119_s9 + $0x8] sm:$0xff] }
 0xb8c   : > { %v16871_v55 = vpop.permute.xlu1 %8467  ;;  %v16873_v44 = vpop.permute.xlu0 %8226 }
 0xb8e   : > { %9622 = vperm.xlu1 %11359, %v11185_v32   ;;  %5451 = vperm.xlu0 %11360, %v10806_v8   ;;  %v8121_v32 = vrot.slane %v16853_v6, 4  ;;  %v16943_v8 = vsel %vm1884_vm10, %v8115_v5, %v8116_v24  ;;  %v8364_v5 = vrot.slane %v16861_v1, 4 }
 0xb90   : > { %v8104_v12 = vpop.permute.xlu1 %8103  ;;  %v16881_v2 = vpop.permute.xlu0 %8101  ;;  %v8138_v24 = vsel %vm1884_vm10, %v8121_v32, %v8122_v23 }
 0xb91   : > { %v8124_v10 = vrot.slane %v8104_v12, 4  ;;  %v8123_v37 = vrot.slane %v16881_v2, 4  ;;  %v10803_v12 = vld [vmem:[%s18117_s7 + $0xc8] sm:$0xff] }
 0xb92   : > { %7538 = vperm.xlu1 %11359, %v10995_v18   ;;  %9617 = vperm.xlu0 %11360, %v11184_v51   ;;  %v8118_v18 = vrot.slane %v16811_v49, 4 }
 0xb94   : > { %v16889_v54 = vpop.permute.xlu1 %8345  ;;  %v16891_v20 = vpop.permute.xlu0 %8343 }
 0xb96   : > { %3363 = vperm.xlu1 %11359, %v3301_v26   ;;  %7533 = vperm.xlu0 %11360, %v10994_v3   ;;  %v8140_v26 = vsel %vm1884_vm10, %v8123_v37, %v8124_v10  ;;  %v8366_v3 = vrot.slane %v16889_v54, 4  ;;  %v10802_v37 = vld [vmem:[%s18117_s7 + $0xc0] sm:$0xff] }
 0xb98   : > { %v8108_v53 = vpop.permute.xlu1 %8107  ;;  %v16899_v56 = vpop.permute.xlu0 %8230 }
 0xb99   : > { %v8126_v51 = vrot.slane %v8108_v53, 4  ;;  %v8136_v53 = vsel %vm1884_vm10, %v8119_v0, %v8120_v29 }
 0xb9a   : > { %5446 = vperm.xlu1 %11359, %v10805_v27   ;;  %3358 = vperm.xlu0 %11360, %v3300_v14   ;;  %v8365_v27 = vrot.slane %v16891_v20, 4 }
 0xb9c   : > { %v16907_v48 = vpop.permute.xlu1 %8349  ;;  %v8106_v57 = vpop.permute.xlu0 %8105 }
 0xb9d   : > { %v8125_v34 = vrot.slane %v8106_v57, 4  ;;  %v8368_v54 = vrot.slane %v16907_v48, 4  ;;  %v8381_v48 = vsel %vm1884_vm10, %v8365_v27, %v8366_v3  ;;  %v8359_v3 = vrot.slane %v16823_v7, 4 }
 0xb9e   : > { %9612 = vperm.xlu1 %11359, %v11183_v28   ;;  %5441 = vperm.xlu0 %11360, %v10804_v59  }
 0xb9f   : > { %v8142_v59 = vsel %vm1884_vm10, %v8125_v34, %v8126_v51 }
 0xba0   : > { %v16915_v16 = vpop.permute.xlu1 %8475  ;;  %v16917_v43 = vpop.permute.xlu0 %8347 }
 0xba1   : > { %v8367_v14 = vrot.slane %v16917_v43, 4 }
 0xba2   : > { %7528 = vperm.xlu1 %11359, %v10993_v15   ;;  %9607 = vperm.xlu0 %11360, %v11182_v52  }
 0xba3   : > { %v8383_v1 = vsel %vm1884_vm10, %v8367_v14, %v8368_v54 }
 0xba4   : > { %v8112_v19 = vpop.permute.xlu1 %8111  ;;  %v16932_v4 = vpop.permute.xlu0 %8234 }
 0xba5   : > { %v8128_v15 = vrot.slane %v8112_v19, 4  ;;  %v8143_v19 = vsel %vm8130_vm0, %v8106_v57, %v8142_v59  ;;  %v8139_v57 = vsel %vm8130_vm0, %v16853_v6, %v8138_v24  ;;  %v8137_v6 = vsel %vm8130_vm0, %v16833_v50, %v8136_v53 }
 0xba6   : > { %3353 = vperm.xlu1 %11359, %v3299_v17   ;;  %7523 = vperm.xlu0 %11360, %v10992_v42   ;;  %v8363_v17 = vrot.slane %v16863_v31, 4  ;;  %v8141_v42 = vsel %vm8130_vm0, %v16881_v2, %v8140_v26  ;;  %v8360_v26 = vrot.slane %v16821_v9, 4  ;;  %v11180_v9 = vld [vmem:[%s18117_s7 + $0x1d0] sm:$0xff]  ;;  %v8377_v24 = vsel %vm1884_vm10, %v8361_v60, %v8362_v13 }
 0xba7   : > { %v11095_v14 = vcombine.high %v8139_v57, %v8141_v42  ;;  %v8356_v50 = vrot.slane %v16781_v25, 4  ;;  %v11094_v53 = vcombine.low %v8139_v57, %v8141_v42  ;;  %v11179_v25 = vld [vmem:[%s18117_s7 + $0x1c8] sm:$0xff]  ;;  %v17026_v60 = vrot.slane %v11484_v40, 4 }
 0xba8   : > { %v8354_v49 = vpop.permute.xlu1 %8353  ;;  %v8110_v28 = vpop.permute.xlu0 %8109  ;;  %v8379_v27 = vsel %vm1884_vm10, %v8363_v17, %v8364_v5  ;;  %v8355_v17 = vrot.slane %v16783_v47, 4  ;;  %v8133_v42 = vsel %vm8130_vm0, %v16793_v35, %v16943_v8  ;;  %v11489_v35 = vunpack.i.l.bf16 %v16757_v36 }
 0xba9   : > { %v8127_v52 = vrot.slane %v8110_v28, 4  ;;  %v8370_v34 = vrot.slane %v8354_v49, 4  ;;  %v8495_v57 = vrot.slane %v16915_v16, 4 }
 0xbaa   : > { %5436 = vperm.xlu1 %11359, %v10803_v12   ;;  %3348 = vperm.xlu0 %11360, %v3298_v39   ;;  %v8358_v12 = vrot.slane %v16801_v63, 4  ;;  %v8134_v39 = vsel %vm1884_vm10, %v8117_v30, %v8118_v18  ;;  %v10991_v63 = vld [vmem:[%s18117_s7 + $0x148] sm:$0xff]  ;;  %v8382_v18 = vsel %vm8130_vm0, %v16891_v20, %v8381_v48  ;;  %v8384_v30 = vsel %vm8130_vm0, %v16917_v43, %v8383_v1 }
 0xbab   : > { %v8144_v10 = vsel %vm1884_vm10, %v8127_v52, %v8128_v15  ;;  %v8357_v52 = vrot.slane %v16803_v58, 4  ;;  %v8135_v20 = vsel %vm8130_vm0, %v16813_v33, %v8134_v39  ;;  %v8380_v43 = vsel %vm8130_vm0, %v16863_v31, %v8379_v27  ;;  %v10990_v33 = vld [vmem:[%s18117_s7 + $0x140] sm:$0xff] }
 0xbac   : > { %v8145_v29 = vsel %vm8130_vm0, %v8110_v28, %v8144_v10  ;;  %v16978_v0 = vpop.permute.xlu1 %8471  ;;  %v8352_v2 = vpop.permute.xlu0 %8351  ;;  %v8375_v10 = vsel %vm1884_vm10, %v8359_v3, %v8360_v26  ;;  %v11091_v13 = vcombine.high %v8135_v20, %v8137_v6  ;;  %v17022_v31 = vrot.slane %v11485_v22, 4 }
 0xbad   : > { %v11098_v23 = vcombine.low %v8143_v19, %v8145_v29  ;;  %v11099_v32 = vcombine.high %v8143_v19, %v8145_v29  ;;  %v8369_v51 = vrot.slane %v8352_v2, 4  ;;  %v11494_v22 = vunpack.i.l.bf16 %v16755_v45 }
 0xbae   : > { %9602 = vperm.xlu1 %11359, %v11181_v38   ;;  %5431 = vperm.xlu0 %11360, %v10802_v37   ;;  %v11097_v38 = vcombine.high %v8380_v43, %v8382_v18  ;;  %v8378_v37 = vsel %vm8130_vm0, %v16843_v21, %v8377_v24  ;;  %v11490_v1 = vunpack.i.h.bf16 %v16757_v36  ;;  %v8373_v40 = vsel %vm1884_vm10, %v8357_v52, %v8358_v12  ;;  %v11178_v36 = vld [vmem:[%s18117_s7 + $0x1c0] sm:$0xff] }
 0xbaf   : > { %v8385_v49 = vsel %vm1884_vm10, %v8369_v51, %v8370_v34  ;;  %9061 = vmatprep.subr.bf16.mxu0 %v11099_v32  ;;  %v8376_v21 = vsel %vm8130_vm0, %v16823_v7, %v8375_v10  ;;  %v11090_v8 = vcombine.low %v8135_v20, %v8137_v6  ;;  %v11096_v29 = vcombine.low %v8380_v43, %v8382_v18  ;;  %v9974_v18 = vld [vmem:[%s18119_s9 + $0x18] sm:$0xff] }
 0xbb0   : > { %v8386_v28 = vsel %vm8130_vm0, %v8352_v2, %v8385_v49  ;;  %v17001_v59 = vpop.permute.xlu1 %11502  ;;  %9062 = vmatpush1.bf16.msra.mxu0 %v11098_v23  ;;  %v17003_v15 = vpop.permute.xlu0 %11497  ;;  %v8253_v2 = vrot.slane %v11495_v61, 4  ;;  %v8371_v34 = vsel %vm1884_vm10, %v8355_v17, %v8356_v50  ;;  %v11087_v23 = vcombine.high %v8131_v46, %v8133_v42 }
 0xbb1   : > { %v11100_v54 = vcombine.low %v8384_v30, %v8386_v28  ;;  %v11101_v5 = vcombine.high %v8384_v30, %v8386_v28  ;;  %9063 = vmatprep.subr.bf16.mxu0 %v11095_v14  ;;  %v11093_v41 = vcombine.high %v8376_v21, %v8378_v37  ;;  %v8374_v7 = vsel %vm8130_vm0, %v16803_v58, %v8373_v40  ;;  %v9971_v30 = vld [vmem:[%s18119_s9] sm:$0xff] }
 0xbb2   : > { %7518 = vperm.xlu1 %11359, %v10991_v63   ;;  %9597 = vperm.xlu0 %11360, %v11180_v9   ;;  %v8250_v32 = vrot.slane %v16873_v44, 4  ;;  %v8252_v45 = vrot.slane %v16899_v56, 4  ;;  %v11500_v61 = vunpack.i.h.bf16 %v17003_v15  ;;  %v8251_v39 = vrot.slane %v11494_v22, 4  ;;  %v9973_v22 = vld [vmem:[%s18119_s9 + $0x10] sm:$0xff] }
 0xbb3   : > { %9174 = vmatprep.subr.bf16.mxu1 %v11101_v5  ;;  %v8498_v26 = vrot.slane %v11490_v1, 4  ;;  %v11499_v3 = vunpack.i.l.bf16 %v17003_v15  ;;  %v8496_v58 = vrot.slane %v11489_v35, 4  ;;  %v8372_v27 = vsel %vm8130_vm0, %v16783_v47, %v8371_v34  ;;  %v12436_v35 = vld [vmem:[%s13720_s19] ss:$8 sps:$4 sm:$0xff]   ;;  %v12437_v34 = vld [vmem:[%s13720_s19 + $0x14] ss:$8 sps:$4 sm:$0xff]  }
 0xbb4   : > { %v17033_v48 = vpop.permute.xlu1 %8459  ;;  %9064 = vmatpush1.bf16.msra.mxu0 %v11094_v53  ;;  %9175 = vmatpush1.bf16.msra.mxu1 %v11100_v54  ;;  %v17035_v19 = vpop.permute.xlu0 %8218  ;;  %v11086_v14 = vcombine.low %v8131_v46, %v8133_v42  ;;  %v11092_v49 = vcombine.low %v8376_v21, %v8378_v37  ;;  %v11088_v63 = vcombine.low %v8372_v27, %v8374_v7  ;;  %v8254_v9 = vrot.slane %v16932_v4, 4  ;;  %v12435_v53 = vld [vmem:[%s13720_s19 + $0x4] ss:$8 sps:$4 sm:$0xff]  }
 0xbb5   : > { %9065 = vmatprep.subr.bf16.mxu0 %v11091_v13  ;;  %9176 = vmatprep.subr.bf16.mxu1 %v11097_v38  ;;  %v11089_v6 = vcombine.high %v8372_v27, %v8374_v7  ;;  %v8267_v47 = vsel %vm1884_vm10, %v8250_v32, %v8251_v39  ;;  %v8269_v28 = vsel %vm1884_vm10, %v8252_v45, %v8253_v2  ;;  %v11505_v15 = vunpack.i.h.bf16 %v17001_v59 }
 0xbb6   : > { %9592 = vperm.xlu1 %11359, %v11179_v25   ;;  %7513 = vperm.xlu0 %11360, %v10990_v33   ;;  %v8494_v52 = vrot.slane %v11500_v61, 4  ;;  %v8511_v5 = vsel %vm1884_vm10, %v8495_v57, %v8496_v58  ;;  %v8492_v50 = vrot.slane %v11499_v3, 4  ;;  %v8491_v17 = vrot.slane %v16871_v55, 4  ;;  %v10231_v61 = vld [vmem:[%s18120_s10 + $0x10] sm:$0xff] }
 0xbb7   : > { %v8493_v10 = vrot.slane %v16978_v0, 4  ;;  %v11504_v38 = vunpack.i.l.bf16 %v17001_v59  ;;  %v17085_v25 = vsel %vm8259_vm1, %v16873_v44, %v8267_v47  ;;  %v17089_v33 = vsel %vm8259_vm1, %v16899_v56, %v8269_v28  ;;  %v10230_v59 = vld [vmem:[%s18120_s10 + $0x8] sm:$0xff]  ;;  %v12438_v57 = vld [vmem:[%s13720_s19 + $0x10] ss:$8 sps:$4 sm:$0xff]   ;;  %s18069_s19 = scalar_lea.sflag [#allocation6], %s425_s18 }
 0xbb8   : > { %v17060_v51 = vpop.permute.xlu1 %8463  ;;  %9066 = vmatpush1.bf16.msra.mxu0 %v11090_v8  ;;  %9177 = vmatpush1.bf16.msra.mxu1 %v11096_v29  ;;  %v17062_v12 = vpop.permute.xlu0 %8222  ;;  %v8271_v42 = vsel %vm1884_vm10, %v8254_v9, %v17026_v60  ;;  %v8512_v44 = vsel %vm8259_vm1, %v16915_v16, %v8511_v5  ;;  %v8249_v1 = vrot.slane %v11505_v15, 4  ;;  %v8507_v21 = vsel %vm1884_vm10, %v8491_v17, %v8492_v50  ;;  %v10232_v15 = vld [vmem:[%s18120_s10 + $0x18] sm:$0xff]  ;;  %v9975_v5 = vld [vmem:[%s18119_s9 + $0x20] sm:$0xff] }
 0xbb9   : > { %9067 = vmatprep.subr.bf16.mxu0 %v11087_v23  ;;  %9178 = vmatprep.subr.bf16.mxu1 %v11093_v41  ;;  %v8509_v56 = vsel %vm1884_vm10, %v8493_v10, %v8494_v52  ;;  %v8248_v8 = vrot.slane %v17062_v12, 4  ;;  %v8272_v16 = vsel %vm8259_vm1, %v16932_v4, %v8271_v42  ;;  %v8247_v23 = vrot.slane %v11504_v38, 4  ;;  %v10229_v4 = vld [vmem:[%s18120_s10] sm:$0xff] }
 0xbba   : > { %9986 = vperm.xlu1 %11359, %v9972_v11   ;;  %9587 = vperm.xlu0 %11360, %v11178_v36   ;;  %v8487_v41 = vrot.slane %v17033_v48, 4  ;;  %v8246_v36 = vrot.slane %v17035_v19, 4  ;;  %v8489_v7 = vrot.slane %v17060_v51, 4  ;;  %v8508_v58 = vsel %vm8259_vm1, %v16871_v55, %v8507_v21  ;;  %v10234_v21 = vld [vmem:[%s18120_s10 + $0x28] sm:$0xff] }
 0xbbb   : > { %v8510_v27 = vsel %vm8259_vm1, %v16978_v0, %v8509_v56  ;;  %v11127_v55 = vcombine.high %v17085_v25, %v17089_v33  ;;  %v11126_v10 = vcombine.low %v17085_v25, %v17089_v33  ;;  %v9976_v25 = vld [vmem:[%s18119_s9 + $0x28] sm:$0xff] }
 0xbbc   : > { %v8480_v24 = vpop.permute.xlu1 %8479  ;;  %9068 = vmatpush1.bf16.msra.mxu0 %v11086_v14  ;;  %9179 = vmatpush1.bf16.msra.mxu1 %v11092_v49  ;;  %v11508_v54 = vpop.permute.xlu0 %11507  ;;  %v8265_v14 = vsel %vm1884_vm10, %v8248_v8, %v8249_v1  ;;  %v8263_v0 = vsel %vm1884_vm10, %v8246_v36, %v8247_v23  ;;  %v11129_v28 = vcombine.high %v8508_v58, %v8510_v27 }
 0xbbd   : > { %v8497_v20 = vrot.slane %v8480_v24, 4  ;;  %v11510_v43 = vunpack.i.h.bf16 %v11508_v54  ;;  %9180 = vmatprep.subr.bf16.mxu1 %v11089_v6  ;;  %9075 = vmatprep.subr.bf16.mxu0 %v12435_v53  ;;  %v11509_v13 = vunpack.i.l.bf16 %v11508_v54  ;;  %v11128_v17 = vcombine.low %v8508_v58, %v8510_v27  ;;  %v11632_v58 = vld [vmem:[%s18114_s4 + $0x1b4] ss:$8 sps:$4 sm:$0xff]   ;;  %v11634_v27 = vld [vmem:[%s18114_s4 + $0x1b0] ss:$8 sps:$4 sm:$0xff]  }
 0xbbe   : > { %9996 = vperm.xlu1 %11359, %v9974_v18   ;;  %9981 = vperm.xlu0 %11360, %v9971_v30   ;;  %v8264_v38 = vsel %vm8259_vm1, %v17035_v19, %v8263_v0  ;;  %v17241_v0 = vpop.f32.mrf.mxu1 }
 0xbbf   : > { %v8513_v37 = vsel %vm1884_vm10, %v8497_v20, %v8498_v26  ;;  %v8490_v29 = vrot.slane %v11510_v43, 4  ;;  %v8488_v2 = vrot.slane %v11509_v13, 4  ;;  %v8266_v43 = vsel %vm8259_vm1, %v17062_v12, %v8265_v14  ;;  %v11635_v14 = vld [vmem:[%s18114_s4 + $0x1c4] ss:$8 sps:$4 sm:$0xff]   ;;  %18543 = vst [vmem:[#allocation111_spill] sm:$0xff] %v17241_v0 }
 0xbc0   : > { %v8514_v46 = vsel %vm8259_vm1, %v8480_v24, %v8513_v37  ;;  %v11513_v60 = vpop.permute.xlu1 %11512  ;;  %9181 = vmatpush1.bf16.msra.mxu1 %v11088_v63  ;;  %v8239_v40 = vpop.permute.xlu0 %8238  ;;  %9076 = vmatpush2.bf16.msra.mxu0 %v12436_v35  ;;  %v11123_v12 = vcombine.high %v8264_v38, %v8266_v43 }
 0xbc1   : > { %9188 = vmatprep.subr.bf16.mxu1 %v12437_v34  ;;  %v8256_v11 = vrot.slane %v8239_v40, 4  ;;  %v11133_v32 = vcombine.high %v8512_v44, %v8514_v46  ;;  %v11515_v45 = vunpack.i.h.bf16 %v11513_v60  ;;  %v11514_v39 = vunpack.i.l.bf16 %v11513_v60 }
 0xbc2   : > { %10244 = vperm.xlu1 %11359, %v10230_v59   ;;  %9991 = vperm.xlu0 %11360, %v9973_v22   ;;  %v8505_v49 = vsel %vm1884_vm10, %v8489_v7, %v8490_v29  ;;  %v8503_v63 = vsel %vm1884_vm10, %v8487_v41, %v8488_v2  ;;  %v11132_v6 = vcombine.low %v8512_v44, %v8514_v46  ;;  %v9977_v29 = vld [vmem:[%s18119_s9 + $0x30] sm:$0xff]  ;;  %v10236_v7 = vld [vmem:[%s18120_s10 + $0x38] sm:$0xff] }
 0xbc3   : > { %v8273_v26 = vsel %vm1884_vm10, %v8256_v11, %v17022_v31  ;;  %v8245_v47 = vrot.slane %v11515_v45, 4  ;;  %v8243_v52 = vrot.slane %v11514_v39, 4  ;;  %v8504_v50 = vsel %vm8259_vm1, %v17033_v48, %v8503_v63  ;;  %v9978_v45 = vld [vmem:[%s18119_s9 + $0x38] sm:$0xff]  ;;  %v10361_v39 = vld [vmem:[#allocation4] sm:$0x1] }
 0xbc4   : > { %9189 = vmatpush2.bf16.msra.mxu1 %v12438_v57  ;;  %v8211_v3 = vpop.permute.xlu0 %8210  ;;  %v8274_v9 = vsel %vm8259_vm1, %v8239_v40, %v8273_v26  ;;  %v8452_v30 = vpop.permute.xlu1 %8451  ;;  %v8506_v20 = vsel %vm8259_vm1, %v17060_v51, %v8505_v49  ;;  %v10233_v51 = vld [vmem:[%s18120_s10 + $0x20] sm:$0xff]  ;;  %v11122_v44 = vcombine.low %v8264_v38, %v8266_v43  ;;  %v11628_v26 = vld [vmem:[%s18114_s4 + $0x190] ss:$8 sps:$4 sm:$0xff]   ;;  %v11638_v63 = vld [vmem:[%s18114_s4 + $0x1d4] ss:$8 sps:$4 sm:$0xff]  }
 0xbc5   : > { %9190 = vmatprep.subr.bf16.mxu1 %v11133_v32  ;;  %v11130_v31 = vcombine.low %v8272_v16, %v8274_v9  ;;  %v11131_v18 = vcombine.high %v8272_v16, %v8274_v9  ;;  %v8242_v24 = vrot.slane %v8211_v3, 4  ;;  %v11125_v13 = vcombine.high %v8504_v50, %v8506_v20  ;;  %v11623_v32 = vld [vmem:[%s18114_s4 + $0x180] ss:$8 sps:$4 sm:$0xff]   ;;  %v11629_v57 = vld [vmem:[%s18114_s4 + $0x1a4] ss:$8 sps:$4 sm:$0xff]  }
 0xbc6   : > { %10249 = vperm.xlu1 %11359, %v10231_v61   ;;  %10239 = vperm.xlu0 %11360, %v10229_v4   ;;  %v8483_v1 = vrot.slane %v8452_v30, 4  ;;  %v11124_v56 = vcombine.low %v8504_v50, %v8506_v20  ;;  %v11626_v61 = vld [vmem:[%s18114_s4 + $0x194] ss:$8 sps:$4 sm:$0xff]   ;;  %v11637_v49 = vld [vmem:[%s18114_s4 + $0x1c0] ss:$8 sps:$4 sm:$0xff]  }
 0xbc7   : > { %9077 = vmatprep.subr.bf16.mxu0 %v11131_v18  ;;  %v8258_v42 = vsel %vm1884_vm10, %v8242_v24, %v8243_v52  ;;  %v10235_v4 = vld [vmem:[%s18120_s10 + $0x30] sm:$0xff] }
 0xbc8   : > { %9191 = vmatpush2.bf16.msra.mxu1 %v11132_v6  ;;  %v8215_v54 = vpop.permute.xlu0 %8214  ;;  %9078 = vmatpush2.bf16.msra.mxu0 %v11130_v31  ;;  %v8456_v37 = vpop.permute.xlu1 %8455  ;;  %v8260_v46 = vsel %vm8259_vm1, %v8211_v3, %v8258_v42  ;;  %v11631_v3 = vld [vmem:[%s18114_s4 + $0x1a0] ss:$8 sps:$4 sm:$0xff]   ;;  %v11640_v9 = vld [vmem:[%s18114_s4 + $0x1d0] ss:$8 sps:$4 sm:$0xff]   ;;  %v11641_v6 = vld [vmem:[%s18114_s4 + $0x1e4] ss:$8 sps:$4 sm:$0xff]  }
 0xbc9   : > { %v8244_v53 = vrot.slane %v8215_v54, 4  ;;  %9192 = vmatprep.subr.bf16.mxu1 %v11129_v28  ;;  %9079 = vmatprep.subr.bf16.mxu0 %v11127_v55  ;;  %v8485_v60 = vrot.slane %v8456_v37, 4  ;;  %v11643_v31 = vld [vmem:[%s18114_s4 + $0x1e0] ss:$8 sps:$4 sm:$0xff]   ;;  %v11644_v18 = vld [vmem:[%s18114_s4 + $0x1f4] ss:$8 sps:$4 sm:$0xff]   ;;  %v17239_v55 = vpop.f32.mrf.mxu0  ;;  %v17245_v28 = vpop.f32.mrf.mxu1 }
 0xbca   : > { %10254 = vperm.xlu1 %11359, %v10232_v15   ;;  %10001 = vperm.xlu0 %11360, %v9975_v5   ;;  %18542 = vst [vmem:[#allocation110_spill] sm:$0xff] %v17239_v55  ;;  %18545 = vst [vmem:[#allocation109_spill] sm:$0xff] %v17245_v28 }
 0xbcb   : > { %v8261_v48 = vsel %vm1884_vm10, %v8244_v53, %v8245_v47  ;;  %v17243_v47 = vpop.f32.mrf.mxu0  ;;  %v17249_v52 = vpop.f32.mrf.mxu1 }
 0xbcc   : > { %v11518_v59 = vpop.permute.xlu0 %11517  ;;  %9193 = vmatpush2.bf16.msra.mxu1 %v11128_v17  ;;  %v8262_v19 = vsel %vm8259_vm1, %v8215_v54, %v8261_v48  ;;  %9080 = vmatpush2.bf16.msra.mxu0 %v11126_v10  ;;  %18544 = vst [vmem:[#allocation108_spill] sm:$0xff] %v17243_v47  ;;  %18547 = vst [vmem:[#allocation78_spill] sm:$0xff] %v17249_v52 }
 0xbcd   : > { %v11520_v33 = vunpack.i.h.bf16 %v11518_v59  ;;  %v11519_v22 = vunpack.i.l.bf16 %v11518_v59  ;;  %9194 = vmatprep.subr.bf16.mxu1 %v11125_v13  ;;  %9081 = vmatprep.subr.bf16.mxu0 %v11123_v12  ;;  %v11119_v8 = vcombine.high %v8260_v46, %v8262_v19  ;;  %v11118_v41 = vcombine.low %v8260_v46, %v8262_v19  ;;  %v17247_v15 = vpop.f32.mrf.mxu0  ;;  %v17253_v54 = vpop.f32.mrf.mxu1 }
 0xbce   : > { %10259 = vperm.xlu1 %11359, %v10233_v51   ;;  %10006 = vperm.xlu0 %11360, %v9976_v25   ;;  %18546 = vst [vmem:[#allocation107_spill] sm:$0xff] %v17247_v15  ;;  %18549 = vst [vmem:[#allocation76_spill] sm:$0xff] %v17253_v54 }
 0xbcf   : > { %v8486_v40 = vrot.slane %v11520_v33, 4  ;;  %v8484_v35 = vrot.slane %v11519_v22, 4  ;;  %v17251_v24 = vpop.f32.mrf.mxu0  ;;  %v17257_v50 = vpop.f32.mrf.mxu1 }
 0xbd0   : > { %9195 = vmatpush2.bf16.msra.mxu1 %v11124_v56  ;;  %9082 = vmatpush2.bf16.msra.mxu0 %v11122_v44  ;;  %18548 = vst [vmem:[#allocation79_spill] sm:$0xff] %v17251_v24  ;;  %18551 = vst [vmem:[#allocation75_spill] sm:$0xff] %v17257_v50 }
 0xbd1   : > { %v8501_v2 = vsel %vm1884_vm10, %v8485_v60, %v8486_v40  ;;  %v8499_v34 = vsel %vm1884_vm10, %v8483_v1, %v8484_v35  ;;  %9083 = vmatprep.subr.bf16.mxu0 %v11119_v8  ;;  %v17255_v5 = vpop.f32.mrf.mxu0  ;;  %v17261_v43 = vpop.f32.mrf.mxu1 }
 0xbd2   : > { %10264 = vperm.xlu1 %11359, %v10234_v21   ;;  %v8500_v16 = vsel %vm8259_vm1, %v8452_v30, %v8499_v34  ;;  %v8502_v23 = vsel %vm8259_vm1, %v8456_v37, %v8501_v2  ;;  %10011 = vperm.xlu0 %11360, %v9977_v29   ;;  %v11646_v30 = vld [vmem:[%s18114_s4 + $0x1f0] ss:$8 sps:$4 sm:$0xff]   ;;  %18550 = vst [vmem:[#allocation77_spill] sm:$0xff] %v17255_v5  ;;  %18553 = vst [vmem:[#allocation48_spill] sm:$0xff] %v17261_v43 }
 0xbd3   : > { %v11120_v11 = vcombine.low %v8500_v16, %v8502_v23  ;;  %v11121_v36 = vcombine.high %v8500_v16, %v8502_v23  ;;  %v17259_v20 = vpop.f32.mrf.mxu0  ;;  %v17267_v10 = vpop.f32.mrf.mxu1 }
 0xbd4   : > { %9084 = vmatpush2.bf16.msra.mxu0 %v11118_v41  ;;  %18552 = vst [vmem:[#allocation49_spill] sm:$0xff] %v17259_v20  ;;  %18555 = vst [vmem:[#allocation47_spill] sm:$0xff] %v17267_v10 }
 0xbd5   : > { %9196 = vmatprep.subr.bf16.mxu1 %v11121_v36  ;;  %v17263_v53 = vpop.f32.mrf.mxu0  ;;  %v17271_v48 = vpop.permute.xlu1 %8694 }
 0xbd6   : > { %10274 = vperm.xlu1 %11359, %v10236_v7   ;;  %9197 = vmatpush2.bf16.msra.mxu1 %v11120_v11  ;;  %18554 = vst [vmem:[#allocation46_spill] sm:$0xff] %v17263_v53  ;;  %v17273_v13 = vpop.f32.mrf.mxu1 }
 0xbd7   : > { %10016 = vperm.xlu0 %11360, %v9978_v45   ;;  %9086 = vmatmul.mubr.bf16.vlgmr.msra.gmra.mxu0 %v11623_v32  ;;  %v17269_v38 = vpop.f32.mrf.mxu0  ;;  %18557 = vst [vmem:[#allocation44_spill] sm:$0xff] %v17273_v13 }
 0xbd8   : > { %11139 = vmatprep.mubr.msk.bf16.mxu0 %vm2783_vm11, %v11626_v61  ;;  %18556 = vst [vmem:[#allocation43_spill] sm:$0xff] %v17269_v38  ;;  %v17279_v42 = vpop.f32.mrf.mxu1 }
 0xbd9   : > { %9199 = vmatmul.mubr.bf16.vlgmr.msra.gmra.mxu1 %v11623_v32  ;;  %v17265_v17 = vpop.permute.xlu0 %8689  ;;  %v17277_v12 = vpop.f32.mrf.mxu0  ;;  %18559 = vst [vmem:[#allocation35_spill] sm:$0xff] %v17279_v42 }
 0xbda   : > { %11147 = vmatprep.mubr.msk.bf16.mxu1 %vm2783_vm11, %v11626_v61  ;;  %18558 = vst [vmem:[#allocation45_spill] sm:$0xff] %v17277_v12  ;;  %v17281_v37 = vpop.permute.xlu1 %8684  ;;  %v17287_v19 = vpop.f32.mrf.mxu1 }
 0xbdb   : > { %10269 = vperm.xlu0 %11360, %v10235_v4   ;;  %v17283_v59 = vpop.f32.mrf.mxu0  ;;  %18561 = vst [vmem:[#allocation36_spill] sm:$0xff] %v17287_v19 }
 0xbdc   : > { %18560 = vst [vmem:[#allocation38_spill] sm:$0xff] %v17283_v59  ;;  %v17293_v44 = vpop.f32.mrf.mxu1 }
 0xbdd   : > { %v17275_v51 = vpop.permute.xlu0 %8679  ;;  %v17289_v33 = vpop.f32.mrf.mxu0  ;;  %18563 = vst [vmem:[#allocation39_spill] sm:$0xff] %v17293_v44 }
 0xbde   : > { %18562 = vst [vmem:[#allocation37_spill] sm:$0xff] %v17289_v33  ;;  %v17291_v22 = vpop.permute.xlu1 %8674  ;;  %v17299_v46 = vpop.f32.mrf.mxu1 }
 0xbdf   : > { %10364 = vperm.xlu0 %11360, %v10361_v39   ;;  %9096 = vmatmul.mubr.bf16.gmra.mxu0 %v11628_v26  ;;  %v17297_v56 = vpop.f32.mrf.mxu0  ;;  %18565 = vst [vmem:[#allocation27_spill] sm:$0xff] %v17299_v46 }
 0xbe0   : > { %11140 = vmatprep.mubr.msk.bf16.mxu0 %vm2783_vm11, %v11629_v57  ;;  %18564 = vst [vmem:[#allocation28_spill] sm:$0xff] %v17297_v56  ;;  %v17307_v21 = vpop.f32.mrf.mxu1 }
 0xbe1   : > { %9209 = vmatmul.mubr.bf16.gmra.mxu1 %v11628_v26  ;;  %v17285_v25 = vpop.permute.xlu0 %8669  ;;  %v17303_v40 = vpop.f32.mrf.mxu0  ;;  %18567 = vst [vmem:[#allocation41_spill] sm:$0xff] %v17307_v21 }
 0xbe2   : > { %11148 = vmatprep.mubr.msk.bf16.mxu1 %vm2783_vm11, %v11629_v57  ;;  %v17301_v60 = vpop.permute.xlu1 %8664  ;;  %18566 = vst [vmem:[#allocation40_spill] sm:$0xff] %v17303_v40  ;;  %v17313_v2 = vpop.f32.mrf.mxu1 }
 0xbe3   : > { %v17309_v8 = vpop.f32.mrf.mxu0  ;;  %18569 = vst [vmem:[#allocation29_spill] sm:$0xff] %v17313_v2 }
 0xbe4   : > { %18568 = vst [vmem:[#allocation30_spill] sm:$0xff] %v17309_v8  ;;  %v17319_v23 = vpop.f32.mrf.mxu1 }
 0xbe5   : > { %v17295_v1 = vpop.permute.xlu0 %8659  ;;  %v17317_v16 = vpop.f32.mrf.mxu0  ;;  %18571 = vst [vmem:[#allocation31_spill] sm:$0xff] %v17319_v23 }
 0xbe6   : > { %v17311_v29 = vpop.permute.xlu1 %8654  ;;  %18570 = vst [vmem:[#allocation42_spill] sm:$0xff] %v17317_v16  ;;  %v17325_v7 = vpop.f32.mrf.mxu1 }
 0xbe7   : > { %9106 = vmatmul.mubr.bf16.gmra.mxu0 %v11631_v3  ;;  %v17323_v11 = vpop.f32.mrf.mxu0  ;;  %18573 = vst [vmem:[#allocation19_spill] sm:$0xff] %v17325_v7 }
 0xbe8   : > { %11141 = vmatprep.mubr.msk.bf16.mxu0 %vm2783_vm11, %v11632_v58  ;;  %18572 = vst [vmem:[#allocation20_spill] sm:$0xff] %v17323_v11 }
 0xbe9   : > { %9219 = vmatmul.mubr.bf16.gmra.mxu1 %v11631_v3  ;;  %v17305_v35 = vpop.permute.xlu0 %8649 }
 0xbea   : > { %11149 = vmatprep.mubr.msk.bf16.mxu1 %vm2783_vm11, %v11632_v58  ;;  %v17321_v41 = vpop.permute.xlu1 %8644 }
 0xbed   : > { %v17315_v34 = vpop.permute.xlu0 %8639 }
 0xbee   : > { %v8635_v4 = vpop.permute.xlu1 %8634 }
 0xbef   : > { %9116 = vmatmul.mubr.bf16.gmra.mxu0 %v11634_v27 }
 0xbf0   : > { %11142 = vmatprep.mubr.msk.bf16.mxu0 %vm2783_vm11, %v11635_v14 }
 0xbf1   : > { %9229 = vmatmul.mubr.bf16.gmra.mxu1 %v11634_v27  ;;  %v8630_v36 = vpop.permute.xlu0 %8629 }
 0xbf2   : > { %11150 = vmatprep.mubr.msk.bf16.mxu1 %vm2783_vm11, %v11635_v14 }
 0xbf5   : > { %v8620_v57 = vpop.permute.xlu0 %8619 }
 0xbf7   : > { %9126 = vmatmul.mubr.bf16.gmra.mxu0 %v11637_v49 }
 0xbf8   : > { %11143 = vmatprep.mubr.msk.bf16.mxu0 %vm2783_vm11, %v11638_v63 }
 0xbf9   : > { %9239 = vmatmul.mubr.bf16.gmra.mxu1 %v11637_v49 }
 0xbfa   : > { %11151 = vmatprep.mubr.msk.bf16.mxu1 %vm2783_vm11, %v11638_v63 }
 0xbff   : > { %9136 = vmatmul.mubr.bf16.gmra.mxu0 %v11640_v9 }
 0xc00   : > { %11144 = vmatprep.mubr.msk.bf16.mxu0 %vm2783_vm11, %v11641_v6 }
 0xc01   : > { %9249 = vmatmul.mubr.bf16.gmra.mxu1 %v11640_v9 }
 0xc02   : > { %11152 = vmatprep.mubr.msk.bf16.mxu1 %vm2783_vm11, %v11641_v6  ;;  %v8625_v6 = vpop.permute.xlu1 %8624 }
 0xc07   : > { %9146 = vmatmul.mubr.bf16.gmra.mxu0 %v11643_v31 }
 0xc08   : > { %11145 = vmatprep.mubr.msk.bf16.mxu0 %vm2783_vm11, %v11644_v18 }
 0xc09   : > { %9259 = vmatmul.mubr.bf16.gmra.mxu1 %v11643_v31 }
 0xc0a   : > { %11153 = vmatprep.mubr.msk.bf16.mxu1 %vm2783_vm11, %v11644_v18 }
 0xc0f   : > { %9156 = vmatmul.mubr.bf16.gmra.mxu0 %v11646_v30 }
 0xc10   : > { %9721 = vmatprep.mubr.bf16.mxu0 %v18509_v62 }
 0xc11   : > { %9269 = vmatmul.mubr.bf16.gmra.mxu1 %v11646_v30 }
 0xc12   : > { %9818 = vmatprep.mubr.bf16.mxu1 %v18509_v62 }
 0xc97   : > { %v9087_v32 = vpop.f32.mrf.mxu0 }
 0xc98   : > { %v9088_v58 = vadd.f32 %v9087_v32, %v8620_v57 }
 0xc99   : > { %v9200_v45 = vpop.f32.mrf.mxu1  ;;  %v9089_v61 = vpop.f32.mrf.mxu0 }
 0xc9a   : > { %v9201_v14 = vadd.f32 %v9200_v45, %v8620_v57  ;;  %v9090_v63 = vadd.f32 %v9089_v61, %v8620_v57  ;;  %12235 = vtanh.f32 %v9088_v58 }
 0xc9b   : > { %v9202_v39 = vpop.f32.mrf.mxu1  ;;  %v9091_v26 = vpop.f32.mrf.mxu0 }
 0xc9c   : > { %v9203_v31 = vadd.f32 %v9202_v39, %v8620_v57  ;;  %v9092_v30 = vadd.f32 %v9091_v26, %v8625_v6  ;;  %12237 = vtanh.f32 %v9201_v14 }
 0xc9d   : > { %v9204_v3 = vpop.f32.mrf.mxu1  ;;  %v9093_v27 = vpop.f32.mrf.mxu0  ;;  %12239 = vtanh.f32 %v9090_v63 }
 0xc9e   : > { %v9205_v0 = vadd.f32 %v9204_v3, %v8625_v6  ;;  %v9094_v55 = vadd.f32 %v9093_v27, %v8625_v6  ;;  %12241 = vtanh.f32 %v9203_v31 }
 0xc9f   : > { %v9206_v49 = vpop.f32.mrf.mxu1  ;;  %v9097_v9 = vpop.f32.mrf.mxu0  ;;  %12243 = vtanh.f32 %v9092_v30 }
 0xca0   : > { %v9207_v52 = vadd.f32 %v9206_v49, %v8625_v6  ;;  %v9098_v45 = vadd.f32 %v9097_v9, %v8630_v36  ;;  %12245 = vtanh.f32 %v9205_v0 }
 0xca1   : > { %v9210_v18 = vpop.f32.mrf.mxu1  ;;  %v9099_v28 = vpop.f32.mrf.mxu0  ;;  %12247 = vtanh.f32 %v9094_v55 }
 0xca2   : > { %v9211_v61 = vadd.f32 %v9210_v18, %v8630_v36  ;;  %v9100_v39 = vadd.f32 %v9099_v28, %v8630_v36  ;;  %12249 = vtanh.f32 %v9207_v52 }
 0xca3   : > { %v9212_v47 = vpop.f32.mrf.mxu1  ;;  %v9101_v54 = vpop.f32.mrf.mxu0  ;;  %12251 = vtanh.f32 %v9098_v45 }
 0xca4   : > { %v9213_v26 = vadd.f32 %v9212_v47, %v8630_v36  ;;  %v9102_v3 = vadd.f32 %v9101_v54, %v8635_v4  ;;  %12253 = vtanh.f32 %v9211_v61 }
 0xca5   : > { %v9214_v32 = vpop.f32.mrf.mxu1  ;;  %v9103_v24 = vpop.f32.mrf.mxu0  ;;  %12255 = vtanh.f32 %v9100_v39 }
 0xca6   : > { %v9215_v27 = vadd.f32 %v9214_v32, %v8635_v4  ;;  %v9104_v49 = vadd.f32 %v9103_v24, %v8635_v4  ;;  %12257 = vtanh.f32 %v9213_v26 }
 0xca7   : > { %v9216_v15 = vpop.f32.mrf.mxu1  ;;  %v9107_v57 = vpop.f32.mrf.mxu0  ;;  %12259 = vtanh.f32 %v9102_v3 }
 0xca8   : > { %v9217_v0 = vadd.f32 %v9216_v15, %v8635_v4  ;;  %v9108_v55 = vadd.f32 %v9107_v57, %v17315_v34  ;;  %v17330_v52 = vpop.eup %12235  ;;  %12261 = vtanh.f32 %v9215_v27 }
 0xca9   : > { %v9220_v58 = vpop.f32.mrf.mxu1  ;;  %v9109_v14 = vpop.f32.mrf.mxu0  ;;  %12263 = vtanh.f32 %v9104_v49 }
 0xcaa   : > { %v9221_v47 = vadd.f32 %v9220_v58, %v17315_v34  ;;  %v17333_v36 = vpop.eup %12237  ;;  %v9110_v31 = vadd.f32 %v9109_v14, %v17315_v34  ;;  %12265 = vtanh.f32 %v9217_v0 }
 0xcab   : > { %v17327_v63 = vpop.f32.mrf.mxu1  ;;  %v9111_v9 = vpop.f32.mrf.mxu0  ;;  %12267 = vtanh.f32 %v9108_v55 }
 0xcac   : > { %v17336_v18 = vpop.eup %12239  ;;  %v9112_v15 = vadd.f32 %v9111_v9, %v17321_v41  ;;  %12269 = vtanh.f32 %v9221_v47 }
 0xcad   : > { %v9224_v6 = vpop.f32.mrf.mxu1  ;;  %v9113_v28 = vpop.f32.mrf.mxu0  ;;  %12271 = vtanh.f32 %v9110_v31 }
 0xcae   : > { %v17341_v30 = vpop.eup %12241  ;;  %v9225_v32 = vadd.f32 %v9224_v6, %v17321_v41  ;;  %v9114_v39 = vadd.f32 %v9113_v28, %v17321_v41  ;;  %12273 = vtanh.f32 %v9112_v15 }
 0xcaf   : > { %v9226_v54 = vpop.f32.mrf.mxu1  ;;  %v9117_v24 = vpop.f32.mrf.mxu0 }
 0xcb0   : > { %v17344_v61 = vpop.eup %12243  ;;  %v9227_v58 = vadd.f32 %v9226_v54, %v17321_v41  ;;  %v9118_v27 = vadd.f32 %v9117_v24, %v17305_v35  ;;  %12275 = vtanh.f32 %v9225_v32 }
 0xcb1   : > { %v17339_v4 = vpop.f32.mrf.mxu1  ;;  %v9119_v45 = vpop.f32.mrf.mxu0 }
 0xcb2   : > { %v17347_v26 = vpop.eup %12245  ;;  %v9120_v0 = vadd.f32 %v9119_v45, %v17305_v35  ;;  %12277 = vtanh.f32 %v9114_v39 }
 0xcb3   : > { %v9232_v57 = vpop.f32.mrf.mxu1  ;;  %v9121_v3 = vpop.f32.mrf.mxu0 }
 0xcb4   : > { %v17350_v14 = vpop.eup %12247  ;;  %v9233_v28 = vadd.f32 %v9232_v57, %v17305_v35  ;;  %12279 = vtanh.f32 %v9227_v58  ;;  %v9122_v54 = vadd.f32 %v9121_v3, %v17311_v29 }
 0xcb5   : > { %v9234_v49 = vpop.f32.mrf.mxu1  ;;  %v17353_v9 = vpop.eup %12249  ;;  %12281 = vtanh.f32 %v9118_v27 }
 0xcb6   : > { %v9123_v6 = vpop.f32.mrf.mxu0  ;;  %v17356_v55 = vpop.eup %12251  ;;  %v9235_v15 = vadd.f32 %v9234_v49, %v17311_v29  ;;  %12283 = vtanh.f32 %v9120_v0 }
 0xcb7   : > { %v17359_v47 = vpop.f32.mrf.mxu1  ;;  %v17361_v41 = vpop.eup %12253  ;;  %v9124_v39 = vadd.f32 %v9123_v6, %v17311_v29  ;;  %12285 = vtanh.f32 %v9233_v28 }
 0xcb8   : > { %v9127_v31 = vpop.f32.mrf.mxu0  ;;  %v17364_v24 = vpop.eup %12255  ;;  %12287 = vtanh.f32 %v9122_v54 }
 0xcb9   : > { %v9128_v32 = vadd.f32 %v9127_v31, %v17295_v1  ;;  %v9240_v45 = vpop.f32.mrf.mxu1  ;;  %v17368_v43 = vpop.eup %12257  ;;  %12289 = vtanh.f32 %v9235_v15 }
 0xcba   : > { %v9129_v57 = vpop.f32.mrf.mxu0  ;;  %v9241_v50 = vadd.f32 %v9240_v45, %v17295_v1  ;;  %v17372_v58 = vpop.eup %12259  ;;  %12291 = vtanh.f32 %v9124_v39 }
 0xcbb   : > { %v9311_v3 = vsub.f32 0.0, %v9128_v32  ;;  %v9130_v20 = vadd.f32 %v9129_v57, %v17295_v1  ;;  %v9242_v27 = vpop.f32.mrf.mxu1  ;;  %v17375_v5 = vpop.eup %12261 }
 0xcbc   : > { %v9313_v49 = vsub.f32 0.0, %v9241_v50  ;;  %v9131_v31 = vpop.f32.mrf.mxu0  ;;  %v9243_v13 = vadd.f32 %v9242_v27, %v17295_v1  ;;  %v17378_v0 = vpop.eup %12263 }
 0xcbd   : > { %v9343_v6 = vmul.f32 1.442695, %v9311_v3  ;;  %v9312_v10 = vsub.f32 0.0, %v9130_v20  ;;  %v9132_v45 = vadd.f32 %v9131_v31, %v17301_v60  ;;  %v9244_v38 = vpop.f32.mrf.mxu1  ;;  %v17381_v28 = vpop.eup %12265 }
 0xcbe   : > { %v9347_v32 = vmul.f32 1.442695, %v9313_v49  ;;  %v9314_v57 = vsub.f32 0.0, %v9243_v13  ;;  %v9133_v53 = vpop.f32.mrf.mxu0  ;;  %v9245_v54 = vadd.f32 %v9244_v38, %v17301_v60  ;;  %v17384_v50 = vpop.eup %12267 }
 0xcbf   : > { %12293 = vpow2.f32 %v9343_v6  ;;  %v9345_v1 = vmul.f32 1.442695, %v9312_v10  ;;  %v9315_v27 = vsub.f32 0.0, %v9132_v45  ;;  %v9134_v15 = vadd.f32 %v9133_v53, %v17301_v60  ;;  %v9246_v3 = vpop.f32.mrf.mxu1  ;;  %v17387_v20 = vpop.eup %12269 }
 0xcc0   : > { %12295 = vpow2.f32 %v9347_v32  ;;  %v9349_v31 = vmul.f32 1.442695, %v9314_v57  ;;  %v9317_v19 = vsub.f32 0.0, %v9245_v54  ;;  %v9137_v42 = vpop.f32.mrf.mxu0  ;;  %v9247_v39 = vadd.f32 %v9246_v3, %v17301_v60  ;;  %v17390_v13 = vpop.eup %12271 }
 0xcc1   : > { %18574 = vst [vmem:[#allocation32_spill] sm:$0xff] %v17390_v13  ;;  %12297 = vpow2.f32 %v9345_v1  ;;  %v9351_v38 = vmul.f32 1.442695, %v9315_v27  ;;  %v9316_v49 = vsub.f32 0.0, %v9134_v15  ;;  %v9138_v6 = vadd.f32 %v9137_v42, %v17285_v25  ;;  %v9250_v10 = vpop.f32.mrf.mxu1  ;;  %v17393_v45 = vpop.eup %12273 }
 0xcc2   : > { %12299 = vpow2.f32 %v9349_v31  ;;  %v9355_v53 = vmul.f32 1.442695, %v9317_v19  ;;  %v9318_v59 = vsub.f32 0.0, %v9247_v39  ;;  %v9139_v12 = vpop.f32.mrf.mxu0  ;;  %v9251_v32 = vadd.f32 %v9250_v10, %v17285_v25  ;;  %v17396_v57 = vpop.eup %12275 }
 0xcc3   : > { %12301 = vpow2.f32 %v9351_v38  ;;  %v9353_v60 = vmul.f32 1.442695, %v9316_v49  ;;  %v9319_v54 = vsub.f32 0.0, %v9138_v6  ;;  %v9140_v1 = vadd.f32 %v9139_v12, %v17285_v25  ;;  %v9252_v27 = vpop.f32.mrf.mxu1  ;;  %v17399_v15 = vpop.eup %12277 }
 0xcc4   : > { %18575 = vst [vmem:[#allocation33_spill] sm:$0xff] %v17399_v15  ;;  %12303 = vpow2.f32 %v9355_v53  ;;  %v9357_v42 = vmul.f32 1.442695, %v9318_v59  ;;  %v9321_v3 = vsub.f32 0.0, %v9251_v32  ;;  %v9141_v46 = vpop.f32.mrf.mxu0  ;;  %v9253_v19 = vadd.f32 %v9252_v27, %v17285_v25  ;;  %v17402_v31 = vpop.eup %12279 }
 0xcc5   : > { %18576 = vst [vmem:[#allocation21_spill] sm:$0xff] %v17402_v31  ;;  %12305 = vpow2.f32 %v9353_v60  ;;  %v9359_v39 = vmul.f32 1.442695, %v9319_v54  ;;  %v9320_v10 = vsub.f32 0.0, %v9140_v1  ;;  %v9142_v38 = vadd.f32 %v9141_v46, %v17291_v22  ;;  %v9254_v49 = vpop.f32.mrf.mxu1  ;;  %v17405_v6 = vpop.eup %12281 }
 0xcc6   : > { %18577 = vst [vmem:[#allocation22_spill] sm:$0xff] %v17405_v6  ;;  %12307 = vpow2.f32 %v9357_v42  ;;  %v9363_v12 = vmul.f32 1.442695, %v9321_v3  ;;  %v9322_v44 = vsub.f32 0.0, %v9253_v19  ;;  %v9143_v56 = vpop.f32.mrf.mxu0  ;;  %v9255_v59 = vadd.f32 %v9254_v49, %v17291_v22  ;;  %v17408_v53 = vpop.eup %12283 }
 0xcc7   : > { %12309 = vpow2.f32 %v9359_v39  ;;  %v9361_v25 = vmul.f32 1.442695, %v9320_v10  ;;  %v9323_v32 = vsub.f32 0.0, %v9142_v38  ;;  %v9144_v60 = vadd.f32 %v9143_v56, %v17291_v22  ;;  %v9256_v54 = vpop.f32.mrf.mxu1  ;;  %v17411_v1 = vpop.eup %12285 }
 0xcc8   : > { %18578 = vst [vmem:[#allocation34_spill] sm:$0xff] %v17411_v1  ;;  %12311 = vpow2.f32 %v9363_v12  ;;  %v9365_v46 = vmul.f32 1.442695, %v9322_v44  ;;  %v9325_v27 = vsub.f32 0.0, %v9255_v59  ;;  %v9147_v33 = vpop.f32.mrf.mxu0  ;;  %v9257_v42 = vadd.f32 %v9256_v54, %v17291_v22  ;;  %v17414_v3 = vpop.eup %12287 }
 0xcc9   : > { %12313 = vpow2.f32 %v9361_v25  ;;  %v9367_v19 = vmul.f32 1.442695, %v9323_v32  ;;  %v9324_v49 = vsub.f32 0.0, %v9144_v60  ;;  %v9260_v2 = vpop.f32.mrf.mxu1  ;;  %v17416_v39 = vpop.eup %12289  ;;  %v9148_v12 = vadd.f32 %v9147_v33, %v17275_v51 }
 0xcca   : > { %18579 = vst [vmem:[#allocation112_spill] sm:$0xff] %v17416_v39  ;;  %12315 = vpow2.f32 %v9365_v46  ;;  %v9371_v10 = vmul.f32 1.442695, %v9325_v27  ;;  %v9326_v56 = vsub.f32 0.0, %v9257_v42  ;;  %v9149_v38 = vpop.f32.mrf.mxu0  ;;  %v17418_v21 = vpop.eup %12291  ;;  %v9261_v25 = vadd.f32 %v9260_v2, %v17275_v51 }
 0xccb   : > { %12317 = vpow2.f32 %v9367_v19  ;;  %v9369_v44 = vmul.f32 1.442695, %v9324_v49  ;;  %v9262_v59 = vpop.f32.mrf.mxu1  ;;  %v9327_v49 = vsub.f32 0.0, %v9148_v12  ;;  %v9150_v33 = vadd.f32 %v9149_v38, %v17275_v51 }
 0xccc   : > { %v12294_v22 = vpop.eup %12293  ;;  %12319 = vpow2.f32 %v9371_v10  ;;  %v9373_v54 = vmul.f32 1.442695, %v9326_v56  ;;  %v9151_v32 = vpop.f32.mrf.mxu0  ;;  %v9329_v2 = vsub.f32 0.0, %v9261_v25 }
 0xccd   : > { %v12296_v60 = vpop.eup %12295  ;;  %v9407_v8 = vadd.f32 1.0, %v12294_v22  ;;  %12321 = vpow2.f32 %v9369_v44  ;;  %v9264_v46 = vpop.f32.mrf.mxu1  ;;  %v9328_v38 = vsub.f32 0.0, %v9150_v33 }
 0xcce   : > { %v12298_v27 = vpop.eup %12297  ;;  %v9409_v42 = vadd.f32 1.0, %v12296_v60  ;;  %12323 = vpow2.f32 %v9373_v54  ;;  %v9153_v40 = vpop.f32.mrf.mxu0  ;;  %v9263_v54 = vadd.f32 %v9262_v59, %v17275_v51  ;;  %v17424_v25 = vmul.f32 1.442695, %v9329_v2 }
 0xccf   : > { %v12300_v7 = vpop.eup %12299  ;;  %12325 = vrcp.f32 %v9407_v8  ;;  %v9408_v19 = vadd.f32 1.0, %v12298_v27  ;;  %v9266_v23 = vpop.f32.mrf.mxu1  ;;  %v9375_v27 = vmul.f32 1.442695, %v9327_v49  ;;  %v9265_v51 = vadd.f32 %v9264_v46, %v17281_v37 }
 0xcd0   : > { %v12302_v10 = vpop.eup %12301  ;;  %12327 = vrcp.f32 %v9409_v42  ;;  %v9410_v56 = vadd.f32 1.0, %v12300_v7  ;;  %v9157_v11 = vpop.f32.mrf.mxu0  ;;  %v9152_v42 = vadd.f32 %v9151_v32, %v17281_v37  ;;  %v9267_v33 = vadd.f32 %v9266_v23, %v17281_v37 }
 0xcd1   : > { %v12304_v16 = vpop.eup %12303  ;;  %12329 = vrcp.f32 %v9408_v19  ;;  %v9411_v44 = vadd.f32 1.0, %v12302_v10  ;;  %v9270_v62 = vpop.f32.mrf.mxu1  ;;  %v9158_v49 = vadd.f32 %v9157_v11, %v17265_v17  ;;  %v9330_v46 = vsub.f32 0.0, %v9263_v54 }
 0xcd2   : > { %v12306_v22 = vpop.eup %12305  ;;  %12331 = vrcp.f32 %v9410_v56  ;;  %v9413_v60 = vadd.f32 1.0, %v12304_v16  ;;  %v9159_v31 = vpop.f32.mrf.mxu0  ;;  %v9154_v16 = vadd.f32 %v9153_v40, %v17281_v37  ;;  %v9333_v11 = vsub.f32 0.0, %v9265_v51 }
 0xcd3   : > { %v12308_v8 = vpop.eup %12307  ;;  %12333 = vrcp.f32 %v9411_v44  ;;  %v9412_v12 = vadd.f32 1.0, %v12306_v22  ;;  %v9272_v44 = vpop.f32.mrf.mxu1  ;;  %v9160_v32 = vadd.f32 %v9159_v31, %v17265_v17  ;;  %v9335_v23 = vsub.f32 0.0, %v9158_v49 }
 0xcd4   : > { %v12310_v1 = vpop.eup %12309  ;;  %12335 = vrcp.f32 %v9413_v60  ;;  %v9414_v7 = vadd.f32 1.0, %v12308_v8  ;;  %v9377_v60 = vmul.f32 1.442695, %v9328_v38  ;;  %v9161_v8 = vpop.f32.mrf.mxu0  ;;  %v9381_v49 = vmul.f32 1.442695, %v9330_v46 }
 0xcd5   : > { %v12312_v19 = vpop.eup %12311  ;;  %12337 = vrcp.f32 %v9412_v12  ;;  %v9415_v10 = vadd.f32 1.0, %v12310_v1  ;;  %v9331_v12 = vsub.f32 0.0, %v9152_v42  ;;  %v9336_v6 = vsub.f32 0.0, %v9160_v32 }
 0xcd6   : > { %v12314_v59 = vpop.eup %12313  ;;  %12339 = vrcp.f32 %v9414_v7  ;;  %v9417_v56 = vadd.f32 1.0, %v12312_v19  ;;  %v9332_v19 = vsub.f32 0.0, %v9154_v16  ;;  %v9273_v16 = vadd.f32 %v9272_v44, %v17265_v17 }
 0xcd7   : > { %v12316_v22 = vpop.eup %12315  ;;  %12341 = vrcp.f32 %v9415_v10  ;;  %v9416_v2 = vadd.f32 1.0, %v12314_v59  ;;  %v9334_v10 = vsub.f32 0.0, %v9267_v33  ;;  %v9274_v59 = vpop.f32.mrf.mxu1 }
 0xcd8   : > { %v12318_v1 = vpop.eup %12317  ;;  %12343 = vrcp.f32 %v9417_v56  ;;  %v9418_v40 = vadd.f32 1.0, %v12316_v22  ;;  %v9271_v56 = vadd.f32 %v9270_v62, %v17265_v17  ;;  %v9163_v22 = vpop.f32.mrf.mxu0  ;;  %v9385_v33 = vmul.f32 1.442695, %v9332_v19 }
 0xcd9   : > { %v12320_v39 = vpop.eup %12319  ;;  %12345 = vrcp.f32 %v9416_v2  ;;  %v9419_v7 = vadd.f32 1.0, %v12318_v1  ;;  %v9162_v2 = vadd.f32 %v9161_v8, %v17271_v48  ;;  %v9164_v32 = vadd.f32 %v9163_v22, %v17271_v48  ;;  %v9276_v62 = vpop.f32.mrf.mxu1 }
 0xcda   : > { %v12322_v13 = vpop.eup %12321  ;;  %12347 = vrcp.f32 %v9418_v40  ;;  %v9421_v37 = vadd.f32 1.0, %v12320_v39  ;;  %v9383_v39 = vmul.f32 1.442695, %v9331_v12  ;;  %v9387_v40 = vmul.f32 1.442695, %v9333_v11 }
 0xcdb   : > { %v12324_v38 = vpop.eup %12323  ;;  %12349 = vrcp.f32 %v9419_v7  ;;  %v9420_v31 = vadd.f32 1.0, %v12322_v13  ;;  %v9391_v13 = vmul.f32 1.442695, %v9335_v23  ;;  %v9337_v15 = vsub.f32 0.0, %v9271_v56 }
 0xcdc   : > { %v12326_v42 = vpop.eup %12325  ;;  %12351 = vrcp.f32 %v9421_v37  ;;  %v9422_v54 = vadd.f32 1.0, %v12324_v38  ;;  %v9389_v37 = vmul.f32 1.442695, %v9334_v10  ;;  %v9393_v38 = vmul.f32 1.442695, %v9336_v6 }
 0xcdd   : > { %v12328_v51 = vpop.eup %12327  ;;  %12353 = vrcp.f32 %v9420_v31  ;;  %v9339_v17 = vsub.f32 0.0, %v9162_v2  ;;  %v9338_v44 = vsub.f32 0.0, %v9273_v16  ;;  %v9275_v12 = vadd.f32 %v9274_v59, %v17271_v48 }
 0xcde   : > { %v12330_v1 = vpop.eup %12329  ;;  %12355 = vpow2.f32 %v9375_v27  ;;  %v9277_v27 = vadd.f32 %v9276_v62, %v17271_v48  ;;  %v17440_v19 = vmul.f32 %v12326_v42, %v17330_v52  ;;  %v9340_v6 = vsub.f32 0.0, %v9164_v32 }
 0xcdf   : > { %v12332_v7 = vpop.eup %12331  ;;  %12357 = vrcp.f32 %v9422_v54  ;;  %v9341_v22 = vsub.f32 0.0, %v9275_v12  ;;  %v9399_v54 = vmul.f32 1.442695, %v9339_v17 }
 0xce0   : > { %v12334_v8 = vpop.eup %12333  ;;  %12359 = vpow2.f32 %v9377_v60  ;;  %v17446_v60 = vmul.f32 %v12328_v51, %v17333_v36  ;;  %v17460_v31 = vmul.f32 %v12332_v7, %v17341_v30  ;;  %v9342_v2 = vsub.f32 0.0, %v9277_v27 }
 0xce1   : > { %v12336_v46 = vpop.eup %12335  ;;  %12361 = vpow2.f32 %v17424_v25  ;;  %v17443_v11 = vmul.f32 %v12334_v8, %v17344_v61  ;;  %v17452_v25 = vmul.f32 %v12330_v1, %v17336_v18  ;;  %v9395_v18 = vmul.f32 1.442695, %v9337_v15 }
 0xce2   : > { %v12338_v23 = vpop.eup %12337  ;;  %12363 = vpow2.f32 %v9383_v39  ;;  %v17449_v10 = vmul.f32 %v12336_v46, %v17347_v26  ;;  %v9237_v39 = vadd.f32 %v17359_v47, %v17311_v29  ;;  %v9401_v15 = vmul.f32 1.442695, %v9340_v6 }
 0xce3   : > { %v12340_v59 = vpop.eup %12339  ;;  %12365 = vpow2.f32 %v9381_v49  ;;  %v17455_v48 = vmul.f32 %v12338_v23, %v17350_v14  ;;  %v9520_v52 = vpack.c.bf16 %v17443_v11, %v17440_v19  ;;  %v9405_v32 = vmul.f32 1.442695, %v9342_v2  ;;  %v11649_v19 = vld [vmem:[%s18116_s6 + $0xd0] sm:$0xff]   ;;  %v11650_v11 = vld [vmem:[%s18116_s6 + $0xd8] sm:$0xff]  }
 0xce4   : > { %v12342_v61 = vpop.eup %12341  ;;  %12367 = vpow2.f32 %v9385_v33  ;;  %v17463_v36 = vmul.f32 %v12340_v59, %v17353_v9  ;;  %v9522_v26 = vpack.c.bf16 %v17449_v10, %v17446_v60  ;;  %v9397_v9 = vmul.f32 1.442695, %v9338_v44  ;;  %v11651_v60 = vld [vmem:[%s18116_s6 + $0xe0] sm:$0xff]   ;;  %v11652_v10 = vld [vmem:[%s18116_s6 + $0xe8] sm:$0xff]  }
 0xce5   : > { %v12344_v56 = vpop.eup %12343  ;;  %12369 = vpow2.f32 %v9387_v40  ;;  %v9521_v14 = vpack.c.bf16 %v17455_v48, %v17452_v25  ;;  %v9403_v33 = vmul.f32 1.442695, %v9341_v22  ;;  %v17474_v1 = vmul.f32 %v12342_v61, %v17356_v55  ;;  %v11648_v48 = vld [vmem:[%s18116_s6 + $0xc8] sm:$0xff]  }
 0xce6   : > { %v12346_v42 = vpop.eup %12345  ;;  %12371 = vpow2.f32 %v9391_v13  ;;  %v9523_v30 = vpack.c.bf16 %v17463_v36, %v17460_v31  ;;  %v17480_v62 = vmul.f32 %v12344_v56, %v17361_v41  ;;  %v18586_v25 = vmov 0   ;;  %v11654_v31 = vld [vmem:[%s18116_s6 + $0xf8] sm:$0xff]   ;;  %v3384_v36 = vpop.permute.xlu1 %3383 }
 0xce7   : > { %v12348_v16 = vpop.eup %12347  ;;  %12373 = vpow2.f32 %v9389_v37  ;;  %v17486_v47 = vmul.f32 %v12346_v42, %v17364_v24 }
 0xce8   : > { %v12350_v51 = vpop.eup %12349  ;;  %12375 = vpow2.f32 %v9393_v38  ;;  %v17498_v24 = vmul.f32 %v12348_v16, %v17368_v43 }
 0xce9   : > { %v12352_v49 = vpop.eup %12351  ;;  %12377 = vpow2.f32 %v9395_v18  ;;  %v17477_v40 = vmul.f32 %v12350_v51, %v17372_v58 }
 0xcea   : > { %v12354_v13 = vpop.eup %12353  ;;  %12379 = vpow2.f32 %v9399_v54  ;;  %v17483_v7 = vmul.f32 %v12352_v49, %v17375_v5 }
 0xceb   : > { %v12356_v29 = vpop.eup %12355  ;;  %12381 = vpow2.f32 %v9397_v9  ;;  %v17489_v55 = vmul.f32 %v12354_v13, %v17378_v0  ;;  %v9524_v58 = vpack.c.bf16 %v17477_v40, %v17474_v1 }
 0xcec   : > { %v12358_v37 = vpop.eup %12357  ;;  %v9423_v38 = vadd.f32 1.0, %v12356_v29  ;;  %12383 = vpow2.f32 %v9401_v15  ;;  %v9526_v41 = vpack.c.bf16 %v17483_v7, %v17480_v62 }
 0xced   : > { %v12360_v8 = vpop.eup %12359  ;;  %12385 = vpow2.f32 %v9403_v33  ;;  %v9525_v5 = vpack.c.bf16 %v17489_v55, %v17486_v47  ;;  %v17501_v0 = vmul.f32 %v12358_v37, %v17381_v28  ;;  %v11647_v47 = vld [vmem:[%s18116_s6 + $0xc0] sm:$0xff]  }
 0xcee   : > { %v12362_v17 = vpop.eup %12361  ;;  %12387 = vtanh.f32 %v9237_v39  ;;  %v9424_v44 = vadd.f32 1.0, %v12360_v8 }
 0xcef   : > { %v12364_v12 = vpop.eup %12363  ;;  %v9425_v46 = vadd.f32 1.0, %v12362_v17  ;;  %12389 = vpow2.f32 %v9405_v32  ;;  %v9527_v27 = vpack.c.bf16 %v17501_v0, %v17498_v24  ;;  %v9231_v17 = vadd.f32 %v17339_v4, %v17305_v35 }
 0xcf0   : > { %v12366_v23 = vpop.eup %12365  ;;  %12391 = vrcp.f32 %v9423_v38  ;;  %v9427_v6 = vadd.f32 1.0, %v12364_v12  ;;  %v9223_v12 = vadd.f32 %v17327_v63, %v17315_v34 }
 0xcf1   : > { %v12368_v59 = vpop.eup %12367  ;;  %12393 = vrcp.f32 %v9424_v44  ;;  %v9426_v61 = vadd.f32 1.0, %v12366_v23 }
 0xcf2   : > { %v12370_v43 = vpop.eup %12369  ;;  %12395 = vrcp.f32 %v9427_v6  ;;  %v9428_v56 = vadd.f32 1.0, %v12368_v59 }
 0xcf3   : > { %v12372_v28 = vpop.eup %12371  ;;  %12397 = vrcp.f32 %v9425_v46  ;;  %v9429_v18 = vadd.f32 1.0, %v12370_v43 }
 0xcf4   : > { %v12374_v22 = vpop.eup %12373  ;;  %12399 = vrcp.f32 %v9426_v61  ;;  %v9431_v42 = vadd.f32 1.0, %v12372_v28 }
 0xcf5   : > { %v12376_v54 = vpop.eup %12375  ;;  %12401 = vrcp.f32 %v9429_v18  ;;  %v9430_v2 = vadd.f32 1.0, %v12374_v22 }
 0xcf6   : > { %v12378_v16 = vpop.eup %12377  ;;  %12403 = vrcp.f32 %v9428_v56  ;;  %v9432_v9 = vadd.f32 1.0, %v12376_v54 }
 0xcf7   : > { %v12380_v51 = vpop.eup %12379  ;;  %12405 = vrcp.f32 %v9431_v42  ;;  %v9433_v32 = vadd.f32 1.0, %v12378_v16 }
 0xcf8   : > { %v12382_v39 = vpop.eup %12381  ;;  %12407 = vrcp.f32 %v9430_v2  ;;  %v9435_v15 = vadd.f32 1.0, %v12380_v51 }
 0xcf9   : > { %v12384_v49 = vpop.eup %12383  ;;  %12409 = vrcp.f32 %v9432_v9  ;;  %v9434_v33 = vadd.f32 1.0, %v12382_v39 }
 0xcfa   : > { %v12386_v13 = vpop.eup %12385  ;;  %12411 = vrcp.f32 %v9435_v15  ;;  %v9436_v29 = vadd.f32 1.0, %v12384_v49  ;;  %v18580_v15 = vld [vmem:[#allocation33_spill] sm:$0xff] }
 0xcfb   : > { %v12388_v37 = vpop.eup %12387  ;;  %12413 = vrcp.f32 %v9434_v33  ;;  %v9437_v38 = vadd.f32 1.0, %v12386_v13 }
 0xcfc   : > { %v12390_v8 = vpop.eup %12389  ;;  %12415 = vrcp.f32 %v9436_v29  ;;  %v18582_v29 = vld [vmem:[#allocation32_spill] sm:$0xff] }
 0xcfd   : > { %v12392_v44 = vpop.eup %12391  ;;  %12417 = vrcp.f32 %v9437_v38  ;;  %v9438_v46 = vadd.f32 1.0, %v12390_v8  ;;  %v18583_v8 = vld [vmem:[#allocation112_spill] sm:$0xff] }
 0xcfe   : > { %v12394_v23 = vpop.eup %12393  ;;  %12419 = vrcp.f32 %v9433_v32  ;;  %v9487_v61 = vmul.f32 %v12392_v44, %v17384_v50 }
 0xcff   : > { %v12396_v6 = vpop.eup %12395  ;;  %12421 = vrcp.f32 %v9438_v46  ;;  %v9488_v38 = vmul.f32 %v12394_v23, %v18582_v29  ;;  %v18584_v46 = vld [vmem:[#allocation34_spill] sm:$0xff]  ;;  %v18591_v29 = vld [vmem:[#allocation72_spill] sm:$0xff] }
 0xd00   : > { %v12398_v59 = vpop.eup %12397  ;;  %12423 = vtanh.f32 %v9231_v17  ;;  %v9491_v43 = vmul.f32 %v12396_v6, %v17393_v45 }
 0xd01   : > { %v12400_v56 = vpop.eup %12399  ;;  %12425 = vtanh.f32 %v9223_v12  ;;  %v9489_v18 = vmul.f32 %v12398_v59, %v17387_v20  ;;  %v18581_v20 = vld [vmem:[#allocation22_spill] sm:$0xff]  ;;  %v18585_v59 = vld [vmem:[#allocation21_spill] sm:$0xff] }
 0xd02   : > { %v12402_v35 = vpop.eup %12401  ;;  %v9528_v4 = vpack.c.bf16 %v9491_v43, %v9487_v61 }
 0xd03   : > { %v12404_v28 = vpop.eup %12403  ;;  %v9493_v34 = vmul.f32 %v12402_v35, %v17396_v57 }
 0xd04   : > { %v12406_v63 = vpop.eup %12405  ;;  %v9492_v49 = vmul.f32 %v12404_v28, %v18580_v15 }
 0xd05   : > { %v12408_v22 = vpop.eup %12407  ;;  %v9530_v42 = vpack.c.bf16 %v9493_v34, %v9489_v18  ;;  %v9495_v13 = vmul.f32 %v12406_v63, %v18581_v20  ;;  %v18589_v20 = vld [vmem:[#allocation71_spill] sm:$0xff] }
 0xd06   : > { %v12410_v54 = vpop.eup %12409 }
 0xd07   : > { %v12412_v2 = vpop.eup %12411  ;;  %v9496_v45 = vmul.f32 %v12410_v54, %v17408_v53  ;;  %v9494_v53 = vmul.f32 %v12408_v22, %v18585_v59 }
 0xd08   : > { %v12414_v16 = vpop.eup %12413  ;;  %v9499_v50 = vmul.f32 %v12412_v2, %v17414_v3 }
 0xd09   : > { %v12416_v9 = vpop.eup %12415  ;;  %v9498_v3 = vmul.f32 %v12414_v16, %v18584_v46  ;;  %v18593_v46 = vld [vmem:[#allocation74_spill] sm:$0xff] }
 0xd0a   : > { %v12418_v51 = vpop.eup %12417  ;;  %v9500_v39 = vmul.f32 %v12416_v9, %v17418_v21  ;;  %v9532_v12 = vpack.c.bf16 %v9499_v50, %v9495_v13  ;;  %v9529_v21 = vpack.c.bf16 %v9492_v49, %v9488_v38  ;;  %v3560_v13 = vadd.f32 %v18589_v20, %v3384_v36 }
 0xd0b   : > { %v12420_v33 = vpop.eup %12419  ;;  %v9501_v17 = vmul.f32 %v12418_v51, %v18583_v8  ;;  %v3673_v38 = vadd.f32 %v18591_v29, %v3384_v36  ;;  %v18592_v8 = vld [vmem:[#allocation105_spill] sm:$0xff]  ;;  %v18609_v29 = vld [vmem:[#allocation40_spill] sm:$0xff] }
 0xd0c   : > { %v12422_v57 = vpop.eup %12421  ;;  %v9533_v32 = vpack.c.bf16 %v9500_v39, %v9496_v45  ;;  %v18588_v39 = vld [vmem:[#allocation103_spill] sm:$0xff] }
 0xd0d   : > { %v12424_v44 = vpop.eup %12423  ;;  %v9502_v6 = vmul.f32 %v12422_v57, %v12388_v37  ;;  %v18590_v57 = vld [vmem:[#allocation73_spill] sm:$0xff] }
 0xd0e   : > { %v12426_v61 = vpop.eup %12425  ;;  %9697 = vmatprep.subr.bf16.mxu0 %v9533_v32  ;;  %v9497_v43 = vmul.f32 %v12424_v44, %v12420_v33  ;;  %v3562_v32 = vadd.f32 %v18590_v57, %v3384_v36 }
 0xd0f   : > { %9698 = vmatpush1.bf16.msra.mxu0 %v9532_v12  ;;  %v9535_v35 = vpack.c.bf16 %v9502_v6, %v9498_v3  ;;  %v9490_v28 = vmul.f32 %v12426_v61, %v12400_v56  ;;  %v3675_v3 = vadd.f32 %v18593_v46, %v3384_v36  ;;  %v18594_v6 = vld [vmem:[#allocation104_spill] sm:$0xff]  ;;  %v18601_v36 = vld [vmem:[#allocation19_spill] sm:$0xff] }
 0xd10   : > { %9699 = vmatprep.subr.bf16.mxu0 %v9529_v21  ;;  %v9534_v18 = vpack.c.bf16 %v9501_v17, %v9497_v43  ;;  %v18596_v21 = vld [vmem:[#allocation42_spill] sm:$0xff] }
 0xd11   : > { %9794 = vmatprep.subr.bf16.mxu1 %v9535_v35  ;;  %v9531_v23 = vpack.c.bf16 %v9494_v53, %v9490_v28  ;;  %v18595_v53 = vld [vmem:[#allocation106_spill] sm:$0xff] }
 0xd12   : > { %9795 = vmatpush1.bf16.msra.mxu1 %v9534_v18  ;;  %v18597_v18 = vld [vmem:[#allocation67_spill] sm:$0xff] }
 0xd13   : > { %9796 = vmatprep.subr.bf16.mxu1 %v9531_v23  ;;  %9700 = vmatpush1.bf16.msra.mxu0 %v9528_v4 }
 0xd14   : > { %9701 = vmatprep.subr.bf16.mxu0 %v9525_v5 }
 0xd16   : > { %9797 = vmatpush1.bf16.msra.mxu1 %v9530_v42 }
 0xd17   : > { %9798 = vmatprep.subr.bf16.mxu1 %v9527_v27  ;;  %9702 = vmatpush1.bf16.msra.mxu0 %v9524_v58 }
 0xd18   : > { %9703 = vmatprep.subr.bf16.mxu0 %v9521_v14  ;;  %v5467_v14 = vpop.permute.xlu1 %5466 }
 0xd19   : > { %v5642_v15 = vadd.f32 %v18588_v39, %v5467_v14  ;;  %v5644_v17 = vadd.f32 %v18592_v8, %v5467_v14  ;;  %v5755_v59 = vadd.f32 %v18594_v6, %v5467_v14  ;;  %v5757_v61 = vadd.f32 %v18595_v53, %v5467_v14  ;;  %v18603_v14 = vld [vmem:[#allocation101_spill] sm:$0xff] }
 0xd1a   : > { %9799 = vmatpush1.bf16.msra.mxu1 %v9526_v41  ;;  %v18611_v6 = vld [vmem:[#allocation41_spill] sm:$0xff] }
 0xd1b   : > { %9800 = vmatprep.subr.bf16.mxu1 %v9523_v30  ;;  %9704 = vmatpush1.bf16.msra.mxu0 %v9520_v52  ;;  %v11653_v52 = vld [vmem:[%s18116_s6 + $0xf0] sm:$0xff]   ;;  %v5853_v57 = vadd.f32 %v5755_v59, %v3673_v38 }
 0xd1c   : > { %v7549_v1 = vpop.permute.xlu1 %7548 }
 0xd1d   : > { %v7724_v43 = vadd.f32 %v18596_v21, %v7549_v1 }
 0xd1e   : > { %9801 = vmatpush1.bf16.msra.mxu1 %v9522_v26  ;;  %11194 = vmatmul.mubr.msk.bf16.vlgmr.msra.gmra.mxu0 %vm3426_vm12, %v11647_v47  ;;  %v3379_v26 = vpop.permute.xlu0 %3378 }
 0xd1f   : > { %9727 = vmatprep.mubr.bf16.mxu0 %v18586_v25  ;;  %v3556_v23 = vadd.f32 %v18597_v18, %v3379_v26  ;;  %v18616_v18 = vld [vmem:[#allocation65_spill] sm:$0xff] }
 0xd20   : > { %v17604_v62 = vpop.permute.xlu1 %3373 }
 0xd21   : > { %11202 = vmatmul.mubr.msk.bf16.vlgmr.msra.gmra.mxu1 %vm3426_vm12, %v11647_v47  ;;  %v18598_v47 = vld [vmem:[#allocation69_spill] sm:$0xff] }
 0xd22   : > { %9824 = vmatprep.mubr.bf16.mxu1 %v18586_v25  ;;  %v5462_v30 = vpop.permute.xlu0 %5461 }
 0xd24   : > { %v17608_v55 = vpop.permute.xlu1 %5456 }
 0xd26   : > { %11195 = vmatmul.mubr.msk.bf16.gmra.mxu0 %vm3426_vm12, %v11648_v48  ;;  %v17602_v40 = vpop.permute.xlu0 %7543 }
 0xd27   : > { %9733 = vmatprep.mubr.bf16.mxu0 %v18586_v25  ;;  %v7720_v8 = vadd.f32 %v18609_v29, %v17602_v40 }
 0xd28   : > { %v17612_v41 = vpop.permute.xlu1 %9622 }
 0xd29   : > { %11203 = vmatmul.mubr.msk.bf16.gmra.mxu1 %vm3426_vm12, %v11648_v48  ;;  %18587 = vst [vmem:[#allocation33_spill] sm:$0xff] %v17612_v41  ;;  %v3558_v48 = vadd.f32 %v18598_v47, %v3379_v26  ;;  %v3552_v47 = vadd.f32 %v18616_v18, %v17604_v62  ;;  %v18635_v18 = vld [vmem:[#allocation37_spill] sm:$0xff] }
 0xd2a   : > { %9830 = vmatprep.mubr.bf16.mxu1 %v18586_v25  ;;  %v17606_v7 = vpop.permute.xlu0 %3368  ;;  %v18704_v41 = vld [vmem:[#allocation109_spill] sm:$0xff] }
 0xd2c   : > { %v17616_v24 = vpop.permute.xlu1 %7538 }
 0xd2e   : > { %11196 = vmatmul.mubr.msk.bf16.gmra.mxu0 %vm3426_vm12, %v11649_v19  ;;  %v17610_v58 = vpop.permute.xlu0 %5451 }
 0xd2f   : > { %9739 = vmatprep.mubr.bf16.mxu0 %v18586_v25 }
 0xd30   : > { %v17620_v37 = vpop.permute.xlu1 %3363 }
 0xd31   : > { %11204 = vmatmul.mubr.msk.bf16.gmra.mxu1 %vm3426_vm12, %v11649_v19  ;;  %v18599_v19 = vld [vmem:[#allocation20_spill] sm:$0xff] }
 0xd32   : > { %9836 = vmatprep.mubr.bf16.mxu1 %v18586_v25  ;;  %v17614_v5 = vpop.permute.xlu0 %9617 }
 0xd34   : > { %v17624_v2 = vpop.permute.xlu1 %5446 }
 0xd36   : > { %11197 = vmatmul.mubr.msk.bf16.gmra.mxu0 %vm3426_vm12, %v11650_v11  ;;  %v17618_v0 = vpop.permute.xlu0 %7533 }
 0xd37   : > { %9745 = vmatprep.mubr.bf16.mxu0 %v18586_v25 }
 0xd38   : > { %v17633_v44 = vpop.permute.xlu1 %9612 }
 0xd39   : > { %11205 = vmatmul.mubr.msk.bf16.gmra.mxu1 %vm3426_vm12, %v11650_v11  ;;  %v7726_v11 = vadd.f32 %v18599_v19, %v7549_v1  ;;  %v18617_v19 = vld [vmem:[#allocation95_spill] sm:$0xff] }
 0xd3a   : > { %9842 = vmatprep.mubr.bf16.mxu1 %v18586_v25  ;;  %v17622_v4 = vpop.permute.xlu0 %3358 }
 0xd3c   : > { %v17660_v53 = vpop.permute.xlu1 %7528 }
 0xd3e   : > { %11198 = vmatmul.mubr.msk.bf16.gmra.mxu0 %vm3426_vm12, %v11651_v60  ;;  %v17626_v9 = vpop.permute.xlu0 %5441 }
 0xd3f   : > { %9755 = vmatprep.mubr.bf16.mxu0 %v18586_v25 }
 0xd41   : > { %11206 = vmatmul.mubr.msk.bf16.gmra.mxu1 %vm3426_vm12, %v11651_v60 }
 0xd42   : > { %9852 = vmatprep.mubr.bf16.mxu1 %v18586_v25  ;;  %v17639_v35 = vpop.permute.xlu0 %9607 }
 0xd46   : > { %11199 = vmatmul.mubr.msk.bf16.gmra.mxu0 %vm3426_vm12, %v11652_v10 }
 0xd47   : > { %9765 = vmatprep.mubr.bf16.mxu0 %v18586_v25 }
 0xd49   : > { %11207 = vmatmul.mubr.msk.bf16.gmra.mxu1 %vm3426_vm12, %v11652_v10  ;;  %v5851_v10 = vadd.f32 %v5642_v15, %v3560_v13 }
 0xd4a   : > { %9862 = vmatprep.mubr.bf16.mxu1 %v18586_v25 }
 0xd4b   : > { %v17652_v13 = vadd.f32 %v7724_v43, %v5851_v10 }
 0xd4d   : > { %18608 = vst [vmem:[#allocation22_spill] sm:$0xff] %v17652_v13 }
 0xd4e   : > { %11200 = vmatmul.mubr.msk.bf16.gmra.mxu0 %vm3426_vm12, %v11653_v52 }
 0xd4f   : > { %9775 = vmatprep.mubr.bf16.mxu0 %v18586_v25 }
 0xd51   : > { %11208 = vmatmul.mubr.msk.bf16.gmra.mxu1 %vm3426_vm12, %v11653_v52  ;;  %v18600_v52 = vld [vmem:[#allocation31_spill] sm:$0xff] }
 0xd52   : > { %9872 = vmatprep.mubr.bf16.mxu1 %v18586_v25 }
 0xd56   : > { %11201 = vmatmul.mubr.msk.bf16.gmra.mxu0 %vm3426_vm12, %v11654_v31 }
 0xd57   : > { %10083 = vmatprep.mubr.bf16.mxu0 %v18586_v25 }
 0xd59   : > { %11209 = vmatmul.mubr.msk.bf16.gmra.mxu1 %vm3426_vm12, %v11654_v31  ;;  %v7837_v31 = vadd.f32 %v18600_v52, %v7549_v1  ;;  %v18618_v52 = vld [vmem:[#allocation64_spill] sm:$0xff] }
 0xd5a   : > { %10156 = vmatprep.mubr.bf16.mxu1 %v18586_v25 }
 0xdde   : > { %v9723_v27 = vpop.f32.mrf.mxu0 }
 0xddf   : > { %v7839_v27 = vadd.f32 %v18601_v36, %v7549_v1  ;;  %v5854_v1 = vadd.f32 %v5757_v61, %v3675_v3  ;;  %v17666_v3 = vadd.f32 %v7837_v31, %v5853_v57  ;;  %v18615_v61 = vld [vmem:[#allocation63_spill] sm:$0xff]  ;;  %v3663_v36 = vadd.f32 %v18618_v52, %v17604_v62  ;;  %v18620_v31 = vld [vmem:[#allocation29_spill] sm:$0xff] }
 0xde0   : > { %v9724_v56 = vpop.f32.mrf.mxu0 }
 0xde1   : > { %v9820_v34 = vpop.f32.mrf.mxu1  ;;  %v18602_v56 = vld [vmem:[#allocation99_spill] sm:$0xff]  ;;  %18613 = vst [vmem:[#allocation112_spill] sm:$0xff] %v17666_v3  ;;  %v17668_v59 = vadd.f32 %v7839_v27, %v5854_v1  ;;  %v7835_v27 = vadd.f32 %v18620_v31, %v17602_v40  ;;  %v18630_v1 = vld [vmem:[#allocation62_spill] sm:$0xff] }
 0xde2   : > { %v9725_v63 = vpop.f32.mrf.mxu0  ;;  %v5638_v34 = vadd.f32 %v18602_v56, %v5462_v30  ;;  %v3661_v29 = vadd.f32 %v18630_v1, %v17606_v7  ;;  %v18642_v1 = vld [vmem:[#allocation35_spill] sm:$0xff] }
 0xde3   : > { %v9821_v22 = vpop.f32.mrf.mxu1  ;;  %v5640_v63 = vadd.f32 %v18603_v14, %v5462_v30  ;;  %18614 = vst [vmem:[#allocation34_spill] sm:$0xff] %v17668_v59  ;;  %v18621_v14 = vld [vmem:[#allocation97_spill] sm:$0xff] }
 0xde4   : > { %v9726_v42 = vpop.f32.mrf.mxu0  ;;  %v5847_v43 = vadd.f32 %v5638_v34, %v3556_v23  ;;  %v18619_v23 = vld [vmem:[#allocation66_spill] sm:$0xff] }
 0xde5   : > { %v9822_v54 = vpop.f32.mrf.mxu1  ;;  %v18604_v42 = vld [vmem:[#allocation68_spill] sm:$0xff]  ;;  %v5848_v38 = vadd.f32 %v5640_v63, %v3558_v48  ;;  %v3665_v48 = vadd.f32 %v18619_v23, %v17604_v62  ;;  %v5634_v63 = vadd.f32 %v18621_v14, %v17608_v55  ;;  %v18638_v23 = vld [vmem:[#allocation27_spill] sm:$0xff] }
 0xde6   : > { %v9729_v16 = vpop.f32.mrf.mxu0  ;;  %v3669_v54 = vadd.f32 %v18604_v42, %v3379_v26  ;;  %v17684_v42 = vadd.f32 %v7720_v8, %v5847_v43  ;;  %v18631_v8 = vld [vmem:[#allocation91_spill] sm:$0xff]  ;;  %v7829_v31 = vadd.f32 %v18638_v23, %v17616_v24 }
 0xde7   : > { %v9823_v50 = vpop.f32.mrf.mxu1  ;;  %v18605_v16 = vld [vmem:[#allocation70_spill] sm:$0xff]  ;;  %v5844_v14 = vadd.f32 %v5634_v63, %v3552_v47 }
 0xde8   : > { %v9730_v51 = vpop.f32.mrf.mxu0  ;;  %v3671_v50 = vadd.f32 %v18605_v16, %v3379_v26  ;;  %v7833_v26 = vadd.f32 %v18611_v6, %v17602_v40  ;;  %18622 = vst [vmem:[#allocation21_spill] sm:$0xff] %v17684_v42 }
 0xde9   : > { %v9826_v45 = vpop.f32.mrf.mxu1  ;;  %v18606_v51 = vld [vmem:[#allocation100_spill] sm:$0xff] }
 0xdea   : > { %v9731_v49 = vpop.f32.mrf.mxu0  ;;  %v5751_v45 = vadd.f32 %v18606_v51, %v5462_v30  ;;  %v18625_v51 = vld [vmem:[#allocation96_spill] sm:$0xff] }
 0xdeb   : > { %v9827_v33 = vpop.f32.mrf.mxu1  ;;  %v5852_v49 = vadd.f32 %v5644_v17, %v3562_v32 }
 0xdec   : > { %v9732_v12 = vpop.f32.mrf.mxu0  ;;  %v18607_v33 = vld [vmem:[#allocation102_spill] sm:$0xff]  ;;  %v5849_v10 = vadd.f32 %v5751_v45, %v3669_v54  ;;  %v5745_v45 = vadd.f32 %v18625_v51, %v17608_v55 }
 0xded   : > { %v9828_v28 = vpop.f32.mrf.mxu1  ;;  %v5753_v20 = vadd.f32 %v18607_v33, %v5462_v30  ;;  %v18610_v12 = vld [vmem:[#allocation30_spill] sm:$0xff]  ;;  %v17662_v32 = vadd.f32 %v7726_v11, %v5852_v49  ;;  %v17664_v30 = vpop.permute.xlu0 %7523 }
 0xdee   : > { %v9735_v60 = vpop.f32.mrf.mxu0  ;;  %v7722_v46 = vadd.f32 %v18610_v12, %v17602_v40  ;;  %v3550_v28 = vadd.f32 %v18615_v61, %v17604_v62  ;;  %v17688_v54 = vadd.f32 %v7833_v26, %v5849_v10  ;;  %v18626_v62 = vld [vmem:[#allocation98_spill] sm:$0xff]  ;;  %v18627_v40 = vld [vmem:[#allocation59_spill] sm:$0xff]  ;;  %v5628_v12 = vadd.f32 %v18631_v8, %v17610_v58  ;;  %v18632_v26 = vld [vmem:[#allocation93_spill] sm:$0xff] }
 0xdef   : > { %v9829_v22 = vpop.f32.mrf.mxu1  ;;  %18612 = vst [vmem:[#allocation32_spill] sm:$0xff] %v17662_v32  ;;  %v5632_v60 = vadd.f32 %v18617_v19, %v17608_v55  ;;  %v5850_v34 = vadd.f32 %v5753_v20, %v3671_v50  ;;  %v3546_v49 = vadd.f32 %v18627_v40, %v17606_v7  ;;  %v18628_v50 = vld [vmem:[#allocation61_spill] sm:$0xff]  ;;  %v7714_v19 = vadd.f32 %v18635_v18, %v17616_v24  ;;  %v18636_v10 = vld [vmem:[#allocation28_spill] sm:$0xff] }
 0xdf0   : > { %v9736_v39 = vpop.f32.mrf.mxu0  ;;  %v17686_v16 = vadd.f32 %v7722_v46, %v5848_v38  ;;  %18624 = vst [vmem:[#allocation71_spill] sm:$0xff] %v17688_v54  ;;  %v3548_v33 = vadd.f32 %v18628_v50, %v17606_v7  ;;  %v17704_v46 = vpop.permute.xlu1 %3353  ;;  %v18634_v38 = vld [vmem:[#allocation94_spill] sm:$0xff]  ;;  %v7716_v52 = vadd.f32 %v18636_v10, %v17616_v24  ;;  %v7823_v8 = vadd.f32 %v18642_v1, %v17618_v0  ;;  %v18662_v1 = vld [vmem:[#allocation52_spill] sm:$0xff] }
 0xdf1   : > { %v9832_v15 = vpop.f32.mrf.mxu1  ;;  %v5747_v39 = vadd.f32 %v18626_v62, %v17608_v55  ;;  %v5843_v55 = vadd.f32 %v5632_v60, %v3550_v28  ;;  %v5743_v61 = vadd.f32 %v18634_v38, %v17610_v58  ;;  %v18637_v28 = vld [vmem:[#allocation39_spill] sm:$0xff]  ;;  %v5845_v62 = vadd.f32 %v5745_v45, %v3663_v36 }
 0xdf2   : > { %v9737_v21 = vpop.f32.mrf.mxu0  ;;  %18623 = vst [vmem:[#allocation103_spill] sm:$0xff] %v17686_v16  ;;  %v18629_v15 = vld [vmem:[#allocation60_spill] sm:$0xff]  ;;  %v7827_v60 = vadd.f32 %v18637_v28, %v17616_v24  ;;  %v17724_v50 = vadd.f32 %v7835_v27, %v5850_v34 }
 0xdf3   : > { %v9833_v17 = vpop.f32.mrf.mxu1  ;;  %v3659_v57 = vadd.f32 %v18629_v15, %v17606_v7  ;;  %v5630_v21 = vadd.f32 %v18632_v26, %v17610_v58  ;;  %v17714_v7 = vpop.permute.xlu0 %3348  ;;  %v5846_v40 = vadd.f32 %v5747_v39, %v3665_v48  ;;  %v17732_v18 = vadd.f32 %v7714_v19, %v5843_v55  ;;  %v18645_v48 = vld [vmem:[#allocation55_spill] sm:$0xff] }
 0xdf4   : > { %v9738_v11 = vpop.f32.mrf.mxu0  ;;  %v18633_v17 = vld [vmem:[#allocation92_spill] sm:$0xff]  ;;  %18640 = vst [vmem:[#allocation73_spill] sm:$0xff] %v17724_v50  ;;  %v5842_v36 = vadd.f32 %v5743_v61, %v3661_v29  ;;  %v3540_v27 = vadd.f32 %v18645_v48, %v17620_v37  ;;  %v17736_v34 = vpop.permute.xlu1 %5436  ;;  %v17740_v39 = vadd.f32 %v7716_v52, %v5844_v14  ;;  %v18651_v29 = vld [vmem:[#allocation58_spill] sm:$0xff]  ;;  %v18653_v19 = vld [vmem:[#allocation87_spill] sm:$0xff] }
 0xdf5   : > { %v9834_v56 = vpop.f32.mrf.mxu1  ;;  %v5741_v43 = vadd.f32 %v18633_v17, %v17610_v58  ;;  %v5839_v17 = vadd.f32 %v5628_v12, %v3546_v49  ;;  %v5840_v63 = vadd.f32 %v5630_v21, %v3548_v33  ;;  %18644 = vst [vmem:[#allocation72_spill] sm:$0xff] %v17732_v18  ;;  %v18649_v49 = vld [vmem:[#allocation57_spill] sm:$0xff]  ;;  %v3655_v55 = vadd.f32 %v18651_v29, %v17620_v37  ;;  %v18667_v48 = vld [vmem:[#allocation86_spill] sm:$0xff]  ;;  %v18700_v18 = vld [vmem:[#allocation76_spill] sm:$0xff] }
 0xdf6   : > { %v9741_v22 = vpop.f32.mrf.mxu0  ;;  %18646 = vst [vmem:[#allocation105_spill] sm:$0xff] %v17740_v39  ;;  %v3542_v33 = vadd.f32 %v18649_v49, %v17620_v37  ;;  %v5622_v10 = vadd.f32 %v18653_v19, %v17624_v2  ;;  %v5733_v49 = vadd.f32 %v18667_v48, %v17626_v9  ;;  %v18669_v19 = vld [vmem:[#allocation43_spill] sm:$0xff] }
 0xdf7   : > { %v9835_v20 = vpop.f32.mrf.mxu1  ;;  %v18639_v22 = vld [vmem:[#allocation45_spill] sm:$0xff]  ;;  %v5841_v38 = vadd.f32 %v5741_v43, %v3659_v57  ;;  %v18650_v57 = vld [vmem:[#allocation56_spill] sm:$0xff]  ;;  %v17752_v21 = vpop.permute.xlu0 %5431 }
 0xdf8   : > { %v9742_v6 = vpop.f32.mrf.mxu0  ;;  %v7710_v58 = vadd.f32 %v18639_v22, %v17618_v0  ;;  %v18641_v20 = vld [vmem:[#allocation38_spill] sm:$0xff]  ;;  %v3653_v12 = vadd.f32 %v18650_v57, %v17620_v37  ;;  %v18658_v37 = vld [vmem:[#allocation88_spill] sm:$0xff] }
 0xdf9   : > { %v9838_v11 = vpop.f32.mrf.mxu1  ;;  %v7712_v15 = vadd.f32 %v18641_v20, %v17618_v0  ;;  %v18643_v6 = vld [vmem:[#allocation36_spill] sm:$0xff]  ;;  %v5735_v14 = vadd.f32 %v18658_v37, %v17624_v2  ;;  %v18659_v22 = vld [vmem:[#allocation90_spill] sm:$0xff]  ;;  %v18661_v20 = vld [vmem:[#allocation53_spill] sm:$0xff] }
 0xdfa   : > { %v9743_v56 = vpop.f32.mrf.mxu0  ;;  %v7825_v26 = vadd.f32 %v18643_v6, %v17618_v0  ;;  %v17742_v11 = vadd.f32 %v7827_v60, %v5845_v62  ;;  %v17744_v0 = vadd.f32 %v7829_v31, %v5846_v40  ;;  %v17754_v61 = vadd.f32 %v7710_v58, %v5839_v17  ;;  %v18657_v31 = vld [vmem:[#allocation89_spill] sm:$0xff]  ;;  %v18663_v6 = vld [vmem:[#allocation83_spill] sm:$0xff]  ;;  %v18668_v57 = vld [vmem:[#allocation46_spill] sm:$0xff] }
 0xdfb   : > { %v9839_v51 = vpop.f32.mrf.mxu1  ;;  %v17760_v28 = vadd.f32 %v7712_v15, %v5840_v63  ;;  %v17762_v60 = vadd.f32 %v7823_v8, %v5841_v38  ;;  %v5624_v56 = vadd.f32 %v18657_v31, %v17624_v2  ;;  %v5737_v58 = vadd.f32 %v18659_v22, %v17624_v2  ;;  %v18665_v2 = vld [vmem:[#allocation54_spill] sm:$0xff]  ;;  %v18666_v38 = vld [vmem:[#allocation84_spill] sm:$0xff]  ;;  %v18670_v37 = vld [vmem:[#allocation47_spill] sm:$0xff] }
 0xdfc   : > { %v9744_v24 = vpop.f32.mrf.mxu0  ;;  %18647 = vst [vmem:[#allocation74_spill] sm:$0xff] %v17742_v11  ;;  %18648 = vst [vmem:[#allocation104_spill] sm:$0xff] %v17744_v0  ;;  %v17764_v23 = vadd.f32 %v7825_v26, %v5842_v36  ;;  %v18660_v51 = vld [vmem:[#allocation51_spill] sm:$0xff]  ;;  %v3538_v15 = vadd.f32 %v18661_v20, %v17622_v4  ;;  %v3649_v8 = vadd.f32 %v18662_v1, %v17622_v4  ;;  %v17802_v20 = vpop.permute.xlu1 %9602 }
 0xdfd   : > { %v9840_v47 = vpop.f32.mrf.mxu1  ;;  %18652 = vst [vmem:[#allocation106_spill] sm:$0xff] %v17754_v61  ;;  %18654 = vst [vmem:[#allocation42_spill] sm:$0xff] %v17760_v28  ;;  %v3536_v62 = vadd.f32 %v18660_v51, %v17622_v4  ;;  %v5618_v26 = vadd.f32 %v18663_v6, %v17626_v9  ;;  %v18664_v24 = vld [vmem:[#allocation85_spill] sm:$0xff]  ;;  %v3651_v63 = vadd.f32 %v18665_v2, %v17622_v4  ;;  %v18671_v51 = vld [vmem:[#allocation44_spill] sm:$0xff]  ;;  %v17808_v2 = vpop.permute.xlu0 %9597 }
 0xdfe   : > { %v17738_v45 = vpop.f32.mrf.mxu0  ;;  %18655 = vst [vmem:[#allocation67_spill] sm:$0xff] %v17762_v60  ;;  %18656 = vst [vmem:[#allocation69_spill] sm:$0xff] %v17764_v23  ;;  %v5620_v17 = vadd.f32 %v18664_v24, %v17626_v9  ;;  %v5731_v36 = vadd.f32 %v18666_v38, %v17626_v9  ;;  %v7704_v29 = vadd.f32 %v18668_v57, %v17660_v53  ;;  %v18672_v9 = vld [vmem:[#allocation77_spill] sm:$0xff] }
 0xdff   : > { %v9841_v43 = vpop.f32.mrf.mxu1  ;;  %v7706_v31 = vadd.f32 %v18669_v19, %v17660_v53  ;;  %v7817_v22 = vadd.f32 %v18670_v37, %v17660_v53  ;;  %v7819_v4 = vadd.f32 %v18671_v51, %v17660_v53  ;;  %v5835_v6 = vadd.f32 %v5622_v10, %v3540_v27  ;;  %v18673_v37 = vld [vmem:[#allocation49_spill] sm:$0xff]  ;;  %v18674_v53 = vld [vmem:[#allocation75_spill] sm:$0xff]  ;;  %v18675_v10 = vld [vmem:[#allocation48_spill] sm:$0xff] }
 0xe00   : > { %v17758_v52 = vpop.f32.mrf.mxu0  ;;  %v7700_v24 = vadd.f32 %v18672_v9, %v17664_v30  ;;  %v5836_v48 = vadd.f32 %v5624_v56, %v3542_v33  ;;  %v5837_v57 = vadd.f32 %v5735_v14, %v3653_v12  ;;  %v5838_v19 = vadd.f32 %v5737_v58, %v3655_v55  ;;  %v18676_v12 = vld [vmem:[#allocation14_spill] sm:$0xff] }
 0xe01   : > { %v17774_v40 = vpop.f32.mrf.mxu1  ;;  %v7702_v25 = vadd.f32 %v18673_v37, %v17664_v30  ;;  %v7813_v51 = vadd.f32 %v18674_v53, %v17664_v30  ;;  %v5831_v60 = vadd.f32 %v5618_v26, %v3536_v62  ;;  %v5832_v27 = vadd.f32 %v5620_v17, %v3538_v15  ;;  %v18679_v15 = vld [vmem:[#allocation18_spill] sm:$0xff]  ;;  %v18680_v26 = vld [vmem:[#allocation17_spill] sm:$0xff]  ;;  %v18685_v37 = vld [vmem:[#allocation80_spill] sm:$0xff] }
 0xe02   : > { %v17784_v47 = vpop.f32.mrf.mxu0  ;;  %v7815_v9 = vadd.f32 %v18675_v10, %v17664_v30  ;;  %v5833_v23 = vadd.f32 %v5731_v36, %v3649_v8  ;;  %v17822_v54 = vadd.f32 %v7704_v29, %v5835_v6  ;;  %v5834_v33 = vadd.f32 %v5733_v49, %v3651_v63  ;;  %v18681_v17 = vld [vmem:[#allocation50_spill] sm:$0xff]  ;;  %v18682_v29 = vld [vmem:[#allocation25_spill] sm:$0xff]  ;;  %v7519_v6 = vpop.permute.xlu1 %7518 }
 0xe03   : > { %v17794_v43 = vpop.f32.mrf.mxu1  ;;  %v3530_v55 = vadd.f32 %v18676_v12, %v17704_v46  ;;  %v17828_v14 = vadd.f32 %v7706_v31, %v5836_v48  ;;  %v17830_v58 = vadd.f32 %v7817_v22, %v5837_v57  ;;  %v17832_v62 = vadd.f32 %v7819_v4, %v5838_v19  ;;  %v18683_v22 = vld [vmem:[#allocation81_spill] sm:$0xff]  ;;  %v7514_v12 = vpop.permute.xlu0 %7513 }
 0xe04   : > { %v17804_v1 = vpop.f32.mrf.mxu0  ;;  %v3532_v30 = vadd.f32 %v18679_v15, %v17704_v46  ;;  %v3643_v8 = vadd.f32 %v18680_v26, %v17704_v46  ;;  %v3645_v63 = vadd.f32 %v18681_v17, %v17704_v46  ;;  %v17840_v36 = vadd.f32 %v7700_v24, %v5831_v60  ;;  %v18686_v46 = vld [vmem:[#allocation82_spill] sm:$0xff]  ;;  %v18687_v24 = vld [vmem:[#allocation15_spill] sm:$0xff]  ;;  %v18691_v17 = vld [vmem:[#allocation13_spill] sm:$0xff] }
 0xe05   : > { %v17810_v38 = vpop.f32.mrf.mxu1  ;;  %18677 = vst [vmem:[#allocation20_spill] sm:$0xff] %v17830_v58  ;;  %18678 = vst [vmem:[#allocation31_spill] sm:$0xff] %v17832_v62  ;;  %v5612_v31 = vadd.f32 %v18682_v29, %v17736_v34  ;;  %v5614_v4 = vadd.f32 %v18683_v22, %v17736_v34  ;;  %v17848_v48 = vadd.f32 %v7702_v25, %v5832_v27  ;;  %v18689_v25 = vld [vmem:[#allocation16_spill] sm:$0xff]  ;;  %v18692_v22 = vld [vmem:[#allocation23_spill] sm:$0xff] }
 0xe06   : > { %v17816_v11 = vpop.f32.mrf.mxu0  ;;  %v17850_v57 = vadd.f32 %v7813_v51, %v5833_v23  ;;  %v5725_v53 = vadd.f32 %v18685_v37, %v17736_v34  ;;  %v5727_v60 = vadd.f32 %v18686_v46, %v17736_v34  ;;  %v3526_v10 = vadd.f32 %v18687_v24, %v17714_v7  ;;  %v18690_v23 = vld [vmem:[#allocation26_spill] sm:$0xff]  ;;  %v18693_v46 = vld [vmem:[#allocation24_spill] sm:$0xff]  ;;  %v9593_v39 = vpop.permute.xlu1 %9592 }
 0xe07   : > { %v17820_v59 = vpop.f32.mrf.mxu1  ;;  %v17858_v15 = vadd.f32 %v7815_v9, %v5834_v33  ;;  %v3528_v27 = vadd.f32 %v18689_v25, %v17714_v7  ;;  %v3639_v51 = vadd.f32 %v18690_v23, %v17714_v7  ;;  %v3641_v29 = vadd.f32 %v18691_v17, %v17714_v7  ;;  %v18694_v9 = vld [vmem:[#allocation11_spill] sm:$0xff]  ;;  %v18699_v7 = vld [vmem:[#allocation78_spill] sm:$0xff] }
 0xe08   : > { %v17826_v56 = vpop.f32.mrf.mxu0  ;;  %18684 = vst [vmem:[#allocation19_spill] sm:$0xff] %v17850_v57  ;;  %v5608_v34 = vadd.f32 %v18692_v22, %v17752_v21  ;;  %v5610_v24 = vadd.f32 %v18693_v46, %v17752_v21  ;;  %v5721_v33 = vadd.f32 %v18694_v9, %v17752_v21  ;;  %v18695_v57 = vld [vmem:[#allocation12_spill] sm:$0xff]  ;;  %v18696_v25 = vld [vmem:[#allocation107_spill] sm:$0xff]  ;;  %v7807_v17 = vadd.f32 %v18699_v7, %v7519_v6  ;;  %v18701_v46 = vld [vmem:[#allocation110_spill] sm:$0xff]  ;;  %v9588_v7 = vpop.permute.xlu0 %9587 }
 0xe09   : > { %v17842_v49 = vpop.f32.mrf.mxu1  ;;  %18688 = vst [vmem:[#allocation99_spill] sm:$0xff] %v17858_v15  ;;  %v5723_v58 = vadd.f32 %v18695_v57, %v17752_v21  ;;  %v7694_v15 = vadd.f32 %v18696_v25, %v7519_v6  ;;  %v18698_v23 = vld [vmem:[#allocation79_spill] sm:$0xff]  ;;  %v5827_v32 = vadd.f32 %v5612_v31, %v3530_v55  ;;  %v5828_v22 = vadd.f32 %v5614_v4, %v3532_v30  ;;  %v18702_v21 = vld [vmem:[#allocation108_spill] sm:$0xff] }
 0xe0a   : > { %v9761_v19 = vpop.f32.mrf.mxu0  ;;  %v7696_v50 = vadd.f32 %v18698_v23, %v7519_v6  ;;  %v7809_v42 = vadd.f32 %v18700_v18, %v7519_v6  ;;  %v7690_v28 = vadd.f32 %v18701_v46, %v7514_v12  ;;  %v5829_v13 = vadd.f32 %v5725_v53, %v3643_v8  ;;  %v18703_v25 = vld [vmem:[#allocation111_spill] sm:$0xff] }
 0xe0b   : > { %v17860_v26 = vpop.f32.mrf.mxu1  ;;  %v5830_v9 = vadd.f32 %v5727_v60, %v3645_v63  ;;  %v7692_v57 = vadd.f32 %v18702_v21, %v7514_v12  ;;  %v7803_v62 = vadd.f32 %v18703_v25, %v7514_v12  ;;  %v7805_v61 = vadd.f32 %v18704_v41, %v7514_v12 }
 0xe0c   : > { %v9763_v37 = vpop.f32.mrf.mxu0  ;;  %v5823_v23 = vadd.f32 %v5608_v34, %v3526_v10  ;;  %v5824_v55 = vadd.f32 %v5610_v24, %v3528_v27  ;;  %v5825_v30 = vadd.f32 %v5721_v33, %v3639_v51  ;;  %v7909_v31 = vadd.f32 %v7694_v15, %v5827_v32 }
 0xe0d   : > { %v17877_v3 = vpop.f32.mrf.mxu1  ;;  %v5826_v4 = vadd.f32 %v5723_v58, %v3641_v29  ;;  %v9750_v6 = vadd.f32 %v17758_v52, %v9588_v7  ;;  %v9752_v8 = vadd.f32 %v17784_v47, %v9593_v39  ;;  %v7910_v63 = vadd.f32 %v7696_v50, %v5828_v22 }
 0xe0e   : > { %18697 = vst [vmem:[#allocation101_spill] sm:$0xff] %v17877_v3  ;;  %v9767_v0 = vpop.f32.mrf.mxu0  ;;  %v17888_v53 = vadd.f32 %v7807_v17, %v5829_v13  ;;  %v17890_v46 = vadd.f32 %v7690_v28, %v5823_v23  ;;  %v9754_v41 = vadd.f32 %v17804_v1, %v9593_v39  ;;  %v9758_v10 = vadd.f32 %v17816_v11, %v17808_v2 }
 0xe0f   : > { %v9860_v16 = vpop.f32.mrf.mxu1  ;;  %v7912_v12 = vadd.f32 %v7809_v42, %v5830_v9  ;;  %v7906_v32 = vadd.f32 %v7692_v57, %v5824_v55  ;;  %v17895_v58 = vadd.f32 %v7803_v62, %v5825_v30  ;;  %v17897_v15 = vadd.f32 %v7805_v61, %v5826_v4  ;;  %v18706_v57 = vld [vmem:[#allocation106_spill] sm:$0xff]  ;;  %v18708_v55 = vld [vmem:[#allocation31_spill] sm:$0xff] }
 0xe10   : > { %v9769_v3 = vpop.f32.mrf.mxu0  ;;  %v9851_v52 = vadd.f32 %v17820_v59, %v9593_v39  ;;  %v17901_v13 = vadd.f32 %v17738_v45, %v9588_v7  ;;  %v17904_v28 = vadd.f32 %v17774_v40, %v9588_v7  ;;  %v9760_v47 = vadd.f32 %v17826_v56, %v17808_v2 }
 0xe11   : > { %v9864_v18 = vpop.f32.mrf.mxu1  ;;  %v9762_v42 = vadd.f32 %v9761_v19, %v17802_v20  ;;  %v17909_v1 = vadd.f32 %v9750_v6, %v7906_v32  ;;  %v17911_v62 = vadd.f32 %v9752_v8, %v7909_v31  ;;  %v17914_v61 = vadd.f32 %v17794_v43, %v9588_v7  ;;  %v18710_v6 = vld [vmem:[#allocation103_spill] sm:$0xff]  ;;  %v18712_v32 = vld [vmem:[#allocation42_spill] sm:$0xff] }
 0xe12   : > { %v9771_v60 = vpop.f32.mrf.mxu0  ;;  %v9764_v59 = vadd.f32 %v9763_v37, %v17802_v20  ;;  %v17917_v51 = vadd.f32 %v9754_v41, %v7910_v63  ;;  %v17920_v40 = vadd.f32 %v17810_v38, %v9593_v39  ;;  %v17923_v56 = vadd.f32 %v9758_v10, %v17840_v36 }
 0xe13   : > { %v9866_v27 = vpop.f32.mrf.mxu1  ;;  %v9768_v19 = vadd.f32 %v9767_v0, %v17639_v35  ;;  %v17926_v34 = vadd.f32 %v9851_v52, %v7912_v12  ;;  %v17930_v43 = vadd.f32 %v17842_v49, %v17808_v2  ;;  %v9861_v37 = vadd.f32 %v9860_v16, %v17802_v20 }
 0xe14   : > { %v9773_v50 = vpop.f32.mrf.mxu0  ;;  %v17935_v39 = vadd.f32 %v9760_v47, %v17848_v48  ;;  %v17938_v38 = vadd.f32 %v9762_v42, %v17822_v54  ;;  %v9857_v0 = vadd.f32 %v17860_v26, %v17808_v2  ;;  %v17944_v49 = vadd.f32 %v9764_v59, %v17828_v14  ;;  %v18707_v26 = vld [vmem:[#allocation33_spill] sm:$0xff]  ;;  %v18714_v59 = vld [vmem:[#allocation72_spill] sm:$0xff] }
 0xe15   : > { %v9868_v11 = vpop.f32.mrf.mxu1  ;;  %v9774_v24 = vadd.f32 %v9773_v50, %v17633_v44  ;;  %v18705_v16 = vld [vmem:[#allocation101_spill] sm:$0xff]  ;;  %v9770_v9 = vadd.f32 %v9769_v3, %v17639_v35  ;;  %v9899_v54 = vadd.f32 %v9768_v19, %v18706_v57  ;;  %v9772_v25 = vadd.f32 %v9771_v60, %v17633_v44  ;;  %v18711_v60 = vld [vmem:[#allocation22_spill] sm:$0xff]  ;;  %v18719_v57 = vld [vmem:[#allocation71_spill] sm:$0xff] }
 0xe16   : > { %v9777_v45 = vpop.f32.mrf.mxu0  ;;  %v9859_v22 = vadd.f32 %v18705_v16, %v17802_v20  ;;  %v17955_v14 = vadd.f32 %v9861_v37, %v18708_v55  ;;  %v9865_v30 = vadd.f32 %v9864_v18, %v17639_v35  ;;  %v18709_v20 = vld [vmem:[#allocation105_spill] sm:$0xff]  ;;  %v9867_v50 = vadd.f32 %v9866_v27, %v17639_v35 }
 0xe17   : > { %v9870_v29 = vpop.f32.mrf.mxu1  ;;  %v9778_v48 = vadd.f32 %v9777_v45, %v17614_v5  ;;  %v9904_v31 = vadd.f32 %v9774_v24, %v18709_v20  ;;  %v9900_v52 = vadd.f32 %v9770_v9, %v18712_v32  ;;  %v18713_v47 = vld [vmem:[#allocation21_spill] sm:$0xff]  ;;  %v9903_v45 = vadd.f32 %v9772_v25, %v18714_v59 }
 0xe18   : > { %v9779_v33 = vpop.f32.mrf.mxu0  ;;  %v9871_v2 = vadd.f32 %v9870_v29, %v17633_v44  ;;  %v9869_v19 = vadd.f32 %v9868_v11, %v17633_v44  ;;  %v18715_v29 = vld [vmem:[#allocation104_spill] sm:$0xff]  ;;  %v18720_v55 = vld [vmem:[#allocation69_spill] sm:$0xff] }
 0xe19   : > { %v9780_v36 = vadd.f32 %v9779_v33, %v17614_v5  ;;  %v9874_v17 = vpop.f32.mrf.mxu1  ;;  %v9907_v18 = vadd.f32 %v9778_v48, %v18713_v47  ;;  %v9936_v27 = vmax.f32 %v9904_v31, 0.0  ;;  %v9932_v25 = vmax.f32 %v9900_v52, 0.0 }
 0xe1a   : > { %v9781_v21 = vpop.f32.mrf.mxu0  ;;  %v9875_v63 = vadd.f32 %v9874_v17, %v17614_v5  ;;  %v9906_v37 = vadd.f32 %v9871_v2, %v18715_v29  ;;  %v18717_v17 = vld [vmem:[#allocation73_spill] sm:$0xff]  ;;  %v9902_v44 = vadd.f32 %v9867_v50, %v18720_v55  ;;  %v18721_v2 = vld [vmem:[#allocation34_spill] sm:$0xff]  ;;  %v9928_v31 = vmax.f32 %v17944_v49, 0.0  ;;  %v18724_v50 = vld [vmem:[#allocation99_spill] sm:$0xff] }
 0xe1b   : > { %v9782_v23 = vadd.f32 %v9781_v21, %v18707_v26  ;;  %v9876_v7 = vpop.f32.mrf.mxu1  ;;  %v9908_v8 = vadd.f32 %v9780_v36, %v18710_v6  ;;  %v18718_v21 = vld [vmem:[#allocation112_spill] sm:$0xff]  ;;  %v9939_v11 = vmax.f32 %v9907_v18, 0.0  ;;  %v18722_v6 = vld [vmem:[#allocation74_spill] sm:$0xff]  ;;  %v9964_v52 = vpack.c.bf16 %v9936_v27, %v9932_v25 }
 0xe1c   : > { %v9877_v3 = vadd.f32 %v9876_v7, %v17614_v5  ;;  %v9783_v4 = vpop.f32.mrf.mxu0  ;;  %v18716_v5 = vld [vmem:[#allocation32_spill] sm:$0xff]  ;;  %v9894_v18 = vadd.f32 %v9857_v0, %v18724_v50  ;;  %v9934_v59 = vmax.f32 %v9902_v44, 0.0  ;;  %v9927_v49 = vmax.f32 %v17938_v38, 0.0  ;;  %v11657_v55 = vld [vmem:[%s18118_s8 + $0x10] sm:$0xff]   ;;  %v11658_v44 = vld [vmem:[%s18118_s8 + $0x18] sm:$0xff]  }
 0xe1d   : > { %v9911_v41 = vadd.f32 %v9782_v23, %v18711_v60  ;;  %v9784_v10 = vadd.f32 %v9783_v4, %v18707_v26  ;;  %v9878_v12 = vpop.f32.mrf.mxu1  ;;  %v9940_v48 = vmax.f32 %v9908_v8, 0.0  ;;  %v9909_v23 = vadd.f32 %v9875_v63, %v18719_v57  ;;  %v18723_v8 = vld [vmem:[#allocation67_spill] sm:$0xff]  ;;  %v18725_v29 = vld [vmem:[#allocation20_spill] sm:$0xff] }
 0xe1e   : > { %v9879_v42 = vadd.f32 %v9878_v12, %v18707_v26  ;;  %v9910_v16 = vadd.f32 %v9877_v3, %v18717_v17  ;;  %v9935_v4 = vmax.f32 %v9903_v45, 0.0  ;;  %v9905_v60 = vadd.f32 %v9869_v19, %v18722_v6  ;;  %v11656_v25 = vld [vmem:[%s18118_s8 + $0x8] sm:$0xff]  }
 0xe1f   : > { %v9912_v24 = vadd.f32 %v9784_v10, %v18716_v5  ;;  %v9880_v33 = vpop.f32.mrf.mxu1  ;;  %v9943_v36 = vmax.f32 %v9911_v41, 0.0  ;;  %v9938_v10 = vmax.f32 %v9906_v37, 0.0  ;;  %v9901_v63 = vadd.f32 %v9865_v30, %v18723_v8 }
 0xe20   : > { %v9913_v9 = vadd.f32 %v9879_v42, %v18718_v21  ;;  %v9881_v35 = vadd.f32 %v9880_v33, %v18707_v26  ;;  %v9942_v32 = vmax.f32 %v9910_v16, 0.0  ;;  %v9941_v47 = vmax.f32 %v9909_v23, 0.0 }
 0xe21   : > { %v9944_v7 = vmax.f32 %v9912_v24, 0.0  ;;  %v9967_v12 = vpack.c.bf16 %v9943_v36, %v9939_v11  ;;  %v9931_v42 = vmax.f32 %v9899_v54, 0.0  ;;  %v9924_v19 = vmax.f32 %v17935_v39, 0.0  ;;  %v18726_v54 = vld [vmem:[#allocation19_spill] sm:$0xff]  ;;  %v9982_v11 = vpop.permute.xlu0 %9981 }
 0xe22   : > { %v9914_v20 = vadd.f32 %v9881_v35, %v18721_v2  ;;  %v9945_v41 = vmax.f32 %v9913_v9, 0.0  ;;  %v9897_v37 = vadd.f32 %v9859_v22, %v18725_v29  ;;  %v9937_v5 = vmax.f32 %v9905_v60, 0.0  ;;  %v9987_v2 = vpop.permute.xlu1 %9986 }
 0xe23   : > { %v9968_v3 = vpack.c.bf16 %v9944_v7, %v9940_v48  ;;  %v9930_v30 = vmax.f32 %v17955_v14, 0.0  ;;  %v9963_v33 = vpack.c.bf16 %v9935_v4, %v9931_v42  ;;  %v9966_v36 = vpack.c.bf16 %v9938_v10, %v9934_v59 }
 0xe24   : > { %v9946_v26 = vmax.f32 %v9914_v20, 0.0  ;;  %v9969_v24 = vpack.c.bf16 %v9945_v41, %v9941_v47  ;;  %v9920_v0 = vmax.f32 %v17917_v51, 0.0  ;;  %v9893_v17 = vadd.f32 %v17930_v43, %v18726_v54 }
 0xe25   : > { %10059 = vmatprep.subr.bf16.mxu0 %v9968_v3  ;;  %v9933_v16 = vmax.f32 %v9901_v63, 0.0  ;;  %v9960_v39 = vpack.c.bf16 %v9928_v31, %v9924_v19  ;;  %v9883_v22 = vadd.f32 %v17901_v13, %v17890_v46  ;;  %v9886_v21 = vadd.f32 %v17914_v61, %v17897_v15  ;;  %v9992_v20 = vpop.permute.xlu0 %9991 }
 0xe26   : > { %10060 = vmatpush1.bf16.msra.mxu0 %v9967_v12  ;;  %v9970_v45 = vpack.c.bf16 %v9946_v26, %v9942_v32  ;;  %v9923_v38 = vmax.f32 %v17923_v56, 0.0  ;;  %v9926_v14 = vmax.f32 %v9894_v18, 0.0  ;;  %v9916_v9 = vmax.f32 %v17909_v1, 0.0  ;;  %v18027_v4 = vpop.permute.xlu1 %9996 }
 0xe27   : > { %10061 = vmatprep.subr.bf16.mxu0 %v9964_v52  ;;  %v9889_v51 = vadd.f32 %v17920_v40, %v17888_v53  ;;  %v9929_v43 = vmax.f32 %v9897_v37, 0.0  ;;  %v9965_v35 = vpack.c.bf16 %v9937_v5, %v9933_v16  ;;  %v9919_v27 = vmax.f32 %v17911_v62, 0.0 }
 0xe28   : > { %10132 = vmatprep.subr.bf16.mxu1 %v9970_v45  ;;  %v9922_v46 = vmax.f32 %v17926_v34, 0.0  ;;  %v9959_v13 = vpack.c.bf16 %v9927_v49, %v9923_v38  ;;  %v9962_v48 = vpack.c.bf16 %v9930_v30, %v9926_v14  ;;  %v9885_v15 = vadd.f32 %v17904_v28, %v17895_v58  ;;  %v11655_v34 = vld [vmem:[%s18118_s8] sm:$0xff]  }
 0xe29   : > { %10133 = vmatpush1.bf16.msra.mxu1 %v9969_v24  ;;  %v9925_v61 = vmax.f32 %v9893_v17, 0.0  ;;  %v9956_v56 = vpack.c.bf16 %v9920_v0, %v9916_v9  ;;  %v9915_v57 = vmax.f32 %v9883_v22, 0.0  ;;  %v9918_v1 = vmax.f32 %v9886_v21, 0.0  ;;  %v10240_v6 = vpop.permute.xlu0 %10239 }
 0xe2a   : > { %10134 = vmatprep.subr.bf16.mxu1 %v9966_v36  ;;  %10062 = vmatpush1.bf16.msra.mxu0 %v9963_v33  ;;  %v9921_v53 = vmax.f32 %v9889_v51, 0.0  ;;  %v9917_v62 = vmax.f32 %v9885_v15, 0.0  ;;  %v18727_v28 = vmov 0   ;;  %v10245_v41 = vpop.permute.xlu1 %10244 }
 0xe2b   : > { %10063 = vmatprep.subr.bf16.mxu0 %v9960_v39  ;;  %v9961_v40 = vpack.c.bf16 %v9929_v43, %v9925_v61  ;;  %v9955_v23 = vpack.c.bf16 %v9919_v27, %v9915_v57  ;;  %v9958_v7 = vpack.c.bf16 %v9922_v46, %v9918_v1 }
 0xe2c   : > { %v9957_v58 = vpack.c.bf16 %v9921_v53, %v9917_v62 }
 0xe2d   : > { %10135 = vmatpush1.bf16.msra.mxu1 %v9965_v35  ;;  %v18029_v32 = vpop.permute.xlu0 %10001 }
 0xe2e   : > { %10136 = vmatprep.subr.bf16.mxu1 %v9962_v48  ;;  %10064 = vmatpush1.bf16.msra.mxu0 %v9959_v13  ;;  %v10250_v18 = vpop.permute.xlu1 %10249 }
 0xe2f   : > { %10065 = vmatprep.subr.bf16.mxu0 %v9956_v56 }
 0xe31   : > { %10137 = vmatpush1.bf16.msra.mxu1 %v9961_v40  ;;  %v18031_v36 = vpop.permute.xlu0 %10006 }
 0xe32   : > { %10138 = vmatprep.subr.bf16.mxu1 %v9958_v7  ;;  %10066 = vmatpush1.bf16.msra.mxu0 %v9955_v23  ;;  %v10255_v46 = vpop.permute.xlu1 %10254 }
 0xe35   : > { %10139 = vmatpush1.bf16.msra.mxu1 %v9957_v58  ;;  %11214 = vmatmul.mubr.msk.bf16.vlgmr.msra.gmra.mxu0 %vm3426_vm12, %v11655_v34 }
 0xe36   : > { %10093 = vmatprep.mubr.bf16.mxu0 %v18727_v28 }
 0xe38   : > { %11218 = vmatmul.mubr.msk.bf16.vlgmr.msra.gmra.mxu1 %vm3426_vm12, %v11655_v34 }
 0xe39   : > { %10166 = vmatprep.mubr.bf16.mxu1 %v18727_v28 }
 0xe3d   : > { %11215 = vmatmul.mubr.msk.bf16.gmra.mxu0 %vm3426_vm12, %v11656_v25 }
 0xe3e   : > { %10103 = vmatprep.mubr.bf16.mxu0 %v18727_v28 }
 0xe40   : > { %11219 = vmatmul.mubr.msk.bf16.gmra.mxu1 %vm3426_vm12, %v11656_v25  ;;  %v18035_v25 = vpop.permute.xlu0 %10011 }
 0xe41   : > { %10176 = vmatprep.mubr.bf16.mxu1 %v18727_v28 }
 0xe45   : > { %11216 = vmatmul.mubr.msk.bf16.gmra.mxu0 %vm3426_vm12, %v11657_v55 }
 0xe46   : > { %10113 = vmatprep.mubr.bf16.mxu0 %v18727_v28 }
 0xe48   : > { %11220 = vmatmul.mubr.msk.bf16.gmra.mxu1 %vm3426_vm12, %v11657_v55 }
 0xe49   : > { %10186 = vmatprep.mubr.bf16.mxu1 %v18727_v28 }
 0xe4d   : > { %11217 = vmatmul.mubr.msk.bf16.gmra.mxu0 %vm3426_vm12, %v11658_v44 }
 0xe50   : > { %11221 = vmatmul.mubr.msk.bf16.gmra.mxu1 %vm3426_vm12, %v11658_v44 }
 0xef5   : > { %v10085_v60 = vpop.f32.mrf.mxu0 }
 0xef6   : > { %v10086_v10 = vadd.f32 %v10085_v60, %v9982_v11 }
 0xef7   : > { %v10087_v3 = vpop.f32.mrf.mxu0 }
 0xef8   : > { %v10158_v12 = vpop.f32.mrf.mxu1  ;;  %v10088_v26 = vadd.f32 %v10087_v3, %v9982_v11  ;;  %v10197_v42 = vmax.f32 %v10086_v10, 0.0 }
 0xef9   : > { %v10159_v31 = vadd.f32 %v10158_v12, %v9982_v11  ;;  %v10089_v8 = vpop.f32.mrf.mxu0 }
 0xefa   : > { %v10090_v63 = vadd.f32 %v10089_v8, %v9987_v2  ;;  %v10160_v47 = vpop.f32.mrf.mxu1  ;;  %v10198_v29 = vmax.f32 %v10088_v26, 0.0  ;;  %v10277_v39 = vmul.f32 %v10240_v6, %v10197_v42 }
 0xefb   : > { %v10161_v52 = vadd.f32 %v10160_v47, %v9982_v11  ;;  %v10091_v50 = vpop.f32.mrf.mxu0  ;;  %v10199_v37 = vmax.f32 %v10159_v31, 0.0  ;;  %v10260_v47 = vpop.permute.xlu1 %10259 }
 0xefc   : > { %v10201_v59 = vmax.f32 %v10090_v63, 0.0  ;;  %v10092_v45 = vadd.f32 %v10091_v50, %v9987_v2  ;;  %v10162_v19 = vpop.f32.mrf.mxu1  ;;  %v10278_v9 = vmul.f32 %v10240_v6, %v10198_v29 }
 0xefd   : > { %v10163_v5 = vadd.f32 %v10162_v19, %v9987_v2  ;;  %v10095_v24 = vpop.f32.mrf.mxu0  ;;  %v10200_v0 = vmax.f32 %v10161_v52, 0.0  ;;  %v10279_v51 = vmul.f32 %v10240_v6, %v10199_v37 }
 0xefe   : > { %v10202_v49 = vmax.f32 %v10092_v45, 0.0  ;;  %v10096_v30 = vadd.f32 %v10095_v24, %v9992_v20  ;;  %v10164_v33 = vpop.f32.mrf.mxu1  ;;  %v10281_v22 = vmul.f32 %v10245_v41, %v10201_v59 }
 0xeff   : > { %v10203_v54 = vmax.f32 %v10163_v5, 0.0  ;;  %v10165_v17 = vadd.f32 %v10164_v33, %v9987_v2  ;;  %v10097_v16 = vpop.f32.mrf.mxu0  ;;  %v10280_v57 = vmul.f32 %v10240_v6, %v10200_v0 }
 0xf00   : > { %v10205_v21 = vmax.f32 %v10096_v30, 0.0  ;;  %v10098_v38 = vadd.f32 %v10097_v16, %v9992_v20  ;;  %v10168_v14 = vpop.f32.mrf.mxu1  ;;  %v10282_v13 = vmul.f32 %v10245_v41, %v10202_v49  ;;  %v10309_v7 = vadd.f32 %v10281_v22, %v10277_v39 }
 0xf01   : > { %v10204_v43 = vmax.f32 %v10165_v17, 0.0  ;;  %v10169_v35 = vadd.f32 %v10168_v14, %v9992_v20  ;;  %v10099_v27 = vpop.f32.mrf.mxu0  ;;  %v10283_v48 = vmul.f32 %v10245_v41, %v10203_v54  ;;  %v18043_v54 = vpop.permute.xlu0 %10016 }
 0xf02   : > { %v10206_v15 = vmax.f32 %v10098_v38, 0.0  ;;  %v10100_v61 = vadd.f32 %v10099_v27, %v18027_v4  ;;  %v10170_v56 = vpop.f32.mrf.mxu1  ;;  %v10285_v1 = vmul.f32 %v10250_v18, %v10205_v21  ;;  %v10322_v3 = vadd.f32 %v10282_v13, %v10278_v9 }
 0xf03   : > { %v10207_v53 = vmax.f32 %v10169_v35, 0.0  ;;  %v10171_v40 = vadd.f32 %v10170_v56, %v9992_v20  ;;  %v10101_v23 = vpop.f32.mrf.mxu0  ;;  %v10284_v62 = vmul.f32 %v10245_v41, %v10204_v43  ;;  %v10335_v6 = vadd.f32 %v10283_v48, %v10279_v51 }
 0xf04   : > { %v10209_v34 = vmax.f32 %v10100_v61, 0.0  ;;  %v10102_v58 = vadd.f32 %v10101_v23, %v18027_v4  ;;  %v10172_v28 = vpop.f32.mrf.mxu1  ;;  %v10286_v55 = vmul.f32 %v10250_v18, %v10206_v15  ;;  %v10310_v26 = vadd.f32 %v10309_v7, %v10285_v1  ;;  %v10265_v15 = vpop.permute.xlu1 %10264 }
 0xf05   : > { %v10287_v44 = vmul.f32 %v10250_v18, %v10207_v53  ;;  %v10208_v11 = vmax.f32 %v10171_v40, 0.0  ;;  %v10173_v2 = vadd.f32 %v10172_v28, %v18027_v4  ;;  %v10105_v60 = vpop.f32.mrf.mxu0  ;;  %v10348_v52 = vadd.f32 %v10284_v62, %v10280_v57 }
 0xf06   : > { %v10210_v10 = vmax.f32 %v10102_v58, 0.0  ;;  %v10106_v20 = vadd.f32 %v10105_v60, %v18029_v32  ;;  %v10174_v12 = vpop.f32.mrf.mxu1  ;;  %v10289_v41 = vmul.f32 %v10255_v46, %v10209_v34  ;;  %v10323_v19 = vadd.f32 %v10322_v3, %v10286_v55 }
 0xf07   : > { %v10211_v31 = vmax.f32 %v10173_v2, 0.0  ;;  %v10175_v8 = vadd.f32 %v10174_v12, %v18027_v4  ;;  %v10107_v63 = vpop.f32.mrf.mxu0  ;;  %v10288_v50 = vmul.f32 %v10250_v18, %v10208_v11  ;;  %v10336_v29 = vadd.f32 %v10335_v6, %v10287_v44  ;;  %v10270_v44 = vpop.permute.xlu0 %10269 }
 0xf08   : > { %v10213_v42 = vmax.f32 %v10106_v20, 0.0  ;;  %v10108_v59 = vadd.f32 %v10107_v63, %v18029_v32  ;;  %v10178_v45 = vpop.f32.mrf.mxu1  ;;  %v10290_v49 = vmul.f32 %v10255_v46, %v10210_v10  ;;  %v10311_v17 = vadd.f32 %v10310_v26, %v10289_v41 }
 0xf09   : > { %v10212_v37 = vmax.f32 %v10175_v8, 0.0  ;;  %v10179_v5 = vadd.f32 %v10178_v45, %v18029_v32  ;;  %v10109_v24 = vpop.f32.mrf.mxu0  ;;  %v10291_v30 = vmul.f32 %v10255_v46, %v10211_v31  ;;  %v10349_v21 = vadd.f32 %v10348_v52, %v10288_v50 }
 0xf0a   : > { %v10214_v33 = vmax.f32 %v10108_v59, 0.0  ;;  %v10110_v0 = vadd.f32 %v10109_v24, %v18031_v36  ;;  %v10180_v4 = vpop.f32.mrf.mxu1  ;;  %v10293_v18 = vmul.f32 %v10260_v47, %v10213_v42  ;;  %v10324_v61 = vadd.f32 %v10323_v19, %v10290_v49  ;;  %v10275_v19 = vpop.permute.xlu1 %10274 }
 0xf0b   : > { %v10215_v16 = vmax.f32 %v10179_v5, 0.0  ;;  %v10181_v39 = vadd.f32 %v10180_v4, %v18029_v32  ;;  %v10111_v22 = vpop.f32.mrf.mxu0  ;;  %v10292_v38 = vmul.f32 %v10255_v46, %v10212_v37  ;;  %v10337_v56 = vadd.f32 %v10336_v29, %v10291_v30 }
 0xf0c   : > { %v10217_v14 = vmax.f32 %v10110_v0, 0.0  ;;  %v10112_v9 = vadd.f32 %v10111_v22, %v18031_v36  ;;  %v10182_v51 = vpop.f32.mrf.mxu1  ;;  %v10294_v43 = vmul.f32 %v10260_v47, %v10214_v33  ;;  %v10312_v53 = vadd.f32 %v10311_v17, %v10293_v18 }
 0xf0d   : > { %v10295_v35 = vmul.f32 %v10260_v47, %v10215_v16  ;;  %v10216_v27 = vmax.f32 %v10181_v39, 0.0  ;;  %v10183_v13 = vadd.f32 %v10182_v51, %v18031_v36  ;;  %v10115_v48 = vpop.f32.mrf.mxu0  ;;  %v10350_v62 = vadd.f32 %v10349_v21, %v10292_v38 }
 0xf0e   : > { %v10218_v57 = vmax.f32 %v10112_v9, 0.0  ;;  %v10116_v1 = vadd.f32 %v10115_v48, %v18035_v25  ;;  %v10184_v32 = vpop.f32.mrf.mxu1  ;;  %v10297_v40 = vmul.f32 %v10265_v15, %v10217_v14  ;;  %v10325_v11 = vadd.f32 %v10324_v61, %v10294_v43 }
 0xf0f   : > { %v10219_v46 = vmax.f32 %v10183_v13, 0.0  ;;  %v10185_v23 = vadd.f32 %v10184_v32, %v18031_v36  ;;  %v10117_v7 = vpop.f32.mrf.mxu0  ;;  %v10296_v34 = vmul.f32 %v10260_v47, %v10216_v27  ;;  %v10338_v2 = vadd.f32 %v10337_v56, %v10295_v35 }
 0xf10   : > { %v10221_v58 = vmax.f32 %v10116_v1, 0.0  ;;  %v10118_v28 = vadd.f32 %v10117_v7, %v18035_v25  ;;  %v10188_v55 = vpop.f32.mrf.mxu1  ;;  %v10298_v10 = vmul.f32 %v10265_v15, %v10218_v57  ;;  %v10313_v41 = vadd.f32 %v10312_v53, %v10297_v40 }
 0xf11   : > { %v10220_v60 = vmax.f32 %v10185_v23, 0.0  ;;  %v10189_v3 = vadd.f32 %v10188_v55, %v18035_v25  ;;  %v10119_v6 = vpop.f32.mrf.mxu0  ;;  %v10299_v31 = vmul.f32 %v10265_v15, %v10219_v46  ;;  %v10351_v52 = vadd.f32 %v10350_v62, %v10296_v34  ;;  %v10365_v55 = vpop.permute.xlu0 %10364 }
 0xf12   : > { %v10301_v20 = vmul.f32 %v10270_v44, %v10221_v58  ;;  %v10222_v12 = vmax.f32 %v10118_v28, 0.0  ;;  %v10120_v26 = vadd.f32 %v10119_v6, %v18043_v54  ;;  %v10190_v36 = vpop.f32.mrf.mxu1  ;;  %v10326_v49 = vadd.f32 %v10325_v11, %v10298_v10 }
 0xf13   : > { %v10223_v8 = vmax.f32 %v10189_v3, 0.0  ;;  %v10191_v63 = vadd.f32 %v10190_v36, %v18035_v25  ;;  %v10121_v47 = vpop.f32.mrf.mxu0  ;;  %v10300_v29 = vmul.f32 %v10265_v15, %v10220_v60  ;;  %v10339_v17 = vadd.f32 %v10338_v2, %v10299_v31 }
 0xf14   : > { %v10302_v50 = vmul.f32 %v10270_v44, %v10222_v12  ;;  %v10225_v42 = vmax.f32 %v10120_v26, 0.0  ;;  %v10122_v59 = vadd.f32 %v10121_v47, %v18043_v54  ;;  %v10192_v45 = vpop.f32.mrf.mxu1  ;;  %v10314_v30 = vadd.f32 %v10313_v41, %v10301_v20  ;;  %v18728_v20 = vld [vmem:[#allocation10_spill] sm:$0xff] }
 0xf15   : > { %v10303_v37 = vmul.f32 %v10270_v44, %v10223_v8  ;;  %v10224_v5 = vmax.f32 %v10191_v63, 0.0  ;;  %v10193_v24 = vadd.f32 %v10192_v45, %v18043_v54  ;;  %v10352_v38 = vadd.f32 %v10351_v52, %v10300_v29  ;;  %v18729_v63 = vld [vmem:[#allocation9_spill] sm:$0xff] }
 0xf16   : > { %v10305_v33 = vmul.f32 %v10275_v19, %v10225_v42  ;;  %v10226_v0 = vmax.f32 %v10122_v59, 0.0  ;;  %v10194_v4 = vpop.f32.mrf.mxu1  ;;  %v10327_v39 = vadd.f32 %v10326_v49, %v10302_v50  ;;  %v12576_v23 = vmov 1966171168  }
 0xf17   : > { %v10304_v25 = vmul.f32 %v10270_v44, %v10224_v5  ;;  %v10227_v18 = vmax.f32 %v10193_v24, 0.0  ;;  %v10195_v16 = vadd.f32 %v10194_v4, %v18043_v54  ;;  %v10340_v14 = vadd.f32 %v10339_v17, %v10303_v37 }
 0xf18   : > { %v10315_v22 = vadd.f32 %v10314_v30, %v10305_v33  ;;  %v10306_v21 = vmul.f32 %v10275_v19, %v10226_v0  ;;  %v10379_v7 = vunpack.c.l.s4 %v12576_v23  ;;  %v10370_v12 = vrot.slane %v10365_v55, %v18728_v20 }
 0xf19   : > { %v10307_v9 = vmul.f32 %v10275_v19, %v10227_v18  ;;  %v10228_v51 = vmax.f32 %v10195_v16, 0.0  ;;  %v10353_v27 = vadd.f32 %v10352_v38, %v10304_v25  ;;  %v18730_v29 = vlaneseq }
 0xf1a   : > { %v10316_v43 = vrot.slane %v10315_v22, 4  ;;  %v10328_v35 = vadd.f32 %v10327_v39, %v10306_v21  ;;  %v10380_v3 = vunpack.c.0.s8 %v10379_v7 }
 0xf1b   : > { %v10341_v13 = vadd.f32 %v10340_v14, %v10307_v9  ;;  %v10308_v48 = vmul.f32 %v10275_v19, %v10228_v51  ;;  %vm10395_vm2 = vcmp.lt.s32.totalorder %v18730_v29, 256 }
 0xf1c   : > { %v10317_v15 = vadd.f32 %v10316_v43, %v10315_v22  ;;  %v10329_v61 = vrot.slane %v10328_v35, 4  ;;  %v10383_v47 = vsub.s32 %v10380_v3, %v18729_v63 }
 0xf1d   : > { %v10342_v56 = vrot.slane %v10341_v13, 4  ;;  %v10354_v57 = vadd.f32 %v10353_v27, %v10308_v48 }
 0xf1e   : > { %v10318_v1 = vrot.slane %v10317_v15, 2  ;;  %v10330_v32 = vadd.f32 %v10329_v61, %v10328_v35 }
 0xf1f   : > { %v10343_v53 = vadd.f32 %v10342_v56, %v10341_v13  ;;  %v10355_v54 = vrot.slane %v10354_v57, 4 }
 0xf20   : > { %v10319_v40 = vadd.f32 %v10318_v1, %v10317_v15  ;;  %v10331_v46 = vrot.slane %v10330_v32, 2 }
 0xf21   : > { %v10344_v62 = vrot.slane %v10343_v53, 2  ;;  %v10356_v34 = vadd.f32 %v10355_v54, %v10354_v57 }
 0xf22   : > { %v10320_v58 = vrot.slane %v10319_v40, 1  ;;  %v10332_v28 = vadd.f32 %v10331_v46, %v10330_v32 }
 0xf23   : > { %v10345_v44 = vadd.f32 %v10344_v62, %v10343_v53  ;;  %v10357_v11 = vrot.slane %v10356_v34, 2 }
 0xf24   : > { %v10321_v2 = vadd.f32 %v10320_v58, %v10319_v40  ;;  %v10333_v60 = vrot.slane %v10332_v28, 1 }
 0xf25   : > { %v10346_v6 = vrot.slane %v10345_v44, 1  ;;  %v10358_v10 = vadd.f32 %v10357_v11, %v10356_v34 }
 0xf26   : > { %v10334_v26 = vadd.f32 %v10333_v60, %v10332_v28  ;;  %v10371_v31 = vadd.f32 %v10370_v12, %v10321_v2 }
 0xf27   : > { %v10347_v36 = vadd.f32 %v10346_v6, %v10345_v44  ;;  %v10359_v41 = vrot.slane %v10358_v10, 1 }
 0xf28   : > { %v10372_v8 = vadd.f32 %v10370_v12, %v10334_v26 }
 0xf29   : > { %v10360_v52 = vadd.f32 %v10359_v41, %v10358_v10  ;;  %v10373_v42 = vadd.f32 %v10370_v12, %v10347_v36 }
 0xf2a   : > { %v10377_v50 = vcombine.low %v10371_v31, %v10372_v8 }
 0xf2b   : > { %v10374_v59 = vadd.f32 %v10370_v12, %v10360_v52 }
 0xf2c   : > { %v10384_v45 = vrot.slane %v10377_v50, %v10383_v47 }
 0xf2d   : > { %v10400_v19 = vcombine.low %v10373_v42, %v10374_v59 }
 0xf2e   : > { %v10391_v37 = vrot.slane %v10384_v45, %v10383_v47 }
 0xf2f   : > { %v10407_v5 = vrot.slane %v10400_v19, %v10383_v47 }
 0xf30   : > { %10397 = vst.msk [vmem:[%s427_s30] sm:$0x3] %vm10395_vm2, %v10391_v37 }
 0xf31   : > { %v10414_v24 = vrot.slane %v10407_v5, %v10383_v47 }
 0xf33   : > { %11222 = vst.msk [vmem:[%s427_s30 + $0x2] sm:$0x3] %vm10395_vm2, %v10414_v24 }
 0xf34   : > { %12516 = shalt.err (!%p12513_p3)
}
 0xf35   : > { %s12517_s18 = scalar_lea.hbm %s18065_s16, 64  ;;  %s12521_s27 = scalar_lea.hbm %s18122_s12, 128 }
 0xf36   : > { %p12518_p4 = scmp.ne.s32.totalorder %s18065_s16, %s12517_s18  ;;  %p12522_p9 = scmp.lt.s32.totalorder %s18065_s16, %s18122_s12 }
 0xf37   : > { %p12523_p10 = scmp.lt.s32.totalorder %s12521_s27, %s12517_s18 }
 0xf38   : > { %p12519_p7 = pnand %p12518_p4, %p12685_p5 }
 0xf39   : > { %p12524_p11 = por %p12523_p10, %p12522_p9 }
 0xf3a   : > { %p12520_p8 = pneg %p12519_p7 }
 0xf3c   : > { %p12525_p12 = pnand %p12524_p11, %p12520_p8 }
 0xf3e   : > { %12528 = shalt.err (!%p12525_p12)
}
 0xf3f   : > { %s12578_s11 = smov 32   ;;  %s18731_s20 = smov 2  }
 0xf40   : > { %11298 = dma.vmem_to_hbm [thread:$0]  (%p12685_p5), %s18067_s13, 64, %s18065_s16, %s18069_s19, %s12578_s11, %s12578_s11, %s18731_s20  }
 0xf41 PF: > { %p11304_p13 = scmp.ge.s32.totalorder %s12563_s26, 2  ;;  %s10448_s22 = sand.u32 1, %s12551_s23  }
 0xf42   : > { %s10449_s21 = scalar_lea.sflag [#allocation6], %s10448_s22 }
 0xf43   : > { %p11301_p0 = pnand %p11304_p13, %p12689_p6 }
 0xf45   : > { %p11302_p1 = pneg %p11301_p0 }
 0xf47   : > { %12546 = dma.done.wait (%p11302_p1), %s10449_s21, 64  }
 0xf48   : > { %12548 = vsyncadd (%p11302_p1), %s10449_s21, 4294967232  ;;  %s18732_s14 = sld [smem:[#allocation8_spill]]  ;;  %p24_p2 = scmp.ge.s32.totalorder %s12672_s28, 4  }
 0xf49   : > { %s18733_s23 = smov %s12555_s24  ;;  %s18734_s24 = smov %s12559_s25 }
 0xf4a   : > { %s18736_s26 = smov %s12672_s28  ;;  %26 = sbr.rel (!%p24_p2) target bundleno = 6 (0x6), region = 121 }
 0xf4e   : > { %s18735_s25 = smov %s18732_s14 }
 0xf4f   :  { %10454 = vsyncpa [#allocation6], 1 }
 0xf50   :  { %10456 = vsyncpa [#allocation6 + $0x1], 1 }

</bundles_post_ra>
